<compile_context>
chip_gen: v6e
topology: v6e:2x2x1
jax: 0.10.0
libtpu: 0.0.40
codegen_flags: <defaults>
</compile_context>

<pallas_src>
from functools import partial

import numpy as np
import jax
import jax.numpy as jnp
from jax.experimental import pallas as pl
from jax.experimental.pallas import tpu as pltpu


# ---------------------------------------------------------------------------
# The fused kernel (one grid step == one batch element, activations in (T, 5F))
# ---------------------------------------------------------------------------

def _dpfl_kernel(
    # --- SMEM scalar tables ---
    w_in_sm, b_in_sm, sfi_flag_sm, sfi_count_sm, alpha_sm,
    # --- per-batch VMEM inputs ---
    x_ref, mask_ref,
    # --- VMEM constants / stacked block-diagonal weights ---
    shift_ref, hmask_ref, hmap_ref, hmapT_ref, negmask_ref, bd4_ref,
    part_w_ref, part_b_ref,
    sfi_ws_ref, sfi_wsb_ref, sfi_w1_ref, sfi_b1_ref, sfi_w2_ref, sfi_b2_ref,
    cp_w1_ref, cp_b1_ref, cp_w2_ref, cp_b2_ref,
    aff_w_ref, aff_b_ref, aqkv_w_ref, aqkv_b_ref,
    ao_w_ref, ao_b_ref, ac_w_ref, ac_b_ref,
    fuse_w_ref, fuse_b_ref,
    # --- outputs ---
    parts_out_ref, final_out_ref,
    # --- scratch ---
    feat_ref, chans_ref,
    *, num_parts, num_sfi, num_layers, C, T, V, F,
):
    f32 = jnp.float32
    FP = num_parts * F                      # 5F   (all parts packed along lanes)
    FP4 = (num_parts - 1) * F               # 4F   (parts 0..3, lane-dense output block)
    mask_col = mask_ref[...]                # (T, 1), broadcasts over features / joints
    alpha = alpha_sm[0]
    inv_t = 1.0 / T

    def dot(a, b):
        return jnp.dot(a, b, preferred_element_type=f32)

    def erf(z):
        # Abramowitz & Stegun 7.1.26 (|err| < 1.5e-7): exact-GELU without a Mosaic erf lowering.
        a1, a2, a3, a4, a5 = 0.254829592, -0.284496736, 1.421413741, -1.453152027, 1.061405429
        p = 0.3275911
        az = jnp.abs(z)
        t = 1.0 / (1.0 + p * az)
        poly = ((((a5 * t + a4) * t + a3) * t + a2) * t + a1) * t
        y = 1.0 - poly * jnp.exp(-az * az)
        return jnp.where(z < 0.0, -y, y)

    def gelu_exact(z):
        return 0.5 * z * (1.0 + erf(z * 0.7071067811865476))

    def conv_in_channel(ch):
        # 1x1 Conv2d over C input channels for output channel `ch`, in (T, V) layout,
        # masked over time exactly like `conv_in(x) * mask.unsqueeze(-1)`.
        acc = jnp.zeros((T, V), f32) + b_in_sm[ch]
        for c in range(C):
            acc = acc + w_in_sm[ch, c] * x_ref[c]
        return acc * mask_col

    # ---- conv_in (channel `num_sfi` is feature_t) + ALL per-part 1x1 convs in one matmul ----
    ft_tv = conv_in_channel(num_sfi)                                          # (T, V)
    feat_ref[...] = (dot(ft_tv, part_w_ref[...]) + part_b_ref[...]) * mask_col

    # conv_in channels feeding the SFI rounds are computed once and cached (tiny VMEM scratch).
    for c in range(num_sfi):
        chans_ref[c] = conv_in_channel(c)

    # ---- layer loop: optional [SFI (+CPAtt for parts 0..3)] then AttModule for every part ----
    @pl.loop(0, num_layers)
    def _layer(l):
        @pl.when(sfi_flag_sm[l] == 1)
        def _sfi():
            c = sfi_count_sm[l]
            ft_all = feat_ref[...]                                            # (T, 5F) pre-round
            f4 = ft_all[:, FP4:]                                              # global part, pre-round

            # ---- SFI for all 5 parts (block-diag batched, masked row-softmax == per-part) ----
            fs_all = dot(chans_ref[c], sfi_ws_ref[c]) + sfi_wsb_ref[c]        # (T, 5F)
            s = jax.lax.dot_general(fs_all, ft_all, (((0,), (0,)), ((), ())),
                                    preferred_element_type=f32) * inv_t       # (5F, 5F)
            s = s + negmask_ref[...]                                          # off-part -> -1e30
            s = s - jnp.max(s, axis=-1, keepdims=True)
            e = jnp.exp(s)
            p = e * pl.reciprocal(jnp.sum(e, axis=-1, keepdims=True), approx=True)
            cross = jax.lax.dot_general(ft_all, p, (((1,), (1,)), ((), ())),
                                        preferred_element_type=f32) + ft_all  # (T, 5F)
            h = gelu_exact(dot(cross, sfi_w1_ref[c]) + sfi_b1_ref[c])
            new_all = (dot(h, sfi_w2_ref[c]) + sfi_b2_ref[c] + ft_all) * mask_col

            # ---- CPAtt(global-part(pre-round), part_i(post-SFI)) for parts 0..3, batched ----
            ft03 = new_all[:, :FP4]                                           # (T, 4F)
            st = jax.lax.dot_general(ft03, f4, (((0,), (0,)), ((), ())),
                                     preferred_element_type=f32) * inv_t      # (4F, F)
            blocks = []
            for j in range(num_parts - 1):                                    # exact per-part softmax
                blk = st[j * F:(j + 1) * F, :]                                # (F, F)
                m = jnp.max(blk, axis=0, keepdims=True)
                eb = jnp.exp(blk - m)
                blocks.append(eb * pl.reciprocal(jnp.sum(eb, axis=0, keepdims=True), approx=True))
            pT = jnp.concatenate(blocks, axis=0)                              # (4F, F)
            p_exp = jnp.concatenate([pT] * (num_parts - 1), axis=1) * bd4_ref[...]   # (4F, 4F)
            cross4 = dot(ft03, p_exp) + ft03
            h4 = gelu_exact(dot(cross4, cp_w1_ref[c]) + cp_b1_ref[c])
            cp03 = (dot(h4, cp_w2_ref[c]) + cp_b2_ref[c] + ft03) * mask_col

            feat_ref[:, :FP4] = cp03
            feat_ref[:, FP4:] = new_all[:, FP4:]

        # ---- AttModule('encoder') for all 5 parts (block-diag batched) ----
        x_all = feat_ref[...]                                                 # (T, 5F)
        both = dot(shift_ref[l], x_all)                                       # (2T, 5F): [x[t-d]; x[t+d]]
        xm = both[:T]
        xp = both[T:]
        ff = jnp.maximum(
            dot(xm, aff_w_ref[l, 0]) + dot(x_all, aff_w_ref[l, 1])
            + dot(xp, aff_w_ref[l, 2]) + aff_b_ref[l], 0.0)                   # dilated conv3 + ReLU

        # InstanceNorm1d(affine=False), normalised over time
        mu = jnp.mean(ff, axis=0, keepdims=True)
        ctr = ff - mu
        var = jnp.mean(ctr * ctr, axis=0, keepdims=True)
        qn = ctr * jax.lax.rsqrt(var + 1e-5)

        # Linear_Attention with queries == keys == values == qn ("elu" is sigmoid in the ref).
        qkv = dot(qn, aqkv_w_ref[l]) + aqkv_b_ref[l]                          # fused q|k|v, (T, 15F)
        qk = jax.nn.sigmoid(qkv[:, :2 * FP])
        q = qk[:, :FP]
        k = qk[:, FP:]
        v = qkv[:, 2 * FP:]
        kv = jax.lax.dot_general(k, v, (((0,), (0,)), ((), ())),
                                 preferred_element_type=f32) * hmask_ref[...]  # block-diag (part x head)
        ksum = jnp.sum(k, axis=0, keepdims=True) + 1e-6                        # (1, 5F)
        z = pl.reciprocal(dot(q * ksum, hmapT_ref[...]), approx=True)          # (T, 5H)
        att = dot(q, kv) * dot(z, hmap_ref[...])                               # (T, 5F)
        att = (dot(att, ao_w_ref[l]) + ao_b_ref[l]) * mask_col
        out = alpha * att + ff
        out = dot(out, ac_w_ref[l]) + ac_b_ref[l]
        feat_ref[...] = (x_all + out) * mask_col

    # ---- fuse + output 1x1 conv ----
    parts = feat_ref[...]
    fuse = parts * mask_col                                                    # (T, 5F)
    final_out_ref[...] = (dot(fuse, fuse_w_ref[...]) + fuse_b_ref[...]) * mask_col
    parts_out_ref[...] = parts[:, :FP4]                                        # lane-dense (T, 4F)


# ---------------------------------------------------------------------------
# Wrapper: a single pallas_call for the whole forward pass
# ---------------------------------------------------------------------------

_SMEM_NAMES = ("w_in", "b_in", "sfi_flag", "sfi_count", "alpha")
_WEIGHT_NAMES = ("shift", "hmask", "hmap", "hmapT", "negmask", "bd4",
                 "part_w", "part_b",
                 "sfi_ws", "sfi_wsb", "sfi_w1", "sfi_b1", "sfi_w2", "sfi_b2",
                 "cp_w1", "cp_b1", "cp_w2", "cp_b2",
                 "aff_w", "aff_b", "aqkv_w", "aqkv_b",
                 "ao_w", "ao_b", "ac_w", "ac_b",
                 "fuse_w", "fuse_b")


def _const_spec(shape):
    zeros = (0,) * len(shape)
    return pl.BlockSpec(shape, lambda n, _z=zeros: _z)


@jax.jit
def dpfl_forward(stacked, x, mask):
    """x: (N, C, T, V) float32, mask: (N, 1, T) float32 -> list of 5 features (PyTorch layout)."""
    N, C, T, V = x.shape
    FP = stacked["part_w"].shape[-1]            # 5F
    FP4 = stacked["bd4"].shape[-1]              # 4F
    F = FP - FP4
    num_parts = FP // F
    num_layers = stacked["shift"].shape[0]
    num_sfi = stacked["w_in"].shape[0] - 1
    OC = stacked["fuse_w"].shape[-1]

    mask_col = jnp.transpose(mask, (0, 2, 1))                                # (N, T, 1), once

    in_specs = [pl.BlockSpec(memory_space=pltpu.MemorySpace.SMEM) for _ in _SMEM_NAMES]
    in_specs += [
        pl.BlockSpec((None, C, T, V), lambda n: (n, 0, 0, 0)),               # x
        pl.BlockSpec((None, T, 1), lambda n: (n, 0, 0)),                     # mask
    ]
    in_specs += [_const_spec(stacked[k].shape) for k in _WEIGHT_NAMES]

    inputs = [stacked[k] for k in _SMEM_NAMES] + [x, mask_col] + [stacked[k] for k in _WEIGHT_NAMES]

    kernel = partial(_dpfl_kernel, num_parts=num_parts, num_sfi=num_sfi,
                     num_layers=num_layers, C=C, T=T, V=V, F=F)

    parts_out, final_out = pl.pallas_call(
        kernel,
        out_shape=(jax.ShapeDtypeStruct((N, T, FP4), jnp.float32),
                   jax.ShapeDtypeStruct((N, T, OC), jnp.float32)),
        grid=(N,),
        in_specs=in_specs,
        out_specs=(pl.BlockSpec((None, T, FP4), lambda n: (n, 0, 0)),
                   pl.BlockSpec((None, T, OC), lambda n: (n, 0, 0))),
        scratch_shapes=[pltpu.VMEM((T, FP), jnp.float32),
                        pltpu.VMEM((max(num_sfi, 1), T, V), jnp.float32)],
        compiler_params=pltpu.CompilerParams(
            dimension_semantics=("parallel",),                   # batch across TCs where available
            vmem_limit_bytes=56 * 1024 * 1024),                  # ~34 MiB actually used
    )(*inputs)

    # Final (one-off) layout glue back to the PyTorch (N, F, T) convention.
    parts = jnp.transpose(parts_out.reshape(N, T, num_parts - 1, F), (0, 2, 3, 1))   # (N, 4, F, T)
    final = jnp.transpose(final_out, (0, 2, 1))                                      # (N, OC, T)
    return [parts[:, 0], parts[:, 1], parts[:, 2], parts[:, 3], final]


# ---------------------------------------------------------------------------
# Parameter preparation: torch-layout params -> batched / block-diagonal kernel operands
# ---------------------------------------------------------------------------

def prepare_inputs(params, node_idx_list, SFI_layer, T, V, n_features, n_heads, alpha):
    F = n_features
    P5 = 5
    num_sfi = len(SFI_layer)
    num_steps = num_sfi + 1          # the original forward runs len(SFI_layer)+1 AttModule indices
    FP = P5 * F
    FP4 = (P5 - 1) * F
    ns = max(num_sfi, 1)
    assert len(params["att"][0]) >= num_steps

    def A(v):
        return np.asarray(v, dtype=np.float32)

    part_w = np.zeros((V, FP), np.float32)
    part_b = np.zeros((1, FP), np.float32)
    sfi_ws = np.zeros((ns, V, FP), np.float32)
    sfi_wsb = np.zeros((ns, 1, FP), np.float32)
    sfi_w1 = np.zeros((ns, FP, FP), np.float32)
    sfi_b1 = np.zeros((ns, 1, FP), np.float32)
    sfi_w2 = np.zeros((ns, FP, FP), np.float32)
    sfi_b2 = np.zeros((ns, 1, FP), np.float32)
    cp_w1 = np.zeros((ns, FP4, FP4), np.float32)
    cp_b1 = np.zeros((ns, 1, FP4), np.float32)
    cp_w2 = np.zeros((ns, FP4, FP4), np.float32)
    cp_b2 = np.zeros((ns, 1, FP4), np.float32)
    aff_w = np.zeros((num_steps, 3, FP, FP), np.float32)
    aff_b = np.zeros((num_steps, 1, FP), np.float32)
    aqkv_w = np.zeros((num_steps, FP, 3 * FP), np.float32)
    aqkv_b = np.zeros((num_steps, 1, 3 * FP), np.float32)
    ao_w = np.zeros((num_steps, FP, FP), np.float32)
    ao_b = np.zeros((num_steps, 1, FP), np.float32)
    ac_w = np.zeros((num_steps, FP, FP), np.float32)
    ac_b = np.zeros((num_steps, 1, FP), np.float32)

    for i in range(P5):
        lo, hi = i * F, (i + 1) * F
        idx = np.asarray(node_idx_list[i], dtype=np.int64)
        # node gather folded into a zero-scattered (V, F) block of the batched weight
        part_w[idx, lo:hi] = A(params["part"][i]["w"]).T
        part_b[0, lo:hi] = A(params["part"][i]["b"])
        for c in range(num_sfi):
            p = params["sfi"][i][c]
            sfi_ws[c, idx, lo:hi] = A(p["conv_s_w"]).T
            sfi_wsb[c, 0, lo:hi] = A(p["conv_s_b"])
            sfi_w1[c, lo:hi, lo:hi] = A(p["w1"]).T
            sfi_b1[c, 0, lo:hi] = A(p["b1"])
            sfi_w2[c, lo:hi, lo:hi] = A(p["w2"]).T
            sfi_b2[c, 0, lo:hi] = A(p["b2"])
        if i != P5 - 1:
            for c in range(num_sfi):
                p = params["cpatt"][i][c]
                cp_w1[c, lo:hi, lo:hi] = A(p["w1"]).T
                cp_b1[c, 0, lo:hi] = A(p["b1"])
                cp_w2[c, lo:hi, lo:hi] = A(p["w2"]).T
                cp_b2[c, 0, lo:hi] = A(p["b2"])
        for l in range(num_steps):
            p = params["att"][i][l]
            ffw = A(p["ff_w"])                                  # torch Conv1d weight (Cout, Cin, 3)
            for k in range(3):                                  # tap k <-> offset (k-1)*dilation
                aff_w[l, k, lo:hi, lo:hi] = ffw[:, :, k].T
            aff_b[l, 0, lo:hi] = A(p["ff_b"])
            aqkv_w[l, lo:hi, 0 * FP + lo:0 * FP + hi] = A(p["wq"]).T   # fused q | k | v projection
            aqkv_w[l, lo:hi, 1 * FP + lo:1 * FP + hi] = A(p["wk"]).T
            aqkv_w[l, lo:hi, 2 * FP + lo:2 * FP + hi] = A(p["wv"]).T
            aqkv_b[l, 0, 0 * FP + lo:0 * FP + hi] = A(p["bq"])
            aqkv_b[l, 0, 1 * FP + lo:1 * FP + hi] = A(p["bk"])
            aqkv_b[l, 0, 2 * FP + lo:2 * FP + hi] = A(p["bv"])
            ao_w[l, lo:hi, lo:hi] = A(p["wo"]).T
            ao_b[l, 0, lo:hi] = A(p["bo"])
            ac_w[l, lo:hi, lo:hi] = A(p["out_w"]).T
            ac_b[l, 0, lo:hi] = A(p["out_b"])

    # Per-layer fused shift matrix: rows [0,T) produce x[t-d], rows [T,2T) produce x[t+d]
    # (zero padding and dilation 2**l encoded in the matrix).
    shift = np.zeros((num_steps, 2 * T, T), np.float32)
    for l in range(num_steps):
        d = 2 ** l
        for t in range(T):
            if t - d >= 0:
                shift[l, t, t - d] = 1.0
            if t + d < T:
                shift[l, T + t, t + d] = 1.0

    # Block-diagonal (part x head) KV mask + head-membership matrix (replace per-head loops).
    dh = F // n_heads
    hmask = np.zeros((FP, FP), np.float32)
    hmap = np.zeros((P5 * n_heads, FP), np.float32)
    for i in range(P5):
        for h in range(n_heads):
            a = i * F + h * dh
            hmask[a:a + dh, a:a + dh] = 1.0
            hmap[i * n_heads + h, a:a + dh] = 1.0

    # Additive -1e30 mask restricting the batched SFI softmax to each part's own block, and the
    # 0/1 block-diag selector used by the batched CPAtt cross map.
    negmask = np.full((FP, FP), -1e30, np.float32)
    bd4 = np.zeros((FP4, FP4), np.float32)
    for i in range(P5):
        negmask[i * F:(i + 1) * F, i * F:(i + 1) * F] = 0.0
        if i != P5 - 1:
            bd4[i * F:(i + 1) * F, i * F:(i + 1) * F] = 1.0

    sfi_flag = np.zeros((num_steps,), np.int32)
    sfi_count = np.zeros((num_steps,), np.int32)
    cnt = 0
    for l in range(num_steps):
        if l in SFI_layer:
            sfi_flag[l] = 1
            sfi_count[l] = cnt
            cnt += 1

    st = dict(
        w_in=A(params["conv_in"]["w"]), b_in=A(params["conv_in"]["b"]),
        sfi_flag=sfi_flag, sfi_count=sfi_count,
        alpha=np.asarray([alpha], np.float32),
        shift=shift, hmask=hmask, hmap=hmap, hmapT=np.ascontiguousarray(hmap.T),
        negmask=negmask, bd4=bd4,
        part_w=part_w, part_b=part_b,
        sfi_ws=sfi_ws, sfi_wsb=sfi_wsb, sfi_w1=sfi_w1, sfi_b1=sfi_b1,
        sfi_w2=sfi_w2, sfi_b2=sfi_b2,
        cp_w1=cp_w1, cp_b1=cp_b1, cp_w2=cp_w2, cp_b2=cp_b2,
        aff_w=aff_w, aff_b=aff_b, aqkv_w=aqkv_w, aqkv_b=aqkv_b,
        ao_w=ao_w, ao_b=ao_b, ac_w=ac_w, ac_b=ac_b,
        fuse_w=A(params["conv_out"]["w"]).T,
        fuse_b=A(params["conv_out"]["b"]).reshape(1, -1),
    )
    return {k: jnp.asarray(v) for k, v in st.items()}


# ---------------------------------------------------------------------------
# Deterministic synthetic parameters in torch layout (weights (out, in), biases (out,))
# ---------------------------------------------------------------------------

def init_params(key, in_channel, n_features, out_channel, num_layers, num_sfi, node_list):
    keys = iter(jax.random.split(key, 4096))

    def rnd(shape, scale=0.1):
        return scale * jax.random.normal(next(keys), shape, dtype=jnp.float32)

    F = n_features
    params = {
        "conv_in": {"w": rnd((num_sfi + 1, in_channel)), "b": rnd((num_sfi + 1,))},
        "conv_out": {"w": rnd((out_channel, 5 * F)), "b": rnd((out_channel,))},
        "part": [], "sfi": [], "cpatt": [], "att": [],
    }
    # NOTE: DPFL.conv_t and CPAtt.conv_s exist in __init__ but are unused in forward -> omitted.
    for idx in range(5):
        P = node_list[idx]
        params["part"].append({"w": rnd((F, P)), "b": rnd((F,))})
        params["sfi"].append([
            {"conv_s_w": rnd((F, P)), "conv_s_b": rnd((F,)),
             "w1": rnd((F, F)), "b1": rnd((F,)),
             "w2": rnd((F, F)), "b2": rnd((F,))}
            for _ in range(num_sfi)])
        if idx != 4:
            params["cpatt"].append([
                {"w1": rnd((F, F)), "b1": rnd((F,)),
                 "w2": rnd((F, F)), "b2": rnd((F,))}
                for _ in range(num_sfi)])
        params["att"].append([
            {"ff_w": rnd((F, F, 3)), "ff_b": rnd((F,)),      # Conv1d(k=3) weight (Cout, Cin, 3)
             "wq": rnd((F, F)), "bq": rnd((F,)),
             "wk": rnd((F, F)), "bk": rnd((F,)),
             "wv": rnd((F, F)), "bv": rnd((F,)),
             "wo": rnd((F, F)), "bo": rnd((F,)),
             "out_w": rnd((F, F)), "out_b": rnd((F,))}
            for _ in range(num_layers)])
    return params


# ---------------------------------------------------------------------------
# Demo
# ---------------------------------------------------------------------------

if __name__ == "__main__":
    N, C, T, V = 2, 4, 16, 12
    n_features = 32          # divisible by n_heads=4
    out_channel = 8
    n_heads = 4
    SFI_layer = tuple(range(9))          # 9 SFI stages: matches conv_in's 10-channel (9, 1) split
    num_layers = len(SFI_layer) + 1      # forward loop runs len(SFI_layer)+1 AttModule indices

    head_list = [0, 1, 2]
    hand_list = [3, 4, 5, 6]
    hip_list = [7, 8]
    foot_list = [9, 10, 11]
    node_idx_list = [head_list, hand_list, hip_list, foot_list, list(range(V))]
    node_list = [len(head_list), len(hand_list), len(hip_list), len(foot_list), V]

    root = jax.random.PRNGKey(0)
    k_param, k_x = jax.random.split(root)
    params = init_params(k_param, C, n_features, out_channel, num_layers,
                         len(SFI_layer), node_list)
    stacked = prepare_inputs(params, node_idx_list, SFI_layer, T=T, V=V,
                             n_features=n_features, n_heads=n_heads, alpha=1.0)

    x = jax.random.normal(k_x, (N, C, T, V), dtype=jnp.float32)
    mask = jnp.ones((N, 1, T), dtype=jnp.float32)
    mask = mask.at[1, 0, 12:].set(0.0)   # second sequence is padded at the tail

    outs = dpfl_forward(stacked, x, mask)
    outs = jax.block_until_ready(outs)

    assert len(outs) == 5
    for i in range(4):
        assert outs[i].shape == (N, n_features, T)
    assert outs[4].shape == (N, out_channel, T)
    assert all(bool(jnp.isfinite(o).all()) for o in outs)
    print("KERNEL_OK")
</pallas_src>

<mosaic_0001>
module attributes {stable_mosaic.version = 11 : i64} {
  func.func @_dpfl_kernel(%arg0: i32, %arg1: memref<10x4xf32, #tpu.memory_space<smem>>, %arg2: memref<10xf32, #tpu.memory_space<smem>>, %arg3: memref<10xi32, #tpu.memory_space<smem>>, %arg4: memref<10xi32, #tpu.memory_space<smem>>, %arg5: memref<1xf32, #tpu.memory_space<smem>>, %arg6: memref<1x4x16x12xf32, #tpu.memory_space<vmem>>, %arg7: memref<1x16x1xf32, #tpu.memory_space<vmem>>, %arg8: memref<10x32x16xf32, #tpu.memory_space<vmem>>, %arg9: memref<160x160xf32, #tpu.memory_space<vmem>>, %arg10: memref<20x160xf32, #tpu.memory_space<vmem>>, %arg11: memref<160x20xf32, #tpu.memory_space<vmem>>, %arg12: memref<160x160xf32, #tpu.memory_space<vmem>>, %arg13: memref<128x128xf32, #tpu.memory_space<vmem>>, %arg14: memref<12x160xf32, #tpu.memory_space<vmem>>, %arg15: memref<1x160xf32, #tpu.memory_space<vmem>>, %arg16: memref<9x12x160xf32, #tpu.memory_space<vmem>>, %arg17: memref<9x1x160xf32, #tpu.memory_space<vmem>>, %arg18: memref<9x160x160xf32, #tpu.memory_space<vmem>>, %arg19: memref<9x1x160xf32, #tpu.memory_space<vmem>>, %arg20: memref<9x160x160xf32, #tpu.memory_space<vmem>>, %arg21: memref<9x1x160xf32, #tpu.memory_space<vmem>>, %arg22: memref<9x128x128xf32, #tpu.memory_space<vmem>>, %arg23: memref<9x1x128xf32, #tpu.memory_space<vmem>>, %arg24: memref<9x128x128xf32, #tpu.memory_space<vmem>>, %arg25: memref<9x1x128xf32, #tpu.memory_space<vmem>>, %arg26: memref<10x3x160x160xf32, #tpu.memory_space<vmem>>, %arg27: memref<10x1x160xf32, #tpu.memory_space<vmem>>, %arg28: memref<10x160x480xf32, #tpu.memory_space<vmem>>, %arg29: memref<10x1x480xf32, #tpu.memory_space<vmem>>, %arg30: memref<10x160x160xf32, #tpu.memory_space<vmem>>, %arg31: memref<10x1x160xf32, #tpu.memory_space<vmem>>, %arg32: memref<10x160x160xf32, #tpu.memory_space<vmem>>, %arg33: memref<10x1x160xf32, #tpu.memory_space<vmem>>, %arg34: memref<160x8xf32, #tpu.memory_space<vmem>>, %arg35: memref<1x8xf32, #tpu.memory_space<vmem>>, %arg36: memref<1x16x128xf32, #tpu.memory_space<vmem>>, %arg37: memref<1x16x8xf32, #tpu.memory_space<vmem>>, %arg38: memref<16x160xf32, #tpu.memory_space<vmem>>, %arg39: memref<9x16x12xf32, #tpu.memory_space<vmem>>) attributes {dimension_semantics = [#tpu.dimension_semantics<parallel>], iteration_bounds = array<i64: 2>, scalar_prefetch = 0 : i64, scratch_operands = 2 : i64, tpu.core_type = #tpu.core_type<tc>, window_params = [{transform_indices = @transform_0, window_bounds = array<i64: 10, 4>}, {transform_indices = @transform_1, window_bounds = array<i64: 10>}, {transform_indices = @transform_2, window_bounds = array<i64: 10>}, {transform_indices = @transform_3, window_bounds = array<i64: 10>}, {transform_indices = @transform_4, window_bounds = array<i64: 1>}, {transform_indices = @transform_5, window_bounds = array<i64: 1, 4, 16, 12>}, {transform_indices = @transform_6, window_bounds = array<i64: 1, 16, 1>}, {pipeline_mode = #tpu.pipeline_mode<synchronous>, transform_indices = @transform_7, window_bounds = array<i64: 10, 32, 16>}, {pipeline_mode = #tpu.pipeline_mode<synchronous>, transform_indices = @transform_8, window_bounds = array<i64: 160, 160>}, {pipeline_mode = #tpu.pipeline_mode<synchronous>, transform_indices = @transform_9, window_bounds = array<i64: 20, 160>}, {pipeline_mode = #tpu.pipeline_mode<synchronous>, transform_indices = @transform_10, window_bounds = array<i64: 160, 20>}, {pipeline_mode = #tpu.pipeline_mode<synchronous>, transform_indices = @transform_11, window_bounds = array<i64: 160, 160>}, {pipeline_mode = #tpu.pipeline_mode<synchronous>, transform_indices = @transform_12, window_bounds = array<i64: 128, 128>}, {pipeline_mode = #tpu.pipeline_mode<synchronous>, transform_indices = @transform_13, window_bounds = array<i64: 12, 160>}, {pipeline_mode = #tpu.pipeline_mode<synchronous>, transform_indices = @transform_14, window_bounds = array<i64: 1, 160>}, {pipeline_mode = #tpu.pipeline_mode<synchronous>, transform_indices = @transform_15, window_bounds = array<i64: 9, 12, 160>}, {pipeline_mode = #tpu.pipeline_mode<synchronous>, transform_indices = @transform_16, window_bounds = array<i64: 9, 1, 160>}, {pipeline_mode = #tpu.pipeline_mode<synchronous>, transform_indices = @transform_17, window_bounds = array<i64: 9, 160, 160>}, {pipeline_mode = #tpu.pipeline_mode<synchronous>, transform_indices = @transform_18, window_bounds = array<i64: 9, 1, 160>}, {pipeline_mode = #tpu.pipeline_mode<synchronous>, transform_indices = @transform_19, window_bounds = array<i64: 9, 160, 160>}, {pipeline_mode = #tpu.pipeline_mode<synchronous>, transform_indices = @transform_20, window_bounds = array<i64: 9, 1, 160>}, {pipeline_mode = #tpu.pipeline_mode<synchronous>, transform_indices = @transform_21, window_bounds = array<i64: 9, 128, 128>}, {pipeline_mode = #tpu.pipeline_mode<synchronous>, transform_indices = @transform_22, window_bounds = array<i64: 9, 1, 128>}, {pipeline_mode = #tpu.pipeline_mode<synchronous>, transform_indices = @transform_23, window_bounds = array<i64: 9, 128, 128>}, {pipeline_mode = #tpu.pipeline_mode<synchronous>, transform_indices = @transform_24, window_bounds = array<i64: 9, 1, 128>}, {pipeline_mode = #tpu.pipeline_mode<synchronous>, transform_indices = @transform_25, window_bounds = array<i64: 10, 3, 160, 160>}, {pipeline_mode = #tpu.pipeline_mode<synchronous>, transform_indices = @transform_26, window_bounds = array<i64: 10, 1, 160>}, {pipeline_mode = #tpu.pipeline_mode<synchronous>, transform_indices = @transform_27, window_bounds = array<i64: 10, 160, 480>}, {pipeline_mode = #tpu.pipeline_mode<synchronous>, transform_indices = @transform_28, window_bounds = array<i64: 10, 1, 480>}, {pipeline_mode = #tpu.pipeline_mode<synchronous>, transform_indices = @transform_29, window_bounds = array<i64: 10, 160, 160>}, {pipeline_mode = #tpu.pipeline_mode<synchronous>, transform_indices = @transform_30, window_bounds = array<i64: 10, 1, 160>}, {pipeline_mode = #tpu.pipeline_mode<synchronous>, transform_indices = @transform_31, window_bounds = array<i64: 10, 160, 160>}, {pipeline_mode = #tpu.pipeline_mode<synchronous>, transform_indices = @transform_32, window_bounds = array<i64: 10, 1, 160>}, {pipeline_mode = #tpu.pipeline_mode<synchronous>, transform_indices = @transform_33, window_bounds = array<i64: 160, 8>}, {pipeline_mode = #tpu.pipeline_mode<synchronous>, transform_indices = @transform_34, window_bounds = array<i64: 1, 8>}, {transform_indices = @transform_35, window_bounds = array<i64: 1, 16, 128>}, {transform_indices = @transform_36, window_bounds = array<i64: 1, 16, 8>}]} {
    %c0 = arith.constant 0 : index
    %c0_0 = arith.constant 0 : index
    %c0_1 = arith.constant 0 : index
    %0 = vector.load %arg7[%c0, %c0_0, %c0_1] : memref<1x16x1xf32, #tpu.memory_space<vmem>>, vector<1x16x1xf32>
    %1 = vector.shape_cast %0 : vector<1x16x1xf32> to vector<16x1xf32>
    %c0_2 = arith.constant 0 : index
    %2 = memref.load %arg5[%c0_2] : memref<1xf32, #tpu.memory_space<smem>>
    %cst = arith.constant 0.000000e+00 : f32
    %3 = vector.broadcast %cst : f32 to vector<16x12xf32>
    %c9 = arith.constant 9 : index
    %4 = memref.load %arg2[%c9] : memref<10xf32, #tpu.memory_space<smem>>
    %5 = vector.broadcast %4 : f32 to vector<16x12xf32>
    %6 = arith.addf %3, %5 : vector<16x12xf32>
    %c9_3 = arith.constant 9 : index
    %c0_4 = arith.constant 0 : index
    %7 = memref.load %arg1[%c9_3, %c0_4] : memref<10x4xf32, #tpu.memory_space<smem>>
    %c0_5 = arith.constant 0 : index
    %c0_6 = arith.constant 0 : index
    %c0_7 = arith.constant 0 : index
    %c0_8 = arith.constant 0 : index
    %8 = vector.load %arg6[%c0_5, %c0_6, %c0_7, %c0_8] : memref<1x4x16x12xf32, #tpu.memory_space<vmem>>, vector<1x1x16x12xf32>
    %9 = vector.shape_cast %8 : vector<1x1x16x12xf32> to vector<16x12xf32>
    %10 = vector.broadcast %7 : f32 to vector<16x12xf32>
    %11 = arith.mulf %10, %9 : vector<16x12xf32>
    %12 = arith.addf %6, %11 : vector<16x12xf32>
    %c9_9 = arith.constant 9 : index
    %c1 = arith.constant 1 : index
    %13 = memref.load %arg1[%c9_9, %c1] : memref<10x4xf32, #tpu.memory_space<smem>>
    %c0_10 = arith.constant 0 : index
    %c1_11 = arith.constant 1 : index
    %c0_12 = arith.constant 0 : index
    %c0_13 = arith.constant 0 : index
    %14 = vector.load %arg6[%c0_10, %c1_11, %c0_12, %c0_13] : memref<1x4x16x12xf32, #tpu.memory_space<vmem>>, vector<1x1x16x12xf32>
    %15 = vector.shape_cast %14 : vector<1x1x16x12xf32> to vector<16x12xf32>
    %16 = vector.broadcast %13 : f32 to vector<16x12xf32>
    %17 = arith.mulf %16, %15 : vector<16x12xf32>
    %18 = arith.addf %12, %17 : vector<16x12xf32>
    %c9_14 = arith.constant 9 : index
    %c2 = arith.constant 2 : index
    %19 = memref.load %arg1[%c9_14, %c2] : memref<10x4xf32, #tpu.memory_space<smem>>
    %c0_15 = arith.constant 0 : index
    %c2_16 = arith.constant 2 : index
    %c0_17 = arith.constant 0 : index
    %c0_18 = arith.constant 0 : index
    %20 = vector.load %arg6[%c0_15, %c2_16, %c0_17, %c0_18] : memref<1x4x16x12xf32, #tpu.memory_space<vmem>>, vector<1x1x16x12xf32>
    %21 = vector.shape_cast %20 : vector<1x1x16x12xf32> to vector<16x12xf32>
    %22 = vector.broadcast %19 : f32 to vector<16x12xf32>
    %23 = arith.mulf %22, %21 : vector<16x12xf32>
    %24 = arith.addf %18, %23 : vector<16x12xf32>
    %c9_19 = arith.constant 9 : index
    %c3 = arith.constant 3 : index
    %25 = memref.load %arg1[%c9_19, %c3] : memref<10x4xf32, #tpu.memory_space<smem>>
    %c0_20 = arith.constant 0 : index
    %c3_21 = arith.constant 3 : index
    %c0_22 = arith.constant 0 : index
    %c0_23 = arith.constant 0 : index
    %26 = vector.load %arg6[%c0_20, %c3_21, %c0_22, %c0_23] : memref<1x4x16x12xf32, #tpu.memory_space<vmem>>, vector<1x1x16x12xf32>
    %27 = vector.shape_cast %26 : vector<1x1x16x12xf32> to vector<16x12xf32>
    %28 = vector.broadcast %25 : f32 to vector<16x12xf32>
    %29 = arith.mulf %28, %27 : vector<16x12xf32>
    %30 = arith.addf %24, %29 : vector<16x12xf32>
    %31 = vector.broadcast %1 : vector<16x1xf32> to vector<16x12xf32>
    %32 = arith.mulf %30, %31 : vector<16x12xf32>
    %c0_24 = arith.constant 0 : index
    %c0_25 = arith.constant 0 : index
    %33 = vector.load %arg14[%c0_24, %c0_25] : memref<12x160xf32, #tpu.memory_space<vmem>>, vector<12x160xf32>
    %cst_26 = arith.constant dense<0.000000e+00> : vector<16x160xf32>
    %34 = tpu.matmul %32, %33, %cst_26 {dimension_numbers = #tpu.dot_dimension_numbers<[1], [0], [0], [1], [0, 0, 1, 1], [], []>} : vector<16x12xf32>, vector<12x160xf32>, vector<16x160xf32> -> vector<16x160xf32>
    %c0_27 = arith.constant 0 : index
    %c0_28 = arith.constant 0 : index
    %35 = vector.load %arg15[%c0_27, %c0_28] : memref<1x160xf32, #tpu.memory_space<vmem>>, vector<1x160xf32>
    %36 = vector.broadcast %35 : vector<1x160xf32> to vector<16x160xf32>
    %37 = arith.addf %34, %36 : vector<16x160xf32>
    %38 = vector.broadcast %1 : vector<16x1xf32> to vector<16x160xf32>
    %39 = arith.mulf %37, %38 : vector<16x160xf32>
    %c0_29 = arith.constant 0 : index
    %c0_30 = arith.constant 0 : index
    %40 = vector.load %arg38[%c0_29, %c0_30] : memref<16x160xf32, #tpu.memory_space<vmem>>, vector<16x160xf32>
    tpu.vector_store %arg38[%c0_29, %c0_30], %39 {strides = array<i32>} : memref<16x160xf32, #tpu.memory_space<vmem>>, vector<16x160xf32>,
    %cst_31 = arith.constant 0.000000e+00 : f32
    %41 = vector.broadcast %cst_31 : f32 to vector<16x12xf32>
    %c0_32 = arith.constant 0 : index
    %42 = memref.load %arg2[%c0_32] : memref<10xf32, #tpu.memory_space<smem>>
    %43 = vector.broadcast %42 : f32 to vector<16x12xf32>
    %44 = arith.addf %41, %43 : vector<16x12xf32>
    %c0_33 = arith.constant 0 : index
    %c0_34 = arith.constant 0 : index
    %45 = memref.load %arg1[%c0_33, %c0_34] : memref<10x4xf32, #tpu.memory_space<smem>>
    %c0_35 = arith.constant 0 : index
    %c0_36 = arith.constant 0 : index
    %c0_37 = arith.constant 0 : index
    %c0_38 = arith.constant 0 : index
    %46 = vector.load %arg6[%c0_35, %c0_36, %c0_37, %c0_38] : memref<1x4x16x12xf32, #tpu.memory_space<vmem>>, vector<1x1x16x12xf32>
    %47 = vector.shape_cast %46 : vector<1x1x16x12xf32> to vector<16x12xf32>
    %48 = vector.broadcast %45 : f32 to vector<16x12xf32>
    %49 = arith.mulf %48, %47 : vector<16x12xf32>
    %50 = arith.addf %44, %49 : vector<16x12xf32>
    %c0_39 = arith.constant 0 : index
    %c1_40 = arith.constant 1 : index
    %51 = memref.load %arg1[%c0_39, %c1_40] : memref<10x4xf32, #tpu.memory_space<smem>>
    %c0_41 = arith.constant 0 : index
    %c1_42 = arith.constant 1 : index
    %c0_43 = arith.constant 0 : index
    %c0_44 = arith.constant 0 : index
    %52 = vector.load %arg6[%c0_41, %c1_42, %c0_43, %c0_44] : memref<1x4x16x12xf32, #tpu.memory_space<vmem>>, vector<1x1x16x12xf32>
    %53 = vector.shape_cast %52 : vector<1x1x16x12xf32> to vector<16x12xf32>
    %54 = vector.broadcast %51 : f32 to vector<16x12xf32>
    %55 = arith.mulf %54, %53 : vector<16x12xf32>
    %56 = arith.addf %50, %55 : vector<16x12xf32>
    %c0_45 = arith.constant 0 : index
    %c2_46 = arith.constant 2 : index
    %57 = memref.load %arg1[%c0_45, %c2_46] : memref<10x4xf32, #tpu.memory_space<smem>>
    %c0_47 = arith.constant 0 : index
    %c2_48 = arith.constant 2 : index
    %c0_49 = arith.constant 0 : index
    %c0_50 = arith.constant 0 : index
    %58 = vector.load %arg6[%c0_47, %c2_48, %c0_49, %c0_50] : memref<1x4x16x12xf32, #tpu.memory_space<vmem>>, vector<1x1x16x12xf32>
    %59 = vector.shape_cast %58 : vector<1x1x16x12xf32> to vector<16x12xf32>
    %60 = vector.broadcast %57 : f32 to vector<16x12xf32>
    %61 = arith.mulf %60, %59 : vector<16x12xf32>
    %62 = arith.addf %56, %61 : vector<16x12xf32>
    %c0_51 = arith.constant 0 : index
    %c3_52 = arith.constant 3 : index
    %63 = memref.load %arg1[%c0_51, %c3_52] : memref<10x4xf32, #tpu.memory_space<smem>>
    %c0_53 = arith.constant 0 : index
    %c3_54 = arith.constant 3 : index
    %c0_55 = arith.constant 0 : index
    %c0_56 = arith.constant 0 : index
    %64 = vector.load %arg6[%c0_53, %c3_54, %c0_55, %c0_56] : memref<1x4x16x12xf32, #tpu.memory_space<vmem>>, vector<1x1x16x12xf32>
    %65 = vector.shape_cast %64 : vector<1x1x16x12xf32> to vector<16x12xf32>
    %66 = vector.broadcast %63 : f32 to vector<16x12xf32>
    %67 = arith.mulf %66, %65 : vector<16x12xf32>
    %68 = arith.addf %62, %67 : vector<16x12xf32>
    %69 = vector.broadcast %1 : vector<16x1xf32> to vector<16x12xf32>
    %70 = arith.mulf %68, %69 : vector<16x12xf32>
    %c0_57 = arith.constant 0 : index
    %c0_58 = arith.constant 0 : index
    %c0_59 = arith.constant 0 : index
    %71 = vector.load %arg39[%c0_57, %c0_58, %c0_59] : memref<9x16x12xf32, #tpu.memory_space<vmem>>, vector<1x16x12xf32>
    %72 = vector.shape_cast %71 : vector<1x16x12xf32> to vector<16x12xf32>
    %73 = vector.shape_cast %70 : vector<16x12xf32> to vector<1x16x12xf32>
    tpu.vector_store %arg39[%c0_57, %c0_58, %c0_59], %73 {strides = array<i32>} : memref<9x16x12xf32, #tpu.memory_space<vmem>>, vector<1x16x12xf32>,
    %cst_60 = arith.constant 0.000000e+00 : f32
    %74 = vector.broadcast %cst_60 : f32 to vector<16x12xf32>
    %c1_61 = arith.constant 1 : index
    %75 = memref.load %arg2[%c1_61] : memref<10xf32, #tpu.memory_space<smem>>
    %76 = vector.broadcast %75 : f32 to vector<16x12xf32>
    %77 = arith.addf %74, %76 : vector<16x12xf32>
    %c1_62 = arith.constant 1 : index
    %c0_63 = arith.constant 0 : index
    %78 = memref.load %arg1[%c1_62, %c0_63] : memref<10x4xf32, #tpu.memory_space<smem>>
    %c0_64 = arith.constant 0 : index
    %c0_65 = arith.constant 0 : index
    %c0_66 = arith.constant 0 : index
    %c0_67 = arith.constant 0 : index
    %79 = vector.load %arg6[%c0_64, %c0_65, %c0_66, %c0_67] : memref<1x4x16x12xf32, #tpu.memory_space<vmem>>, vector<1x1x16x12xf32>
    %80 = vector.shape_cast %79 : vector<1x1x16x12xf32> to vector<16x12xf32>
    %81 = vector.broadcast %78 : f32 to vector<16x12xf32>
    %82 = arith.mulf %81, %80 : vector<16x12xf32>
    %83 = arith.addf %77, %82 : vector<16x12xf32>
    %c1_68 = arith.constant 1 : index
    %c1_69 = arith.constant 1 : index
    %84 = memref.load %arg1[%c1_68, %c1_69] : memref<10x4xf32, #tpu.memory_space<smem>>
    %c0_70 = arith.constant 0 : index
    %c1_71 = arith.constant 1 : index
    %c0_72 = arith.constant 0 : index
    %c0_73 = arith.constant 0 : index
    %85 = vector.load %arg6[%c0_70, %c1_71, %c0_72, %c0_73] : memref<1x4x16x12xf32, #tpu.memory_space<vmem>>, vector<1x1x16x12xf32>
    %86 = vector.shape_cast %85 : vector<1x1x16x12xf32> to vector<16x12xf32>
    %87 = vector.broadcast %84 : f32 to vector<16x12xf32>
    %88 = arith.mulf %87, %86 : vector<16x12xf32>
    %89 = arith.addf %83, %88 : vector<16x12xf32>
    %c1_74 = arith.constant 1 : index
    %c2_75 = arith.constant 2 : index
    %90 = memref.load %arg1[%c1_74, %c2_75] : memref<10x4xf32, #tpu.memory_space<smem>>
    %c0_76 = arith.constant 0 : index
    %c2_77 = arith.constant 2 : index
    %c0_78 = arith.constant 0 : index
    %c0_79 = arith.constant 0 : index
    %91 = vector.load %arg6[%c0_76, %c2_77, %c0_78, %c0_79] : memref<1x4x16x12xf32, #tpu.memory_space<vmem>>, vector<1x1x16x12xf32>
    %92 = vector.shape_cast %91 : vector<1x1x16x12xf32> to vector<16x12xf32>
    %93 = vector.broadcast %90 : f32 to vector<16x12xf32>
    %94 = arith.mulf %93, %92 : vector<16x12xf32>
    %95 = arith.addf %89, %94 : vector<16x12xf32>
    %c1_80 = arith.constant 1 : index
    %c3_81 = arith.constant 3 : index
    %96 = memref.load %arg1[%c1_80, %c3_81] : memref<10x4xf32, #tpu.memory_space<smem>>
    %c0_82 = arith.constant 0 : index
    %c3_83 = arith.constant 3 : index
    %c0_84 = arith.constant 0 : index
    %c0_85 = arith.constant 0 : index
    %97 = vector.load %arg6[%c0_82, %c3_83, %c0_84, %c0_85] : memref<1x4x16x12xf32, #tpu.memory_space<vmem>>, vector<1x1x16x12xf32>
    %98 = vector.shape_cast %97 : vector<1x1x16x12xf32> to vector<16x12xf32>
    %99 = vector.broadcast %96 : f32 to vector<16x12xf32>
    %100 = arith.mulf %99, %98 : vector<16x12xf32>
    %101 = arith.addf %95, %100 : vector<16x12xf32>
    %102 = vector.broadcast %1 : vector<16x1xf32> to vector<16x12xf32>
    %103 = arith.mulf %101, %102 : vector<16x12xf32>
    %c1_86 = arith.constant 1 : index
    %c0_87 = arith.constant 0 : index
    %c0_88 = arith.constant 0 : index
    %104 = vector.load %arg39[%c1_86, %c0_87, %c0_88] : memref<9x16x12xf32, #tpu.memory_space<vmem>>, vector<1x16x12xf32>
    %105 = vector.shape_cast %104 : vector<1x16x12xf32> to vector<16x12xf32>
    %106 = vector.shape_cast %103 : vector<16x12xf32> to vector<1x16x12xf32>
    tpu.vector_store %arg39[%c1_86, %c0_87, %c0_88], %106 {strides = array<i32>} : memref<9x16x12xf32, #tpu.memory_space<vmem>>, vector<1x16x12xf32>,
    %cst_89 = arith.constant 0.000000e+00 : f32
    %107 = vector.broadcast %cst_89 : f32 to vector<16x12xf32>
    %c2_90 = arith.constant 2 : index
    %108 = memref.load %arg2[%c2_90] : memref<10xf32, #tpu.memory_space<smem>>
    %109 = vector.broadcast %108 : f32 to vector<16x12xf32>
    %110 = arith.addf %107, %109 : vector<16x12xf32>
    %c2_91 = arith.constant 2 : index
    %c0_92 = arith.constant 0 : index
    %111 = memref.load %arg1[%c2_91, %c0_92] : memref<10x4xf32, #tpu.memory_space<smem>>
    %c0_93 = arith.constant 0 : index
    %c0_94 = arith.constant 0 : index
    %c0_95 = arith.constant 0 : index
    %c0_96 = arith.constant 0 : index
    %112 = vector.load %arg6[%c0_93, %c0_94, %c0_95, %c0_96] : memref<1x4x16x12xf32, #tpu.memory_space<vmem>>, vector<1x1x16x12xf32>
    %113 = vector.shape_cast %112 : vector<1x1x16x12xf32> to vector<16x12xf32>
    %114 = vector.broadcast %111 : f32 to vector<16x12xf32>
    %115 = arith.mulf %114, %113 : vector<16x12xf32>
    %116 = arith.addf %110, %115 : vector<16x12xf32>
    %c2_97 = arith.constant 2 : index
    %c1_98 = arith.constant 1 : index
    %117 = memref.load %arg1[%c2_97, %c1_98] : memref<10x4xf32, #tpu.memory_space<smem>>
    %c0_99 = arith.constant 0 : index
    %c1_100 = arith.constant 1 : index
    %c0_101 = arith.constant 0 : index
    %c0_102 = arith.constant 0 : index
    %118 = vector.load %arg6[%c0_99, %c1_100, %c0_101, %c0_102] : memref<1x4x16x12xf32, #tpu.memory_space<vmem>>, vector<1x1x16x12xf32>
    %119 = vector.shape_cast %118 : vector<1x1x16x12xf32> to vector<16x12xf32>
    %120 = vector.broadcast %117 : f32 to vector<16x12xf32>
    %121 = arith.mulf %120, %119 : vector<16x12xf32>
    %122 = arith.addf %116, %121 : vector<16x12xf32>
    %c2_103 = arith.constant 2 : index
    %c2_104 = arith.constant 2 : index
    %123 = memref.load %arg1[%c2_103, %c2_104] : memref<10x4xf32, #tpu.memory_space<smem>>
    %c0_105 = arith.constant 0 : index
    %c2_106 = arith.constant 2 : index
    %c0_107 = arith.constant 0 : index
    %c0_108 = arith.constant 0 : index
    %124 = vector.load %arg6[%c0_105, %c2_106, %c0_107, %c0_108] : memref<1x4x16x12xf32, #tpu.memory_space<vmem>>, vector<1x1x16x12xf32>
    %125 = vector.shape_cast %124 : vector<1x1x16x12xf32> to vector<16x12xf32>
    %126 = vector.broadcast %123 : f32 to vector<16x12xf32>
    %127 = arith.mulf %126, %125 : vector<16x12xf32>
    %128 = arith.addf %122, %127 : vector<16x12xf32>
    %c2_109 = arith.constant 2 : index
    %c3_110 = arith.constant 3 : index
    %129 = memref.load %arg1[%c2_109, %c3_110] : memref<10x4xf32, #tpu.memory_space<smem>>
    %c0_111 = arith.constant 0 : index
    %c3_112 = arith.constant 3 : index
    %c0_113 = arith.constant 0 : index
    %c0_114 = arith.constant 0 : index
    %130 = vector.load %arg6[%c0_111, %c3_112, %c0_113, %c0_114] : memref<1x4x16x12xf32, #tpu.memory_space<vmem>>, vector<1x1x16x12xf32>
    %131 = vector.shape_cast %130 : vector<1x1x16x12xf32> to vector<16x12xf32>
    %132 = vector.broadcast %129 : f32 to vector<16x12xf32>
    %133 = arith.mulf %132, %131 : vector<16x12xf32>
    %134 = arith.addf %128, %133 : vector<16x12xf32>
    %135 = vector.broadcast %1 : vector<16x1xf32> to vector<16x12xf32>
    %136 = arith.mulf %134, %135 : vector<16x12xf32>
    %c2_115 = arith.constant 2 : index
    %c0_116 = arith.constant 0 : index
    %c0_117 = arith.constant 0 : index
    %137 = vector.load %arg39[%c2_115, %c0_116, %c0_117] : memref<9x16x12xf32, #tpu.memory_space<vmem>>, vector<1x16x12xf32>
    %138 = vector.shape_cast %137 : vector<1x16x12xf32> to vector<16x12xf32>
    %139 = vector.shape_cast %136 : vector<16x12xf32> to vector<1x16x12xf32>
    tpu.vector_store %arg39[%c2_115, %c0_116, %c0_117], %139 {strides = array<i32>} : memref<9x16x12xf32, #tpu.memory_space<vmem>>, vector<1x16x12xf32>,
    %cst_118 = arith.constant 0.000000e+00 : f32
    %140 = vector.broadcast %cst_118 : f32 to vector<16x12xf32>
    %c3_119 = arith.constant 3 : index
    %141 = memref.load %arg2[%c3_119] : memref<10xf32, #tpu.memory_space<smem>>
    %142 = vector.broadcast %141 : f32 to vector<16x12xf32>
    %143 = arith.addf %140, %142 : vector<16x12xf32>
    %c3_120 = arith.constant 3 : index
    %c0_121 = arith.constant 0 : index
    %144 = memref.load %arg1[%c3_120, %c0_121] : memref<10x4xf32, #tpu.memory_space<smem>>
    %c0_122 = arith.constant 0 : index
    %c0_123 = arith.constant 0 : index
    %c0_124 = arith.constant 0 : index
    %c0_125 = arith.constant 0 : index
    %145 = vector.load %arg6[%c0_122, %c0_123, %c0_124, %c0_125] : memref<1x4x16x12xf32, #tpu.memory_space<vmem>>, vector<1x1x16x12xf32>
    %146 = vector.shape_cast %145 : vector<1x1x16x12xf32> to vector<16x12xf32>
    %147 = vector.broadcast %144 : f32 to vector<16x12xf32>
    %148 = arith.mulf %147, %146 : vector<16x12xf32>
    %149 = arith.addf %143, %148 : vector<16x12xf32>
    %c3_126 = arith.constant 3 : index
    %c1_127 = arith.constant 1 : index
    %150 = memref.load %arg1[%c3_126, %c1_127] : memref<10x4xf32, #tpu.memory_space<smem>>
    %c0_128 = arith.constant 0 : index
    %c1_129 = arith.constant 1 : index
    %c0_130 = arith.constant 0 : index
    %c0_131 = arith.constant 0 : index
    %151 = vector.load %arg6[%c0_128, %c1_129, %c0_130, %c0_131] : memref<1x4x16x12xf32, #tpu.memory_space<vmem>>, vector<1x1x16x12xf32>
    %152 = vector.shape_cast %151 : vector<1x1x16x12xf32> to vector<16x12xf32>
    %153 = vector.broadcast %150 : f32 to vector<16x12xf32>
    %154 = arith.mulf %153, %152 : vector<16x12xf32>
    %155 = arith.addf %149, %154 : vector<16x12xf32>
    %c3_132 = arith.constant 3 : index
    %c2_133 = arith.constant 2 : index
    %156 = memref.load %arg1[%c3_132, %c2_133] : memref<10x4xf32, #tpu.memory_space<smem>>
    %c0_134 = arith.constant 0 : index
    %c2_135 = arith.constant 2 : index
    %c0_136 = arith.constant 0 : index
    %c0_137 = arith.constant 0 : index
    %157 = vector.load %arg6[%c0_134, %c2_135, %c0_136, %c0_137] : memref<1x4x16x12xf32, #tpu.memory_space<vmem>>, vector<1x1x16x12xf32>
    %158 = vector.shape_cast %157 : vector<1x1x16x12xf32> to vector<16x12xf32>
    %159 = vector.broadcast %156 : f32 to vector<16x12xf32>
    %160 = arith.mulf %159, %158 : vector<16x12xf32>
    %161 = arith.addf %155, %160 : vector<16x12xf32>
    %c3_138 = arith.constant 3 : index
    %c3_139 = arith.constant 3 : index
    %162 = memref.load %arg1[%c3_138, %c3_139] : memref<10x4xf32, #tpu.memory_space<smem>>
    %c0_140 = arith.constant 0 : index
    %c3_141 = arith.constant 3 : index
    %c0_142 = arith.constant 0 : index
    %c0_143 = arith.constant 0 : index
    %163 = vector.load %arg6[%c0_140, %c3_141, %c0_142, %c0_143] : memref<1x4x16x12xf32, #tpu.memory_space<vmem>>, vector<1x1x16x12xf32>
    %164 = vector.shape_cast %163 : vector<1x1x16x12xf32> to vector<16x12xf32>
    %165 = vector.broadcast %162 : f32 to vector<16x12xf32>
    %166 = arith.mulf %165, %164 : vector<16x12xf32>
    %167 = arith.addf %161, %166 : vector<16x12xf32>
    %168 = vector.broadcast %1 : vector<16x1xf32> to vector<16x12xf32>
    %169 = arith.mulf %167, %168 : vector<16x12xf32>
    %c3_144 = arith.constant 3 : index
    %c0_145 = arith.constant 0 : index
    %c0_146 = arith.constant 0 : index
    %170 = vector.load %arg39[%c3_144, %c0_145, %c0_146] : memref<9x16x12xf32, #tpu.memory_space<vmem>>, vector<1x16x12xf32>
    %171 = vector.shape_cast %170 : vector<1x16x12xf32> to vector<16x12xf32>
    %172 = vector.shape_cast %169 : vector<16x12xf32> to vector<1x16x12xf32>
    tpu.vector_store %arg39[%c3_144, %c0_145, %c0_146], %172 {strides = array<i32>} : memref<9x16x12xf32, #tpu.memory_space<vmem>>, vector<1x16x12xf32>,
    %cst_147 = arith.constant 0.000000e+00 : f32
    %173 = vector.broadcast %cst_147 : f32 to vector<16x12xf32>
    %c4 = arith.constant 4 : index
    %174 = memref.load %arg2[%c4] : memref<10xf32, #tpu.memory_space<smem>>
    %175 = vector.broadcast %174 : f32 to vector<16x12xf32>
    %176 = arith.addf %173, %175 : vector<16x12xf32>
    %c4_148 = arith.constant 4 : index
    %c0_149 = arith.constant 0 : index
    %177 = memref.load %arg1[%c4_148, %c0_149] : memref<10x4xf32, #tpu.memory_space<smem>>
    %c0_150 = arith.constant 0 : index
    %c0_151 = arith.constant 0 : index
    %c0_152 = arith.constant 0 : index
    %c0_153 = arith.constant 0 : index
    %178 = vector.load %arg6[%c0_150, %c0_151, %c0_152, %c0_153] : memref<1x4x16x12xf32, #tpu.memory_space<vmem>>, vector<1x1x16x12xf32>
    %179 = vector.shape_cast %178 : vector<1x1x16x12xf32> to vector<16x12xf32>
    %180 = vector.broadcast %177 : f32 to vector<16x12xf32>
    %181 = arith.mulf %180, %179 : vector<16x12xf32>
    %182 = arith.addf %176, %181 : vector<16x12xf32>
    %c4_154 = arith.constant 4 : index
    %c1_155 = arith.constant 1 : index
    %183 = memref.load %arg1[%c4_154, %c1_155] : memref<10x4xf32, #tpu.memory_space<smem>>
    %c0_156 = arith.constant 0 : index
    %c1_157 = arith.constant 1 : index
    %c0_158 = arith.constant 0 : index
    %c0_159 = arith.constant 0 : index
    %184 = vector.load %arg6[%c0_156, %c1_157, %c0_158, %c0_159] : memref<1x4x16x12xf32, #tpu.memory_space<vmem>>, vector<1x1x16x12xf32>
    %185 = vector.shape_cast %184 : vector<1x1x16x12xf32> to vector<16x12xf32>
    %186 = vector.broadcast %183 : f32 to vector<16x12xf32>
    %187 = arith.mulf %186, %185 : vector<16x12xf32>
    %188 = arith.addf %182, %187 : vector<16x12xf32>
    %c4_160 = arith.constant 4 : index
    %c2_161 = arith.constant 2 : index
    %189 = memref.load %arg1[%c4_160, %c2_161] : memref<10x4xf32, #tpu.memory_space<smem>>
    %c0_162 = arith.constant 0 : index
    %c2_163 = arith.constant 2 : index
    %c0_164 = arith.constant 0 : index
    %c0_165 = arith.constant 0 : index
    %190 = vector.load %arg6[%c0_162, %c2_163, %c0_164, %c0_165] : memref<1x4x16x12xf32, #tpu.memory_space<vmem>>, vector<1x1x16x12xf32>
    %191 = vector.shape_cast %190 : vector<1x1x16x12xf32> to vector<16x12xf32>
    %192 = vector.broadcast %189 : f32 to vector<16x12xf32>
    %193 = arith.mulf %192, %191 : vector<16x12xf32>
    %194 = arith.addf %188, %193 : vector<16x12xf32>
    %c4_166 = arith.constant 4 : index
    %c3_167 = arith.constant 3 : index
    %195 = memref.load %arg1[%c4_166, %c3_167] : memref<10x4xf32, #tpu.memory_space<smem>>
    %c0_168 = arith.constant 0 : index
    %c3_169 = arith.constant 3 : index
    %c0_170 = arith.constant 0 : index
    %c0_171 = arith.constant 0 : index
    %196 = vector.load %arg6[%c0_168, %c3_169, %c0_170, %c0_171] : memref<1x4x16x12xf32, #tpu.memory_space<vmem>>, vector<1x1x16x12xf32>
    %197 = vector.shape_cast %196 : vector<1x1x16x12xf32> to vector<16x12xf32>
    %198 = vector.broadcast %195 : f32 to vector<16x12xf32>
    %199 = arith.mulf %198, %197 : vector<16x12xf32>
    %200 = arith.addf %194, %199 : vector<16x12xf32>
    %201 = vector.broadcast %1 : vector<16x1xf32> to vector<16x12xf32>
    %202 = arith.mulf %200, %201 : vector<16x12xf32>
    %c4_172 = arith.constant 4 : index
    %c0_173 = arith.constant 0 : index
    %c0_174 = arith.constant 0 : index
    %203 = vector.load %arg39[%c4_172, %c0_173, %c0_174] : memref<9x16x12xf32, #tpu.memory_space<vmem>>, vector<1x16x12xf32>
    %204 = vector.shape_cast %203 : vector<1x16x12xf32> to vector<16x12xf32>
    %205 = vector.shape_cast %202 : vector<16x12xf32> to vector<1x16x12xf32>
    tpu.vector_store %arg39[%c4_172, %c0_173, %c0_174], %205 {strides = array<i32>} : memref<9x16x12xf32, #tpu.memory_space<vmem>>, vector<1x16x12xf32>,
    %cst_175 = arith.constant 0.000000e+00 : f32
    %206 = vector.broadcast %cst_175 : f32 to vector<16x12xf32>
    %c5 = arith.constant 5 : index
    %207 = memref.load %arg2[%c5] : memref<10xf32, #tpu.memory_space<smem>>
    %208 = vector.broadcast %207 : f32 to vector<16x12xf32>
    %209 = arith.addf %206, %208 : vector<16x12xf32>
    %c5_176 = arith.constant 5 : index
    %c0_177 = arith.constant 0 : index
    %210 = memref.load %arg1[%c5_176, %c0_177] : memref<10x4xf32, #tpu.memory_space<smem>>
    %c0_178 = arith.constant 0 : index
    %c0_179 = arith.constant 0 : index
    %c0_180 = arith.constant 0 : index
    %c0_181 = arith.constant 0 : index
    %211 = vector.load %arg6[%c0_178, %c0_179, %c0_180, %c0_181] : memref<1x4x16x12xf32, #tpu.memory_space<vmem>>, vector<1x1x16x12xf32>
    %212 = vector.shape_cast %211 : vector<1x1x16x12xf32> to vector<16x12xf32>
    %213 = vector.broadcast %210 : f32 to vector<16x12xf32>
    %214 = arith.mulf %213, %212 : vector<16x12xf32>
    %215 = arith.addf %209, %214 : vector<16x12xf32>
    %c5_182 = arith.constant 5 : index
    %c1_183 = arith.constant 1 : index
    %216 = memref.load %arg1[%c5_182, %c1_183] : memref<10x4xf32, #tpu.memory_space<smem>>
    %c0_184 = arith.constant 0 : index
    %c1_185 = arith.constant 1 : index
    %c0_186 = arith.constant 0 : index
    %c0_187 = arith.constant 0 : index
    %217 = vector.load %arg6[%c0_184, %c1_185, %c0_186, %c0_187] : memref<1x4x16x12xf32, #tpu.memory_space<vmem>>, vector<1x1x16x12xf32>
    %218 = vector.shape_cast %217 : vector<1x1x16x12xf32> to vector<16x12xf32>
    %219 = vector.broadcast %216 : f32 to vector<16x12xf32>
    %220 = arith.mulf %219, %218 : vector<16x12xf32>
    %221 = arith.addf %215, %220 : vector<16x12xf32>
    %c5_188 = arith.constant 5 : index
    %c2_189 = arith.constant 2 : index
    %222 = memref.load %arg1[%c5_188, %c2_189] : memref<10x4xf32, #tpu.memory_space<smem>>
    %c0_190 = arith.constant 0 : index
    %c2_191 = arith.constant 2 : index
    %c0_192 = arith.constant 0 : index
    %c0_193 = arith.constant 0 : index
    %223 = vector.load %arg6[%c0_190, %c2_191, %c0_192, %c0_193] : memref<1x4x16x12xf32, #tpu.memory_space<vmem>>, vector<1x1x16x12xf32>
    %224 = vector.shape_cast %223 : vector<1x1x16x12xf32> to vector<16x12xf32>
    %225 = vector.broadcast %222 : f32 to vector<16x12xf32>
    %226 = arith.mulf %225, %224 : vector<16x12xf32>
    %227 = arith.addf %221, %226 : vector<16x12xf32>
    %c5_194 = arith.constant 5 : index
    %c3_195 = arith.constant 3 : index
    %228 = memref.load %arg1[%c5_194, %c3_195] : memref<10x4xf32, #tpu.memory_space<smem>>
    %c0_196 = arith.constant 0 : index
    %c3_197 = arith.constant 3 : index
    %c0_198 = arith.constant 0 : index
    %c0_199 = arith.constant 0 : index
    %229 = vector.load %arg6[%c0_196, %c3_197, %c0_198, %c0_199] : memref<1x4x16x12xf32, #tpu.memory_space<vmem>>, vector<1x1x16x12xf32>
    %230 = vector.shape_cast %229 : vector<1x1x16x12xf32> to vector<16x12xf32>
    %231 = vector.broadcast %228 : f32 to vector<16x12xf32>
    %232 = arith.mulf %231, %230 : vector<16x12xf32>
    %233 = arith.addf %227, %232 : vector<16x12xf32>
    %234 = vector.broadcast %1 : vector<16x1xf32> to vector<16x12xf32>
    %235 = arith.mulf %233, %234 : vector<16x12xf32>
    %c5_200 = arith.constant 5 : index
    %c0_201 = arith.constant 0 : index
    %c0_202 = arith.constant 0 : index
    %236 = vector.load %arg39[%c5_200, %c0_201, %c0_202] : memref<9x16x12xf32, #tpu.memory_space<vmem>>, vector<1x16x12xf32>
    %237 = vector.shape_cast %236 : vector<1x16x12xf32> to vector<16x12xf32>
    %238 = vector.shape_cast %235 : vector<16x12xf32> to vector<1x16x12xf32>
    tpu.vector_store %arg39[%c5_200, %c0_201, %c0_202], %238 {strides = array<i32>} : memref<9x16x12xf32, #tpu.memory_space<vmem>>, vector<1x16x12xf32>,
    %cst_203 = arith.constant 0.000000e+00 : f32
    %239 = vector.broadcast %cst_203 : f32 to vector<16x12xf32>
    %c6 = arith.constant 6 : index
    %240 = memref.load %arg2[%c6] : memref<10xf32, #tpu.memory_space<smem>>
    %241 = vector.broadcast %240 : f32 to vector<16x12xf32>
    %242 = arith.addf %239, %241 : vector<16x12xf32>
    %c6_204 = arith.constant 6 : index
    %c0_205 = arith.constant 0 : index
    %243 = memref.load %arg1[%c6_204, %c0_205] : memref<10x4xf32, #tpu.memory_space<smem>>
    %c0_206 = arith.constant 0 : index
    %c0_207 = arith.constant 0 : index
    %c0_208 = arith.constant 0 : index
    %c0_209 = arith.constant 0 : index
    %244 = vector.load %arg6[%c0_206, %c0_207, %c0_208, %c0_209] : memref<1x4x16x12xf32, #tpu.memory_space<vmem>>, vector<1x1x16x12xf32>
    %245 = vector.shape_cast %244 : vector<1x1x16x12xf32> to vector<16x12xf32>
    %246 = vector.broadcast %243 : f32 to vector<16x12xf32>
    %247 = arith.mulf %246, %245 : vector<16x12xf32>
    %248 = arith.addf %242, %247 : vector<16x12xf32>
    %c6_210 = arith.constant 6 : index
    %c1_211 = arith.constant 1 : index
    %249 = memref.load %arg1[%c6_210, %c1_211] : memref<10x4xf32, #tpu.memory_space<smem>>
    %c0_212 = arith.constant 0 : index
    %c1_213 = arith.constant 1 : index
    %c0_214 = arith.constant 0 : index
    %c0_215 = arith.constant 0 : index
    %250 = vector.load %arg6[%c0_212, %c1_213, %c0_214, %c0_215] : memref<1x4x16x12xf32, #tpu.memory_space<vmem>>, vector<1x1x16x12xf32>
    %251 = vector.shape_cast %250 : vector<1x1x16x12xf32> to vector<16x12xf32>
    %252 = vector.broadcast %249 : f32 to vector<16x12xf32>
    %253 = arith.mulf %252, %251 : vector<16x12xf32>
    %254 = arith.addf %248, %253 : vector<16x12xf32>
    %c6_216 = arith.constant 6 : index
    %c2_217 = arith.constant 2 : index
    %255 = memref.load %arg1[%c6_216, %c2_217] : memref<10x4xf32, #tpu.memory_space<smem>>
    %c0_218 = arith.constant 0 : index
    %c2_219 = arith.constant 2 : index
    %c0_220 = arith.constant 0 : index
    %c0_221 = arith.constant 0 : index
    %256 = vector.load %arg6[%c0_218, %c2_219, %c0_220, %c0_221] : memref<1x4x16x12xf32, #tpu.memory_space<vmem>>, vector<1x1x16x12xf32>
    %257 = vector.shape_cast %256 : vector<1x1x16x12xf32> to vector<16x12xf32>
    %258 = vector.broadcast %255 : f32 to vector<16x12xf32>
    %259 = arith.mulf %258, %257 : vector<16x12xf32>
    %260 = arith.addf %254, %259 : vector<16x12xf32>
    %c6_222 = arith.constant 6 : index
    %c3_223 = arith.constant 3 : index
    %261 = memref.load %arg1[%c6_222, %c3_223] : memref<10x4xf32, #tpu.memory_space<smem>>
    %c0_224 = arith.constant 0 : index
    %c3_225 = arith.constant 3 : index
    %c0_226 = arith.constant 0 : index
    %c0_227 = arith.constant 0 : index
    %262 = vector.load %arg6[%c0_224, %c3_225, %c0_226, %c0_227] : memref<1x4x16x12xf32, #tpu.memory_space<vmem>>, vector<1x1x16x12xf32>
    %263 = vector.shape_cast %262 : vector<1x1x16x12xf32> to vector<16x12xf32>
    %264 = vector.broadcast %261 : f32 to vector<16x12xf32>
    %265 = arith.mulf %264, %263 : vector<16x12xf32>
    %266 = arith.addf %260, %265 : vector<16x12xf32>
    %267 = vector.broadcast %1 : vector<16x1xf32> to vector<16x12xf32>
    %268 = arith.mulf %266, %267 : vector<16x12xf32>
    %c6_228 = arith.constant 6 : index
    %c0_229 = arith.constant 0 : index
    %c0_230 = arith.constant 0 : index
    %269 = vector.load %arg39[%c6_228, %c0_229, %c0_230] : memref<9x16x12xf32, #tpu.memory_space<vmem>>, vector<1x16x12xf32>
    %270 = vector.shape_cast %269 : vector<1x16x12xf32> to vector<16x12xf32>
    %271 = vector.shape_cast %268 : vector<16x12xf32> to vector<1x16x12xf32>
    tpu.vector_store %arg39[%c6_228, %c0_229, %c0_230], %271 {strides = array<i32>} : memref<9x16x12xf32, #tpu.memory_space<vmem>>, vector<1x16x12xf32>,
    %cst_231 = arith.constant 0.000000e+00 : f32
    %272 = vector.broadcast %cst_231 : f32 to vector<16x12xf32>
    %c7 = arith.constant 7 : index
    %273 = memref.load %arg2[%c7] : memref<10xf32, #tpu.memory_space<smem>>
    %274 = vector.broadcast %273 : f32 to vector<16x12xf32>
    %275 = arith.addf %272, %274 : vector<16x12xf32>
    %c7_232 = arith.constant 7 : index
    %c0_233 = arith.constant 0 : index
    %276 = memref.load %arg1[%c7_232, %c0_233] : memref<10x4xf32, #tpu.memory_space<smem>>
    %c0_234 = arith.constant 0 : index
    %c0_235 = arith.constant 0 : index
    %c0_236 = arith.constant 0 : index
    %c0_237 = arith.constant 0 : index
    %277 = vector.load %arg6[%c0_234, %c0_235, %c0_236, %c0_237] : memref<1x4x16x12xf32, #tpu.memory_space<vmem>>, vector<1x1x16x12xf32>
    %278 = vector.shape_cast %277 : vector<1x1x16x12xf32> to vector<16x12xf32>
    %279 = vector.broadcast %276 : f32 to vector<16x12xf32>
    %280 = arith.mulf %279, %278 : vector<16x12xf32>
    %281 = arith.addf %275, %280 : vector<16x12xf32>
    %c7_238 = arith.constant 7 : index
    %c1_239 = arith.constant 1 : index
    %282 = memref.load %arg1[%c7_238, %c1_239] : memref<10x4xf32, #tpu.memory_space<smem>>
    %c0_240 = arith.constant 0 : index
    %c1_241 = arith.constant 1 : index
    %c0_242 = arith.constant 0 : index
    %c0_243 = arith.constant 0 : index
    %283 = vector.load %arg6[%c0_240, %c1_241, %c0_242, %c0_243] : memref<1x4x16x12xf32, #tpu.memory_space<vmem>>, vector<1x1x16x12xf32>
    %284 = vector.shape_cast %283 : vector<1x1x16x12xf32> to vector<16x12xf32>
    %285 = vector.broadcast %282 : f32 to vector<16x12xf32>
    %286 = arith.mulf %285, %284 : vector<16x12xf32>
    %287 = arith.addf %281, %286 : vector<16x12xf32>
    %c7_244 = arith.constant 7 : index
    %c2_245 = arith.constant 2 : index
    %288 = memref.load %arg1[%c7_244, %c2_245] : memref<10x4xf32, #tpu.memory_space<smem>>
    %c0_246 = arith.constant 0 : index
    %c2_247 = arith.constant 2 : index
    %c0_248 = arith.constant 0 : index
    %c0_249 = arith.constant 0 : index
    %289 = vector.load %arg6[%c0_246, %c2_247, %c0_248, %c0_249] : memref<1x4x16x12xf32, #tpu.memory_space<vmem>>, vector<1x1x16x12xf32>
    %290 = vector.shape_cast %289 : vector<1x1x16x12xf32> to vector<16x12xf32>
    %291 = vector.broadcast %288 : f32 to vector<16x12xf32>
    %292 = arith.mulf %291, %290 : vector<16x12xf32>
    %293 = arith.addf %287, %292 : vector<16x12xf32>
    %c7_250 = arith.constant 7 : index
    %c3_251 = arith.constant 3 : index
    %294 = memref.load %arg1[%c7_250, %c3_251] : memref<10x4xf32, #tpu.memory_space<smem>>
    %c0_252 = arith.constant 0 : index
    %c3_253 = arith.constant 3 : index
    %c0_254 = arith.constant 0 : index
    %c0_255 = arith.constant 0 : index
    %295 = vector.load %arg6[%c0_252, %c3_253, %c0_254, %c0_255] : memref<1x4x16x12xf32, #tpu.memory_space<vmem>>, vector<1x1x16x12xf32>
    %296 = vector.shape_cast %295 : vector<1x1x16x12xf32> to vector<16x12xf32>
    %297 = vector.broadcast %294 : f32 to vector<16x12xf32>
    %298 = arith.mulf %297, %296 : vector<16x12xf32>
    %299 = arith.addf %293, %298 : vector<16x12xf32>
    %300 = vector.broadcast %1 : vector<16x1xf32> to vector<16x12xf32>
    %301 = arith.mulf %299, %300 : vector<16x12xf32>
    %c7_256 = arith.constant 7 : index
    %c0_257 = arith.constant 0 : index
    %c0_258 = arith.constant 0 : index
    %302 = vector.load %arg39[%c7_256, %c0_257, %c0_258] : memref<9x16x12xf32, #tpu.memory_space<vmem>>, vector<1x16x12xf32>
    %303 = vector.shape_cast %302 : vector<1x16x12xf32> to vector<16x12xf32>
    %304 = vector.shape_cast %301 : vector<16x12xf32> to vector<1x16x12xf32>
    tpu.vector_store %arg39[%c7_256, %c0_257, %c0_258], %304 {strides = array<i32>} : memref<9x16x12xf32, #tpu.memory_space<vmem>>, vector<1x16x12xf32>,
    %cst_259 = arith.constant 0.000000e+00 : f32
    %305 = vector.broadcast %cst_259 : f32 to vector<16x12xf32>
    %c8 = arith.constant 8 : index
    %306 = memref.load %arg2[%c8] : memref<10xf32, #tpu.memory_space<smem>>
    %307 = vector.broadcast %306 : f32 to vector<16x12xf32>
    %308 = arith.addf %305, %307 : vector<16x12xf32>
    %c8_260 = arith.constant 8 : index
    %c0_261 = arith.constant 0 : index
    %309 = memref.load %arg1[%c8_260, %c0_261] : memref<10x4xf32, #tpu.memory_space<smem>>
    %c0_262 = arith.constant 0 : index
    %c0_263 = arith.constant 0 : index
    %c0_264 = arith.constant 0 : index
    %c0_265 = arith.constant 0 : index
    %310 = vector.load %arg6[%c0_262, %c0_263, %c0_264, %c0_265] : memref<1x4x16x12xf32, #tpu.memory_space<vmem>>, vector<1x1x16x12xf32>
    %311 = vector.shape_cast %310 : vector<1x1x16x12xf32> to vector<16x12xf32>
    %312 = vector.broadcast %309 : f32 to vector<16x12xf32>
    %313 = arith.mulf %312, %311 : vector<16x12xf32>
    %314 = arith.addf %308, %313 : vector<16x12xf32>
    %c8_266 = arith.constant 8 : index
    %c1_267 = arith.constant 1 : index
    %315 = memref.load %arg1[%c8_266, %c1_267] : memref<10x4xf32, #tpu.memory_space<smem>>
    %c0_268 = arith.constant 0 : index
    %c1_269 = arith.constant 1 : index
    %c0_270 = arith.constant 0 : index
    %c0_271 = arith.constant 0 : index
    %316 = vector.load %arg6[%c0_268, %c1_269, %c0_270, %c0_271] : memref<1x4x16x12xf32, #tpu.memory_space<vmem>>, vector<1x1x16x12xf32>
    %317 = vector.shape_cast %316 : vector<1x1x16x12xf32> to vector<16x12xf32>
    %318 = vector.broadcast %315 : f32 to vector<16x12xf32>
    %319 = arith.mulf %318, %317 : vector<16x12xf32>
    %320 = arith.addf %314, %319 : vector<16x12xf32>
    %c8_272 = arith.constant 8 : index
    %c2_273 = arith.constant 2 : index
    %321 = memref.load %arg1[%c8_272, %c2_273] : memref<10x4xf32, #tpu.memory_space<smem>>
    %c0_274 = arith.constant 0 : index
    %c2_275 = arith.constant 2 : index
    %c0_276 = arith.constant 0 : index
    %c0_277 = arith.constant 0 : index
    %322 = vector.load %arg6[%c0_274, %c2_275, %c0_276, %c0_277] : memref<1x4x16x12xf32, #tpu.memory_space<vmem>>, vector<1x1x16x12xf32>
    %323 = vector.shape_cast %322 : vector<1x1x16x12xf32> to vector<16x12xf32>
    %324 = vector.broadcast %321 : f32 to vector<16x12xf32>
    %325 = arith.mulf %324, %323 : vector<16x12xf32>
    %326 = arith.addf %320, %325 : vector<16x12xf32>
    %c8_278 = arith.constant 8 : index
    %c3_279 = arith.constant 3 : index
    %327 = memref.load %arg1[%c8_278, %c3_279] : memref<10x4xf32, #tpu.memory_space<smem>>
    %c0_280 = arith.constant 0 : index
    %c3_281 = arith.constant 3 : index
    %c0_282 = arith.constant 0 : index
    %c0_283 = arith.constant 0 : index
    %328 = vector.load %arg6[%c0_280, %c3_281, %c0_282, %c0_283] : memref<1x4x16x12xf32, #tpu.memory_space<vmem>>, vector<1x1x16x12xf32>
    %329 = vector.shape_cast %328 : vector<1x1x16x12xf32> to vector<16x12xf32>
    %330 = vector.broadcast %327 : f32 to vector<16x12xf32>
    %331 = arith.mulf %330, %329 : vector<16x12xf32>
    %332 = arith.addf %326, %331 : vector<16x12xf32>
    %333 = vector.broadcast %1 : vector<16x1xf32> to vector<16x12xf32>
    %334 = arith.mulf %332, %333 : vector<16x12xf32>
    %c8_284 = arith.constant 8 : index
    %c0_285 = arith.constant 0 : index
    %c0_286 = arith.constant 0 : index
    %335 = vector.load %arg39[%c8_284, %c0_285, %c0_286] : memref<9x16x12xf32, #tpu.memory_space<vmem>>, vector<1x16x12xf32>
    %336 = vector.shape_cast %335 : vector<1x16x12xf32> to vector<16x12xf32>
    %337 = vector.shape_cast %334 : vector<16x12xf32> to vector<1x16x12xf32>
    tpu.vector_store %arg39[%c8_284, %c0_285, %c0_286], %337 {strides = array<i32>} : memref<9x16x12xf32, #tpu.memory_space<vmem>>, vector<1x16x12xf32>,
    %c0_i32 = arith.constant 0 : i32
    %c10_i32 = arith.constant 10 : i32
    %338 = arith.addi %c0_i32, %c10_i32 : i32
    %c1_i32 = arith.constant 1 : i32
    scf.for %arg40 = %c0_i32 to %338 step %c1_i32  : i32 {
      %c1_i32_301 = arith.constant 1 : i32
      %356 = arith.muli %arg40, %c1_i32_301 : i32
      %c0_i32_302 = arith.constant 0 : i32
      %357 = arith.addi %c0_i32_302, %356 : i32
      %358 = arith.index_cast %357 : i32 to index
      %359 = memref.load %arg3[%358] : memref<10xi32, #tpu.memory_space<smem>>
      %c1_i32_303 = arith.constant 1 : i32
      %360 = arith.cmpi eq, %359, %c1_i32_303 : i32
      %361 = arith.extui %360 : i1 to i32
      %c0_i32_304 = arith.constant 0 : i32
      %362 = arith.cmpi ne, %361, %c0_i32_304 : i32
      scf.if %362 {
        %468 = arith.index_cast %357 : i32 to index
        %469 = memref.load %arg4[%468] : memref<10xi32, #tpu.memory_space<smem>>
        %c0_360 = arith.constant 0 : index
        %c0_361 = arith.constant 0 : index
        %470 = vector.load %arg38[%c0_360, %c0_361] : memref<16x160xf32, #tpu.memory_space<vmem>>, vector<16x160xf32>
        %471 = vector.extract_strided_slice %470 {offsets = [0, 128], sizes = [16, 32], strides = [1, 1]} : vector<16x160xf32> to vector<16x32xf32>
        %472 = arith.index_cast %469 : i32 to index
        %c0_362 = arith.constant 0 : index
        %c0_363 = arith.constant 0 : index
        %473 = vector.load %arg39[%472, %c0_362, %c0_363] : memref<9x16x12xf32, #tpu.memory_space<vmem>>, vector<1x16x12xf32>
        %474 = vector.shape_cast %473 : vector<1x16x12xf32> to vector<16x12xf32>
        %475 = arith.index_cast %469 : i32 to index
        %c0_364 = arith.constant 0 : index
        %c0_365 = arith.constant 0 : index
        %476 = vector.load %arg16[%475, %c0_364, %c0_365] : memref<9x12x160xf32, #tpu.memory_space<vmem>>, vector<1x12x160xf32>
        %477 = vector.shape_cast %476 : vector<1x12x160xf32> to vector<12x160xf32>
        %cst_366 = arith.constant dense<0.000000e+00> : vector<16x160xf32>
        %478 = tpu.matmul %474, %477, %cst_366 {dimension_numbers = #tpu.dot_dimension_numbers<[1], [0], [0], [1], [0, 0, 1, 1], [], []>} : vector<16x12xf32>, vector<12x160xf32>, vector<16x160xf32> -> vector<16x160xf32>
        %479 = arith.index_cast %469 : i32 to index
        %c0_367 = arith.constant 0 : index
        %c0_368 = arith.constant 0 : index
        %480 = vector.load %arg17[%479, %c0_367, %c0_368] : memref<9x1x160xf32, #tpu.memory_space<vmem>>, vector<1x1x160xf32>
        %481 = vector.shape_cast %480 : vector<1x1x160xf32> to vector<1x160xf32>
        %482 = vector.broadcast %481 : vector<1x160xf32> to vector<16x160xf32>
        %483 = arith.addf %478, %482 : vector<16x160xf32>
        %cst_369 = arith.constant dense<0.000000e+00> : vector<160x160xf32>
        %484 = tpu.matmul %483, %470, %cst_369 {dimension_numbers = #tpu.dot_dimension_numbers<[0], [0], [1], [1], [0, 1, 1, 1], [], []>} : vector<16x160xf32>, vector<16x160xf32>, vector<160x160xf32> -> vector<160x160xf32>
        %cst_370 = arith.constant 6.250000e-02 : f32
        %485 = vector.broadcast %cst_370 : f32 to vector<160x160xf32>
        %486 = arith.mulf %484, %485 : vector<160x160xf32>
        %c0_371 = arith.constant 0 : index
        %c0_372 = arith.constant 0 : index
        %487 = vector.load %arg12[%c0_371, %c0_372] : memref<160x160xf32, #tpu.memory_space<vmem>>, vector<160x160xf32>
        %488 = arith.addf %486, %487 : vector<160x160xf32>
        %cst_373 = arith.constant dense<0xFF800000> : vector<160xf32>
        %489 = vector.multi_reduction <maximumf>, %488, %cst_373 [1] : vector<160x160xf32> to vector<160xf32>
        %490 = vector.shape_cast %489 : vector<160xf32> to vector<160x1xf32>
        %491 = vector.broadcast %490 : vector<160x1xf32> to vector<160x160xf32>
        %492 = arith.subf %488, %491 : vector<160x160xf32>
        %493 = math.exp %492 : vector<160x160xf32>
        %cst_374 = arith.constant dense<0.000000e+00> : vector<160xf32>
        %494 = vector.multi_reduction <add>, %493, %cst_374 [1] : vector<160x160xf32> to vector<160xf32>
        %495 = vector.shape_cast %494 : vector<160xf32> to vector<160x1xf32>
        %496 = tpu.reciprocal %495 {approx = true} : vector<160x1xf32> -> vector<160x1xf32>
        %497 = vector.broadcast %496 : vector<160x1xf32> to vector<160x160xf32>
        %498 = arith.mulf %493, %497 : vector<160x160xf32>
        %cst_375 = arith.constant dense<0.000000e+00> : vector<16x160xf32>
        %499 = tpu.matmul %470, %498, %cst_375 {dimension_numbers = #tpu.dot_dimension_numbers<[1], [1], [0], [0], [0, 0, 1, 0], [], []>} : vector<16x160xf32>, vector<160x160xf32>, vector<16x160xf32> -> vector<16x160xf32>
        %500 = arith.addf %499, %470 : vector<16x160xf32>
        %501 = arith.index_cast %469 : i32 to index
        %c0_376 = arith.constant 0 : index
        %c0_377 = arith.constant 0 : index
        %502 = vector.load %arg18[%501, %c0_376, %c0_377] : memref<9x160x160xf32, #tpu.memory_space<vmem>>, vector<1x160x160xf32>
        %503 = vector.shape_cast %502 : vector<1x160x160xf32> to vector<160x160xf32>
        %cst_378 = arith.constant dense<0.000000e+00> : vector<16x160xf32>
        %504 = tpu.matmul %500, %503, %cst_378 {dimension_numbers = #tpu.dot_dimension_numbers<[1], [0], [0], [1], [0, 0, 1, 1], [], []>} : vector<16x160xf32>, vector<160x160xf32>, vector<16x160xf32> -> vector<16x160xf32>
        %505 = arith.index_cast %469 : i32 to index
        %c0_379 = arith.constant 0 : index
        %c0_380 = arith.constant 0 : index
        %506 = vector.load %arg19[%505, %c0_379, %c0_380] : memref<9x1x160xf32, #tpu.memory_space<vmem>>, vector<1x1x160xf32>
        %507 = vector.shape_cast %506 : vector<1x1x160xf32> to vector<1x160xf32>
        %508 = vector.broadcast %507 : vector<1x160xf32> to vector<16x160xf32>
        %509 = arith.addf %504, %508 : vector<16x160xf32>
        %cst_381 = arith.constant 5.000000e-01 : f32
        %510 = vector.broadcast %cst_381 : f32 to vector<16x160xf32>
        %511 = arith.mulf %510, %509 : vector<16x160xf32>
        %cst_382 = arith.constant 0.707106769 : f32
        %512 = vector.broadcast %cst_382 : f32 to vector<16x160xf32>
        %513 = arith.mulf %509, %512 : vector<16x160xf32>
        %514 = math.absf %513 : vector<16x160xf32>
        %cst_383 = arith.constant 0.327591091 : f32
        %515 = vector.broadcast %cst_383 : f32 to vector<16x160xf32>
        %516 = arith.mulf %515, %514 : vector<16x160xf32>
        %cst_384 = arith.constant 1.000000e+00 : f32
        %517 = vector.broadcast %cst_384 : f32 to vector<16x160xf32>
        %518 = arith.addf %517, %516 : vector<16x160xf32>
        %cst_385 = arith.constant 1.000000e+00 : f32
        %519 = vector.broadcast %cst_385 : f32 to vector<16x160xf32>
        %520 = arith.divf %519, %518 : vector<16x160xf32>
        %cst_386 = arith.constant 1.06140542 : f32
        %521 = vector.broadcast %cst_386 : f32 to vector<16x160xf32>
        %522 = arith.mulf %521, %520 : vector<16x160xf32>
        %cst_387 = arith.constant -1.45315206 : f32
        %523 = vector.broadcast %cst_387 : f32 to vector<16x160xf32>
        %524 = arith.addf %522, %523 : vector<16x160xf32>
        %525 = arith.mulf %524, %520 : vector<16x160xf32>
        %cst_388 = arith.constant 1.42141378 : f32
        %526 = vector.broadcast %cst_388 : f32 to vector<16x160xf32>
        %527 = arith.addf %525, %526 : vector<16x160xf32>
        %528 = arith.mulf %527, %520 : vector<16x160xf32>
        %cst_389 = arith.constant -0.284496725 : f32
        %529 = vector.broadcast %cst_389 : f32 to vector<16x160xf32>
        %530 = arith.addf %528, %529 : vector<16x160xf32>
        %531 = arith.mulf %530, %520 : vector<16x160xf32>
        %cst_390 = arith.constant 0.254829586 : f32
        %532 = vector.broadcast %cst_390 : f32 to vector<16x160xf32>
        %533 = arith.addf %531, %532 : vector<16x160xf32>
        %534 = arith.mulf %533, %520 : vector<16x160xf32>
        %cst_391 = arith.constant 0.000000e+00 : f32
        %535 = vector.broadcast %cst_391 : f32 to vector<16x160xf32>
        %536 = arith.subf %535, %514 : vector<16x160xf32>
        %537 = arith.mulf %536, %514 : vector<16x160xf32>
        %538 = math.exp %537 : vector<16x160xf32>
        %539 = arith.mulf %534, %538 : vector<16x160xf32>
        %cst_392 = arith.constant 1.000000e+00 : f32
        %540 = vector.broadcast %cst_392 : f32 to vector<16x160xf32>
        %541 = arith.subf %540, %539 : vector<16x160xf32>
        %cst_393 = arith.constant 0.000000e+00 : f32
        %542 = vector.broadcast %cst_393 : f32 to vector<16x160xf32>
        %543 = arith.cmpf olt, %513, %542 : vector<16x160xf32>
        %cst_394 = arith.constant 0.000000e+00 : f32
        %544 = vector.broadcast %cst_394 : f32 to vector<16x160xf32>
        %545 = arith.subf %544, %541 : vector<16x160xf32>
        %546 = arith.select %543, %545, %541 : vector<16x160xi1>, vector<16x160xf32>
        %cst_395 = arith.constant 1.000000e+00 : f32
        %547 = vector.broadcast %cst_395 : f32 to vector<16x160xf32>
        %548 = arith.addf %547, %546 : vector<16x160xf32>
        %549 = arith.mulf %511, %548 : vector<16x160xf32>
        %550 = arith.index_cast %469 : i32 to index
        %c0_396 = arith.constant 0 : index
        %c0_397 = arith.constant 0 : index
        %551 = vector.load %arg20[%550, %c0_396, %c0_397] : memref<9x160x160xf32, #tpu.memory_space<vmem>>, vector<1x160x160xf32>
        %552 = vector.shape_cast %551 : vector<1x160x160xf32> to vector<160x160xf32>
        %cst_398 = arith.constant dense<0.000000e+00> : vector<16x160xf32>
        %553 = tpu.matmul %549, %552, %cst_398 {dimension_numbers = #tpu.dot_dimension_numbers<[1], [0], [0], [1], [0, 0, 1, 1], [], []>} : vector<16x160xf32>, vector<160x160xf32>, vector<16x160xf32> -> vector<16x160xf32>
        %554 = arith.index_cast %469 : i32 to index
        %c0_399 = arith.constant 0 : index
        %c0_400 = arith.constant 0 : index
        %555 = vector.load %arg21[%554, %c0_399, %c0_400] : memref<9x1x160xf32, #tpu.memory_space<vmem>>, vector<1x1x160xf32>
        %556 = vector.shape_cast %555 : vector<1x1x160xf32> to vector<1x160xf32>
        %557 = vector.broadcast %556 : vector<1x160xf32> to vector<16x160xf32>
        %558 = arith.addf %553, %557 : vector<16x160xf32>
        %559 = arith.addf %558, %470 : vector<16x160xf32>
        %560 = vector.broadcast %1 : vector<16x1xf32> to vector<16x160xf32>
        %561 = arith.mulf %559, %560 : vector<16x160xf32>
        %562 = vector.extract_strided_slice %561 {offsets = [0, 0], sizes = [16, 128], strides = [1, 1]} : vector<16x160xf32> to vector<16x128xf32>
        %cst_401 = arith.constant dense<0.000000e+00> : vector<128x32xf32>
        %563 = tpu.matmul %562, %471, %cst_401 {dimension_numbers = #tpu.dot_dimension_numbers<[0], [0], [1], [1], [0, 1, 1, 1], [], []>} : vector<16x128xf32>, vector<16x32xf32>, vector<128x32xf32> -> vector<128x32xf32>
        %cst_402 = arith.constant 6.250000e-02 : f32
        %564 = vector.broadcast %cst_402 : f32 to vector<128x32xf32>
        %565 = arith.mulf %563, %564 : vector<128x32xf32>
        %566 = vector.extract_strided_slice %565 {offsets = [0, 0], sizes = [32, 32], strides = [1, 1]} : vector<128x32xf32> to vector<32x32xf32>
        %cst_403 = arith.constant dense<0xFF800000> : vector<32xf32>
        %567 = vector.multi_reduction <maximumf>, %566, %cst_403 [0] : vector<32x32xf32> to vector<32xf32>
        %568 = vector.shape_cast %567 : vector<32xf32> to vector<1x32xf32>
        %569 = vector.broadcast %568 : vector<1x32xf32> to vector<32x32xf32>
        %570 = arith.subf %566, %569 : vector<32x32xf32>
        %571 = math.exp %570 : vector<32x32xf32>
        %cst_404 = arith.constant dense<0.000000e+00> : vector<32xf32>
        %572 = vector.multi_reduction <add>, %571, %cst_404 [0] : vector<32x32xf32> to vector<32xf32>
        %573 = vector.shape_cast %572 : vector<32xf32> to vector<1x32xf32>
        %574 = tpu.reciprocal %573 {approx = true} : vector<1x32xf32> -> vector<1x32xf32>
        %575 = vector.broadcast %574 : vector<1x32xf32> to vector<32x32xf32>
        %576 = arith.mulf %571, %575 : vector<32x32xf32>
        %577 = vector.extract_strided_slice %565 {offsets = [32, 0], sizes = [32, 32], strides = [1, 1]} : vector<128x32xf32> to vector<32x32xf32>
        %cst_405 = arith.constant dense<0xFF800000> : vector<32xf32>
        %578 = vector.multi_reduction <maximumf>, %577, %cst_405 [0] : vector<32x32xf32> to vector<32xf32>
        %579 = vector.shape_cast %578 : vector<32xf32> to vector<1x32xf32>
        %580 = vector.broadcast %579 : vector<1x32xf32> to vector<32x32xf32>
        %581 = arith.subf %577, %580 : vector<32x32xf32>
        %582 = math.exp %581 : vector<32x32xf32>
        %cst_406 = arith.constant dense<0.000000e+00> : vector<32xf32>
        %583 = vector.multi_reduction <add>, %582, %cst_406 [0] : vector<32x32xf32> to vector<32xf32>
        %584 = vector.shape_cast %583 : vector<32xf32> to vector<1x32xf32>
        %585 = tpu.reciprocal %584 {approx = true} : vector<1x32xf32> -> vector<1x32xf32>
        %586 = vector.broadcast %585 : vector<1x32xf32> to vector<32x32xf32>
        %587 = arith.mulf %582, %586 : vector<32x32xf32>
        %588 = vector.extract_strided_slice %565 {offsets = [64, 0], sizes = [32, 32], strides = [1, 1]} : vector<128x32xf32> to vector<32x32xf32>
        %cst_407 = arith.constant dense<0xFF800000> : vector<32xf32>
        %589 = vector.multi_reduction <maximumf>, %588, %cst_407 [0] : vector<32x32xf32> to vector<32xf32>
        %590 = vector.shape_cast %589 : vector<32xf32> to vector<1x32xf32>
        %591 = vector.broadcast %590 : vector<1x32xf32> to vector<32x32xf32>
        %592 = arith.subf %588, %591 : vector<32x32xf32>
        %593 = math.exp %592 : vector<32x32xf32>
        %cst_408 = arith.constant dense<0.000000e+00> : vector<32xf32>
        %594 = vector.multi_reduction <add>, %593, %cst_408 [0] : vector<32x32xf32> to vector<32xf32>
        %595 = vector.shape_cast %594 : vector<32xf32> to vector<1x32xf32>
        %596 = tpu.reciprocal %595 {approx = true} : vector<1x32xf32> -> vector<1x32xf32>
        %597 = vector.broadcast %596 : vector<1x32xf32> to vector<32x32xf32>
        %598 = arith.mulf %593, %597 : vector<32x32xf32>
        %599 = vector.extract_strided_slice %565 {offsets = [96, 0], sizes = [32, 32], strides = [1, 1]} : vector<128x32xf32> to vector<32x32xf32>
        %cst_409 = arith.constant dense<0xFF800000> : vector<32xf32>
        %600 = vector.multi_reduction <maximumf>, %599, %cst_409 [0] : vector<32x32xf32> to vector<32xf32>
        %601 = vector.shape_cast %600 : vector<32xf32> to vector<1x32xf32>
        %602 = vector.broadcast %601 : vector<1x32xf32> to vector<32x32xf32>
        %603 = arith.subf %599, %602 : vector<32x32xf32>
        %604 = math.exp %603 : vector<32x32xf32>
        %cst_410 = arith.constant dense<0.000000e+00> : vector<32xf32>
        %605 = vector.multi_reduction <add>, %604, %cst_410 [0] : vector<32x32xf32> to vector<32xf32>
        %606 = vector.shape_cast %605 : vector<32xf32> to vector<1x32xf32>
        %607 = tpu.reciprocal %606 {approx = true} : vector<1x32xf32> -> vector<1x32xf32>
        %608 = vector.broadcast %607 : vector<1x32xf32> to vector<32x32xf32>
        %609 = arith.mulf %604, %608 : vector<32x32xf32>
        %610 = tpu.concatenate %576, %587, %598, %609 in 0 : vector<32x32xf32>, vector<32x32xf32>, vector<32x32xf32>, vector<32x32xf32> -> vector<128x32xf32>
        %611 = tpu.concatenate %610, %610, %610, %610 in 1 : vector<128x32xf32>, vector<128x32xf32>, vector<128x32xf32>, vector<128x32xf32> -> vector<128x128xf32>
        %c0_411 = arith.constant 0 : index
        %c0_412 = arith.constant 0 : index
        %612 = vector.load %arg13[%c0_411, %c0_412] : memref<128x128xf32, #tpu.memory_space<vmem>>, vector<128x128xf32>
        %613 = arith.mulf %611, %612 : vector<128x128xf32>
        %cst_413 = arith.constant dense<0.000000e+00> : vector<16x128xf32>
        %614 = tpu.matmul %562, %613, %cst_413 {dimension_numbers = #tpu.dot_dimension_numbers<[1], [0], [0], [1], [0, 0, 1, 1], [], []>} : vector<16x128xf32>, vector<128x128xf32>, vector<16x128xf32> -> vector<16x128xf32>
        %615 = arith.addf %614, %562 : vector<16x128xf32>
        %616 = arith.index_cast %469 : i32 to index
        %c0_414 = arith.constant 0 : index
        %c0_415 = arith.constant 0 : index
        %617 = vector.load %arg22[%616, %c0_414, %c0_415] : memref<9x128x128xf32, #tpu.memory_space<vmem>>, vector<1x128x128xf32>
        %618 = vector.shape_cast %617 : vector<1x128x128xf32> to vector<128x128xf32>
        %cst_416 = arith.constant dense<0.000000e+00> : vector<16x128xf32>
        %619 = tpu.matmul %615, %618, %cst_416 {dimension_numbers = #tpu.dot_dimension_numbers<[1], [0], [0], [1], [0, 0, 1, 1], [], []>} : vector<16x128xf32>, vector<128x128xf32>, vector<16x128xf32> -> vector<16x128xf32>
        %620 = arith.index_cast %469 : i32 to index
        %c0_417 = arith.constant 0 : index
        %c0_418 = arith.constant 0 : index
        %621 = vector.load %arg23[%620, %c0_417, %c0_418] : memref<9x1x128xf32, #tpu.memory_space<vmem>>, vector<1x1x128xf32>
        %622 = vector.shape_cast %621 : vector<1x1x128xf32> to vector<1x128xf32>
        %623 = vector.broadcast %622 : vector<1x128xf32> to vector<16x128xf32>
        %624 = arith.addf %619, %623 : vector<16x128xf32>
        %cst_419 = arith.constant 5.000000e-01 : f32
        %625 = vector.broadcast %cst_419 : f32 to vector<16x128xf32>
        %626 = arith.mulf %625, %624 : vector<16x128xf32>
        %cst_420 = arith.constant 0.707106769 : f32
        %627 = vector.broadcast %cst_420 : f32 to vector<16x128xf32>
        %628 = arith.mulf %624, %627 : vector<16x128xf32>
        %629 = math.absf %628 : vector<16x128xf32>
        %cst_421 = arith.constant 0.327591091 : f32
        %630 = vector.broadcast %cst_421 : f32 to vector<16x128xf32>
        %631 = arith.mulf %630, %629 : vector<16x128xf32>
        %cst_422 = arith.constant 1.000000e+00 : f32
        %632 = vector.broadcast %cst_422 : f32 to vector<16x128xf32>
        %633 = arith.addf %632, %631 : vector<16x128xf32>
        %cst_423 = arith.constant 1.000000e+00 : f32
        %634 = vector.broadcast %cst_423 : f32 to vector<16x128xf32>
        %635 = arith.divf %634, %633 : vector<16x128xf32>
        %cst_424 = arith.constant 1.06140542 : f32
        %636 = vector.broadcast %cst_424 : f32 to vector<16x128xf32>
        %637 = arith.mulf %636, %635 : vector<16x128xf32>
        %cst_425 = arith.constant -1.45315206 : f32
        %638 = vector.broadcast %cst_425 : f32 to vector<16x128xf32>
        %639 = arith.addf %637, %638 : vector<16x128xf32>
        %640 = arith.mulf %639, %635 : vector<16x128xf32>
        %cst_426 = arith.constant 1.42141378 : f32
        %641 = vector.broadcast %cst_426 : f32 to vector<16x128xf32>
        %642 = arith.addf %640, %641 : vector<16x128xf32>
        %643 = arith.mulf %642, %635 : vector<16x128xf32>
        %cst_427 = arith.constant -0.284496725 : f32
        %644 = vector.broadcast %cst_427 : f32 to vector<16x128xf32>
        %645 = arith.addf %643, %644 : vector<16x128xf32>
        %646 = arith.mulf %645, %635 : vector<16x128xf32>
        %cst_428 = arith.constant 0.254829586 : f32
        %647 = vector.broadcast %cst_428 : f32 to vector<16x128xf32>
        %648 = arith.addf %646, %647 : vector<16x128xf32>
        %649 = arith.mulf %648, %635 : vector<16x128xf32>
        %cst_429 = arith.constant 0.000000e+00 : f32
        %650 = vector.broadcast %cst_429 : f32 to vector<16x128xf32>
        %651 = arith.subf %650, %629 : vector<16x128xf32>
        %652 = arith.mulf %651, %629 : vector<16x128xf32>
        %653 = math.exp %652 : vector<16x128xf32>
        %654 = arith.mulf %649, %653 : vector<16x128xf32>
        %cst_430 = arith.constant 1.000000e+00 : f32
        %655 = vector.broadcast %cst_430 : f32 to vector<16x128xf32>
        %656 = arith.subf %655, %654 : vector<16x128xf32>
        %cst_431 = arith.constant 0.000000e+00 : f32
        %657 = vector.broadcast %cst_431 : f32 to vector<16x128xf32>
        %658 = arith.cmpf olt, %628, %657 : vector<16x128xf32>
        %cst_432 = arith.constant 0.000000e+00 : f32
        %659 = vector.broadcast %cst_432 : f32 to vector<16x128xf32>
        %660 = arith.subf %659, %656 : vector<16x128xf32>
        %661 = arith.select %658, %660, %656 : vector<16x128xi1>, vector<16x128xf32>
        %cst_433 = arith.constant 1.000000e+00 : f32
        %662 = vector.broadcast %cst_433 : f32 to vector<16x128xf32>
        %663 = arith.addf %662, %661 : vector<16x128xf32>
        %664 = arith.mulf %626, %663 : vector<16x128xf32>
        %665 = arith.index_cast %469 : i32 to index
        %c0_434 = arith.constant 0 : index
        %c0_435 = arith.constant 0 : index
        %666 = vector.load %arg24[%665, %c0_434, %c0_435] : memref<9x128x128xf32, #tpu.memory_space<vmem>>, vector<1x128x128xf32>
        %667 = vector.shape_cast %666 : vector<1x128x128xf32> to vector<128x128xf32>
        %cst_436 = arith.constant dense<0.000000e+00> : vector<16x128xf32>
        %668 = tpu.matmul %664, %667, %cst_436 {dimension_numbers = #tpu.dot_dimension_numbers<[1], [0], [0], [1], [0, 0, 1, 1], [], []>} : vector<16x128xf32>, vector<128x128xf32>, vector<16x128xf32> -> vector<16x128xf32>
        %669 = arith.index_cast %469 : i32 to index
        %c0_437 = arith.constant 0 : index
        %c0_438 = arith.constant 0 : index
        %670 = vector.load %arg25[%669, %c0_437, %c0_438] : memref<9x1x128xf32, #tpu.memory_space<vmem>>, vector<1x1x128xf32>
        %671 = vector.shape_cast %670 : vector<1x1x128xf32> to vector<1x128xf32>
        %672 = vector.broadcast %671 : vector<1x128xf32> to vector<16x128xf32>
        %673 = arith.addf %668, %672 : vector<16x128xf32>
        %674 = arith.addf %673, %562 : vector<16x128xf32>
        %675 = vector.broadcast %1 : vector<16x1xf32> to vector<16x128xf32>
        %676 = arith.mulf %674, %675 : vector<16x128xf32>
        %c0_439 = arith.constant 0 : index
        %c0_440 = arith.constant 0 : index
        %677 = vector.load %arg38[%c0_439, %c0_440] : memref<16x160xf32, #tpu.memory_space<vmem>>, vector<16x128xf32>
        tpu.vector_store %arg38[%c0_439, %c0_440], %676 {strides = array<i32>} : memref<16x160xf32, #tpu.memory_space<vmem>>, vector<16x128xf32>,
        %678 = vector.extract_strided_slice %561 {offsets = [0, 128], sizes = [16, 32], strides = [1, 1]} : vector<16x160xf32> to vector<16x32xf32>
        %c0_441 = arith.constant 0 : index
        %c128 = arith.constant 128 : index
        %679 = vector.load %arg38[%c0_441, %c128] : memref<16x160xf32, #tpu.memory_space<vmem>>, vector<16x32xf32>
        tpu.vector_store %arg38[%c0_441, %c128], %678 {strides = array<i32>} : memref<16x160xf32, #tpu.memory_space<vmem>>, vector<16x32xf32>,
      } else {
      }
      %c0_305 = arith.constant 0 : index
      %c0_306 = arith.constant 0 : index
      %363 = vector.load %arg38[%c0_305, %c0_306] : memref<16x160xf32, #tpu.memory_space<vmem>>, vector<16x160xf32>
      %364 = arith.index_cast %357 : i32 to index
      %c0_307 = arith.constant 0 : index
      %c0_308 = arith.constant 0 : index
      %365 = vector.load %arg8[%364, %c0_307, %c0_308] : memref<10x32x16xf32, #tpu.memory_space<vmem>>, vector<1x32x16xf32>
      %366 = vector.shape_cast %365 : vector<1x32x16xf32> to vector<32x16xf32>
      %cst_309 = arith.constant dense<0.000000e+00> : vector<32x160xf32>
      %367 = tpu.matmul %366, %363, %cst_309 {dimension_numbers = #tpu.dot_dimension_numbers<[1], [0], [0], [1], [0, 0, 1, 1], [], []>} : vector<32x16xf32>, vector<16x160xf32>, vector<32x160xf32> -> vector<32x160xf32>
      %368 = vector.extract_strided_slice %367 {offsets = [0, 0], sizes = [16, 160], strides = [1, 1]} : vector<32x160xf32> to vector<16x160xf32>
      %369 = vector.extract_strided_slice %367 {offsets = [16, 0], sizes = [16, 160], strides = [1, 1]} : vector<32x160xf32> to vector<16x160xf32>
      %370 = arith.index_cast %357 : i32 to index
      %c0_310 = arith.constant 0 : index
      %c0_311 = arith.constant 0 : index
      %c0_312 = arith.constant 0 : index
      %371 = vector.load %arg26[%370, %c0_310, %c0_311, %c0_312] : memref<10x3x160x160xf32, #tpu.memory_space<vmem>>, vector<1x1x160x160xf32>
      %372 = vector.shape_cast %371 : vector<1x1x160x160xf32> to vector<160x160xf32>
      %cst_313 = arith.constant dense<0.000000e+00> : vector<16x160xf32>
      %373 = tpu.matmul %368, %372, %cst_313 {dimension_numbers = #tpu.dot_dimension_numbers<[1], [0], [0], [1], [0, 0, 1, 1], [], []>} : vector<16x160xf32>, vector<160x160xf32>, vector<16x160xf32> -> vector<16x160xf32>
      %374 = arith.index_cast %357 : i32 to index
      %c1_314 = arith.constant 1 : index
      %c0_315 = arith.constant 0 : index
      %c0_316 = arith.constant 0 : index
      %375 = vector.load %arg26[%374, %c1_314, %c0_315, %c0_316] : memref<10x3x160x160xf32, #tpu.memory_space<vmem>>, vector<1x1x160x160xf32>
      %376 = vector.shape_cast %375 : vector<1x1x160x160xf32> to vector<160x160xf32>
      %cst_317 = arith.constant dense<0.000000e+00> : vector<16x160xf32>
      %377 = tpu.matmul %363, %376, %cst_317 {dimension_numbers = #tpu.dot_dimension_numbers<[1], [0], [0], [1], [0, 0, 1, 1], [], []>} : vector<16x160xf32>, vector<160x160xf32>, vector<16x160xf32> -> vector<16x160xf32>
      %378 = arith.addf %373, %377 : vector<16x160xf32>
      %379 = arith.index_cast %357 : i32 to index
      %c2_318 = arith.constant 2 : index
      %c0_319 = arith.constant 0 : index
      %c0_320 = arith.constant 0 : index
      %380 = vector.load %arg26[%379, %c2_318, %c0_319, %c0_320] : memref<10x3x160x160xf32, #tpu.memory_space<vmem>>, vector<1x1x160x160xf32>
      %381 = vector.shape_cast %380 : vector<1x1x160x160xf32> to vector<160x160xf32>
      %cst_321 = arith.constant dense<0.000000e+00> : vector<16x160xf32>
      %382 = tpu.matmul %369, %381, %cst_321 {dimension_numbers = #tpu.dot_dimension_numbers<[1], [0], [0], [1], [0, 0, 1, 1], [], []>} : vector<16x160xf32>, vector<160x160xf32>, vector<16x160xf32> -> vector<16x160xf32>
      %383 = arith.addf %378, %382 : vector<16x160xf32>
      %384 = arith.index_cast %357 : i32 to index
      %c0_322 = arith.constant 0 : index
      %c0_323 = arith.constant 0 : index
      %385 = vector.load %arg27[%384, %c0_322, %c0_323] : memref<10x1x160xf32, #tpu.memory_space<vmem>>, vector<1x1x160xf32>
      %386 = vector.shape_cast %385 : vector<1x1x160xf32> to vector<1x160xf32>
      %387 = vector.broadcast %386 : vector<1x160xf32> to vector<16x160xf32>
      %388 = arith.addf %383, %387 : vector<16x160xf32>
      %cst_324 = arith.constant 0.000000e+00 : f32
      %389 = vector.broadcast %cst_324 : f32 to vector<16x160xf32>
      %390 = arith.maximumf %388, %389 : vector<16x160xf32>
      %cst_325 = arith.constant dense<0.000000e+00> : vector<160xf32>
      %391 = vector.multi_reduction <add>, %390, %cst_325 [0] : vector<16x160xf32> to vector<160xf32>
      %392 = vector.shape_cast %391 : vector<160xf32> to vector<1x160xf32>
      %cst_326 = arith.constant 1.600000e+01 : f32
      %393 = vector.broadcast %cst_326 : f32 to vector<1x160xf32>
      %394 = arith.divf %392, %393 : vector<1x160xf32>
      %395 = vector.broadcast %394 : vector<1x160xf32> to vector<16x160xf32>
      %396 = arith.subf %390, %395 : vector<16x160xf32>
      %397 = arith.mulf %396, %396 : vector<16x160xf32>
      %cst_327 = arith.constant dense<0.000000e+00> : vector<160xf32>
      %398 = vector.multi_reduction <add>, %397, %cst_327 [0] : vector<16x160xf32> to vector<160xf32>
      %399 = vector.shape_cast %398 : vector<160xf32> to vector<1x160xf32>
      %cst_328 = arith.constant 1.600000e+01 : f32
      %400 = vector.broadcast %cst_328 : f32 to vector<1x160xf32>
      %401 = arith.divf %399, %400 : vector<1x160xf32>
      %cst_329 = arith.constant 9.99999974E-6 : f32
      %402 = vector.broadcast %cst_329 : f32 to vector<1x160xf32>
      %403 = arith.addf %401, %402 : vector<1x160xf32>
      %404 = math.rsqrt %403 : vector<1x160xf32>
      %405 = vector.broadcast %404 : vector<1x160xf32> to vector<16x160xf32>
      %406 = arith.mulf %396, %405 : vector<16x160xf32>
      %407 = arith.index_cast %357 : i32 to index
      %c0_330 = arith.constant 0 : index
      %c0_331 = arith.constant 0 : index
      %408 = vector.load %arg28[%407, %c0_330, %c0_331] : memref<10x160x480xf32, #tpu.memory_space<vmem>>, vector<1x160x480xf32>
      %409 = vector.shape_cast %408 : vector<1x160x480xf32> to vector<160x480xf32>
      %cst_332 = arith.constant dense<0.000000e+00> : vector<16x480xf32>
      %410 = tpu.matmul %406, %409, %cst_332 {dimension_numbers = #tpu.dot_dimension_numbers<[1], [0], [0], [1], [0, 0, 1, 1], [], []>} : vector<16x160xf32>, vector<160x480xf32>, vector<16x480xf32> -> vector<16x480xf32>
      %411 = arith.index_cast %357 : i32 to index
      %c0_333 = arith.constant 0 : index
      %c0_334 = arith.constant 0 : index
      %412 = vector.load %arg29[%411, %c0_333, %c0_334] : memref<10x1x480xf32, #tpu.memory_space<vmem>>, vector<1x1x480xf32>
      %413 = vector.shape_cast %412 : vector<1x1x480xf32> to vector<1x480xf32>
      %414 = vector.broadcast %413 : vector<1x480xf32> to vector<16x480xf32>
      %415 = arith.addf %410, %414 : vector<16x480xf32>
      %416 = vector.extract_strided_slice %415 {offsets = [0, 0], sizes = [16, 320], strides = [1, 1]} : vector<16x480xf32> to vector<16x320xf32>
      %417 = arith.negf %416 : vector<16x320xf32>
      %418 = math.exp %417 : vector<16x320xf32>
      %cst_335 = arith.constant 1.000000e+00 : f32
      %419 = vector.broadcast %cst_335 : f32 to vector<16x320xf32>
      %420 = arith.addf %419, %418 : vector<16x320xf32>
      %421 = arith.divf %419, %420 : vector<16x320xf32>
      %422 = vector.extract_strided_slice %421 {offsets = [0, 0], sizes = [16, 160], strides = [1, 1]} : vector<16x320xf32> to vector<16x160xf32>
      %423 = vector.extract_strided_slice %421 {offsets = [0, 160], sizes = [16, 160], strides = [1, 1]} : vector<16x320xf32> to vector<16x160xf32>
      %424 = vector.extract_strided_slice %415 {offsets = [0, 320], sizes = [16, 160], strides = [1, 1]} : vector<16x480xf32> to vector<16x160xf32>
      %cst_336 = arith.constant dense<0.000000e+00> : vector<160x160xf32>
      %425 = tpu.matmul %423, %424, %cst_336 {dimension_numbers = #tpu.dot_dimension_numbers<[0], [0], [1], [1], [0, 1, 1, 1], [], []>} : vector<16x160xf32>, vector<16x160xf32>, vector<160x160xf32> -> vector<160x160xf32>
      %c0_337 = arith.constant 0 : index
      %c0_338 = arith.constant 0 : index
      %426 = vector.load %arg9[%c0_337, %c0_338] : memref<160x160xf32, #tpu.memory_space<vmem>>, vector<160x160xf32>
      %427 = arith.mulf %425, %426 : vector<160x160xf32>
      %cst_339 = arith.constant dense<0.000000e+00> : vector<160xf32>
      %428 = vector.multi_reduction <add>, %423, %cst_339 [0] : vector<16x160xf32> to vector<160xf32>
      %429 = vector.shape_cast %428 : vector<160xf32> to vector<1x160xf32>
      %cst_340 = arith.constant 9.99999997E-7 : f32
      %430 = vector.broadcast %cst_340 : f32 to vector<1x160xf32>
      %431 = arith.addf %429, %430 : vector<1x160xf32>
      %432 = vector.broadcast %431 : vector<1x160xf32> to vector<16x160xf32>
      %433 = arith.mulf %422, %432 : vector<16x160xf32>
      %c0_341 = arith.constant 0 : index
      %c0_342 = arith.constant 0 : index
      %434 = vector.load %arg11[%c0_341, %c0_342] : memref<160x20xf32, #tpu.memory_space<vmem>>, vector<160x20xf32>
      %cst_343 = arith.constant dense<0.000000e+00> : vector<16x20xf32>
      %435 = tpu.matmul %433, %434, %cst_343 {dimension_numbers = #tpu.dot_dimension_numbers<[1], [0], [0], [1], [0, 0, 1, 1], [], []>} : vector<16x160xf32>, vector<160x20xf32>, vector<16x20xf32> -> vector<16x20xf32>
      %436 = tpu.reciprocal %435 {approx = true} : vector<16x20xf32> -> vector<16x20xf32>
      %cst_344 = arith.constant dense<0.000000e+00> : vector<16x160xf32>
      %437 = tpu.matmul %422, %427, %cst_344 {dimension_numbers = #tpu.dot_dimension_numbers<[1], [0], [0], [1], [0, 0, 1, 1], [], []>} : vector<16x160xf32>, vector<160x160xf32>, vector<16x160xf32> -> vector<16x160xf32>
      %c0_345 = arith.constant 0 : index
      %c0_346 = arith.constant 0 : index
      %438 = vector.load %arg10[%c0_345, %c0_346] : memref<20x160xf32, #tpu.memory_space<vmem>>, vector<20x160xf32>
      %cst_347 = arith.constant dense<0.000000e+00> : vector<16x160xf32>
      %439 = tpu.matmul %436, %438, %cst_347 {dimension_numbers = #tpu.dot_dimension_numbers<[1], [0], [0], [1], [0, 0, 1, 1], [], []>} : vector<16x20xf32>, vector<20x160xf32>, vector<16x160xf32> -> vector<16x160xf32>
      %440 = arith.mulf %437, %439 : vector<16x160xf32>
      %441 = arith.index_cast %357 : i32 to index
      %c0_348 = arith.constant 0 : index
      %c0_349 = arith.constant 0 : index
      %442 = vector.load %arg30[%441, %c0_348, %c0_349] : memref<10x160x160xf32, #tpu.memory_space<vmem>>, vector<1x160x160xf32>
      %443 = vector.shape_cast %442 : vector<1x160x160xf32> to vector<160x160xf32>
      %cst_350 = arith.constant dense<0.000000e+00> : vector<16x160xf32>
      %444 = tpu.matmul %440, %443, %cst_350 {dimension_numbers = #tpu.dot_dimension_numbers<[1], [0], [0], [1], [0, 0, 1, 1], [], []>} : vector<16x160xf32>, vector<160x160xf32>, vector<16x160xf32> -> vector<16x160xf32>
      %445 = arith.index_cast %357 : i32 to index
      %c0_351 = arith.constant 0 : index
      %c0_352 = arith.constant 0 : index
      %446 = vector.load %arg31[%445, %c0_351, %c0_352] : memref<10x1x160xf32, #tpu.memory_space<vmem>>, vector<1x1x160xf32>
      %447 = vector.shape_cast %446 : vector<1x1x160xf32> to vector<1x160xf32>
      %448 = vector.broadcast %447 : vector<1x160xf32> to vector<16x160xf32>
      %449 = arith.addf %444, %448 : vector<16x160xf32>
      %450 = vector.broadcast %1 : vector<16x1xf32> to vector<16x160xf32>
      %451 = arith.mulf %449, %450 : vector<16x160xf32>
      %452 = vector.broadcast %2 : f32 to vector<16x160xf32>
      %453 = arith.mulf %452, %451 : vector<16x160xf32>
      %454 = arith.addf %453, %390 : vector<16x160xf32>
      %455 = arith.index_cast %357 : i32 to index
      %c0_353 = arith.constant 0 : index
      %c0_354 = arith.constant 0 : index
      %456 = vector.load %arg32[%455, %c0_353, %c0_354] : memref<10x160x160xf32, #tpu.memory_space<vmem>>, vector<1x160x160xf32>
      %457 = vector.shape_cast %456 : vector<1x160x160xf32> to vector<160x160xf32>
      %cst_355 = arith.constant dense<0.000000e+00> : vector<16x160xf32>
      %458 = tpu.matmul %454, %457, %cst_355 {dimension_numbers = #tpu.dot_dimension_numbers<[1], [0], [0], [1], [0, 0, 1, 1], [], []>} : vector<16x160xf32>, vector<160x160xf32>, vector<16x160xf32> -> vector<16x160xf32>
      %459 = arith.index_cast %357 : i32 to index
      %c0_356 = arith.constant 0 : index
      %c0_357 = arith.constant 0 : index
      %460 = vector.load %arg33[%459, %c0_356, %c0_357] : memref<10x1x160xf32, #tpu.memory_space<vmem>>, vector<1x1x160xf32>
      %461 = vector.shape_cast %460 : vector<1x1x160xf32> to vector<1x160xf32>
      %462 = vector.broadcast %461 : vector<1x160xf32> to vector<16x160xf32>
      %463 = arith.addf %458, %462 : vector<16x160xf32>
      %464 = arith.addf %363, %463 : vector<16x160xf32>
      %465 = vector.broadcast %1 : vector<16x1xf32> to vector<16x160xf32>
      %466 = arith.mulf %464, %465 : vector<16x160xf32>
      %c0_358 = arith.constant 0 : index
      %c0_359 = arith.constant 0 : index
      %467 = vector.load %arg38[%c0_358, %c0_359] : memref<16x160xf32, #tpu.memory_space<vmem>>, vector<16x160xf32>
      tpu.vector_store %arg38[%c0_358, %c0_359], %466 {strides = array<i32>} : memref<16x160xf32, #tpu.memory_space<vmem>>, vector<16x160xf32>,
    }
    %c10_i32_287 = arith.constant 10 : i32
    %c0_288 = arith.constant 0 : index
    %c0_289 = arith.constant 0 : index
    %339 = vector.load %arg38[%c0_288, %c0_289] : memref<16x160xf32, #tpu.memory_space<vmem>>, vector<16x160xf32>
    %340 = vector.broadcast %1 : vector<16x1xf32> to vector<16x160xf32>
    %341 = arith.mulf %339, %340 : vector<16x160xf32>
    %c0_290 = arith.constant 0 : index
    %c0_291 = arith.constant 0 : index
    %342 = vector.load %arg34[%c0_290, %c0_291] : memref<160x8xf32, #tpu.memory_space<vmem>>, vector<160x8xf32>
    %cst_292 = arith.constant dense<0.000000e+00> : vector<16x8xf32>
    %343 = tpu.matmul %341, %342, %cst_292 {dimension_numbers = #tpu.dot_dimension_numbers<[1], [0], [0], [1], [0, 0, 1, 1], [], []>} : vector<16x160xf32>, vector<160x8xf32>, vector<16x8xf32> -> vector<16x8xf32>
    %c0_293 = arith.constant 0 : index
    %c0_294 = arith.constant 0 : index
    %344 = vector.load %arg35[%c0_293, %c0_294] : memref<1x8xf32, #tpu.memory_space<vmem>>, vector<1x8xf32>
    %345 = vector.broadcast %344 : vector<1x8xf32> to vector<16x8xf32>
    %346 = arith.addf %343, %345 : vector<16x8xf32>
    %347 = vector.broadcast %1 : vector<16x1xf32> to vector<16x8xf32>
    %348 = arith.mulf %346, %347 : vector<16x8xf32>
    %c0_295 = arith.constant 0 : index
    %c0_296 = arith.constant 0 : index
    %c0_297 = arith.constant 0 : index
    %349 = vector.load %arg37[%c0_295, %c0_296, %c0_297] : memref<1x16x8xf32, #tpu.memory_space<vmem>>, vector<1x16x8xf32>
    %350 = vector.shape_cast %349 : vector<1x16x8xf32> to vector<16x8xf32>
    %351 = vector.shape_cast %348 : vector<16x8xf32> to vector<1x16x8xf32>
    tpu.vector_store %arg37[%c0_295, %c0_296, %c0_297], %351 {strides = array<i32>} : memref<1x16x8xf32, #tpu.memory_space<vmem>>, vector<1x16x8xf32>,
    %352 = vector.extract_strided_slice %339 {offsets = [0, 0], sizes = [16, 128], strides = [1, 1]} : vector<16x160xf32> to vector<16x128xf32>
    %c0_298 = arith.constant 0 : index
    %c0_299 = arith.constant 0 : index
    %c0_300 = arith.constant 0 : index
    %353 = vector.load %arg36[%c0_298, %c0_299, %c0_300] : memref<1x16x128xf32, #tpu.memory_space<vmem>>, vector<1x16x128xf32>
    %354 = vector.shape_cast %353 : vector<1x16x128xf32> to vector<16x128xf32>
    %355 = vector.shape_cast %352 : vector<16x128xf32> to vector<1x16x128xf32>
    tpu.vector_store %arg36[%c0_298, %c0_299, %c0_300], %355 {strides = array<i32>} : memref<1x16x128xf32, #tpu.memory_space<vmem>>, vector<1x16x128xf32>,
    return
  }
  func.func @transform_0(%arg0: i32) -> (i32, i32) {
    %c0_i32 = arith.constant 0 : i32
    %c0_i32_0 = arith.constant 0 : i32
    %c0_i32_1 = arith.constant 0 : i32
    return %c0_i32, %c0_i32_0 : i32, i32
  }
  func.func @transform_1(%arg0: i32) -> i32 {
    %c0_i32 = arith.constant 0 : i32
    %c0_i32_0 = arith.constant 0 : i32
    return %c0_i32 : i32
  }
  func.func @transform_2(%arg0: i32) -> i32 {
    %c0_i32 = arith.constant 0 : i32
    %c0_i32_0 = arith.constant 0 : i32
    return %c0_i32 : i32
  }
  func.func @transform_3(%arg0: i32) -> i32 {
    %c0_i32 = arith.constant 0 : i32
    %c0_i32_0 = arith.constant 0 : i32
    return %c0_i32 : i32
  }
  func.func @transform_4(%arg0: i32) -> i32 {
    %c0_i32 = arith.constant 0 : i32
    %c0_i32_0 = arith.constant 0 : i32
    return %c0_i32 : i32
  }
  func.func @transform_5(%arg0: i32) -> (i32, i32, i32, i32) {
    %c0_i32 = arith.constant 0 : i32
    %c0_i32_0 = arith.constant 0 : i32
    %c0_i32_1 = arith.constant 0 : i32
    %c0_i32_2 = arith.constant 0 : i32
    return %arg0, %c0_i32, %c0_i32_0, %c0_i32_1 : i32, i32, i32, i32
  }
  func.func @transform_6(%arg0: i32) -> (i32, i32, i32) {
    %c0_i32 = arith.constant 0 : i32
    %c0_i32_0 = arith.constant 0 : i32
    %c0_i32_1 = arith.constant 0 : i32
    return %arg0, %c0_i32, %c0_i32_0 : i32, i32, i32
  }
  func.func @transform_7(%arg0: i32) -> (i32, i32, i32) {
    %c0_i32 = arith.constant 0 : i32
    %c0_i32_0 = arith.constant 0 : i32
    %c0_i32_1 = arith.constant 0 : i32
    %c0_i32_2 = arith.constant 0 : i32
    return %c0_i32, %c0_i32_0, %c0_i32_1 : i32, i32, i32
  }
  func.func @transform_8(%arg0: i32) -> (i32, i32) {
    %c0_i32 = arith.constant 0 : i32
    %c0_i32_0 = arith.constant 0 : i32
    %c0_i32_1 = arith.constant 0 : i32
    return %c0_i32, %c0_i32_0 : i32, i32
  }
  func.func @transform_9(%arg0: i32) -> (i32, i32) {
    %c0_i32 = arith.constant 0 : i32
    %c0_i32_0 = arith.constant 0 : i32
    %c0_i32_1 = arith.constant 0 : i32
    return %c0_i32, %c0_i32_0 : i32, i32
  }
  func.func @transform_10(%arg0: i32) -> (i32, i32) {
    %c0_i32 = arith.constant 0 : i32
    %c0_i32_0 = arith.constant 0 : i32
    %c0_i32_1 = arith.constant 0 : i32
    return %c0_i32, %c0_i32_0 : i32, i32
  }
  func.func @transform_11(%arg0: i32) -> (i32, i32) {
    %c0_i32 = arith.constant 0 : i32
    %c0_i32_0 = arith.constant 0 : i32
    %c0_i32_1 = arith.constant 0 : i32
    return %c0_i32, %c0_i32_0 : i32, i32
  }
  func.func @transform_12(%arg0: i32) -> (i32, i32) {
    %c0_i32 = arith.constant 0 : i32
    %c0_i32_0 = arith.constant 0 : i32
    %c0_i32_1 = arith.constant 0 : i32
    return %c0_i32, %c0_i32_0 : i32, i32
  }
  func.func @transform_13(%arg0: i32) -> (i32, i32) {
    %c0_i32 = arith.constant 0 : i32
    %c0_i32_0 = arith.constant 0 : i32
    %c0_i32_1 = arith.constant 0 : i32
    return %c0_i32, %c0_i32_0 : i32, i32
  }
  func.func @transform_14(%arg0: i32) -> (i32, i32) {
    %c0_i32 = arith.constant 0 : i32
    %c0_i32_0 = arith.constant 0 : i32
    %c0_i32_1 = arith.constant 0 : i32
    return %c0_i32, %c0_i32_0 : i32, i32
  }
  func.func @transform_15(%arg0: i32) -> (i32, i32, i32) {
    %c0_i32 = arith.constant 0 : i32
    %c0_i32_0 = arith.constant 0 : i32
    %c0_i32_1 = arith.constant 0 : i32
    %c0_i32_2 = arith.constant 0 : i32
    return %c0_i32, %c0_i32_0, %c0_i32_1 : i32, i32, i32
  }
  func.func @transform_16(%arg0: i32) -> (i32, i32, i32) {
    %c0_i32 = arith.constant 0 : i32
    %c0_i32_0 = arith.constant 0 : i32
    %c0_i32_1 = arith.constant 0 : i32
    %c0_i32_2 = arith.constant 0 : i32
    return %c0_i32, %c0_i32_0, %c0_i32_1 : i32, i32, i32
  }
  func.func @transform_17(%arg0: i32) -> (i32, i32, i32) {
    %c0_i32 = arith.constant 0 : i32
    %c0_i32_0 = arith.constant 0 : i32
    %c0_i32_1 = arith.constant 0 : i32
    %c0_i32_2 = arith.constant 0 : i32
    return %c0_i32, %c0_i32_0, %c0_i32_1 : i32, i32, i32
  }
  func.func @transform_18(%arg0: i32) -> (i32, i32, i32) {
    %c0_i32 = arith.constant 0 : i32
    %c0_i32_0 = arith.constant 0 : i32
    %c0_i32_1 = arith.constant 0 : i32
    %c0_i32_2 = arith.constant 0 : i32
    return %c0_i32, %c0_i32_0, %c0_i32_1 : i32, i32, i32
  }
  func.func @transform_19(%arg0: i32) -> (i32, i32, i32) {
    %c0_i32 = arith.constant 0 : i32
    %c0_i32_0 = arith.constant 0 : i32
    %c0_i32_1 = arith.constant 0 : i32
    %c0_i32_2 = arith.constant 0 : i32
    return %c0_i32, %c0_i32_0, %c0_i32_1 : i32, i32, i32
  }
  func.func @transform_20(%arg0: i32) -> (i32, i32, i32) {
    %c0_i32 = arith.constant 0 : i32
    %c0_i32_0 = arith.constant 0 : i32
    %c0_i32_1 = arith.constant 0 : i32
    %c0_i32_2 = arith.constant 0 : i32
    return %c0_i32, %c0_i32_0, %c0_i32_1 : i32, i32, i32
  }
  func.func @transform_21(%arg0: i32) -> (i32, i32, i32) {
    %c0_i32 = arith.constant 0 : i32
    %c0_i32_0 = arith.constant 0 : i32
    %c0_i32_1 = arith.constant 0 : i32
    %c0_i32_2 = arith.constant 0 : i32
    return %c0_i32, %c0_i32_0, %c0_i32_1 : i32, i32, i32
  }
  func.func @transform_22(%arg0: i32) -> (i32, i32, i32) {
    %c0_i32 = arith.constant 0 : i32
    %c0_i32_0 = arith.constant 0 : i32
    %c0_i32_1 = arith.constant 0 : i32
    %c0_i32_2 = arith.constant 0 : i32
    return %c0_i32, %c0_i32_0, %c0_i32_1 : i32, i32, i32
  }
  func.func @transform_23(%arg0: i32) -> (i32, i32, i32) {
    %c0_i32 = arith.constant 0 : i32
    %c0_i32_0 = arith.constant 0 : i32
    %c0_i32_1 = arith.constant 0 : i32
    %c0_i32_2 = arith.constant 0 : i32
    return %c0_i32, %c0_i32_0, %c0_i32_1 : i32, i32, i32
  }
  func.func @transform_24(%arg0: i32) -> (i32, i32, i32) {
    %c0_i32 = arith.constant 0 : i32
    %c0_i32_0 = arith.constant 0 : i32
    %c0_i32_1 = arith.constant 0 : i32
    %c0_i32_2 = arith.constant 0 : i32
    return %c0_i32, %c0_i32_0, %c0_i32_1 : i32, i32, i32
  }
  func.func @transform_25(%arg0: i32) -> (i32, i32, i32, i32) {
    %c0_i32 = arith.constant 0 : i32
    %c0_i32_0 = arith.constant 0 : i32
    %c0_i32_1 = arith.constant 0 : i32
    %c0_i32_2 = arith.constant 0 : i32
    %c0_i32_3 = arith.constant 0 : i32
    return %c0_i32, %c0_i32_0, %c0_i32_1, %c0_i32_2 : i32, i32, i32, i32
  }
  func.func @transform_26(%arg0: i32) -> (i32, i32, i32) {
    %c0_i32 = arith.constant 0 : i32
    %c0_i32_0 = arith.constant 0 : i32
    %c0_i32_1 = arith.constant 0 : i32
    %c0_i32_2 = arith.constant 0 : i32
    return %c0_i32, %c0_i32_0, %c0_i32_1 : i32, i32, i32
  }
  func.func @transform_27(%arg0: i32) -> (i32, i32, i32) {
    %c0_i32 = arith.constant 0 : i32
    %c0_i32_0 = arith.constant 0 : i32
    %c0_i32_1 = arith.constant 0 : i32
    %c0_i32_2 = arith.constant 0 : i32
    return %c0_i32, %c0_i32_0, %c0_i32_1 : i32, i32, i32
  }
  func.func @transform_28(%arg0: i32) -> (i32, i32, i32) {
    %c0_i32 = arith.constant 0 : i32
    %c0_i32_0 = arith.constant 0 : i32
    %c0_i32_1 = arith.constant 0 : i32
    %c0_i32_2 = arith.constant 0 : i32
    return %c0_i32, %c0_i32_0, %c0_i32_1 : i32, i32, i32
  }
  func.func @transform_29(%arg0: i32) -> (i32, i32, i32) {
    %c0_i32 = arith.constant 0 : i32
    %c0_i32_0 = arith.constant 0 : i32
    %c0_i32_1 = arith.constant 0 : i32
    %c0_i32_2 = arith.constant 0 : i32
    return %c0_i32, %c0_i32_0, %c0_i32_1 : i32, i32, i32
  }
  func.func @transform_30(%arg0: i32) -> (i32, i32, i32) {
    %c0_i32 = arith.constant 0 : i32
    %c0_i32_0 = arith.constant 0 : i32
    %c0_i32_1 = arith.constant 0 : i32
    %c0_i32_2 = arith.constant 0 : i32
    return %c0_i32, %c0_i32_0, %c0_i32_1 : i32, i32, i32
  }
  func.func @transform_31(%arg0: i32) -> (i32, i32, i32) {
    %c0_i32 = arith.constant 0 : i32
    %c0_i32_0 = arith.constant 0 : i32
    %c0_i32_1 = arith.constant 0 : i32
    %c0_i32_2 = arith.constant 0 : i32
    return %c0_i32, %c0_i32_0, %c0_i32_1 : i32, i32, i32
  }
  func.func @transform_32(%arg0: i32) -> (i32, i32, i32) {
    %c0_i32 = arith.constant 0 : i32
    %c0_i32_0 = arith.constant 0 : i32
    %c0_i32_1 = arith.constant 0 : i32
    %c0_i32_2 = arith.constant 0 : i32
    return %c0_i32, %c0_i32_0, %c0_i32_1 : i32, i32, i32
  }
  func.func @transform_33(%arg0: i32) -> (i32, i32) {
    %c0_i32 = arith.constant 0 : i32
    %c0_i32_0 = arith.constant 0 : i32
    %c0_i32_1 = arith.constant 0 : i32
    return %c0_i32, %c0_i32_0 : i32, i32
  }
  func.func @transform_34(%arg0: i32) -> (i32, i32) {
    %c0_i32 = arith.constant 0 : i32
    %c0_i32_0 = arith.constant 0 : i32
    %c0_i32_1 = arith.constant 0 : i32
    return %c0_i32, %c0_i32_0 : i32, i32
  }
  func.func @transform_35(%arg0: i32) -> (i32, i32, i32) {
    %c0_i32 = arith.constant 0 : i32
    %c0_i32_0 = arith.constant 0 : i32
    %c0_i32_1 = arith.constant 0 : i32
    return %arg0, %c0_i32, %c0_i32_0 : i32, i32, i32
  }
  func.func @transform_36(%arg0: i32) -> (i32, i32, i32) {
    %c0_i32 = arith.constant 0 : i32
    %c0_i32_0 = arith.constant 0 : i32
    %c0_i32_1 = arith.constant 0 : i32
    return %arg0, %c0_i32, %c0_i32_0 : i32, i32, i32
  }
}

</mosaic_0001>

<bundles_post_ra>
// kernel: dpfl_forward.1
= control target key start
LH: loop header
LB: loop body
LE: loop exit
PB: predicated region body
PF: predicated region fallthrough
CT: control target
= control target key end

     0   :  { %s9039_s6 = smov 1   ;;  %s9040_s10 = smov 2   ;;  %s11759_s0 = inlined_call_operand.smem [shape: u32[37], index: -1, kind: input, shape index: {}] }
   0x1   :  { %s9131_s5 = sld [smem:[%s11759_s0]]   ;;  %s9041_s14 = smov 3  }
   0x2   :  { %s9136_s9 = sld [smem:[%s11759_s0 + %s9039_s6]]   ;;  %s9042_s18 = smov 4  }
   0x3   :  { %s9141_s13 = sld [smem:[%s11759_s0 + %s9040_s10]]   ;;  %s9043_s22 = smov 5  }
   0x4   :  { %s9146_s17 = sld [smem:[%s11759_s0 + %s9041_s14]]   ;;  %s9044_s26 = smov 6  }
   0x5   :  { %s9151_s21 = sld [smem:[%s11759_s0 + %s9042_s18]]   ;;  %s9045_s30 = smov 7  }
   0x6   :  { %s9156_s25 = sld [smem:[%s11759_s0 + %s9043_s22]]   ;;  %s9046_s4 = smov 8  }
   0x7   :  { %11775 = sst [smem:[#allocation66_spill]] %s9131_s5  ;;  %s9047_s10 = smov 9  }
   0x8   :  { %11776 = sst [smem:[#allocation67_spill]] %s9136_s9  ;;  %s9048_s15 = smov 10  }
   0x9   :  { %11777 = sst [smem:[#allocation68_spill]] %s9141_s13  ;;  %s9049_s20 = smov 11  }
   0xa   :  { %11778 = sst [smem:[#allocation69_spill]] %s9146_s17  ;;  %s9051_s1 = smov 13  }
   0xb   :  { %s9161_s29 = sld [smem:[%s11759_s0 + %s9044_s26]]   ;;  %s9050_s26 = smov 12  }
   0xc   :  { %11779 = sst [smem:[#allocation70_spill]] %s9156_s25  ;;  %s9052_s7 = smov 14  }
   0xd   :  { %s9166_s3 = sld [smem:[%s11759_s0 + %s9045_s30]]   ;;  %s9054_s22 = smov 16  }
   0xe   :  { %s9171_s8 = sld [smem:[%s11759_s0 + %s9046_s4]]   ;;  %s9055_s28 = smov 17  }
   0xf   :  { %s9176_s14 = sld [smem:[%s11759_s0 + %s9047_s10]]  }
  0x10   :  { %s9181_s19 = sld [smem:[%s11759_s0 + %s9048_s15]]   ;;  %s9053_s15 = smov 15  }
  0x11   :  { %11780 = sst [smem:[#allocation71_spill]] %s9161_s29 }
  0x12   :  { %s9186_s24 = sld [smem:[%s11759_s0 + %s9049_s20]]  }
  0x13   :  { %11781 = sst [smem:[#allocation72_spill]] %s9166_s3 }
  0x14   :  { %11782 = sst [smem:[#allocation73_spill]] %s9171_s8  ;;  %s9074_s8 = smov 36  }
  0x15   :  { %11783 = sst [smem:[#allocation74_spill]] %s9176_s14 }
  0x16   :  { %11784 = sst [smem:[#allocation75_spill]] %s9181_s19 }
  0x17   :  { %s9191_s30 = sld [smem:[%s11759_s0 + %s9050_s26]]  }
  0x18   :  { %11785 = sst [smem:[#allocation76_spill]] %s9186_s24 }
  0x19   :  { %s9196_s6 = sld [smem:[%s11759_s0 + %s9051_s1]]  }
  0x1a   :  { %s9201_s12 = sld [smem:[%s11759_s0 + %s9052_s7]]   ;;  %s9056_s7 = smov 18  }
  0x1b   :  { %s9206_s20 = sld [smem:[%s11759_s0 + %s9053_s15]]   ;;  %s9057_s15 = smov 19  }
  0x1c   :  { %s9211_s27 = sld [smem:[%s11759_s0 + %s9054_s22]]   ;;  %s9058_s22 = smov 20  }
  0x1d   :  { %s9216_s4 = sld [smem:[%s11759_s0 + %s9055_s28]]   ;;  %s9059_s28 = smov 21  }
  0x1e   :  { %s9221_s19 = sld [smem:[%s11759_s0 + %s9056_s7]]   ;;  %s9060_s7 = smov 22  }
  0x1f   :  { %11786 = sst [smem:[#allocation77_spill]] %s9196_s6 }
  0x20   :  { %11787 = sst [smem:[#allocation78_spill]] %s9201_s12 }
  0x21   :  { %11788 = sst [smem:[#allocation79_spill]] %s9206_s20 }
  0x22   :  { %s9226_s3 = sld [smem:[%s11759_s0 + %s9057_s15]]   ;;  %s9061_s15 = smov 23  }
  0x23   :  { %11789 = sst [smem:[#allocation80_spill]] %s9216_s4 }
  0x24   :  { %s9231_s25 = sld [smem:[%s11759_s0 + %s9058_s22]]   ;;  %s9062_s22 = smov 24  }
  0x25   :  { %s9236_s29 = sld [smem:[%s11759_s0 + %s9059_s28]]   ;;  %s9063_s28 = smov 25  }
  0x26   :  { %s9241_s4 = sld [smem:[%s11759_s0 + %s9060_s7]]   ;;  %s9064_s7 = smov 26  }
  0x27   :  { %s9251_s20 = sld [smem:[%s11759_s0 + %s9062_s22]]   ;;  %s9066_s22 = smov 28  }
  0x28   :  { %11790 = sst [smem:[#allocation81_spill]] %s9226_s3 }
  0x29   :  { %s9246_s3 = sld [smem:[%s11759_s0 + %s9061_s15]]   ;;  %s9065_s15 = smov 27  }
  0x2a   :  { %s9261_s6 = sld [smem:[%s11759_s0 + %s9064_s7]]   ;;  %s9068_s7 = smov 30  }
  0x2b   :  { %11791 = sst [smem:[#allocation82_spill]] %s9236_s29 }
  0x2c   :  { %11792 = sst [smem:[#allocation83_spill]] %s9241_s4 }
  0x2d   :  { %s9256_s29 = sld [smem:[%s11759_s0 + %s9063_s28]]   ;;  %s9067_s28 = smov 29  }
  0x2e   :  { %s9271_s24 = sld [smem:[%s11759_s0 + %s9066_s22]]   ;;  %s9070_s22 = smov 32  }
  0x2f   :  { %11793 = sst [smem:[#allocation84_spill]] %s9246_s3 }
  0x30   :  { %11795 = sst [smem:[#allocation86_spill]] %s9261_s6 }
  0x31   :  { %s9266_s3 = sld [smem:[%s11759_s0 + %s9065_s15]]   ;;  %s9069_s15 = smov 31  }
  0x32   :  { %s9276_s10 = sld [smem:[%s11759_s0 + %s9067_s28]]   ;;  %s9071_s28 = smov 33  }
  0x33   :  { %11794 = sst [smem:[#allocation85_spill]] %s9256_s29  ;;  %s9072_s29 = smov 34  }
  0x34   :  { %s9281_s16 = sld [smem:[%s11759_s0 + %s9068_s7]]  }
  0x35   :  { %s9286_s23 = sld [smem:[%s11759_s0 + %s9069_s15]]  }
  0x36   :  { %s9291_s1 = sld [smem:[%s11759_s0 + %s9070_s22]]  }
  0x37   :  { %11796 = sst [smem:[#allocation87_spill]] %s9266_s3  ;;  %s9073_s3 = smov 35  }
  0x38   :  { %11797 = sst [smem:[#allocation88_spill]] %s9276_s10 }
  0x39   :  { %s9296_s17 = sld [smem:[%s11759_s0 + %s9071_s28]]  }
  0x3a   :  { %s9301_s9 = sld [smem:[%s11759_s0 + %s9072_s29]]  }
  0x3b   :  { %11798 = sst [smem:[#allocation89_spill]] %s9286_s23 }
  0x3c   :  { %11799 = sst [smem:[#allocation90_spill]] %s9291_s1 }
  0x3d   :  { %s9306_s23 = sld [smem:[%s11759_s0 + %s9073_s3]]  }
  0x3e   :  { %s9311_s1 = sld [smem:[%s11759_s0 + %s9074_s8]]  }
  0x3f   :  { %79 = sst [smem:[#allocation4]] %s9151_s21 }
  0x40   :  { %80 = vsyncpa [#allocation8], 0 }
  0x41   :  { %81 = vsyncpa [#allocation7], 0 }
  0x42   :  { %82 = vsyncpa [#allocation11], 0 }
  0x43   :  { %83 = vsyncpa [#allocation6], 0 }
  0x44   :  { %84 = vsyncpa [#allocation15], 0 }
  0x45   :  { %85 = vsyncpa [#allocation18], 0 }
  0x46   :  { %86 = vsyncpa [#allocation21], 0 }
  0x47   :  { %87 = vsyncpa [#allocation24], 0 }
  0x48   :  { %88 = vsyncpa [#allocation27], 0 }
  0x49   :  { %89 = vsyncpa [#allocation30], 0 }
  0x4a   :  { %90 = vsyncpa [#allocation33], 0 }
  0x4b   :  { %91 = vsyncpa [#allocation36], 0 }
  0x4c   :  { %92 = vsyncpa [#allocation39], 0 }
  0x4d   :  { %93 = vsyncpa [#allocation42], 0 }
  0x4e   :  { %94 = vsyncpa [#allocation45], 0 }
  0x4f   :  { %95 = vsyncpa [#allocation48], 0  ;;  %s9314_s10 = smov 0  }
  0x50 LB: > { %s9320_s0 = sadd.s32 4294967295, %s9033_s10   ;;  %s11800_s13 = sld [smem:[#allocation68_spill]]  ;;  %s9033_s10 = sphi %s9314_s10, %s101_s10  }
  0x51   : > { %p7011_p0 = scmp.ge.s32.totalorder %s9033_s10, 1  ;;  %p903_p1 = scmp.lt.s32.totalorder %s9033_s10, 3 }
  0x52   : > { %p11761_p2 = scmp.eq.s32.totalorder %s9320_s0, 0  ;;  %s9075_s28 = smov [#allocation14]  }
  0x53   : > { %p9325_p3 = pnand %p7011_p0, %p903_p1  ;;  %s974_s2 = sshll.u32 %s9075_s28, 4  ;;  %s975_s2 = int_to_ptr.vmem [resolvable:$true] %s974_s2 }
  0x54   : > { %s9076_s7 = smov [#allocation17]   ;;  %s9077_s3 = smov [#allocation20]  }
  0x55   : > { %s11801_s21 = scalar_select %p9325_p3, 1, 0 }
  0x56   : > { %p7790_p4 = pneg %p9325_p3  ;;  %s1003_s11 = sshll.u32 %s9076_s7, 4  ;;  %s9337_s11 = int_to_ptr.vmem [resolvable:$true] %s1003_s11 }
  0x57   : > { %s9339_s15 = sshll.u32 %s9077_s3, 4  ;;  %s9078_s18 = smov [#allocation10]   ;;  %s1031_s15 = int_to_ptr.vmem [resolvable:$true] %s9339_s15 }
  0x58   : > { %p9333_p5 = pnand %p11761_p2, %p7790_p4  ;;  %s8283_s22 = scalar_lea.vmem %s975_s2, 768 }
  0x59   : > { %p8284_p7 = scmp.ne.s32.totalorder %s975_s2, %s8283_s22  ;;  %p8291_p10 = scmp.lt.s32.totalorder %s975_s2, %s975_s2 }
  0x5a   : > { %7799 = dma.hbm_to_smem (!%p9333_p5), %s11800_s13, 16, %s9078_s18, [#allocation11]  }
  0x5b   : > { %p9346_p6 = pneg %p9333_p5  ;;  %p8292_p11 = scmp.lt.s32.totalorder %s8283_s22, %s8283_s22 }
  0x5d   : > { %p8286_p8 = pnand %p8284_p7, %p9346_p6  ;;  %p8293_p12 = por %p8292_p11, %p8291_p10 }
  0x5f   : > { %p8287_p9 = pneg %p8286_p8 }
  0x61   : > { %p8294_p13 = pnand %p8293_p12, %p8287_p9 }
  0x63   : > { %8297 = shalt.err (!%p8294_p13)
}
  0x64   : > { %s11763_s26 = smov 256   ;;  %s11804_s14 = sld [smem:[#allocation74_spill]] }
  0x65   : > { %s11769_s28 = smov 16   ;;  %s8309_s7 = scalar_lea.vmem %s9337_s11, 2048 }
  0x66   : > { %p8310_p0 = scmp.ne.s32.totalorder %s9337_s11, %s8309_s7  ;;  %p8317_p7 = scmp.lt.s32.totalorder %s9337_s11, %s9337_s11 }
  0x67   : > { %p8318_p8 = scmp.lt.s32.totalorder %s8309_s7, %s8309_s7 }
  0x68   : > { %p8312_p1 = pnand %p8310_p0, %p9346_p6 }
  0x69   : > { %p8319_p9 = por %p8318_p8, %p8317_p7 }
  0x6a   : > { %7808 = dma.hbm_to_vmem [thread:$0]  (!%p9333_p5), %s11804_s14, 768, %s975_s2, [#allocation15], %s11763_s26, %s11763_s26, %s11769_s28  }
  0x6b   : > { %p8313_p4 = pneg %p8312_p1 }
  0x6d   : > { %p8320_p10 = pnand %p8319_p9, %p8313_p4 }
  0x6f   : > { %8323 = shalt.err (!%p8320_p10)
}
  0x70   : > { %s11765_s3 = smov 128   ;;  %s11767_s18 = smov 8  }
  0x71   : > { %7814 = dma.hbm_to_vmem [thread:$0]  (!%p9333_p5), %s9191_s30, 2048, %s9337_s11, [#allocation18], %s11765_s3, %s11765_s3, %s11767_s18  }
  0x72   : > { %s8335_s2 = scalar_lea.vmem %s1031_s15, 32  ;;  %p8343_p0 = scmp.lt.s32.totalorder %s1031_s15, %s1031_s15 }
  0x73   : > { %p8336_p11 = scmp.ne.s32.totalorder %s1031_s15, %s8335_s2  ;;  %p8344_p1 = scmp.lt.s32.totalorder %s8335_s2, %s8335_s2 }
  0x75   : > { %p8338_p12 = pnand %p8336_p11, %p9346_p6  ;;  %p8345_p4 = por %p8344_p1, %p8343_p0 }
  0x77   : > { %p8339_p13 = pneg %p8338_p12 }
  0x79   : > { %p8346_p7 = pnand %p8345_p4, %p8339_p13 }
  0x7b   : > { %8349 = shalt.err (!%p8346_p7)
}
  0x7c   : > { %s11805_s12 = sld [smem:[#allocation78_spill]]  ;;  %s9083_s22 = smov [#allocation23]  }
  0x7d   : > { %s1053_s7 = sshll.u32 %s9083_s22, 4  ;;  %s1054_s7 = int_to_ptr.vmem [resolvable:$true] %s1053_s7 }
  0x7e   : > { %s8361_s11 = scalar_lea.vmem %s1054_s7, 288  ;;  %p8369_p11 = scmp.lt.s32.totalorder %s1054_s7, %s1054_s7 }
  0x7f   : > { %p8362_p8 = scmp.ne.s32.totalorder %s1054_s7, %s8361_s11  ;;  %p8370_p12 = scmp.lt.s32.totalorder %s8361_s11, %s8361_s11 }
  0x81   : > { %p8364_p9 = pnand %p8362_p8, %p9346_p6  ;;  %p8371_p2 = por %p8370_p12, %p8369_p11 }
  0x82   : > { %7820 = dma.hbm_to_vmem [thread:$0]  (!%p9333_p5), %s11805_s12, 32, %s1031_s15, [#allocation21]  }
  0x83   : > { %p8365_p10 = pneg %p8364_p9 }
  0x85   : > { %p8372_p3 = pnand %p8371_p2, %p8365_p10 }
  0x87   : > { %8375 = shalt.err (!%p8372_p3)
}
  0x88   : > { %s11771_s2 = smov 32   ;;  %s11773_s26 = smov 2  }
  0x89   : > { %7826 = dma.hbm_to_vmem [thread:$0]  (!%p9333_p5), %s9211_s27, 288, %s1054_s7, [#allocation24], %s11771_s2, %s11771_s2, %s11773_s26  }
  0x8a   : > { %s9086_s15 = smov [#allocation26]   ;;  %s9087_s3 = smov [#allocation29]  }
  0x8b   : > { %s1079_s22 = sshll.u32 %s9086_s15, 4  ;;  %s1105_s18 = sshll.u32 %s9087_s3, 4  ;;  %s1080_s22 = int_to_ptr.vmem [resolvable:$true] %s1079_s22  ;;  %s1106_s18 = int_to_ptr.vmem [resolvable:$true] %s1105_s18 }
  0x8c   : > { %s8387_s11 = scalar_lea.vmem %s1080_s22, 288  ;;  %p8395_p0 = scmp.lt.s32.totalorder %s1080_s22, %s1080_s22 }
  0x8d   : > { %p8388_p13 = scmp.ne.s32.totalorder %s1080_s22, %s8387_s11  ;;  %p8396_p1 = scmp.lt.s32.totalorder %s8387_s11, %s8387_s11 }
  0x8f   : > { %p8390_p2 = pnand %p8388_p13, %p9346_p6  ;;  %p8397_p4 = por %p8396_p1, %p8395_p0 }
  0x91   : > { %p8391_p3 = pneg %p8390_p2 }
  0x93   : > { %p8398_p7 = pnand %p8397_p4, %p8391_p3 }
  0x95   : > { %8401 = shalt.err (!%p8398_p7)
}
  0x96   : > { %7832 = dma.hbm_to_vmem [thread:$0]  (!%p9333_p5), %s9221_s19, 288, %s1080_s22, [#allocation27], %s11771_s2, %s11771_s2, %s11773_s26  }
  0x97   : > { %s8413_s3 = scalar_lea.vmem %s1106_s18, 288  ;;  %p8421_p11 = scmp.lt.s32.totalorder %s1106_s18, %s1106_s18 }
  0x98   : > { %p8414_p8 = scmp.ne.s32.totalorder %s1106_s18, %s8413_s3  ;;  %p8422_p12 = scmp.lt.s32.totalorder %s8413_s3, %s8413_s3 }
  0x9a   : > { %p8416_p9 = pnand %p8414_p8, %p9346_p6  ;;  %p8423_p13 = por %p8422_p12, %p8421_p11 }
  0x9c   : > { %p8417_p10 = pneg %p8416_p9 }
  0x9e   : > { %p8424_p2 = pnand %p8423_p13, %p8417_p10 }
  0xa0   : > { %8427 = shalt.err (!%p8424_p2)
}
  0xa1   : > { %7838 = dma.hbm_to_vmem [thread:$0]  (!%p9333_p5), %s9231_s25, 288, %s1106_s18, [#allocation30], %s11771_s2, %s11771_s2, %s11773_s26  }
  0xa2   : > { %s9088_s7 = smov [#allocation32]   ;;  %s9089_s22 = smov [#allocation35]  }
  0xa3   : > { %s1131_s15 = sshll.u32 %s9088_s7, 4  ;;  %s1157_s11 = sshll.u32 %s9089_s22, 4  ;;  %s1132_s15 = int_to_ptr.vmem [resolvable:$true] %s1131_s15  ;;  %s1158_s11 = int_to_ptr.vmem [resolvable:$true] %s1157_s11 }
  0xa4   : > { %s8439_s28 = scalar_lea.vmem %s1132_s15, 144  ;;  %s8446_s3 = scalar_lea.vmem %s1132_s15, 160 }
  0xa5   : > { %p8440_p3 = scmp.ne.s32.totalorder %s1132_s15, %s8439_s28  ;;  %p8447_p4 = scmp.lt.s32.totalorder %s1132_s15, %s1132_s15 }
  0xa6   : > { %p8448_p7 = scmp.lt.s32.totalorder %s8446_s3, %s8439_s28 }
  0xa7   : > { %p8442_p0 = pnand %p8440_p3, %p9346_p6 }
  0xa8   : > { %p8449_p8 = por %p8448_p7, %p8447_p4 }
  0xa9   : > { %p8443_p1 = pneg %p8442_p0 }
  0xab   : > { %p8450_p9 = pnand %p8449_p8, %p8443_p1 }
  0xad   : > { %8453 = shalt.err (!%p8450_p9)
}
  0xae   : > { %s9090_s12 = smov 1   ;;  %s11806_s18 = smov 16  }
  0xaf   : > { %s11807_s4 = sld [smem:[#allocation83_spill]]  ;;  %s8465_s7 = scalar_lea.vmem %s1158_s11, 144 }
  0xb0   : > { %p8466_p10 = scmp.ne.s32.totalorder %s1158_s11, %s8465_s7  ;;  %s8472_s22 = scalar_lea.vmem %s1158_s11, 160 }
  0xb1   : > { %p8473_p13 = scmp.lt.s32.totalorder %s1158_s11, %s1158_s11  ;;  %p8474_p2 = scmp.lt.s32.totalorder %s8472_s22, %s8465_s7 }
  0xb2   : > { %p8468_p11 = pnand %p8466_p10, %p9346_p6 }
  0xb3   : > { %p8475_p3 = por %p8474_p2, %p8473_p13 }
  0xb4   : > { %p8469_p12 = pneg %p8468_p11 }
  0xb5   : > { %7844 = dma.hbm_to_vmem [thread:$0]  (!%p9333_p5), %s11807_s4, 144, %s1132_s15, [#allocation33], %s11806_s18, %s11806_s18, %s9090_s12  }
  0xb6   : > { %p8476_p0 = pnand %p8475_p3, %p8469_p12 }
  0xb8   : > { %8479 = shalt.err (!%p8476_p0)
}
  0xb9   : > { %7850 = dma.hbm_to_vmem [thread:$0]  (!%p9333_p5), %s9251_s20, 144, %s1158_s11, [#allocation36], %s11806_s18, %s11806_s18, %s9090_s12  }
  0xba   : > { %s9091_s28 = smov [#allocation38]   ;;  %s9092_s3 = smov [#allocation41]  }
  0xbb   : > { %s1183_s15 = sshll.u32 %s9091_s28, 4  ;;  %s1209_s2 = sshll.u32 %s9092_s3, 4  ;;  %s1184_s15 = int_to_ptr.vmem [resolvable:$true] %s1183_s15  ;;  %s1210_s2 = int_to_ptr.vmem [resolvable:$true] %s1209_s2 }
  0xbc   : > { %s8491_s26 = scalar_lea.vmem %s1184_s15, 320  ;;  %p8499_p8 = scmp.lt.s32.totalorder %s1184_s15, %s1184_s15 }
  0xbd   : > { %p8492_p1 = scmp.ne.s32.totalorder %s1184_s15, %s8491_s26  ;;  %p8500_p9 = scmp.lt.s32.totalorder %s8491_s26, %s8491_s26 }
  0xbf   : > { %p8494_p4 = pnand %p8492_p1, %p9346_p6  ;;  %p8501_p10 = por %p8500_p9, %p8499_p8 }
  0xc1   : > { %p8495_p7 = pneg %p8494_p4 }
  0xc3   : > { %p8502_p11 = pnand %p8501_p10, %p8495_p7 }
  0xc5   : > { %8505 = shalt.err (!%p8502_p11)
}
  0xc6   : > { %s11808_s7 = smov 2   ;;  %s11809_s22 = smov 32  }
  0xc7   : > { %s11810_s6 = sld [smem:[#allocation86_spill]]  ;;  %s8517_s12 = scalar_lea.vmem %s1210_s2, 640 }
  0xc8   : > { %p8518_p12 = scmp.ne.s32.totalorder %s1210_s2, %s8517_s12  ;;  %p8525_p3 = scmp.lt.s32.totalorder %s1210_s2, %s1210_s2 }
  0xc9   : > { %p8526_p0 = scmp.lt.s32.totalorder %s8517_s12, %s8517_s12 }
  0xca   : > { %p8520_p13 = pnand %p8518_p12, %p9346_p6 }
  0xcb   : > { %p8527_p1 = por %p8526_p0, %p8525_p3 }
  0xcc   : > { %p8521_p2 = pneg %p8520_p13 }
  0xcd   : > { %7856 = dma.hbm_to_vmem [thread:$0]  (!%p9333_p5), %s11810_s6, 320, %s1184_s15, [#allocation39], %s11809_s22, %s11809_s22, %s11808_s7  }
  0xce   : > { %p8528_p4 = pnand %p8527_p1, %p8521_p2 }
  0xd0   : > { %8531 = shalt.err (!%p8528_p4)
}
  0xd1   : > { %s9093_s26 = smov 64   ;;  %s9094_s11 = smov 4  }
  0xd2   : > { %7862 = dma.hbm_to_vmem [thread:$0]  (!%p9333_p5), %s9271_s24, 640, %s1210_s2, [#allocation42], %s9093_s26, %s9093_s26, %s9094_s11  }
  0xd3   : > { %s9095_s28 = smov [#allocation44]   ;;  %s9096_s3 = smov [#allocation47]  }
  0xd4   : > { %s1235_s15 = sshll.u32 %s9095_s28, 4  ;;  %s1261_s4 = sshll.u32 %s9096_s3, 4  ;;  %s1236_s15 = int_to_ptr.vmem [resolvable:$true] %s1235_s15  ;;  %s1262_s4 = int_to_ptr.vmem [resolvable:$true] %s1261_s4 }
  0xd5   : > { %s8543_s6 = scalar_lea.vmem %s1236_s15, 320  ;;  %p8551_p10 = scmp.lt.s32.totalorder %s1236_s15, %s1236_s15 }
  0xd6   : > { %p8544_p7 = scmp.ne.s32.totalorder %s1236_s15, %s8543_s6  ;;  %p8552_p11 = scmp.lt.s32.totalorder %s8543_s6, %s8543_s6 }
  0xd8   : > { %p8546_p8 = pnand %p8544_p7, %p9346_p6  ;;  %p8553_p12 = por %p8552_p11, %p8551_p10 }
  0xda   : > { %p8547_p9 = pneg %p8546_p8 }
  0xdc   : > { %p8554_p13 = pnand %p8553_p12, %p8547_p9 }
  0xde   : > { %8557 = shalt.err (!%p8554_p13)
}
  0xdf   : > { %s11811_s5 = sld [smem:[#allocation66_spill]]  ;;  %s8569_s12 = scalar_lea.vmem %s1262_s4, 320 }
  0xe0   : > { %7868 = dma.hbm_to_vmem [thread:$0]  (!%p9333_p5), %s9281_s16, 320, %s1236_s15, [#allocation45], %s11809_s22, %s11809_s22, %s11808_s7  }
  0xe1   : > { %p8570_p2 = scmp.ne.s32.totalorder %s1262_s4, %s8569_s12  ;;  %p8577_p1 = scmp.lt.s32.totalorder %s1262_s4, %s1262_s4 }
  0xe2   : > { %p8578_p4 = scmp.lt.s32.totalorder %s8569_s12, %s8569_s12 }
  0xe3   : > { %p8572_p3 = pnand %p8570_p2, %p9346_p6 }
  0xe4   : > { %p8579_p7 = por %p8578_p4, %p8577_p1 }
  0xe5   : > { %s915_s2 = sshll.u32 %s11811_s5, 4  ;;  %p8573_p0 = pneg %p8572_p3  ;;  %s916_s2 = int_to_ptr.vmem [resolvable:$true] %s915_s2 }
  0xe7   : > { %p8580_p8 = pnand %p8579_p7, %p8573_p0 }
  0xe9   : > { %8583 = shalt.err (!%p8580_p8)
}
  0xea   : > { %s11812_s6 = sld [smem:[#allocation90_spill]]  ;;  %s8584_s26 = scalar_lea.vmem %s916_s2, 256 }
  0xeb   : > { %p8585_p9 = scmp.ne.s32.totalorder %s916_s2, %s8584_s26  ;;  %p8592_p12 = scmp.lt.s32.totalorder %s916_s2, %s916_s2 }
  0xec   : > { %p8593_p13 = scmp.lt.s32.totalorder %s8584_s26, %s8584_s26 }
  0xed   : > { %p8587_p10 = pnand %p8585_p9, %p9346_p6 }
  0xee   : > { %p8594_p2 = por %p8593_p13, %p8592_p12 }
  0xef   : > { %p8588_p11 = pneg %p8587_p10 }
  0xf0   : > { %7874 = dma.hbm_to_vmem [thread:$0]  (!%p9333_p5), %s11812_s6, 320, %s1262_s4, [#allocation48], %s11809_s22, %s11809_s22, %s11808_s7  }
  0xf1   : > { %p8595_p3 = pnand %p8594_p2, %p8588_p11 }
  0xf3   : > { %8598 = shalt.err (!%p8595_p3)
}
  0xf4   : > { %s9097_s11 = smov [#allocation5]   ;;  %s11813_s28 = smov 8  }
  0xf5   : > { %s11814_s15 = smov 128   ;;  %s11815_s3 = sld [smem:[#allocation67_spill]] }
  0xf6   : > { %s11816_s4 = sld [smem:[#allocation69_spill]]  ;;  %s9098_s7 = smov [#allocation9]  }
  0xf7   : > { %7793 = dma.vmem_to_smem (!%p9333_p5), %s916_s2, 256, %s9097_s11, [#allocation8], %s11814_s15, %s11814_s15, %s11813_s28  }
  0xf8   : > { %s9099_s12 = smov [#allocation12]   ;;  %s9100_s6 = smov [#allocation13]  }
  0xf9   : > { %s961_s26 = sshll.u32 %s9100_s6, 4  ;;  %s9101_s5 = smov [#allocation16]   ;;  %s962_s26 = int_to_ptr.vmem [resolvable:$true] %s961_s26 }
  0xfa   : > { %s990_s13 = sshll.u32 %s9101_s5, 4  ;;  %s8632_s14 = scalar_lea.vmem %s962_s26, 5120  ;;  %s991_s13 = int_to_ptr.vmem [resolvable:$true] %s990_s13 }
  0xfb   : > { %7796 = dma.hbm_to_smem (!%p9333_p5), %s11815_s3, 16, %s9098_s7, [#allocation7]  }
  0xfc   : > { %7802 = dma.hbm_to_smem (!%p9333_p5), %s11816_s4, 16, %s9099_s12, [#allocation11]  }
  0xfd   : > { %p8633_p0 = scmp.ne.s32.totalorder %s962_s26, %s8632_s14  ;;  %p8640_p7 = scmp.lt.s32.totalorder %s962_s26, %s962_s26 }
  0xfe   : > { %p8641_p8 = scmp.lt.s32.totalorder %s8632_s14, %s8632_s14 }
  0xff   : > { %p8635_p1 = pnand %p8633_p0, %p9346_p6 }
 0x100   : > { %p8642_p9 = por %p8641_p8, %p8640_p7 }
 0x101   : > { %p8636_p4 = pneg %p8635_p1 }
 0x103   : > { %p8643_p10 = pnand %p8642_p9, %p8636_p4 }
 0x105   : > { %8646 = shalt.err (!%p8643_p10)
}
 0x106   : > { %s11817_s2 = smov 256   ;;  %s11818_s11 = sld [smem:[#allocation73_spill]] }
 0x107   : > { %s8658_s5 = scalar_lea.vmem %s991_s13, 5120  ;;  %p8666_p2 = scmp.lt.s32.totalorder %s991_s13, %s991_s13 }
 0x108   : > { %p8659_p11 = scmp.ne.s32.totalorder %s991_s13, %s8658_s5  ;;  %p8667_p3 = scmp.lt.s32.totalorder %s8658_s5, %s8658_s5 }
 0x10a   : > { %p8661_p12 = pnand %p8659_p11, %p9346_p6  ;;  %p8668_p0 = por %p8667_p3, %p8666_p2 }
 0x10c   : > { %7805 = dma.hbm_to_vmem [thread:$0]  (!%p9333_p5), %s11818_s11, 5120, %s962_s26, [#allocation6], %s11817_s2, %s11817_s2, %s11806_s18  }
 0x10d   : > { %p8662_p13 = pneg %p8661_p12 }
 0x10f   : > { %p8669_p1 = pnand %p8668_p0, %p8662_p13 }
 0x111   : > { %8672 = shalt.err (!%p8669_p1)
}
 0x112   : > { %s11819_s14 = sld [smem:[#allocation76_spill]]  ;;  %s9102_s3 = smov [#allocation19]  }
 0x113   : > { %s1016_s4 = sshll.u32 %s9102_s3, 4  ;;  %s9103_s7 = smov [#allocation22]   ;;  %s1017_s4 = int_to_ptr.vmem [resolvable:$true] %s1016_s4 }
 0x114   : > { %s1040_s12 = sshll.u32 %s9103_s7, 4  ;;  %s8684_s6 = scalar_lea.vmem %s1017_s4, 512  ;;  %s1041_s12 = int_to_ptr.vmem [resolvable:$true] %s1040_s12 }
 0x115   : > { %p8685_p4 = scmp.ne.s32.totalorder %s1017_s4, %s8684_s6  ;;  %p8692_p9 = scmp.lt.s32.totalorder %s1017_s4, %s1017_s4 }
 0x116   : > { %p8693_p10 = scmp.lt.s32.totalorder %s8684_s6, %s8684_s6 }
 0x117   : > { %p8687_p7 = pnand %p8685_p4, %p9346_p6 }
 0x118   : > { %7811 = dma.hbm_to_vmem [thread:$0]  (!%p9333_p5), %s11819_s14, 5120, %s991_s13, [#allocation15], %s11817_s2, %s11817_s2, %s11806_s18  }
 0x119   : > { %p8688_p8 = pneg %p8687_p7  ;;  %p8694_p11 = por %p8693_p10, %p8692_p9 }
 0x11b   : > { %p8695_p12 = pnand %p8694_p11, %p8688_p8 }
 0x11d   : > { %8698 = shalt.err (!%p8695_p12)
}
 0x11e   : > { %s11820_s13 = sld [smem:[#allocation77_spill]]  ;;  %s8710_s26 = scalar_lea.vmem %s1041_s12, 4608 }
 0x11f   : > { %p8711_p13 = scmp.ne.s32.totalorder %s1041_s12, %s8710_s26  ;;  %p8718_p0 = scmp.lt.s32.totalorder %s1041_s12, %s1041_s12 }
 0x120   : > { %p8719_p1 = scmp.lt.s32.totalorder %s8710_s26, %s8710_s26 }
 0x121   : > { %p8713_p2 = pnand %p8711_p13, %p9346_p6 }
 0x122   : > { %p8720_p4 = por %p8719_p1, %p8718_p0 }
 0x123   : > { %p8714_p3 = pneg %p8713_p2 }
 0x124   : > { %7817 = dma.hbm_to_vmem [thread:$0]  (!%p9333_p5), %s11820_s13, 512, %s1017_s4, [#allocation18], %s11817_s2, %s11817_s2, %s11806_s18  }
 0x125   : > { %p8721_p7 = pnand %p8720_p4, %p8714_p3 }
 0x127   : > { %8724 = shalt.err (!%p8721_p7)
}
 0x128   : > { %s11821_s11 = sld [smem:[#allocation79_spill]]  ;;  %s9104_s5 = smov [#allocation25]  }
 0x129   : > { %s1066_s14 = sshll.u32 %s9104_s5, 4  ;;  %s9105_s3 = smov [#allocation28]   ;;  %s1067_s14 = int_to_ptr.vmem [resolvable:$true] %s1066_s14 }
 0x12a   : > { %s1092_s4 = sshll.u32 %s9105_s3, 4  ;;  %s8736_s7 = scalar_lea.vmem %s1067_s14, 46080  ;;  %s1093_s4 = int_to_ptr.vmem [resolvable:$true] %s1092_s4 }
 0x12b   : > { %p8737_p8 = scmp.ne.s32.totalorder %s1067_s14, %s8736_s7  ;;  %p8744_p11 = scmp.lt.s32.totalorder %s1067_s14, %s1067_s14 }
 0x12c   : > { %p8745_p12 = scmp.lt.s32.totalorder %s8736_s7, %s8736_s7 }
 0x12d   : > { %p8739_p9 = pnand %p8737_p8, %p9346_p6 }
 0x12e   : > { %7823 = dma.hbm_to_vmem [thread:$0]  (!%p9333_p5), %s11821_s11, 4608, %s1041_s12, [#allocation21], %s11817_s2, %s11817_s2, %s11806_s18  }
 0x12f   : > { %p8740_p10 = pneg %p8739_p9  ;;  %p8746_p13 = por %p8745_p12, %p8744_p11 }
 0x131   : > { %p8747_p2 = pnand %p8746_p13, %p8740_p10 }
 0x133   : > { %8750 = shalt.err (!%p8747_p2)
}
 0x134   : > { %s11822_s12 = sld [smem:[#allocation80_spill]]  ;;  %s8762_s6 = scalar_lea.vmem %s1093_s4, 46080 }
 0x135   : > { %p8763_p3 = scmp.ne.s32.totalorder %s1093_s4, %s8762_s6  ;;  %p8770_p4 = scmp.lt.s32.totalorder %s1093_s4, %s1093_s4 }
 0x136   : > { %p8771_p7 = scmp.lt.s32.totalorder %s8762_s6, %s8762_s6 }
 0x137   : > { %p8765_p0 = pnand %p8763_p3, %p9346_p6 }
 0x138   : > { %p8772_p8 = por %p8771_p7, %p8770_p4 }
 0x139   : > { %p8766_p1 = pneg %p8765_p0 }
 0x13a   : > { %7829 = dma.hbm_to_vmem [thread:$0]  (!%p9333_p5), %s11822_s12, 46080, %s1067_s14, [#allocation24], %s11817_s2, %s11817_s2, %s11806_s18  }
 0x13b   : > { %p8773_p9 = pnand %p8772_p8, %p8766_p1 }
 0x13d   : > { %8776 = shalt.err (!%p8773_p9)
}
 0x13e   : > { %s11823_s13 = sld [smem:[#allocation81_spill]]  ;;  %s9106_s26 = smov [#allocation31]  }
 0x13f   : > { %s1118_s11 = sshll.u32 %s9106_s26, 4  ;;  %s9107_s5 = smov [#allocation34]   ;;  %s1119_s11 = int_to_ptr.vmem [resolvable:$true] %s1118_s11 }
 0x140   : > { %s1144_s14 = sshll.u32 %s9107_s5, 4  ;;  %s8788_s3 = scalar_lea.vmem %s1119_s11, 18432  ;;  %s1145_s14 = int_to_ptr.vmem [resolvable:$true] %s1144_s14 }
 0x141   : > { %p8789_p10 = scmp.ne.s32.totalorder %s1119_s11, %s8788_s3  ;;  %p8796_p13 = scmp.lt.s32.totalorder %s1119_s11, %s1119_s11 }
 0x142   : > { %p8797_p2 = scmp.lt.s32.totalorder %s8788_s3, %s8788_s3 }
 0x143   : > { %p8791_p11 = pnand %p8789_p10, %p9346_p6 }
 0x144   : > { %7835 = dma.hbm_to_vmem [thread:$0]  (!%p9333_p5), %s11823_s13, 46080, %s1093_s4, [#allocation27], %s11817_s2, %s11817_s2, %s11806_s18  }
 0x145   : > { %p8792_p12 = pneg %p8791_p11  ;;  %p8798_p3 = por %p8797_p2, %p8796_p13 }
 0x147   : > { %p8799_p0 = pnand %p8798_p3, %p8792_p12 }
 0x149   : > { %8802 = shalt.err (!%p8799_p0)
}
 0x14a   : > { %s11824_s4 = sld [smem:[#allocation82_spill]]  ;;  %s8814_s7 = scalar_lea.vmem %s1145_s14, 18432 }
 0x14b   : > { %p8815_p1 = scmp.ne.s32.totalorder %s1145_s14, %s8814_s7  ;;  %p8822_p8 = scmp.lt.s32.totalorder %s1145_s14, %s1145_s14 }
 0x14c   : > { %p8823_p9 = scmp.lt.s32.totalorder %s8814_s7, %s8814_s7 }
 0x14d   : > { %p8817_p4 = pnand %p8815_p1, %p9346_p6 }
 0x14e   : > { %p8824_p10 = por %p8823_p9, %p8822_p8 }
 0x14f   : > { %p8818_p7 = pneg %p8817_p4 }
 0x150   : > { %7841 = dma.hbm_to_vmem [thread:$0]  (!%p9333_p5), %s11824_s4, 18432, %s1119_s11, [#allocation30], %s11814_s15, %s11814_s15, %s11813_s28  }
 0x151   : > { %p8825_p11 = pnand %p8824_p10, %p8818_p7 }
 0x153   : > { %8828 = shalt.err (!%p8825_p11)
}
 0x154   : > { %s11825_s12 = sld [smem:[#allocation84_spill]]  ;;  %s9108_s6 = smov [#allocation37]  }
 0x155   : > { %s1170_s13 = sshll.u32 %s9108_s6, 4  ;;  %s9109_s26 = smov [#allocation40]   ;;  %s1171_s13 = int_to_ptr.vmem [resolvable:$true] %s1170_s13 }
 0x156   : > { %s1196_s11 = sshll.u32 %s9109_s26, 4  ;;  %s8840_s5 = scalar_lea.vmem %s1171_s13, 153600  ;;  %s1197_s11 = int_to_ptr.vmem [resolvable:$true] %s1196_s11 }
 0x157   : > { %p8841_p12 = scmp.ne.s32.totalorder %s1171_s13, %s8840_s5  ;;  %p8848_p3 = scmp.lt.s32.totalorder %s1171_s13, %s1171_s13 }
 0x158   : > { %p8849_p0 = scmp.lt.s32.totalorder %s8840_s5, %s8840_s5 }
 0x159   : > { %p8843_p13 = pnand %p8841_p12, %p9346_p6 }
 0x15a   : > { %7847 = dma.hbm_to_vmem [thread:$0]  (!%p9333_p5), %s11825_s12, 18432, %s1145_s14, [#allocation33], %s11814_s15, %s11814_s15, %s11813_s28  }
 0x15b   : > { %p8844_p2 = pneg %p8843_p13  ;;  %p8850_p1 = por %p8849_p0, %p8848_p3 }
 0x15d   : > { %p8851_p4 = pnand %p8850_p1, %p8844_p2 }
 0x15f   : > { %8854 = shalt.err (!%p8851_p4)
}
 0x160   : > { %s11826_s28 = sld [smem:[#allocation85_spill]]  ;;  %s8866_s15 = scalar_lea.vmem %s1197_s11, 102400 }
 0x161   : > { %p8867_p7 = scmp.ne.s32.totalorder %s1197_s11, %s8866_s15  ;;  %p8874_p10 = scmp.lt.s32.totalorder %s1197_s11, %s1197_s11 }
 0x162   : > { %p8875_p11 = scmp.lt.s32.totalorder %s8866_s15, %s8866_s15 }
 0x163   : > { %p8869_p8 = pnand %p8867_p7, %p9346_p6 }
 0x164   : > { %p8876_p12 = por %p8875_p11, %p8874_p10 }
 0x165   : > { %p8870_p9 = pneg %p8869_p8 }
 0x166   : > { %7853 = dma.hbm_to_vmem [thread:$0]  (!%p9333_p5), %s11826_s28, 153600, %s1171_s13, [#allocation36], %s11817_s2, %s11817_s2, %s11806_s18  }
 0x167   : > { %p8877_p13 = pnand %p8876_p12, %p8870_p9 }
 0x169   : > { %8880 = shalt.err (!%p8877_p13)
}
 0x16a   : > { %s9110_s14 = smov 512   ;;  %s11827_s3 = sld [smem:[#allocation87_spill]] }
 0x16b   : > { %s9111_s4 = smov [#allocation43]   ;;  %s9112_s12 = smov [#allocation46]  }
 0x16c   : > { %s1222_s7 = sshll.u32 %s9111_s4, 4  ;;  %s1248_s6 = sshll.u32 %s9112_s12, 4  ;;  %s1223_s7 = int_to_ptr.vmem [resolvable:$true] %s1222_s7  ;;  %s1249_s6 = int_to_ptr.vmem [resolvable:$true] %s1248_s6 }
 0x16d   : > { %s8892_s13 = scalar_lea.vmem %s1223_s7, 51200  ;;  %p8900_p1 = scmp.lt.s32.totalorder %s1223_s7, %s1223_s7 }
 0x16e   : > { %p8893_p2 = scmp.ne.s32.totalorder %s1223_s7, %s8892_s13  ;;  %p8901_p4 = scmp.lt.s32.totalorder %s8892_s13, %s8892_s13 }
 0x170   : > { %7859 = dma.hbm_to_vmem [thread:$0]  (!%p9333_p5), %s11827_s3, 102400, %s1197_s11, [#allocation39], %s9110_s14, %s9110_s14, %s11809_s22  }
 0x171   : > { %p8895_p3 = pnand %p8893_p2, %p9346_p6  ;;  %p8902_p7 = por %p8901_p4, %p8900_p1 }
 0x173   : > { %p8896_p0 = pneg %p8895_p3 }
 0x175   : > { %p8903_p8 = pnand %p8902_p7, %p8896_p0 }
 0x177   : > { %8906 = shalt.err (!%p8903_p8)
}
 0x178   : > { %s11828_s22 = sld [smem:[#allocation88_spill]]  ;;  %s8918_s26 = scalar_lea.vmem %s1249_s6, 51200 }
 0x179   : > { %p8919_p9 = scmp.ne.s32.totalorder %s1249_s6, %s8918_s26  ;;  %p8926_p12 = scmp.lt.s32.totalorder %s1249_s6, %s1249_s6 }
 0x17a   : > { %p8927_p13 = scmp.lt.s32.totalorder %s8918_s26, %s8918_s26 }
 0x17b   : > { %p8921_p10 = pnand %p8919_p9, %p9346_p6 }
 0x17c   : > { %p8928_p2 = por %p8927_p13, %p8926_p12 }
 0x17d   : > { %p8922_p11 = pneg %p8921_p10 }
 0x17e   : > { %7865 = dma.hbm_to_vmem [thread:$0]  (!%p9333_p5), %s11828_s22, 51200, %s1223_s7, [#allocation42], %s11817_s2, %s11817_s2, %s11806_s18  }
 0x17f   : > { %p8929_p3 = pnand %p8928_p2, %p8922_p11 }
 0x181   : > { %8932 = shalt.err (!%p8929_p3)
}
 0x182   : > { %s11829_s11 = sld [smem:[#allocation89_spill]]  ;;  %s9113_s5 = smov [#allocation49]  }
 0x183   : > { %s1278_s28 = sshll.u32 %s9113_s5, 4  ;;  %s1279_s28 = int_to_ptr.vmem [resolvable:$true] %s1278_s28 }
 0x184   : > { %s8944_s15 = scalar_lea.vmem %s1279_s28, 16  ;;  %s8951_s14 = scalar_lea.vmem %s1279_s28, 32 }
 0x185   : > { %p8945_p0 = scmp.ne.s32.totalorder %s1279_s28, %s8944_s15  ;;  %p8952_p7 = scmp.lt.s32.totalorder %s1279_s28, %s1279_s28 }
 0x186   : > { %p8953_p8 = scmp.lt.s32.totalorder %s8951_s14, %s8944_s15 }
 0x187   : > { %p8947_p1 = pnand %p8945_p0, %p9346_p6 }
 0x188   : > { %7871 = dma.hbm_to_vmem [thread:$0]  (!%p9333_p5), %s11829_s11, 51200, %s1249_s6, [#allocation45], %s11817_s2, %s11817_s2, %s11806_s18  }
 0x189   : > { %p8948_p4 = pneg %p8947_p1  ;;  %p8954_p9 = por %p8953_p8, %p8952_p7 }
 0x18b   : > { %p8955_p10 = pnand %p8954_p9, %p8948_p4 }
 0x18d   : > { %8958 = shalt.err (!%p8955_p10)
}
 0x18e   : > { %7877 = dma.hbm_to_vmem [thread:$0]  (!%p9333_p5), %s9301_s9, 16, %s1279_s28, [#allocation48]  }
 0x18f   : > { %p11830_p11 = scmp.ne.s32.totalorder %s11801_s21, 0 }
 0x190   : > { %p11831_p12 = scmp.eq.s32.totalorder (!%p11830_p11), %s9320_s0, 0 }
 0x191   : > { %1307 = sbr.rel (%p11830_p11) target bundleno = 5850 (0x16da), region = 160 }
 0x196   : > { %8968 = dma.done.wait (%p11831_p12), [#allocation8], 256   ;;  %p11832_p13 = pmov %p11831_p12 }
 0x197   : > { %p11833_p6 = pmov %p11831_p12 }
 0x198   : > { %8970 = vsyncadd (%p11832_p13), [#allocation8], 4294967040 }
 0x199   : > { %8972 = dma.done.wait (%p11833_p6), [#allocation7], 16   ;;  %p11834_p2 = pmov %p11833_p6 }
 0x19b   : > { %8974 = vsyncadd (%p11834_p2), [#allocation7], 4294967280  ;;  %p11835_p3 = pmov %p11834_p2 }
 0x19c   : > { %p11836_p5 = pmov %p11834_p2 }
 0x19d   : > { %8976 = dma.done.wait (%p11835_p3), [#allocation11], 32  }
 0x19e   : > { %8978 = vsyncadd (%p11836_p5), [#allocation11], 4294967264  ;;  %p11837_p0 = pmov %p11834_p2 }
 0x1a0   : > { %8980 = dma.done.wait (%p11837_p0), [#allocation6], 5120   ;;  %p11838_p1 = pmov %p11837_p0 }
 0x1a1   : > { %p11839_p4 = pmov %p11837_p0 }
 0x1a2   : > { %8982 = vsyncadd (%p11838_p1), [#allocation6], 4294962176 }
 0x1a3   : > { %8984 = dma.done.wait (%p11839_p4), [#allocation15], 5888   ;;  %p11840_p7 = pmov %p11837_p0 }
 0x1a4   : > { %p11841_p8 = pmov %p11837_p0 }
 0x1a5   : > { %8986 = vsyncadd (%p11840_p7), [#allocation15], 4294961408 }
 0x1a6   : > { %8988 = dma.done.wait (%p11841_p8), [#allocation18], 2560   ;;  %p11842_p9 = pmov %p11837_p0 }
 0x1a7   : > { %p11843_p10 = pmov %p11837_p0 }
 0x1a8   : > { %8990 = vsyncadd (%p11842_p9), [#allocation18], 4294964736 }
 0x1a9   : > { %8992 = dma.done.wait (%p11843_p10), [#allocation21], 4640   ;;  %p11844_p11 = pmov %p11837_p0 }
 0x1aa   : > { %p11845_p12 = pmov %p11837_p0 }
 0x1ab   : > { %8994 = vsyncadd (%p11844_p11), [#allocation21], 4294962656 }
 0x1ac   : > { %8996 = dma.done.wait (%p11845_p12), [#allocation24], 46368   ;;  %p11846_p13 = pmov %p11837_p0 }
 0x1ad   : > { %p11847_p6 = pmov %p11837_p0 }
 0x1ae   : > { %8998 = vsyncadd (%p11846_p13), [#allocation24], 4294920928 }
 0x1af   : > { %9000 = dma.done.wait (%p11847_p6), [#allocation27], 46368   ;;  %p11848_p2 = pmov %p11837_p0 }
 0x1b0   : > { %p11849_p3 = pmov %p11837_p0 }
 0x1b1   : > { %9002 = vsyncadd (%p11848_p2), [#allocation27], 4294920928 }
 0x1b2   : > { %9004 = dma.done.wait (%p11849_p3), [#allocation30], 18720   ;;  %p11850_p5 = pmov %p11837_p0 }
 0x1b4   : > { %9006 = vsyncadd (%p11850_p5), [#allocation30], 4294948576 }
 0x1b5   : > { %9008 = dma.done.wait (%p11837_p0), [#allocation33], 18576   ;;  %p11851_p1 = pmov %p11837_p0 }
 0x1b6   : > { %p11852_p4 = pmov %p11837_p0 }
 0x1b7   : > { %9010 = vsyncadd (%p11851_p1), [#allocation33], 4294948720 }
 0x1b8   : > { %9012 = dma.done.wait (%p11852_p4), [#allocation36], 153744   ;;  %p11853_p7 = pmov %p11837_p0 }
 0x1b9   : > { %p11854_p8 = pmov %p11837_p0 }
 0x1ba   : > { %9014 = vsyncadd (%p11853_p7), [#allocation36], 4294813552 }
 0x1bb   : > { %9016 = dma.done.wait (%p11854_p8), [#allocation39], 102720   ;;  %p11855_p9 = pmov %p11837_p0 }
 0x1bc   : > { %p11856_p10 = pmov %p11837_p0 }
 0x1bd   : > { %9018 = vsyncadd (%p11855_p9), [#allocation39], 4294864576 }
 0x1be   : > { %9020 = dma.done.wait (%p11856_p10), [#allocation42], 51840   ;;  %p11857_p11 = pmov %p11837_p0 }
 0x1bf   : > { %p11858_p12 = pmov %p11837_p0 }
 0x1c0   : > { %9022 = vsyncadd (%p11857_p11), [#allocation42], 4294915456 }
 0x1c1   : > { %9024 = dma.done.wait (%p11858_p12), [#allocation45], 51520   ;;  %p11859_p13 = pmov %p11837_p0 }
 0x1c2   : > { %p11860_p6 = pmov %p11837_p0 }
 0x1c3   : > { %9026 = vsyncadd (%p11859_p13), [#allocation45], 4294915776 }
 0x1c4   : > { %9028 = dma.done.wait (%p11860_p6), [#allocation48], 336   ;;  %p11861_p2 = pmov %p11837_p0 }
 0x1c6   : > { %9030 = vsyncadd (%p11861_p2), [#allocation48], 4294966960 }
 0x1c7   : > { %1425 = sfence }
 0x1c8   : > { %p1520_p3 = scmp.lt.s32.totalorder %s9320_s0, 1  ;;  %s9624_s21 = sld [smem:[#allocation4]]  ;;  %v1596_v0 = vld [vmem:[#allocation19 + $0x18] sm:$0xf]  ;;  %v9114_v1 = vmov 0   ;;  %vm1616_vm0 = vcmask 1043456  }
 0x1c9   : > { %s11862_s29 = sld [smem:[#allocation71_spill]]  ;;  %8036 = vset.pattern.permute.xlu0 %v9114_v1  ;;  %v1595_v2 = vld [vmem:[#allocation19 + $0x10] sm:$0xf]  ;;  %7091 = vmatprep.subr.msk.mxu0 %vm1616_vm0, %v1596_v0  ;;  %v1594_v3 = vld [vmem:[#allocation19 + $0x8] sm:$0xff]  ;;  %v1593_v4 = vld [vmem:[#allocation19] sm:$0xff]  ;;  %v9115_v5 = vmov 0.0  }
 0x1ca   : > { %s11867_s0 = smov (!%p1520_p3, %s9320_s0), 1  ;;  %7630 = vmatprep.subr.msk.mxu1 %vm1616_vm0, %v1596_v0  ;;  %7092 = vmatpush1.msk.msra.mxu0 %vm1616_vm0, %v1595_v2  ;;  %s11863_s3 = sld [smem:[#allocation70_spill]]  ;;  %vm1609_vm1 = vcmask 97280   ;;  %vm1705_vm2 = vcmask 261120  }
 0x1cb   : > { %1687 = vmatprep.mubr.f32.mxu0 %v9115_v5  ;;  %s7415_s8 = sshll.u32 %s11867_s0, 4  ;;  %1653 = vmatprep.subr.mxu0 %v1594_v3  ;;  %s9643_s7 = sld [smem:[#allocation9 + $0x9]] }
 0x1cc   : > { %7632 = vmatpush1.msk.msra.mxu1 %vm1616_vm0, %v1595_v2  ;;  %s9637_s2 = scalar_lea.vmem %s9306_s23, %s7415_s8  ;;  %1654 = vmatpush1.msra.mxu0 %v1593_v4  ;;  %s9640_s4 = scalar_lea.vmem %s9311_s1, %s7415_s8 }
 0x1cd   : > { %7631 = vmatprep.subr.mxu1 %v1594_v3  ;;  %1693 = vmatprep.mubr.f32.mxu1 %v9115_v5  ;;  %s9645_s12 = sld [smem:[#allocation5 + $0x480]]  ;;  %s7414_s22 = sshll.u32 %s11867_s0, 6 }
 0x1ce   : > { %7633 = vmatpush1.msra.mxu1 %v1593_v4  ;;  %s9647_s6 = sld [smem:[#allocation5 + $0x481]] }
 0x1cf   : > { %s1529_s18 = scalar_lea.vmem %s11862_s29, %s7415_s8  ;;  %s9649_s13 = sld [smem:[#allocation5 + $0x482]] }
 0x1d0   : > { %v1540_v6 = vld [vmem:[%s1529_s18] sm:$0xff]  ;;  %v1541_v7 = vld [vmem:[%s1529_s18 + $0x8] sm:$0xff]  ;;  %s1712_s26 = sld [smem:[#allocation5]]  ;;  %s9657_s28 = scalar_lea.vmem %s11863_s3, %s7414_s22 }
 0x1d1   : > { %1583 = vperm.xlu0 %8036, %v1540_v6   ;;  %s9652_s11 = sld [smem:[#allocation5 + $0x483]]  ;;  %v9666_v8 = vld [vmem:[%s9657_s28] sm:$0xff]  ;;  %v9679_v12 = vld [vmem:[%s9657_s28 + $0x8] sm:$0xff]  ;;  %v1544_v13 = vstv %s9643_s7  ;;  %v9683_v14 = vld [vmem:[%s9657_s28 + $0x10] sm:$0xff] }
 0x1d2   : > { %s9654_s5 = sld [smem:[#allocation9]]  ;;  %v9701_v23 = vld [vmem:[%s9657_s28 + $0x18] sm:$0xff]  ;;  %v9705_v25 = vld [vmem:[%s9657_s28 + $0x20] sm:$0xff]  ;;  %v9724_v37 = vld [vmem:[%s9657_s28 + $0x28] sm:$0xff] }
 0x1d3   : > { %s9659_s15 = sld [smem:[#allocation5 + $0x1]]  ;;  %v1549_v9 = vstv %s9645_s12  ;;  %v9728_v40 = vld [vmem:[%s9657_s28 + $0x30] sm:$0xff]  ;;  %v9739_v46 = vld [vmem:[%s9657_s28 + $0x38] sm:$0xff] }
 0x1d4   : > { %s9661_s14 = sld [smem:[#allocation5 + $0x80]]  ;;  %v1550_v11 = vmul.f32 %v1549_v9, %v9666_v8  ;;  %v1558_v15 = vstv %s9647_s6  ;;  %v1551_v24 = vmul.f32 %v9679_v12, %v1549_v9 }
 0x1d5   : > { %1588 = vperm.xlu0 %8036, %v1541_v7   ;;  %s9663_s29 = sld [smem:[#allocation5 + $0x2]]  ;;  %v1559_v22 = vmul.f32 %v9683_v14, %v1558_v15  ;;  %v1567_v26 = vstv %s9649_s13  ;;  %v1560_v39 = vmul.f32 %v9701_v23, %v1558_v15 }
 0x1d6   : > { %s9669_s0 = sld [smem:[#allocation5 + $0x3]]  ;;  %v1715_v10 = vstv %s1712_s26  ;;  %v1552_v21 = vadd.f32 %v1550_v11, %v1544_v13  ;;  %v1568_v36 = vmul.f32 %v9705_v25, %v1567_v26  ;;  %v1553_v38 = vadd.f32 %v1551_v24, %v1544_v13 }
 0x1d7   : > { %s9671_s8 = sld [smem:[#allocation9 + $0x1]]  ;;  %v1716_v16 = vmul.f32 %v1715_v10, %v9666_v8  ;;  %v1717_v20 = vmul.f32 %v1715_v10, %v9679_v12  ;;  %v1576_v41 = vstv %s9652_s11  ;;  %v1569_v56 = vmul.f32 %v9724_v37, %v1567_v26 }
 0x1d8   : > { %s9673_s18 = sld [smem:[#allocation5 + $0x81]]  ;;  %v1710_v17 = vstv %s9654_s5  ;;  %v1561_v35 = vadd.f32 %v1559_v22, %v1552_v21  ;;  %v1577_v54 = vmul.f32 %v9728_v40, %v1576_v41  ;;  %v1562_v55 = vadd.f32 %v1560_v39, %v1553_v38 }
 0x1d9   : > { %s9676_s3 = sld [smem:[#allocation5 + $0x82]]  ;;  %v1723_v18 = vstv %s9659_s15  ;;  %v1718_v28 = vadd.f32 %v1716_v16, %v1710_v17  ;;  %v1719_v33 = vadd.f32 %v1717_v20, %v1710_v17  ;;  %v9772_v9 = vmul.f32 %v9739_v46, %v1576_v41 }
 0x1da   : > { %s9686_s12 = sld [smem:[#allocation5 + $0x83]]  ;;  %v1754_v19 = vstv %s9661_s14  ;;  %v1724_v29 = vmul.f32 %v9683_v14, %v1723_v18  ;;  %v1725_v34 = vmul.f32 %v9701_v23, %v1723_v18  ;;  %v1570_v53 = vadd.f32 %v1568_v36, %v1561_v35 }
 0x1db   : > { %s9688_s22 = sld [smem:[#allocation9 + $0x2]]  ;;  %v1731_v27 = vstv %s9663_s29  ;;  %v1755_v30 = vmul.f32 %v1754_v19, %v9666_v8  ;;  %v1756_v43 = vmul.f32 %v1754_v19, %v9679_v12  ;;  %v9769_v7 = vadd.f32 %v1569_v56, %v1562_v55 }
 0x1dc   : > { %s9694_s26 = sld [smem:[#allocation5 + $0x100]]  ;;  %v1739_v42 = vstv %s9669_s0  ;;  %v1726_v44 = vadd.f32 %v1724_v29, %v1718_v28  ;;  %v1732_v45 = vmul.f32 %v9705_v25, %v1731_v27  ;;  %v1727_v51 = vadd.f32 %v1725_v34, %v1719_v33 }
 0x1dd   : > { %s9698_s7 = sld [smem:[#allocation5 + $0x101]]  ;;  %v1749_v31 = vstv %s9671_s8  ;;  %v1733_v52 = vmul.f32 %v9724_v37, %v1731_v27  ;;  %v1740_v57 = vmul.f32 %v9728_v40, %v1739_v42  ;;  %v1741_v58 = vmul.f32 %v9739_v46, %v1739_v42 }
 0x1de   : > { %s9708_s6 = sld [smem:[#allocation5 + $0x102]]  ;;  %v1762_v32 = vstv %s9673_s18  ;;  %v1757_v47 = vadd.f32 %v1755_v30, %v1749_v31  ;;  %v1758_v59 = vadd.f32 %v1756_v43, %v1749_v31  ;;  %v1734_v61 = vadd.f32 %v1732_v45, %v1726_v44 }
 0x1df   : > { %s9711_s5 = sld [smem:[#allocation5 + $0x103]]  ;;  %v1763_v48 = vmul.f32 %v9683_v14, %v1762_v32  ;;  %v1770_v49 = vstv %s9676_s3  ;;  %v1764_v60 = vmul.f32 %v9701_v23, %v1762_v32  ;;  %v1735_v4 = vadd.f32 %v1733_v52, %v1727_v51 }
 0x1e0   : > { %s9717_s15 = sld [smem:[#allocation9 + $0x3]]  ;;  %v1771_v63 = vmul.f32 %v9705_v25, %v1770_v49  ;;  %v1778_v1 = vstv %s9686_s12  ;;  %v9765_v6 = vadd.f32 %v1577_v54, %v1570_v53  ;;  %v1772_v13 = vmul.f32 %v9724_v37, %v1770_v49 }
 0x1e1   : > { %s9721_s13 = sld [smem:[#allocation5 + $0x180]]  ;;  %v1765_v62 = vadd.f32 %v1763_v48, %v1757_v47  ;;  %v1789_v2 = vstv %s9688_s22  ;;  %v1766_v11 = vadd.f32 %v1764_v60, %v1758_v59  ;;  %v1779_v17 = vmul.f32 %v9728_v40, %v1778_v1 }
 0x1e2   : > { %s9732_s14 = sld [smem:[#allocation5 + $0x181]]  ;;  %v1794_v50 = vstv %s9694_s26  ;;  %v9786_v21 = vadd.f32 %v1740_v57, %v1734_v61  ;;  %v9788_v22 = vadd.f32 %v1741_v58, %v1735_v4  ;;  %v9791_v24 = vmul.f32 %v9739_v46, %v1778_v1 }
 0x1e3   : > { %s9735_s29 = sld [smem:[#allocation5 + $0x182]]  ;;  %v1795_v0 = vmul.f32 %v1794_v50, %v9666_v8  ;;  %v1802_v3 = vstv %s9698_s7  ;;  %v1796_v15 = vmul.f32 %v1794_v50, %v9679_v12  ;;  %v1773_v16 = vadd.f32 %v1771_v63, %v1765_v62 }
 0x1e4   : > { %s9744_s8 = sld [smem:[#allocation5 + $0x183]]  ;;  %v1803_v19 = vmul.f32 %v9683_v14, %v1802_v3  ;;  %v1810_v20 = vstv %s9708_s6  ;;  %v9802_v31 = vadd.f32 %v1772_v13, %v1766_v11  ;;  %v1804_v33 = vmul.f32 %v9701_v23, %v1802_v3 }
 0x1e5   : > { %s9748_s11 = sld [smem:[#allocation5 + $0x200]]  ;;  %v1797_v18 = vadd.f32 %v1795_v0, %v1789_v2  ;;  %v1798_v32 = vadd.f32 %v1796_v15, %v1789_v2  ;;  %v1818_v34 = vstv %s9711_s5  ;;  %v9809_v36 = vadd.f32 %v1779_v17, %v1773_v16 }
 0x1e6   : > { %s9751_s28 = sld [smem:[#allocation9 + $0x4]]  ;;  %v1829_v30 = vstv %s9717_s15  ;;  %v1811_v50 = vmul.f32 %v9705_v25, %v1810_v20  ;;  %v1812_v51 = vmul.f32 %v9724_v37, %v1810_v20  ;;  %v9826_v52 = vmul.f32 %v9728_v40, %v1818_v34 }
 0x1e7   : > { %s9756_s0 = sld [smem:[#allocation5 + $0x201]]  ;;  %v1834_v10 = vstv %s9721_s13  ;;  %v1805_v38 = vadd.f32 %v1803_v19, %v1797_v18  ;;  %v1806_v49 = vadd.f32 %v1804_v33, %v1798_v32  ;;  %v9833_v55 = vmul.f32 %v9739_v46, %v1818_v34 }
 0x1e8   : > { %s9763_s18 = sld [smem:[#allocation5 + $0x202]]  ;;  %v1842_v26 = vstv %s9732_s14  ;;  %v1835_v28 = vmul.f32 %v1834_v10, %v9666_v8  ;;  %v1836_v29 = vmul.f32 %v1834_v10, %v9679_v12 }
 0x1e9   : > { %s9767_s3 = sld [smem:[#allocation5 + $0x203]]  ;;  %v1850_v35 = vstv %s9735_s29  ;;  %v1843_v39 = vmul.f32 %v9683_v14, %v1842_v26  ;;  %v1844_v41 = vmul.f32 %v9701_v23, %v1842_v26  ;;  %v9846_v1 = vadd.f32 %v1811_v50, %v1805_v38 }
 0x1ea   : > { %s9775_s26 = sld [smem:[#allocation9 + $0x5]]  ;;  %v1837_v47 = vadd.f32 %v1835_v28, %v1829_v30  ;;  %v1838_v48 = vadd.f32 %v1836_v29, %v1829_v30  ;;  %v1858_v53 = vstv %s9744_s8  ;;  %v1851_v56 = vmul.f32 %v9705_v25, %v1850_v35 }
 0x1eb   : > { %s9779_s12 = sld [smem:[#allocation5 + $0x280]]  ;;  %v1874_v27 = vstv %s9748_s11  ;;  %v1852_v0 = vmul.f32 %v9724_v37, %v1850_v35  ;;  %v9848_v2 = vadd.f32 %v1812_v51, %v1806_v49  ;;  %v9851_v3 = vmul.f32 %v9728_v40, %v1858_v53 }
 0x1ec   : > { %s9784_s22 = sld [smem:[#allocation5 + $0x281]]  ;;  %v1875_v42 = vmul.f32 %v1874_v27, %v9666_v8  ;;  %v1876_v43 = vmul.f32 %v1874_v27, %v9679_v12  ;;  %v1869_v44 = vstv %s9751_s28  ;;  %v1845_v62 = vadd.f32 %v1843_v39, %v1837_v47 }
 0x1ed   : > { %s9795_s7 = sld [smem:[#allocation5 + $0x282]]  ;;  %v1882_v45 = vstv %s9756_s0  ;;  %v1846_v63 = vadd.f32 %v1844_v41, %v1838_v48  ;;  %v9860_v15 = vmul.f32 %v9739_v46, %v1858_v53 }
 0x1ee   : > { %s9800_s6 = sld [smem:[#allocation5 + $0x283]]  ;;  %v1877_v57 = vadd.f32 %v1875_v42, %v1869_v44  ;;  %v1878_v58 = vadd.f32 %v1876_v43, %v1869_v44  ;;  %v1883_v59 = vmul.f32 %v9683_v14, %v1882_v45  ;;  %v1884_v60 = vmul.f32 %v9701_v23, %v1882_v45 }
 0x1ef   : > { %s9807_s13 = sld [smem:[#allocation9 + $0x6]]  ;;  %v1890_v61 = vstv %s9763_s18  ;;  %v1898_v10 = vstv %s9767_s3  ;;  %v9867_v26 = vadd.f32 %v1851_v56, %v1845_v62  ;;  %v9869_v27 = vadd.f32 %v1852_v0, %v1846_v63 }
 0x1f0   : > { %s9811_s14 = sld [smem:[#allocation5 + $0x300]]  ;;  %v1909_v11 = vstv %s9775_s26  ;;  %v1885_v16 = vadd.f32 %v1883_v59, %v1877_v57  ;;  %v1886_v17 = vadd.f32 %v1884_v60, %v1878_v58  ;;  %v1891_v18 = vmul.f32 %v9705_v25, %v1890_v61 }
 0x1f1   : > { %s9819_s5 = sld [smem:[#allocation5 + $0x301]]  ;;  %v1914_v54 = vstv %s9779_s12  ;;  %v1892_v19 = vmul.f32 %v9724_v37, %v1890_v61  ;;  %v9882_v38 = vmul.f32 %v9728_v40, %v1898_v10  ;;  %v9885_v39 = vmul.f32 %v9739_v46, %v1898_v10 }
 0x1f2   : > { %s9821_s15 = sld [smem:[#allocation5 + $0x380]]  ;;  %v1915_v4 = vmul.f32 %v1914_v54, %v9666_v8  ;;  %v1922_v13 = vstv %s9784_s22  ;;  %v1916_v28 = vmul.f32 %v1914_v54, %v9679_v12  ;;  %v9890_v42 = vadd.f32 %v1891_v18, %v1885_v16 }
 0x1f3   : > { %s9830_s29 = sld [smem:[#allocation5 + $0x400]]  ;;  %v1930_v20 = vstv %s9795_s7  ;;  %v1923_v33 = vmul.f32 %v9683_v14, %v1922_v13  ;;  %v9892_v43 = vadd.f32 %v1892_v19, %v1886_v17  ;;  %v1924_v44 = vmul.f32 %v9701_v23, %v1922_v13 }
 0x1f4   : > { %s9836_s11 = sld [smem:[#allocation9 + $0x7]]  ;;  %v1917_v32 = vadd.f32 %v1915_v4, %v1909_v11  ;;  %v1938_v34 = vstv %s9800_s6  ;;  %v1918_v47 = vadd.f32 %v1916_v28, %v1909_v11  ;;  %v1931_v61 = vmul.f32 %v9705_v25, %v1930_v20  ;;  %s10018_s6 = smov 0  }
 0x1f5   : > { %s9841_s8 = sld [smem:[#allocation5 + $0x381]]  ;;  %v1949_v41 = vstv %s9807_s13  ;;  %v1932_v62 = vmul.f32 %v9724_v37, %v1930_v20 }
 0x1f6   : > { %s9844_s28 = sld [smem:[#allocation9 + $0x8]]  ;;  %v1954_v29 = vstv %s9811_s14  ;;  %v1925_v53 = vadd.f32 %v1923_v33, %v1917_v32 }
 0x1f7   : > { %s9857_s0 = sld [smem:[#allocation5 + $0x401]]  ;;  %v1962_v45 = vstv %s9819_s5  ;;  %v1955_v48 = vmul.f32 %v1954_v29, %v9666_v8  ;;  %v1956_v58 = vmul.f32 %v1954_v29, %v9679_v12 }
 0x1f8   : > { %s9862_s18 = sld [smem:[#allocation5 + $0x302]]  ;;  %v1994_v30 = vstv %s9821_s15  ;;  %v1963_v63 = vmul.f32 %v9683_v14, %v1962_v45 }
 0x1f9   : > { %s9874_s3 = sld [smem:[#allocation5 + $0x382]]  ;;  %v2034_v35 = vstv %s9830_s29  ;;  %v1995_v49 = vmul.f32 %v1994_v30, %v9666_v8  ;;  %v1996_v59 = vmul.f32 %v1994_v30, %v9679_v12  ;;  %v1957_v0 = vadd.f32 %v1955_v48, %v1949_v41 }
 0x1fa   : > { %s9879_s26 = sld [smem:[#allocation5 + $0x402]]  ;;  %v1989_v50 = vstv %s9836_s11  ;;  %v2035_v54 = vmul.f32 %v2034_v35, %v9666_v8  ;;  %v1964_v8 = vmul.f32 %v9701_v23, %v1962_v45  ;;  %v2036_v13 = vmul.f32 %v2034_v35, %v9679_v12 }
 0x1fb   : > { %s9888_s12 = sld [smem:[#allocation5 + $0x303]]  ;;  %v2002_v51 = vstv %s9841_s8  ;;  %v1997_v4 = vadd.f32 %v1995_v49, %v1989_v50  ;;  %v1958_v19 = vadd.f32 %v1956_v58, %v1949_v41  ;;  %v1998_v28 = vadd.f32 %v1996_v59, %v1989_v50 }
 0x1fc   : > { %s9896_s22 = sld [smem:[#allocation5 + $0x383]]  ;;  %v2029_v56 = vstv %s9844_s28  ;;  %v2003_v10 = vmul.f32 %v9683_v14, %v2002_v51  ;;  %v2004_v20 = vmul.f32 %v9701_v23, %v2002_v51  ;;  %v1926_v30 = vadd.f32 %v1924_v44, %v1918_v47 }
 0x1fd   : > { %v2042_v57 = vstv %s9857_s0  ;;  %s9905_s7 = sld [smem:[#allocation5 + $0x403]]  ;;  %v2037_v16 = vadd.f32 %v2035_v54, %v2029_v56  ;;  %v1965_v48 = vadd.f32 %v1963_v63, %v1957_v0  ;;  %v2038_v35 = vadd.f32 %v2036_v13, %v2029_v56 }
 0x1fe   : > { %v1970_v60 = vstv %s9862_s18  ;;  %v2043_v17 = vmul.f32 %v9683_v14, %v2042_v57  ;;  %v2005_v49 = vadd.f32 %v2003_v10, %v1997_v4  ;;  %v2044_v14 = vmul.f32 %v9701_v23, %v2042_v57 }
 0x1ff   : > { %v2010_v11 = vstv %s9874_s3  ;;  %v1971_v32 = vmul.f32 %v9705_v25, %v1970_v60  ;;  %v1972_v33 = vmul.f32 %v9724_v37, %v1970_v60  ;;  %v1966_v51 = vadd.f32 %v1964_v8, %v1958_v19 }
 0x200   : > { %v2050_v18 = vstv %s9879_s26  ;;  %v2011_v12 = vmul.f32 %v9705_v25, %v2010_v11  ;;  %v2045_v54 = vadd.f32 %v2043_v17, %v2037_v16  ;;  %v2006_v58 = vadd.f32 %v2004_v20, %v1998_v28 }
 0x201   : > { %v1978_v29 = vstv %s9888_s12  ;;  %v2051_v41 = vmul.f32 %v9705_v25, %v2050_v18  ;;  %v2012_v44 = vmul.f32 %v9724_v37, %v2010_v11  ;;  %v1933_v47 = vadd.f32 %v1931_v61, %v1925_v53 }
 0x202   : > { %v2018_v45 = vstv %s9896_s22  ;;  %v1934_v59 = vadd.f32 %v1932_v62, %v1926_v30  ;;  %v1939_v60 = vmul.f32 %v9728_v40, %v1938_v34  ;;  %v1940_v63 = vmul.f32 %v9739_v46, %v1938_v34 }
 0x203   : > { %v2058_v50 = vstv %s9905_s7  ;;  %v1973_v0 = vadd.f32 %v1971_v32, %v1965_v48  ;;  %v1979_v56 = vmul.f32 %v9728_v40, %v1978_v29  ;;  %v2013_v4 = vadd.f32 %v2011_v12, %v2005_v49 }
 0x204   : > { %v2019_v23 = vmul.f32 %v9728_v40, %v2018_v45  ;;  %v2046_v57 = vadd.f32 %v2044_v14, %v2038_v35  ;;  %v2052_v25 = vmul.f32 %v9724_v37, %v2050_v18  ;;  %v2053_v10 = vadd.f32 %v2051_v41, %v2045_v54 }
 0x205   : > { %v2059_v8 = vmul.f32 %v9728_v40, %v2058_v50  ;;  %v1974_v13 = vadd.f32 %v1972_v33, %v1966_v51  ;;  %v1980_v53 = vmul.f32 %v9739_v46, %v1978_v29  ;;  %v2014_v61 = vadd.f32 %v2012_v44, %v2006_v58 }
 0x206   : > { %v2020_v62 = vmul.f32 %v9739_v46, %v2018_v45  ;;  %v1782_v34 = vadd.f32 %v9791_v24, %v9802_v31  ;;  %v1821_v11 = vadd.f32 %v9826_v52, %v9846_v1  ;;  %v1822_v16 = vadd.f32 %v9833_v55, %v9848_v2 }
 0x207   : > { %v1861_v37 = vadd.f32 %v9851_v3, %v9867_v26  ;;  %v1862_v40 = vadd.f32 %v9860_v15, %v9869_v27  ;;  %v1901_v17 = vadd.f32 %v9882_v38, %v9890_v42  ;;  %v1941_v18 = vadd.f32 %v1939_v60, %v1933_v47 }
 0x208   : > { %v1981_v19 = vadd.f32 %v1979_v56, %v1973_v0  ;;  %v2021_v28 = vadd.f32 %v2019_v23, %v2013_v4  ;;  %v2054_v20 = vadd.f32 %v2052_v25, %v2046_v57  ;;  %v2060_v24 = vmul.f32 %v9739_v46, %v2058_v50  ;;  %v1597_v50 = vld [vmem:[#allocation20] sm:$0x3] }
 0x209   : > { %v2061_v31 = vadd.f32 %v2059_v8, %v2053_v10  ;;  %v1902_v55 = vadd.f32 %v9885_v39, %v9892_v43  ;;  %v1942_v1 = vadd.f32 %v1940_v63, %v1934_v59  ;;  %v1982_v2 = vadd.f32 %v1980_v53, %v1974_v13 }
 0x20a   : > { %v2022_v3 = vadd.f32 %v2020_v62, %v2014_v61  ;;  %v1580_v29 = vadd.f32 %v9772_v9, %v9769_v7  ;;  %v1599_v14 = vlaneseq }
 0x20c   : > { %v10002_v54 = vshrl.u32 %v1599_v14, 7 }
 0x20e   : > { %v10005_v41 = vsub.s32 0, %v10002_v54  ;;  %v10008_v51 = vsub.s32 1, %v10002_v54 }
 0x210   : > { %v1602_v58 = vrot.slane %v1597_v50, %v10005_v41  ;;  %v1606_v44 = vrot.slane %v1597_v50, %v10008_v51 }
 0x24c   : > { %v9950_v52 = vpop.permute.xlu0 %1583 }
 0x24d   : > { %v1591_v15 = vmul.f32 %v9950_v52, %v9765_v6  ;;  %v1744_v26 = vmul.f32 %v9786_v21, %v9950_v52  ;;  %v1783_v27 = vmul.f32 %v9809_v36, %v9950_v52  ;;  %v1823_v46 = vmul.f32 %v1821_v11, %v9950_v52 }
 0x24e   : > { %v1863_v38 = vmul.f32 %v1861_v37, %v9950_v52  ;;  %v1903_v42 = vmul.f32 %v1901_v17, %v9950_v52  ;;  %v1943_v39 = vmul.f32 %v1941_v18, %v9950_v52  ;;  %v1983_v43 = vmul.f32 %v1981_v19, %v9950_v52 }
 0x24f   : > { %7093 = vmatmul.mubr.msk.f32.vlgmr.msra.gmra.mxu0 %vm1609_vm1, %v1591_v15  ;;  %1746 = vst.msk [vmem:[#allocation3] sm:$0xff] %vm1609_vm1, %v1744_v26  ;;  %1786 = vst.msk [vmem:[#allocation3 + $0x10] sm:$0xff] %vm1609_vm1, %v1783_v27  ;;  %v2023_v6 = vmul.f32 %v2021_v28, %v9950_v52  ;;  %v2062_v21 = vadd.f32 %v2060_v24, %v2054_v20  ;;  %v2063_v36 = vmul.f32 %v2061_v31, %v9950_v52 }
 0x250   : > { %1826 = vst.msk [vmem:[#allocation3 + $0x20] sm:$0xff] %vm1609_vm1, %v1823_v46  ;;  %v9973_v30 = vpop.permute.xlu0 %1588  ;;  %1866 = vst.msk [vmem:[#allocation3 + $0x30] sm:$0xff] %vm1609_vm1, %v1863_v38 }
 0x251   : > { %1906 = vst.msk [vmem:[#allocation3 + $0x40] sm:$0xff] %vm1609_vm1, %v1903_v42  ;;  %1946 = vst.msk [vmem:[#allocation3 + $0x50] sm:$0xff] %vm1609_vm1, %v1943_v39  ;;  %v1745_v32 = vmul.f32 %v9788_v22, %v9973_v30  ;;  %v1784_v33 = vmul.f32 %v1782_v34, %v9973_v30  ;;  %v1824_v45 = vmul.f32 %v1822_v16, %v9973_v30 }
 0x252   : > { %1986 = vst.msk [vmem:[#allocation3 + $0x60] sm:$0xff] %vm1609_vm1, %v1983_v43  ;;  %v1864_v48 = vmul.f32 %v1862_v40, %v9973_v30  ;;  %2026 = vst.msk [vmem:[#allocation3 + $0x70] sm:$0xff] %vm1609_vm1, %v2023_v6  ;;  %v1904_v7 = vmul.f32 %v1902_v55, %v9973_v30  ;;  %v1944_v9 = vmul.f32 %v1942_v1, %v9973_v30 }
 0x253   : > { %2066 = vst.msk [vmem:[#allocation3 + $0x80] sm:$0xff] %vm1609_vm1, %v2063_v36  ;;  %v1984_v49 = vmul.f32 %v1982_v2, %v9973_v30  ;;  %v2024_v12 = vmul.f32 %v2022_v3, %v9973_v30  ;;  %1747 = vst.msk [vmem:[#allocation3 + $0x8] sm:$0xff] %vm1609_vm1, %v1745_v32  ;;  %v2064_v22 = vmul.f32 %v2062_v21, %v9973_v30 }
 0x254   : > { %1787 = vst.msk [vmem:[#allocation3 + $0x18] sm:$0xff] %vm1609_vm1, %v1784_v33  ;;  %1827 = vst.msk [vmem:[#allocation3 + $0x28] sm:$0xff] %vm1609_vm1, %v1824_v45  ;;  %v1592_v35 = vmul.f32 %v9973_v30, %v1580_v29 }
 0x255   : > { %1867 = vst.msk [vmem:[#allocation3 + $0x38] sm:$0xff] %vm1609_vm1, %v1864_v48  ;;  %1907 = vst.msk [vmem:[#allocation3 + $0x48] sm:$0xff] %vm1609_vm1, %v1904_v7 }
 0x256   : > { %1947 = vst.msk [vmem:[#allocation3 + $0x58] sm:$0xff] %vm1609_vm1, %v1944_v9  ;;  %1987 = vst.msk [vmem:[#allocation3 + $0x68] sm:$0xff] %vm1609_vm1, %v1984_v49  ;;  %7094 = vmatmul.mubr.msk.f32.vlgmr.msra.gmra.mxu1 %vm1609_vm1, %v1592_v35 }
 0x257   : > { %2027 = vst.msk [vmem:[#allocation3 + $0x78] sm:$0xff] %vm1609_vm1, %v2024_v12  ;;  %2067 = vst.msk [vmem:[#allocation3 + $0x88] sm:$0xff] %vm1609_vm1, %v2064_v22 }
 0x30f   : > { %v1689_v47 = vpop.f32.mrf.mxu0 }
 0x310   : > { %v1690_v59 = vadd.f32 %v1689_v47, %v1602_v58 }
 0x311   : > { %v1691_v60 = vpop.f32.mrf.mxu0 }
 0x312   : > { %v1700_v63 = vmul.f32 %v1690_v59, %v9950_v52  ;;  %v1692_v0 = vadd.f32 %v1691_v60, %v1606_v44 }
 0x314   : > { %1704 = vst [vmem:[#allocation2] sm:$0xff] %v1700_v63  ;;  %v1701_v56 = vmul.f32 %v1692_v0, %v9950_v52 }
 0x316   : > { %v1695_v4 = vpop.f32.mrf.mxu1  ;;  %1706 = vst.msk [vmem:[#allocation2 + $0x8] sm:$0xff] %vm1705_vm2, %v1701_v56 }
 0x317   : > { %v1696_v23 = vadd.f32 %v1695_v4, %v1602_v58 }
 0x318   : > { %v1697_v57 = vpop.f32.mrf.mxu1 }
 0x319   : > { %v1702_v25 = vmul.f32 %v1696_v23, %v9973_v30  ;;  %v1698_v10 = vadd.f32 %v1697_v57, %v1606_v44 }
 0x31b   : > { %1707 = vst [vmem:[#allocation2 + $0x10] sm:$0xff] %v1702_v25  ;;  %v1703_v8 = vmul.f32 %v1698_v10, %v9973_v30 }
 0x31d   : > { %1708 = vst.msk [vmem:[#allocation2 + $0x18] sm:$0xff] %vm1705_vm2, %v1703_v8 }
 0x31e LB: >> { %s2074_s13 = sld [smem:[#allocation10 + %s9037_s6]]  ;;  %s9037_s6 = sphi %s10018_s6, %s2073_s6  }
 0x324   : >> { %p7192_p5 = scmp.ne.s32.totalorder %s2074_s13, 1 }
 0x325   : >> { %s10025_s14 = sld [smem:[#allocation12 + %s9037_s6]] (!%p7192_p5)  ;;  %s9117_s22 = smov (!%p7192_p5), 32  }
 0x326   : >> { %2078 = sbr.rel (%p7192_p5) target bundleno = 3789 (0xecd), region = 287  ;;  %s9118_s7 = smov (!%p7192_p5), 64  }
 0x327   : >> { %s9119_s13 = smov (!%p7192_p5), 96  }
 0x32b   : >> { %v9116_v13 = vmov 0.0   ;;  %s7418_s5 = sshll.u32 %s10025_s14, 5  ;;  %s7193_s15 = sshll.u32 %s10025_s14, 4  ;;  %v2083_v37 = vld [vmem:[#allocation2 + $0x18] sm:$0xff]  ;;  %v2082_v40 = vld [vmem:[#allocation2 + $0x10] sm:$0xff]  ;;  %v2081_v17 = vld [vmem:[#allocation2 + $0x8] sm:$0xff] }
 0x32c   : >> { %2185 = vmatprep.mubr.f32.mxu0 %v9116_v13  ;;  %2387 = vmatprep.mubr.f32.mxu1 %v9116_v13  ;;  %s2090_s29 = scalar_lea.vmem [#allocation22], %s7418_s5  ;;  %s2085_s11 = scalar_lea.vmem [#allocation3], %s7193_s15  ;;  %v2080_v18 = vld [vmem:[#allocation2] sm:$0xff]  ;;  %vm2262_vm3 = vcmask 130048   ;;  %vm4093_vm8 = vcmask 523264   ;;  %vm4110_vm9 = vcmask 785408  }
 0x32d   : >> { %v2094_v53 = vld [vmem:[%s2090_s29 + $0x18] sm:$0xf]  ;;  %v2093_v61 = vld [vmem:[%s2090_s29 + $0x10] sm:$0xf]  ;;  %v2092_v62 = vld [vmem:[%s2090_s29 + $0x8] sm:$0xff]  ;;  %2351 = vmatprep.subr.mxu1 %v2083_v37  ;;  %s10038_s8 = sshll.u32 %s10025_s14, 1 }
 0x32e   : >> { %7197 = vmatprep.subr.msk.mxu0 %vm1616_vm0, %v2094_v53  ;;  %v2091_v34 = vld [vmem:[%s2090_s29] sm:$0xff]  ;;  %v2087_v16 = vld [vmem:[%s2085_s11 + $0x8] sm:$0xff]  ;;  %2352 = vmatpush1.msra.mxu1 %v2082_v40  ;;  %s2096_s28 = scalar_lea.vmem [#allocation23], %s10038_s8  ;;  %s7419_s0 = smul.u32 320, %s10025_s14 }
 0x32f   : >> { %7198 = vmatpush1.msk.msra.mxu0 %vm1616_vm0, %v2093_v61  ;;  %v2086_v11 = vld [vmem:[%s2085_s11] sm:$0xff]  ;;  %2353 = vmatprep.subr.mxu1 %v2081_v17  ;;  %s3154_s26 = scalar_lea.vmem [#allocation26], %s10038_s8  ;;  %s3400_s12 = scalar_lea.vmem [#allocation29], %s10038_s8 }
 0x330   : >> { %2151 = vmatprep.subr.mxu0 %v2092_v62  ;;  %2354 = vmatpush1.msra.mxu1 %v2080_v18  ;;  %v2097_v19 = vld [vmem:[%s2096_s28] sm:$0x3]  ;;  %s10474_s18 = scalar_lea.vmem [#allocation25], %s7419_s0  ;;  %s10600_s3 = scalar_lea.vmem [#allocation28], %s7419_s0 }
 0x331   : >> { %2152 = vmatpush1.msra.mxu0 %v2091_v34  ;;  %v2102_v28 = vrot.slane %v2097_v19, %v10005_v41  ;;  %v2106_v20 = vrot.slane %v2097_v19, %v10008_v51  ;;  %s7265_s5 = sshll.u32 %s10025_s14, 7  ;;  %s4252_s11 = scalar_lea.vmem [#allocation32], %s10025_s14 }
 0x332   : >> { %7199 = vmatmul.mubr.msk.f32.vlgmr.msra.gmra.mxu0 %vm1609_vm1, %v2086_v11  ;;  %s10961_s15 = scalar_lea.vmem [#allocation31], %s7265_s5  ;;  %s11050_s29 = scalar_lea.vmem [#allocation34], %s7265_s5 }
 0x333   : >> { %2191 = vmatprep.mubr.f32.mxu0 %v9116_v13  ;;  %s4406_s8 = scalar_lea.vmem [#allocation35], %s10025_s14 }
 0x336   : >> { %7200 = vmatmul.mubr.msk.f32.gmra.mxu0 %vm1609_vm1, %v2087_v16 }
 0x337   : >> { %7241 = vmatprep.mubr.msk.f32.mxu0 %vm1705_vm2, %v2081_v17 }
 0x3f2   : >> { %v2187_v24 = vpop.f32.mrf.mxu0 }
 0x3f3   : >> { %v2188_v31 = vadd.f32 %v2187_v24, %v2102_v28  ;;  %v2575_v24 = vld [vmem:[#allocation16 + $0xd8] sm:$0xff] }
 0x3f4   : >> { %v2189_v55 = vpop.f32.mrf.mxu0 }
 0x3f5   : >> { %2198 = vxpose.xlu0.b32.start [1/2] (short) %v2188_v31, 128  ;;  %v2190_v1 = vadd.f32 %v2189_v55, %v2106_v20 }
 0x3f6   : >> { %v2193_v2 = vpop.f32.mrf.mxu0 }
 0x3f7   : >> { %v2194_v3 = vadd.f32 %v2193_v2, %v2102_v28  ;;  %2230 = vxpose.xlu1.b32.start [1/2] (short) (narrow) %v2190_v1, 32  ;;  %v2577_v1 = vld [vmem:[#allocation16 + $0xe8] sm:$0xff]  ;;  %v2576_v2 = vld [vmem:[#allocation16 + $0xe0] sm:$0xff] }
 0x3f8   : >> { %v2195_v15 = vpop.f32.mrf.mxu0 }
 0x3f9   : >> { %v2196_v26 = vadd.f32 %v2195_v15, %v2106_v20  ;;  %2199 = vxpose.xlu0.b32.end [2/2] (short) %v2194_v3, 128 }
 0x3fb   : >> { %2231 = vxpose.xlu1.b32.end [2/2] (short) (narrow) %v2196_v26, 32 }
 0x471   : >> { %v2214_v27 = vpop.trf.xlu0 }
 0x472   : >> { %7201 = vmatmul.mubr.msk.f32.vlgmr.msra.gmra.mxu1 %vm2262_vm3, %v2214_v27 }
 0x473   : >> { %2393 = vmatprep.mubr.f32.mxu1 %v9116_v13  ;;  %v2246_v9 = vpop.trf.xlu1 }
 0x475   : >> { %v2215_v46 = vpop.trf.xlu0 }
 0x476   : >> { %7202 = vmatmul.mubr.msk.f32.gmra.mxu1 %vm2262_vm3, %v2215_v46 }
 0x477   : >> { %2399 = vmatprep.mubr.f32.mxu1 %v9116_v13  ;;  %v2247_v12 = vpop.trf.xlu1 }
 0x479   : >> { %v2216_v38 = vpop.trf.xlu0 }
 0x47a   : >> { %7203 = vmatmul.mubr.msk.f32.gmra.mxu1 %vm2262_vm3, %v2216_v38  ;;  %v2573_v38 = vld [vmem:[#allocation16 + $0xc8] sm:$0xff] }
 0x47b   : >> { %2405 = vmatprep.mubr.f32.mxu1 %v9116_v13  ;;  %v2248_v22 = vpop.trf.xlu1 }
 0x47d   : >> { %v2217_v42 = vpop.trf.xlu0 }
 0x47e   : >> { %7204 = vmatmul.mubr.msk.f32.gmra.mxu1 %vm2262_vm3, %v2217_v42 }
 0x47f   : >> { %2411 = vmatprep.mubr.f32.mxu1 %v9116_v13  ;;  %v2249_v35 = vpop.trf.xlu1 }
 0x481   : >> { %v2218_v39 = vpop.trf.xlu0 }
 0x482   : >> { %7205 = vmatmul.mubr.msk.f32.gmra.mxu1 %vm2262_vm3, %v2218_v39 }
 0x483   : >> { %2417 = vmatprep.mubr.f32.mxu1 %v9116_v13 }
 0x485   : >> { %v2219_v43 = vpop.trf.xlu0 }
 0x486   : >> { %7206 = vmatmul.mubr.msk.f32.gmra.mxu1 %vm2262_vm3, %v2219_v43 }
 0x487   : >> { %2423 = vmatprep.mubr.f32.mxu1 %v9116_v13 }
 0x489   : >> { %v2220_v6 = vpop.trf.xlu0 }
 0x48a   : >> { %7207 = vmatmul.mubr.msk.f32.gmra.mxu1 %vm2262_vm3, %v2220_v6 }
 0x48b   : >> { %2429 = vmatprep.mubr.f32.mxu1 %v9116_v13 }
 0x48d   : >> { %v2221_v21 = vpop.trf.xlu0 }
 0x48e   : >> { %7208 = vmatmul.mubr.msk.f32.gmra.mxu1 %vm2262_vm3, %v2221_v21  ;;  %v2579_v21 = vld [vmem:[#allocation16 + $0xf8] sm:$0xff] }
 0x48f   : >> { %2435 = vmatprep.mubr.f32.mxu1 %v9116_v13 }
 0x491   : >> { %v2222_v36 = vpop.trf.xlu0 }
 0x492   : >> { %7209 = vmatmul.mubr.msk.f32.gmra.mxu1 %vm2262_vm3, %v2222_v36  ;;  %v2574_v36 = vld [vmem:[#allocation16 + $0xd0] sm:$0xff] }
 0x493   : >> { %2441 = vmatprep.mubr.f32.mxu1 %v9116_v13 }
 0x495   : >> { %v2223_v29 = vpop.trf.xlu0 }
 0x496   : >> { %7210 = vmatmul.mubr.msk.f32.gmra.mxu1 %vm2262_vm3, %v2223_v29  ;;  %v2578_v29 = vld [vmem:[#allocation16 + $0xf0] sm:$0xff] }
 0x497   : >> { %2447 = vmatprep.mubr.f32.mxu1 %v9116_v13 }
 0x499   : >> { %v2224_v32 = vpop.trf.xlu0 }
 0x49a   : >> { %7211 = vmatmul.mubr.msk.f32.gmra.mxu1 %vm2262_vm3, %v2224_v32 }
 0x49b   : >> { %2453 = vmatprep.mubr.f32.mxu1 %v9116_v13 }
 0x49d   : >> { %v2225_v33 = vpop.trf.xlu0 }
 0x49e   : >> { %7212 = vmatmul.mubr.msk.f32.gmra.mxu1 %vm2262_vm3, %v2225_v33 }
 0x49f   : >> { %2459 = vmatprep.mubr.f32.mxu1 %v9116_v13 }
 0x4a1   : >> { %v2226_v45 = vpop.trf.xlu0 }
 0x4a2   : >> { %7213 = vmatmul.mubr.msk.f32.gmra.mxu1 %vm2262_vm3, %v2226_v45 }
 0x4a3   : >> { %2465 = vmatprep.mubr.f32.mxu1 %v9116_v13 }
 0x4a5   : >> { %v2227_v48 = vpop.trf.xlu0 }
 0x4a6   : >> { %7214 = vmatmul.mubr.msk.f32.gmra.mxu1 %vm2262_vm3, %v2227_v48 }
 0x4a7   : >> { %2471 = vmatprep.mubr.f32.mxu1 %v9116_v13 }
 0x4a9   : >> { %v2228_v7 = vpop.trf.xlu0 }
 0x4aa   : >> { %7215 = vmatmul.mubr.msk.f32.gmra.mxu1 %vm2262_vm3, %v2228_v7 }
 0x4ab   : >> { %2477 = vmatprep.mubr.f32.mxu1 %v9116_v13 }
 0x4ad   : >> { %v2229_v49 = vpop.trf.xlu0 }
 0x4ae   : >> { %7216 = vmatmul.mubr.msk.f32.gmra.mxu1 %vm2262_vm3, %v2229_v49 }
 0x4af   : >> { %2483 = vmatprep.mubr.f32.mxu1 %v9116_v13 }
 0x4b2   : >> { %7217 = vmatmul.mubr.msk.f32.gmra.mxu1 %vm2262_vm3, %v2246_v9 }
 0x4b3   : >> { %2489 = vmatprep.mubr.f32.mxu1 %v9116_v13 }
 0x4b6   : >> { %7218 = vmatmul.mubr.msk.f32.gmra.mxu1 %vm2262_vm3, %v2247_v12 }
 0x4b7   : >> { %2495 = vmatprep.mubr.f32.mxu1 %v9116_v13 }
 0x4ba   : >> { %7219 = vmatmul.mubr.msk.f32.gmra.mxu1 %vm2262_vm3, %v2248_v22  ;;  %v2571_v22 = vld [vmem:[#allocation16 + $0xb8] sm:$0xff] }
 0x4bb   : >> { %2501 = vmatprep.mubr.f32.mxu1 %v9116_v13 }
 0x4be   : >> { %7220 = vmatmul.mubr.msk.f32.gmra.mxu1 %vm2262_vm3, %v2249_v35 }
 0x532   : >> { %v10082_v14 = vpop.f32.mrf.mxu1 }
 0x534   : >> { %v10084_v50 = vpop.f32.mrf.mxu1 }
 0x536   : >> { %v10086_v58 = vpop.f32.mrf.mxu1 }
 0x538   : >> { %v10088_v44 = vpop.f32.mrf.mxu1 }
 0x53a   : >> { %v10090_v47 = vpop.f32.mrf.mxu1 }
 0x53c   : >> { %v10092_v59 = vpop.f32.mrf.mxu1 }
 0x53e   : >> { %v10094_v60 = vpop.f32.mrf.mxu1 }
 0x540   : >> { %v10096_v63 = vpop.f32.mrf.mxu1 }
 0x542   : >> { %v10098_v0 = vpop.f32.mrf.mxu1 }
 0x544   : >> { %v10100_v56 = vpop.f32.mrf.mxu1 }
 0x546   : >> { %v10102_v4 = vpop.f32.mrf.mxu1 }
 0x548   : >> { %v10104_v23 = vpop.f32.mrf.mxu1 }
 0x54a   : >> { %v10106_v57 = vpop.f32.mrf.mxu1 }
 0x54c   : >> { %v10108_v25 = vpop.f32.mrf.mxu1 }
 0x54e   : >> { %v10110_v10 = vpop.f32.mrf.mxu1 }
 0x550   : >> { %v10112_v8 = vpop.f32.mrf.mxu1 }
 0x552   : >> { %v10114_v13 = vpop.f32.mrf.mxu1 }
 0x554   : >> { %v10116_v53 = vpop.f32.mrf.mxu1 }
 0x556   : >> { %v10118_v61 = vpop.f32.mrf.mxu1 }
 0x558   : >> { %v2445_v62 = vpop.f32.mrf.mxu1 }
 0x55a   : >> { %v2449_v34 = vpop.f32.mrf.mxu1 }
 0x55c   : >> { %v2451_v11 = vpop.f32.mrf.mxu1 }
 0x55e   : >> { %v2455_v16 = vpop.f32.mrf.mxu1 }
 0x560   : >> { %v2457_v37 = vpop.f32.mrf.mxu1 }
 0x561   : >> { %v2531_v7 = vmul.f32 0.0625, %v2457_v37 }
 0x562   : >> { %v2461_v40 = vpop.f32.mrf.mxu1 }
 0x563   : >> { %v2532_v35 = vmul.f32 0.0625, %v2461_v40 }
 0x564   : >> { %v2463_v17 = vpop.f32.mrf.mxu1 }
 0x565   : >> { %v2533_v26 = vmul.f32 0.0625, %v2463_v17 }
 0x566   : >> { %v2467_v18 = vpop.f32.mrf.mxu1 }
 0x567   : >> { %v2534_v42 = vmul.f32 0.0625, %v2467_v18  ;;  %v10131_v9 = vadd.f32 %v2573_v38, %v2533_v26  ;;  %v2570_v38 = vld [vmem:[#allocation16 + $0xb0] sm:$0xff] }
 0x568   : >> { %v2469_v19 = vpop.f32.mrf.mxu1 }
 0x569   : >> { %v2535_v20 = vmul.f32 0.0625, %v2469_v19  ;;  %v10137_v17 = vadd.f32 %v2574_v36, %v2534_v42  ;;  %v2676_v40 = vsel %vm1705_vm2, %v10131_v9, -inf  ;;  %v2567_v36 = vld [vmem:[#allocation16 + $0x98] sm:$0xff] }
 0x56a   : >> { %v2473_v28 = vpop.f32.mrf.mxu1 }
 0x56b   : >> { %v2536_v31 = vmul.f32 0.0625, %v2473_v28  ;;  %v10120_v27 = vadd.f32 %v2575_v24, %v2535_v20  ;;  %v2572_v28 = vld [vmem:[#allocation16 + $0xc0] sm:$0xff] }
 0x56c   : >> { %v2475_v55 = vpop.f32.mrf.mxu1 }
 0x56d   : >> { %v2537_v3 = vmul.f32 0.0625, %v2475_v55  ;;  %v10124_v39 = vadd.f32 %v2576_v2, %v2536_v31  ;;  %v2680_v12 = vsel %vm1705_vm2, %v10120_v27, -inf  ;;  %v2529_v55 = vmul.f32 0.0625, %v2451_v11  ;;  %v2569_v2 = vld [vmem:[#allocation16 + $0xa8] sm:$0xff] }
 0x56e   : >> { %v2479_v15 = vpop.f32.mrf.mxu1  ;;  %v2681_v24 = vmax.f32 %v10137_v17, %v2680_v12 }
 0x56f   : >> { %v10122_v46 = vadd.f32 %v2577_v1, %v2537_v3  ;;  %v2538_v43 = vmul.f32 0.0625, %v2479_v15  ;;  %v10147_v1 = vadd.f32 %v2571_v22, %v2531_v7  ;;  %v2530_v3 = vmul.f32 0.0625, %v2455_v16  ;;  %v2583_v7 = vld [vmem:[#allocation16 + $0x118] sm:$0xff] }
 0x570   : >> { %v2481_v6 = vpop.f32.mrf.mxu1  ;;  %v10151_v15 = vadd.f32 %v2572_v28, %v2532_v35 }
 0x571   : >> { %v2539_v32 = vmul.f32 0.0625, %v2481_v6  ;;  %v2684_v33 = vsel %vm1705_vm2, %v10122_v46, -inf  ;;  %v10139_v18 = vadd.f32 %v2578_v29, %v2538_v43  ;;  %v2527_v6 = vmul.f32 0.0625, %v2445_v62 }
 0x572   : >> { %v10128_v45 = vpop.f32.mrf.mxu1  ;;  %v2685_v48 = vmax.f32 %v10124_v39, %v2684_v33  ;;  %v2677_v43 = vmax.f32 %v10151_v15, %v2676_v40  ;;  %v2672_v11 = vsel %vm1705_vm2, %v10147_v1, -inf  ;;  %v2528_v29 = vmul.f32 0.0625, %v2449_v34  ;;  %v2568_v33 = vld [vmem:[#allocation16 + $0xa0] sm:$0xff] }
 0x573   : >> { %v10133_v49 = vadd.f32 %v2579_v21, %v2539_v32  ;;  %v10156_v21 = vadd.f32 %v2569_v2, %v2529_v55  ;;  %v10160_v32 = vadd.f32 %v2570_v38, %v2530_v3  ;;  %v2525_v62 = vmul.f32 0.0625, %v10116_v53  ;;  %v2587_v3 = vld [vmem:[#allocation16 + $0x138] sm:$0xff]  ;;  %v2582_v38 = vld [vmem:[#allocation16 + $0x110] sm:$0xff] }
 0x574   : >> { %2686 = vmax.xlane.f32.xlu1 %v2685_v48  ;;  %v10141_v19 = vpop.f32.mrf.mxu1  ;;  %v10166_v35 = vadd.f32 %v2567_v36, %v2527_v6  ;;  %v10171_v55 = vadd.f32 %v2568_v33, %v2528_v29  ;;  %v2523_v36 = vmul.f32 0.0625, %v10112_v8  ;;  %v2563_v29 = vld [vmem:[#allocation16 + $0x78] sm:$0xff]  ;;  %v2524_v33 = vmul.f32 0.0625, %v10114_v13 }
 0x575   : >> { %v2688_v37 = vsel %vm1705_vm2, %v10133_v49, -inf  ;;  %v2673_v22 = vmax.f32 %v10160_v32, %v2672_v11  ;;  %v2668_v34 = vsel %vm1705_vm2, %v10156_v21, -inf }
 0x576   : >> { %v2491_v20 = vpop.f32.mrf.mxu1  ;;  %v2689_v31 = vmax.f32 %v10139_v18, %v2688_v37  ;;  %v2586_v37 = vld [vmem:[#allocation16 + $0x130] sm:$0xff]  ;;  %v2669_v11 = vmax.f32 %v10171_v55, %v2668_v34  ;;  %v2521_v34 = vmul.f32 0.0625, %v10108_v25 }
 0x577   : >> { %v2542_v40 = vmul.f32 0.0625, %v2491_v20  ;;  %v2664_v20 = vsel %vm1705_vm2, %v10166_v35, -inf }
 0x578   : >> { %2682 = vmax.xlane.f32.xlu1 %v2681_v24  ;;  %2690 = vmax.xlane.f32.xlu0 %v2689_v31  ;;  %v2493_v26 = vpop.f32.mrf.mxu1  ;;  %v2565_v24 = vld [vmem:[#allocation16 + $0x88] sm:$0xff]  ;;  %v2526_v31 = vmul.f32 0.0625, %v10118_v61 }
 0x579   : >> { %v2543_v48 = vmul.f32 0.0625, %v2493_v26  ;;  %v2566_v26 = vld [vmem:[#allocation16 + $0x90] sm:$0xff] }
 0x57a   : >> { %v10153_v42 = vpop.f32.mrf.mxu1 }
 0x57c   : >> { %2678 = vmax.xlane.f32.xlu1 %v2677_v43  ;;  %v10162_v16 = vpop.f32.mrf.mxu1  ;;  %v10173_v43 = vadd.f32 %v2583_v7, %v2543_v48  ;;  %v10188_v48 = vadd.f32 %v2582_v38, %v2542_v40  ;;  %v2564_v7 = vld [vmem:[#allocation16 + $0x80] sm:$0xff]  ;;  %v2522_v40 = vmul.f32 0.0625, %v10110_v10 }
 0x57e   : >> { %v2503_v12 = vpop.f32.mrf.mxu1  ;;  %v2696_v8 = vsel %vm1705_vm2, %v10173_v43, -inf }
 0x57f   : >> { %v2546_v28 = vmul.f32 0.0625, %v2503_v12  ;;  %v10179_v12 = vadd.f32 %v2565_v24, %v2525_v62  ;;  %v10197_v24 = vadd.f32 %v2563_v29, %v2523_v36  ;;  %v2559_v36 = vld [vmem:[#allocation16 + $0x58] sm:$0xff]  ;;  %v2560_v29 = vld [vmem:[#allocation16 + $0x60] sm:$0xff] }
 0x580   : >> { %2674 = vmax.xlane.f32.xlu1 %v2673_v22  ;;  %v2505_v2 = vpop.f32.mrf.mxu1  ;;  %v10186_v22 = vadd.f32 %v2566_v26, %v2526_v31  ;;  %v2561_v31 = vld [vmem:[#allocation16 + $0x68] sm:$0xff]  ;;  %v2562_v26 = vld [vmem:[#allocation16 + $0x70] sm:$0xff] }
 0x581   : >> { %v2547_v53 = vmul.f32 0.0625, %v2505_v2  ;;  %v10175_v6 = vadd.f32 %v2586_v37, %v2546_v28  ;;  %v2660_v13 = vsel %vm1705_vm2, %v10179_v12, -inf  ;;  %v10202_v2 = vadd.f32 %v2564_v7, %v2524_v33 }
 0x582   : >> { %v2665_v62 = vmax.f32 %v10186_v22, %v2664_v20  ;;  %v10207_v25 = vadd.f32 %v2561_v31, %v2521_v34  ;;  %v2520_v20 = vmul.f32 0.0625, %v10106_v57  ;;  %v10212_v10 = vadd.f32 %v2562_v26, %v2522_v40  ;;  %v2558_v57 = vld [vmem:[#allocation16 + $0x50] sm:$0xff]  ;;  %v2555_v40 = vld [vmem:[#allocation16 + $0x38] sm:$0xff] }
 0x583   : >> { %v10181_v61 = vadd.f32 %v2587_v3, %v2547_v53  ;;  %v2697_v3 = vmax.f32 %v10188_v48, %v2696_v8  ;;  %v2661_v38 = vmax.f32 %v10202_v2, %v2660_v13  ;;  %v2519_v53 = vmul.f32 0.0625, %v10104_v23  ;;  %v2557_v8 = vld [vmem:[#allocation16 + $0x48] sm:$0xff] }
 0x584   : >> { %2670 = vmax.xlane.f32.xlu1 %v2669_v11  ;;  %v2656_v11 = vsel %vm1705_vm2, %v10197_v24, -inf  ;;  %v2517_v7 = vmul.f32 0.0625, %v10100_v56  ;;  %v2652_v23 = vsel %vm1705_vm2, %v10207_v25, -inf  ;;  %v2515_v13 = vmul.f32 0.0625, %v10096_v63 }
 0x585   : >> { %v2704_v28 = vsel %vm1705_vm2, %v10181_v61, -inf  ;;  %v2657_v33 = vmax.f32 %v10212_v10, %v2656_v11 }
 0x586   : >> { %v2705_v37 = vmax.f32 %v10175_v6, %v2704_v28  ;;  %v10216_v28 = vadd.f32 %v2559_v36, %v2519_v53  ;;  %v10225_v31 = vadd.f32 %v2557_v8, %v2517_v7  ;;  %v2513_v53 = vmul.f32 0.0625, %v10092_v59  ;;  %v2553_v36 = vld [vmem:[#allocation16 + $0x28] sm:$0xff]  ;;  %v2551_v8 = vld [vmem:[#allocation16 + $0x18] sm:$0xff] }
 0x587   : >> { %v10234_v11 = vadd.f32 %v2555_v40, %v2515_v13  ;;  %v2511_v7 = vmul.f32 0.0625, %v10088_v44  ;;  %v2509_v13 = vmul.f32 0.0625, %v10084_v50  ;;  %v2549_v40 = vld [vmem:[#allocation16 + $0x8] sm:$0xff] }
 0x588   : >> { %2666 = vmax.xlane.f32.xlu1 %v2665_v62  ;;  %2706 = vmax.xlane.f32.xlu0 %v2705_v37  ;;  %v2518_v62 = vmul.f32 0.0625, %v10102_v4  ;;  %v10221_v37 = vadd.f32 %v2560_v29, %v2520_v20  ;;  %v2648_v56 = vsel %vm1705_vm2, %v10216_v28, -inf  ;;  %v2556_v4 = vld [vmem:[#allocation16 + $0x40] sm:$0xff]  ;;  %v2644_v63 = vsel %vm1705_vm2, %v10225_v31, -inf }
 0x589   : >> { %v2514_v20 = vmul.f32 0.0625, %v10094_v60  ;;  %v2640_v59 = vsel %vm1705_vm2, %v10234_v11, -inf  ;;  %v2552_v60 = vld [vmem:[#allocation16 + $0x20] sm:$0xff] }
 0x58a   : >> { %v2653_v34 = vmax.f32 %v10221_v37, %v2652_v23  ;;  %v10230_v26 = vadd.f32 %v2558_v57, %v2518_v62  ;;  %v10243_v23 = vadd.f32 %v2553_v36, %v2513_v53  ;;  %v2512_v62 = vmul.f32 0.0625, %v10090_v47  ;;  %v2550_v47 = vld [vmem:[#allocation16 + $0x10] sm:$0xff]  ;;  %v2585_v53 = vld [vmem:[#allocation16 + $0x128] sm:$0xff] }
 0x58b   : >> { %v10261_v36 = vadd.f32 %v2549_v40, %v2509_v13  ;;  %v2540_v13 = vmul.f32 0.0625, %v10128_v45  ;;  %v2580_v40 = vld [vmem:[#allocation16 + $0x100] sm:$0xff] }
 0x58c   : >> { %2662 = vmax.xlane.f32.xlu1 %v2661_v38  ;;  %2698 = vmax.xlane.f32.xlu0 %v2697_v3  ;;  %v2516_v3 = vmul.f32 0.0625, %v10098_v0  ;;  %v2649_v38 = vmax.f32 %v10230_v26, %v2648_v56  ;;  %v2554_v0 = vld [vmem:[#allocation16 + $0x30] sm:$0xff]  ;;  %v10252_v56 = vadd.f32 %v2551_v8, %v2511_v7  ;;  %v2636_v44 = vsel %vm1705_vm2, %v10243_v23, -inf  ;;  %v2584_v7 = vld [vmem:[#allocation16 + $0x120] sm:$0xff] }
 0x58d   : >> { %v10248_v57 = vadd.f32 %v2554_v0, %v2514_v20  ;;  %v2508_v20 = vmul.f32 0.0625, %v10082_v14  ;;  %v2541_v8 = vmul.f32 0.0625, %v10141_v19 }
 0x58e   : >> { %v10239_v29 = vadd.f32 %v2556_v4, %v2516_v3  ;;  %v2510_v3 = vmul.f32 0.0625, %v10086_v58  ;;  %v10257_v4 = vadd.f32 %v2552_v60, %v2512_v62  ;;  %v2632_v50 = vsel %vm1705_vm2, %v10252_v56, -inf }
 0x58f   : >> { %v2544_v58 = vmul.f32 0.0625, %v10153_v42  ;;  %v2628_v62 = vsel %vm1705_vm2, %v10261_v36, -inf }
 0x590   : >> { %2658 = vmax.xlane.f32.xlu1 %v2657_v33  ;;  %v2645_v33 = vmax.f32 %v10239_v29, %v2644_v63  ;;  %v2637_v63 = vmax.f32 %v10257_v4, %v2636_v44  ;;  %v10266_v0 = vadd.f32 %v2550_v47, %v2510_v3  ;;  %v10286_v47 = vadd.f32 %v2580_v40, %v2540_v13 }
 0x591   : >> { %v10277_v14 = vadd.f32 %v2584_v7, %v2544_v58 }
 0x594   : >> { %2654 = vmax.xlane.f32.xlu1 %v2653_v34  ;;  %v2641_v34 = vmax.f32 %v10248_v57, %v2640_v59 }
 0x598   : >> { %2650 = vmax.xlane.f32.xlu1 %v2649_v38  ;;  %v2545_v38 = vmul.f32 0.0625, %v10162_v16  ;;  %v2633_v16 = vmax.f32 %v10266_v0, %v2632_v50 }
 0x59a   : >> { %v10269_v59 = vadd.f32 %v2585_v53, %v2545_v38 }
 0x59c   : >> { %2646 = vmax.xlane.f32.xlu1 %v2645_v33  ;;  %v2548_v33 = vld [vmem:[#allocation16] sm:$0xff]  ;;  %v2700_v42 = vsel %vm1705_vm2, %v10269_v59, -inf }
 0x59d   : >> { %v10275_v60 = vadd.f32 %v2548_v33, %v2508_v20  ;;  %v2701_v19 = vmax.f32 %v10277_v14, %v2700_v42 }
 0x59f   : >> { %v2629_v44 = vmax.f32 %v10275_v60, %v2628_v62 }
 0x5a0   : >> { %2642 = vmax.xlane.f32.xlu1 %v2641_v34  ;;  %v2581_v34 = vld [vmem:[#allocation16 + $0x108] sm:$0xff] }
 0x5a1   : >> { %v10283_v3 = vadd.f32 %v2581_v34, %v2541_v8 }
 0x5a3   : >> { %v2692_v38 = vsel %vm1705_vm2, %v10283_v3, -inf }
 0x5a4   : >> { %2638 = vmax.xlane.f32.xlu1 %v2637_v63  ;;  %v2693_v53 = vmax.f32 %v10286_v47, %v2692_v38 }
 0x5a8   : >> { %2634 = vmax.xlane.f32.xlu1 %v2633_v16 }
 0x5ac   : >> { %2630 = vmax.xlane.f32.xlu1 %v2629_v44 }
 0x5b0   : >> { %2702 = vmax.xlane.f32.xlu1 %v2701_v19 }
 0x5b4   : >> { %2694 = vmax.xlane.f32.xlu1 %v2693_v53 }
 0x5fd   : >> { %v2687_v63 = vpop.xlane.xlu1 %2686 }
 0x5fe   : >> { %v2736_v45 = vsub.f32 %v10124_v39, %v2687_v63  ;;  %v2737_v50 = vsub.f32 %v10122_v46, %v2687_v63 }
 0x600   : >> { %v2804_v20 = vmul.f32 1.442695, %v2736_v45  ;;  %v2806_v58 = vmul.f32 1.442695, %v2737_v50 }
 0x601   : >> { %v2683_v33 = vpop.xlane.xlu1 %2682  ;;  %v2691_v7 = vpop.xlane.xlu0 %2690 }
 0x602   : >> { %8037 = vpow2.f32 %v2804_v20  ;;  %v2735_v16 = vsub.f32 %v10120_v27, %v2683_v33  ;;  %v2738_v8 = vsub.f32 %v10139_v18, %v2691_v7  ;;  %v2739_v62 = vsub.f32 %v10133_v49, %v2691_v7 }
 0x603   : >> { %8039 = vpow2.f32 %v2806_v58  ;;  %v2734_v13 = vsub.f32 %v10137_v17, %v2683_v33 }
 0x604   : >> { %v2802_v34 = vmul.f32 1.442695, %v2735_v16  ;;  %v2808_v42 = vmul.f32 1.442695, %v2738_v8  ;;  %v2810_v44 = vmul.f32 1.442695, %v2739_v62 }
 0x605   : >> { %v2679_v39 = vpop.xlane.xlu1 %2678  ;;  %v2800_v27 = vmul.f32 1.442695, %v2734_v13 }
 0x606   : >> { %v2732_v46 = vsub.f32 %v10151_v15, %v2679_v39  ;;  %v2733_v40 = vsub.f32 %v10131_v9, %v2679_v39  ;;  %8041 = vpow2.f32 %v2802_v34 }
 0x607   : >> { %8043 = vpow2.f32 %v2808_v42 }
 0x608   : >> { %v2796_v19 = vmul.f32 1.442695, %v2732_v46  ;;  %v2798_v38 = vmul.f32 1.442695, %v2733_v40  ;;  %8045 = vpow2.f32 %v2810_v44 }
 0x609   : >> { %v2675_v18 = vpop.xlane.xlu1 %2674 }
 0x60a   : >> { %8047 = vpow2.f32 %v2796_v19  ;;  %v2730_v49 = vsub.f32 %v10160_v32, %v2675_v18  ;;  %v2731_v53 = vsub.f32 %v10147_v1, %v2675_v18 }
 0x60b   : >> { %8049 = vpow2.f32 %v2798_v38 }
 0x60c   : >> { %v2792_v17 = vmul.f32 1.442695, %v2730_v49  ;;  %v2794_v63 = vmul.f32 1.442695, %v2731_v53  ;;  %8051 = vpow2.f32 %v2800_v27 }
 0x60d   : >> { %v2671_v45 = vpop.xlane.xlu1 %2670 }
 0x60e   : >> { %8053 = vpow2.f32 %v2792_v17  ;;  %v2728_v9 = vsub.f32 %v10171_v55, %v2671_v45  ;;  %v2729_v15 = vsub.f32 %v10156_v21, %v2671_v45 }
 0x60f   : >> { %v10303_v50 = vpop.eup %8037  ;;  %8055 = vpow2.f32 %v2794_v63 }
 0x610   : >> { %v10305_v20 = vpop.eup %8039  ;;  %v2788_v58 = vmul.f32 1.442695, %v2728_v9  ;;  %v2790_v33 = vmul.f32 1.442695, %v2729_v15 }
 0x611   : >> { %v2667_v32 = vpop.xlane.xlu1 %2666  ;;  %v2884_v1 = vsel %vm1705_vm2, %v10305_v20, 0.0 }
 0x612   : >> { %8057 = vpow2.f32 %v2788_v58  ;;  %v2726_v7 = vsub.f32 %v10186_v22, %v2667_v32  ;;  %v2727_v16 = vsub.f32 %v10166_v35, %v2667_v32  ;;  %v2885_v55 = vadd.f32 %v10303_v50, %v2884_v1 }
 0x613   : >> { %8059 = vpow2.f32 %v2790_v33  ;;  %v10312_v21 = vpop.eup %8041 }
 0x614   : >> { %v2784_v8 = vmul.f32 1.442695, %v2726_v7  ;;  %v2786_v62 = vmul.f32 1.442695, %v2727_v16  ;;  %v10314_v34 = vpop.eup %8043  ;;  %2886 = vadd.xlane.f32.xlu1 %v2885_v55 }
 0x615   : >> { %v2663_v42 = vpop.xlane.xlu1 %2662  ;;  %v10316_v13 = vpop.eup %8045 }
 0x616   : >> { %8061 = vpow2.f32 %v2784_v8  ;;  %v2724_v44 = vsub.f32 %v10202_v2, %v2663_v42  ;;  %v2725_v22 = vsub.f32 %v10179_v12, %v2663_v42  ;;  %v2888_v35 = vsel %vm1705_vm2, %v10316_v13, 0.0 }
 0x617   : >> { %v10320_v39 = vpop.eup %8047  ;;  %8063 = vpow2.f32 %v2786_v62  ;;  %v2889_v38 = vadd.f32 %v10314_v34, %v2888_v35  ;;  %v2880_v2 = vsel %vm1705_vm2, %v10312_v21, 0.0 }
 0x618   : >> { %v10324_v46 = vpop.eup %8049  ;;  %v2780_v40 = vmul.f32 1.442695, %v2724_v44  ;;  %v2782_v19 = vmul.f32 1.442695, %v2725_v22 }
 0x619   : >> { %v2659_v27 = vpop.xlane.xlu1 %2658  ;;  %v2876_v18 = vsel %vm1705_vm2, %v10324_v46, 0.0  ;;  %v10331_v12 = vpop.eup %8051  ;;  %2890 = vadd.xlane.f32.xlu0 %v2889_v38 }
 0x61a   : >> { %8065 = vpow2.f32 %v2780_v40  ;;  %v2722_v49 = vsub.f32 %v10212_v10, %v2659_v27  ;;  %v2723_v53 = vsub.f32 %v10197_v24, %v2659_v27  ;;  %v2877_v17 = vadd.f32 %v10320_v39, %v2876_v18 }
 0x61b   : >> { %v10336_v63 = vpop.eup %8053  ;;  %8067 = vpow2.f32 %v2782_v19  ;;  %v2881_v58 = vadd.f32 %v10331_v12, %v2880_v2 }
 0x61c   : >> { %v10338_v45 = vpop.eup %8055  ;;  %v2776_v9 = vmul.f32 1.442695, %v2722_v49  ;;  %v2778_v15 = vmul.f32 1.442695, %v2723_v53  ;;  %2878 = vadd.xlane.f32.xlu1 %v2877_v17  ;;  %v2707_v53 = vpop.xlane.xlu0 %2706 }
 0x61d   : >> { %v2655_v33 = vpop.xlane.xlu1 %2654  ;;  %v2872_v32 = vsel %vm1705_vm2, %v10338_v45, 0.0  ;;  %2882 = vadd.xlane.f32.xlu0 %v2881_v58 }
 0x61e   : >> { %8069 = vpow2.f32 %v2776_v9  ;;  %v2720_v24 = vsub.f32 %v10221_v37, %v2655_v33  ;;  %v2721_v10 = vsub.f32 %v10207_v25, %v2655_v33  ;;  %v2873_v7 = vadd.f32 %v10336_v63, %v2872_v32 }
 0x61f   : >> { %v10345_v1 = vpop.eup %8057  ;;  %8071 = vpow2.f32 %v2778_v15 }
 0x620   : >> { %v10348_v16 = vpop.eup %8059  ;;  %v2772_v55 = vmul.f32 1.442695, %v2720_v24  ;;  %v2774_v8 = vmul.f32 1.442695, %v2721_v10 }
 0x621   : >> { %v2651_v62 = vpop.xlane.xlu1 %2650  ;;  %v2868_v42 = vsel %vm1705_vm2, %v10348_v16, 0.0  ;;  %2874 = vadd.xlane.f32.xlu0 %v2873_v7 }
 0x622   : >> { %8073 = vpow2.f32 %v2772_v55  ;;  %v2718_v44 = vsub.f32 %v10230_v26, %v2651_v62  ;;  %v2719_v37 = vsub.f32 %v10216_v28, %v2651_v62  ;;  %v2869_v25 = vadd.f32 %v10345_v1, %v2868_v42  ;;  %v2699_v42 = vpop.xlane.xlu0 %2698 }
 0x623   : >> { %v10355_v22 = vpop.eup %8061  ;;  %8075 = vpow2.f32 %v2774_v8  ;;  %v2747_v55 = vsub.f32 %v10181_v61, %v2707_v53 }
 0x624   : >> { %v10357_v35 = vpop.eup %8063  ;;  %v2768_v40 = vmul.f32 1.442695, %v2718_v44  ;;  %v2770_v19 = vmul.f32 1.442695, %v2719_v37  ;;  %2870 = vadd.xlane.f32.xlu1 %v2869_v25 }
 0x625   : >> { %v2647_v38 = vpop.xlane.xlu1 %2646  ;;  %v2864_v27 = vsel %vm1705_vm2, %v10357_v35, 0.0 }
 0x626   : >> { %8077 = vpow2.f32 %v2768_v40  ;;  %v2716_v26 = vsub.f32 %v10239_v29, %v2647_v38  ;;  %v2717_v28 = vsub.f32 %v10225_v31, %v2647_v38  ;;  %v2865_v18 = vadd.f32 %v10355_v22, %v2864_v27 }
 0x627   : >> { %v10364_v2 = vpop.eup %8065  ;;  %8079 = vpow2.f32 %v2770_v19  ;;  %v2746_v40 = vsub.f32 %v10175_v6, %v2707_v53  ;;  %v2826_v38 = vmul.f32 1.442695, %v2747_v55  ;;  %v2743_v27 = vsub.f32 %v10173_v43, %v2699_v42 }
 0x628   : >> { %v10366_v49 = vpop.eup %8067  ;;  %v2764_v17 = vmul.f32 1.442695, %v2716_v26  ;;  %v2766_v9 = vmul.f32 1.442695, %v2717_v28  ;;  %2866 = vadd.xlane.f32.xlu0 %v2865_v18  ;;  %v2742_v43 = vsub.f32 %v10188_v48, %v2699_v42 }
 0x629   : >> { %v2643_v15 = vpop.xlane.xlu1 %2642  ;;  %v2860_v58 = vsel %vm1705_vm2, %v10366_v49, 0.0  ;;  %v2824_v53 = vmul.f32 1.442695, %v2746_v40 }
 0x62a   : >> { %8081 = vpow2.f32 %v2764_v17  ;;  %v2714_v29 = vsub.f32 %v10248_v57, %v2643_v15  ;;  %v2715_v31 = vsub.f32 %v10234_v11, %v2643_v15  ;;  %v2861_v33 = vadd.f32 %v10364_v2, %v2860_v58 }
 0x62b   : >> { %v10373_v32 = vpop.eup %8069  ;;  %8083 = vpow2.f32 %v2766_v9  ;;  %v2818_v58 = vmul.f32 1.442695, %v2743_v27 }
 0x62c   : >> { %v10375_v24 = vpop.eup %8071  ;;  %v2760_v10 = vmul.f32 1.442695, %v2714_v29  ;;  %v2762_v7 = vmul.f32 1.442695, %v2715_v31  ;;  %2862 = vadd.xlane.f32.xlu1 %v2861_v33 }
 0x62d   : >> { %v2639_v8 = vpop.xlane.xlu1 %2638  ;;  %v2856_v62 = vsel %vm1705_vm2, %v10375_v24, 0.0 }
 0x62e   : >> { %8085 = vpow2.f32 %v2760_v10  ;;  %v2712_v11 = vsub.f32 %v10257_v4, %v2639_v8  ;;  %v2713_v57 = vsub.f32 %v10243_v23, %v2639_v8  ;;  %v2857_v44 = vadd.f32 %v10373_v32, %v2856_v62 }
 0x62f   : >> { %v10383_v37 = vpop.eup %8073  ;;  %8087 = vpow2.f32 %v2762_v7  ;;  %v2816_v8 = vmul.f32 1.442695, %v2742_v43 }
 0x630   : >> { %v10385_v25 = vpop.eup %8075  ;;  %v2756_v61 = vmul.f32 1.442695, %v2712_v11  ;;  %v2758_v19 = vmul.f32 1.442695, %v2713_v57  ;;  %2858 = vadd.xlane.f32.xlu0 %v2857_v44 }
 0x631   : >> { %v2635_v26 = vpop.xlane.xlu1 %2634  ;;  %v2852_v4 = vsel %vm1705_vm2, %v10385_v25, 0.0 }
 0x632   : >> { %8089 = vpow2.f32 %v2756_v61  ;;  %v2710_v23 = vsub.f32 %v10266_v0, %v2635_v26  ;;  %v2711_v28 = vsub.f32 %v10252_v56, %v2635_v26  ;;  %v2853_v18 = vadd.f32 %v10383_v37, %v2852_v4 }
 0x633   : >> { %v10394_v17 = vpop.eup %8077  ;;  %8091 = vpow2.f32 %v2758_v19 }
 0x634   : >> { %v10396_v6 = vpop.eup %8079  ;;  %v2752_v9 = vmul.f32 1.442695, %v2710_v23  ;;  %v2754_v15 = vmul.f32 1.442695, %v2711_v28  ;;  %2854 = vadd.xlane.f32.xlu1 %v2853_v18  ;;  %8093 = vpow2.f32 %v2826_v38 }
 0x635   : >> { %v2631_v29 = vpop.xlane.xlu1 %2630  ;;  %v2848_v0 = vsel %vm1705_vm2, %v10396_v6, 0.0 }
 0x636   : >> { %8095 = vpow2.f32 %v2752_v9  ;;  %v2708_v56 = vsub.f32 %v10275_v60, %v2631_v29  ;;  %v2709_v31 = vsub.f32 %v10261_v36, %v2631_v29  ;;  %v2849_v33 = vadd.f32 %v10394_v17, %v2848_v0 }
 0x637   : >> { %v10404_v10 = vpop.eup %8081  ;;  %8097 = vpow2.f32 %v2754_v15 }
 0x638   : >> { %v10406_v7 = vpop.eup %8083  ;;  %8099 = vpow2.f32 %v2824_v53  ;;  %v2748_v55 = vmul.f32 1.442695, %v2708_v56  ;;  %v2750_v48 = vmul.f32 1.442695, %v2709_v31  ;;  %2850 = vadd.xlane.f32.xlu0 %v2849_v33 }
 0x639   : >> { %8101 = vpow2.f32 %v2818_v58  ;;  %v2703_v62 = vpop.xlane.xlu1 %2702  ;;  %v2844_v42 = vsel %vm1705_vm2, %v10406_v7, 0.0 }
 0x63a   : >> { %8103 = vpow2.f32 %v2748_v55  ;;  %v2744_v36 = vsub.f32 %v10277_v14, %v2703_v62  ;;  %v2745_v60 = vsub.f32 %v10269_v59, %v2703_v62  ;;  %v2845_v11 = vadd.f32 %v10404_v10, %v2844_v42 }
 0x63b   : >> { %v10413_v57 = vpop.eup %8085  ;;  %8105 = vpow2.f32 %v2750_v48 }
 0x63c   : >> { %v10415_v44 = vpop.eup %8087  ;;  %v2820_v40 = vmul.f32 1.442695, %v2744_v36  ;;  %v2822_v61 = vmul.f32 1.442695, %v2745_v60  ;;  %2846 = vadd.xlane.f32.xlu1 %v2845_v11  ;;  %8107 = vpow2.f32 %v2816_v8 }
 0x63d   : >> { %v2695_v19 = vpop.xlane.xlu1 %2694  ;;  %v2840_v38 = vsel %vm1705_vm2, %v10415_v44, 0.0 }
 0x63e   : >> { %8109 = vpow2.f32 %v2820_v40  ;;  %v2740_v14 = vsub.f32 %v10286_v47, %v2695_v19  ;;  %v2741_v59 = vsub.f32 %v10283_v3, %v2695_v19  ;;  %v2841_v27 = vadd.f32 %v10413_v57, %v2840_v38 }
 0x63f   : >> { %v10422_v26 = vpop.eup %8089  ;;  %8111 = vpow2.f32 %v2822_v61 }
 0x640   : >> { %v10424_v4 = vpop.eup %8091  ;;  %v2812_v23 = vmul.f32 1.442695, %v2740_v14  ;;  %v2814_v28 = vmul.f32 1.442695, %v2741_v59  ;;  %2842 = vadd.xlane.f32.xlu0 %v2841_v27  ;;  %v3145_v59 = vld [vmem:[%s10474_s18 + $0xf8] sm:$0xff]  ;;  %v3144_v27 = vld [vmem:[%s10474_s18 + $0xf0] sm:$0xff] }
 0x641   : >> { %v2836_v18 = vsel %vm1705_vm2, %v10424_v4, 0.0  ;;  %v10428_v53 = vpop.eup %8093  ;;  %3173 = vmatprep.subr.mxu1 %v3145_v59  ;;  %v3127_v59 = vld [vmem:[%s10474_s18 + $0x68] sm:$0xff] }
 0x642   : >> { %8113 = vpow2.f32 %v2812_v23  ;;  %v2837_v47 = vadd.f32 %v10422_v26, %v2836_v18  ;;  %v2904_v56 = vsel %vm1705_vm2, %v10428_v53, 0.0  ;;  %v3143_v23 = vld [vmem:[%s10474_s18 + $0xe8] sm:$0xff]  ;;  %3174 = vmatpush1.msra.mxu1 %v3144_v27  ;;  %v3141_v18 = vld [vmem:[%s10474_s18 + $0xd8] sm:$0xff]  ;;  %v3126_v27 = vld [vmem:[%s10474_s18 + $0x60] sm:$0xff] }
 0x643   : >> { %v10431_v9 = vpop.eup %8095  ;;  %8115 = vpow2.f32 %v2814_v28  ;;  %v3142_v28 = vld [vmem:[%s10474_s18 + $0xe0] sm:$0xff]  ;;  %3175 = vmatprep.subr.mxu1 %v3143_v23  ;;  %v3125_v23 = vld [vmem:[%s10474_s18 + $0x58] sm:$0xff] }
 0x644   : >> { %v10433_v3 = vpop.eup %8097  ;;  %2838 = vadd.xlane.f32.xlu1 %v2837_v47  ;;  %v3140_v47 = vld [vmem:[%s10474_s18 + $0xd0] sm:$0xff]  ;;  %3176 = vmatpush1.msra.mxu1 %v3142_v28 }
 0x645   : >> { %v10435_v15 = vpop.eup %8099  ;;  %v2832_v43 = vsel %vm1705_vm2, %v10433_v3, 0.0  ;;  %3177 = vmatprep.subr.mxu1 %v3141_v18  ;;  %v3124_v28 = vld [vmem:[%s10474_s18 + $0x50] sm:$0xff]  ;;  %v3123_v18 = vld [vmem:[%s10474_s18 + $0x48] sm:$0xff] }
 0x646   : >> { %v10439_v58 = vpop.eup %8101  ;;  %v2833_v29 = vadd.f32 %v10431_v9, %v2832_v43  ;;  %v2905_v8 = vadd.f32 %v10435_v15, %v2904_v56  ;;  %v3139_v43 = vld [vmem:[%s10474_s18 + $0xc8] sm:$0xff]  ;;  %3178 = vmatpush1.msra.mxu1 %v3140_v47  ;;  %v3137_v56 = vld [vmem:[%s10474_s18 + $0xb8] sm:$0xff]  ;;  %v3122_v47 = vld [vmem:[%s10474_s18 + $0x40] sm:$0xff] }
 0x647   : >> { %v10442_v0 = vpop.eup %8103  ;;  %v2896_v42 = vsel %vm1705_vm2, %v10439_v58, 0.0  ;;  %3179 = vmatprep.subr.mxu1 %v3139_v43  ;;  %v3121_v43 = vld [vmem:[%s10474_s18 + $0x38] sm:$0xff] }
 0x648   : >> { %v10446_v31 = vpop.eup %8105  ;;  %2834 = vadd.xlane.f32.xlu0 %v2833_v29  ;;  %v3138_v29 = vld [vmem:[%s10474_s18 + $0xc0] sm:$0xff] }
 0x649   : >> { %v2828_v33 = vsel %vm1705_vm2, %v10446_v31, 0.0  ;;  %v10450_v55 = vpop.eup %8107  ;;  %3180 = vmatpush1.msra.mxu1 %v3138_v29  ;;  %v3120_v29 = vld [vmem:[%s10474_s18 + $0x30] sm:$0xff] }
 0x64a   : >> { %v2829_v48 = vadd.f32 %v10442_v0, %v2828_v33  ;;  %v2897_v40 = vadd.f32 %v10450_v55, %v2896_v42  ;;  %v3136_v33 = vld [vmem:[%s10474_s18 + $0xb0] sm:$0xff]  ;;  %3181 = vmatprep.subr.mxu1 %v3137_v56  ;;  %v3133_v42 = vld [vmem:[%s10474_s18 + $0x98] sm:$0xff] }
 0x64b   : >> { %v10454_v62 = vpop.eup %8109  ;;  %3182 = vmatpush1.msra.mxu1 %v3136_v33  ;;  %v3119_v33 = vld [vmem:[%s10474_s18 + $0x28] sm:$0xff] }
 0x64c   : >> { %v10458_v36 = vpop.eup %8111  ;;  %2830 = vadd.xlane.f32.xlu1 %v2829_v48  ;;  %2906 = vadd.xlane.f32.xlu0 %v2905_v8  ;;  %v3135_v48 = vld [vmem:[%s10474_s18 + $0xa8] sm:$0xff]  ;;  %v3134_v8 = vld [vmem:[%s10474_s18 + $0xa0] sm:$0xff] }
 0x64d   : >> { %v2900_v60 = vsel %vm1705_vm2, %v10458_v36, 0.0  ;;  %3183 = vmatprep.subr.mxu1 %v3135_v48  ;;  %v3118_v48 = vld [vmem:[%s10474_s18 + $0x20] sm:$0xff] }
 0x64e   : >> { %v2901_v11 = vadd.f32 %v10454_v62, %v2900_v60  ;;  %v3132_v60 = vld [vmem:[%s10474_s18 + $0x90] sm:$0xff]  ;;  %3184 = vmatpush1.msra.mxu1 %v3134_v8  ;;  %v3117_v8 = vld [vmem:[%s10474_s18 + $0x18] sm:$0xff] }
 0x64f   : >> { %v10464_v61 = vpop.eup %8113  ;;  %3185 = vmatprep.subr.mxu1 %v3133_v42 }
 0x650   : >> { %v10466_v19 = vpop.eup %8115  ;;  %2902 = vadd.xlane.f32.xlu1 %v2901_v11  ;;  %2898 = vadd.xlane.f32.xlu0 %v2897_v40  ;;  %v3131_v11 = vld [vmem:[%s10474_s18 + $0x88] sm:$0xff]  ;;  %v3130_v40 = vld [vmem:[%s10474_s18 + $0x80] sm:$0xff] }
 0x651   : >> { %v2892_v38 = vsel %vm1705_vm2, %v10466_v19, 0.0  ;;  %3186 = vmatpush1.msra.mxu1 %v3132_v60  ;;  %v3116_v60 = vld [vmem:[%s10474_s18 + $0x10] sm:$0xff] }
 0x652   : >> { %v2893_v14 = vadd.f32 %v10464_v61, %v2892_v38  ;;  %v3129_v38 = vld [vmem:[%s10474_s18 + $0x78] sm:$0xff]  ;;  %3187 = vmatprep.subr.mxu1 %v3131_v11  ;;  %v3115_v11 = vld [vmem:[%s10474_s18 + $0x8] sm:$0xff] }
 0x653   : >> { %3188 = vmatpush1.msra.mxu1 %v3130_v40  ;;  %v3114_v40 = vld [vmem:[%s10474_s18] sm:$0xff] }
 0x654   : >> { %2894 = vadd.xlane.f32.xlu1 %v2893_v14  ;;  %v3128_v14 = vld [vmem:[%s10474_s18 + $0x70] sm:$0xff]  ;;  %3189 = vmatprep.subr.mxu1 %v3129_v38  ;;  %v3153_v38 = vld [vmem:[%s10474_s18 + $0x138] sm:$0xff] }
 0x655   : >> { %3190 = vmatpush1.msra.mxu1 %v3128_v14 }
 0x656   : >> { %3191 = vmatprep.subr.mxu1 %v3127_v59  ;;  %v3152_v59 = vld [vmem:[%s10474_s18 + $0x130] sm:$0xff] }
 0x657   : >> { %3192 = vmatpush1.msra.mxu1 %v3126_v27  ;;  %v3151_v27 = vld [vmem:[%s10474_s18 + $0x128] sm:$0xff] }
 0x658   : >> { %3193 = vmatprep.subr.mxu1 %v3125_v23 }
 0x659   : >> { %3194 = vmatpush1.msra.mxu1 %v3124_v28  ;;  %v3150_v28 = vld [vmem:[%s10474_s18 + $0x120] sm:$0xff] }
 0x65a   : >> { %3195 = vmatprep.subr.mxu1 %v3123_v18  ;;  %v3149_v18 = vld [vmem:[%s10474_s18 + $0x118] sm:$0xff] }
 0x65b   : >> { %3196 = vmatpush1.msra.mxu1 %v3122_v47  ;;  %v3148_v47 = vld [vmem:[%s10474_s18 + $0x110] sm:$0xff] }
 0x65c   : >> { %3197 = vmatprep.subr.mxu1 %v3121_v43 }
 0x65d   : >> { %3198 = vmatpush1.msra.mxu1 %v3120_v29 }
 0x65e   : >> { %3199 = vmatprep.subr.mxu1 %v3119_v33 }
 0x65f   : >> { %3200 = vmatpush1.msra.mxu1 %v3118_v48 }
 0x660   : >> { %3201 = vmatprep.subr.mxu1 %v3117_v8 }
 0x661   : >> { %3202 = vmatpush1.msra.mxu1 %v3116_v60 }
 0x662   : >> { %3203 = vmatprep.subr.mxu1 %v3115_v11 }
 0x663   : >> { %3204 = vmatpush1.msra.mxu1 %v3114_v40 }
 0x664   : >> { %3229 = vmatprep.subr.mxu1 %v3153_v38 }
 0x665   : >> { %3230 = vmatpush2.msra.mxu1 %v3152_v59 }
 0x666   : >> { %3231 = vmatprep.subr.mxu1 %v3151_v27 }
 0x667   : >> { %3232 = vmatpush2.msra.mxu1 %v3150_v28 }
 0x668   : >> { %3233 = vmatprep.subr.mxu1 %v3149_v18 }
 0x669   : >> { %3234 = vmatpush2.msra.mxu1 %v3148_v47 }
 0x69d   : >> { %v2887_v56 = vpop.xlane.xlu1 %2886 }
 0x69e   : >> { %8117 = vrcp.f32 %v2887_v56 }
 0x6a2   : >> { %v2891_v42 = vpop.xlane.xlu0 %2890 }
 0x6a3   : >> { %8119 = vrcp.f32 %v2891_v42 }
 0x6a5   : >> { %v2879_v23 = vpop.xlane.xlu1 %2878 }
 0x6a6   : >> { %v2883_v14 = vpop.xlane.xlu0 %2882 }
 0x6a7   : >> { %8121 = vrcp.f32 %v2883_v14 }
 0x6a8   : >> { %8123 = vrcp.f32 %v2879_v23 }
 0x6aa   : >> { %v2875_v43 = vpop.xlane.xlu0 %2874 }
 0x6ab   : >> { %v8118_v29 = vpop.eup %8117  ;;  %8125 = vrcp.f32 %v2875_v43 }
 0x6ac   : >> { %v2957_v42 = vmul.f32 %v8118_v29, %v10305_v20  ;;  %v2956_v40 = vmul.f32 %v8118_v29, %v10303_v50 }
 0x6ad   : >> { %v2871_v33 = vpop.xlane.xlu1 %2870 }
 0x6ae   : >> { %8127 = vrcp.f32 %v2871_v33 }
 0x6b0   : >> { %v8120_v56 = vpop.eup %8119 }
 0x6b1   : >> { %v2959_v48 = vmul.f32 %v8120_v56, %v10316_v13  ;;  %v2958_v8 = vmul.f32 %v8120_v56, %v10314_v34  ;;  %v2867_v11 = vpop.xlane.xlu0 %2866 }
 0x6b2   : >> { %8129 = vrcp.f32 %v2867_v11 }
 0x6b3   : >> { %7221 = vmatprep.subr.msk.mxu0 %vm1705_vm2, %v2959_v48 }
 0x6b4   : >> { %v8122_v60 = vpop.eup %8121  ;;  %3035 = vmatpush1.xpose.msra.mxu0 %v2958_v8 }
 0x6b5   : >> { %7222 = vmatprep.subr.msk.mxu0 %vm1705_vm2, %v2957_v42  ;;  %v2955_v38 = vmul.f32 %v8122_v60, %v10312_v21  ;;  %v8124_v14 = vpop.eup %8123  ;;  %v2863_v59 = vpop.xlane.xlu1 %2862  ;;  %v2954_v34 = vmul.f32 %v8122_v60, %v10331_v12 }
 0x6b6   : >> { %8131 = vrcp.f32 %v2863_v59  ;;  %v2953_v20 = vmul.f32 %v8124_v14, %v10324_v46  ;;  %v2952_v50 = vmul.f32 %v8124_v14, %v10320_v39 }
 0x6b8   : >> { %3037 = vmatpush1.xpose.msra.mxu0 %v2956_v40  ;;  %v8126_v13 = vpop.eup %8125 }
 0x6b9   : >> { %7223 = vmatprep.subr.msk.mxu0 %vm1705_vm2, %v2955_v38  ;;  %v2859_v27 = vpop.xlane.xlu0 %2858  ;;  %v2951_v21 = vmul.f32 %v8126_v13, %v10338_v45  ;;  %v2950_v12 = vmul.f32 %v8126_v13, %v10336_v63 }
 0x6ba   : >> { %8133 = vrcp.f32 %v2859_v27 }
 0x6bb   : >> { %v8128_v23 = vpop.eup %8127 }
 0x6bc   : >> { %3039 = vmatpush1.xpose.msra.mxu0 %v2954_v34  ;;  %v2949_v46 = vmul.f32 %v8128_v23, %v10348_v16  ;;  %v2948_v39 = vmul.f32 %v8128_v23, %v10345_v1 }
 0x6bd   : >> { %7224 = vmatprep.subr.msk.mxu0 %vm1705_vm2, %v2953_v20  ;;  %v2855_v28 = vpop.xlane.xlu1 %2854 }
 0x6be   : >> { %8135 = vrcp.f32 %v2855_v28 }
 0x6bf   : >> { %v8130_v18 = vpop.eup %8129 }
 0x6c0   : >> { %3041 = vmatpush1.xpose.msra.mxu0 %v2952_v50  ;;  %v2947_v45 = vmul.f32 %v8130_v18, %v10357_v35  ;;  %v2946_v63 = vmul.f32 %v8130_v18, %v10355_v22  ;;  %v10574_v18 = vld [vmem:[#allocation2] sm:$0xff] }
 0x6c1   : >> { %7225 = vmatprep.subr.msk.mxu0 %vm1705_vm2, %v2951_v21  ;;  %v2851_v47 = vpop.xlane.xlu0 %2850 }
 0x6c2   : >> { %8137 = vrcp.f32 %v2851_v47 }
 0x6c3   : >> { %v8132_v43 = vpop.eup %8131 }
 0x6c4   : >> { %3043 = vmatpush1.xpose.msra.mxu0 %v2950_v12  ;;  %v2945_v16 = vmul.f32 %v8132_v43, %v10366_v49  ;;  %v2944_v1 = vmul.f32 %v8132_v43, %v10364_v2 }
 0x6c5   : >> { %7226 = vmatprep.subr.msk.mxu0 %vm1705_vm2, %v2949_v46  ;;  %v2847_v29 = vpop.xlane.xlu1 %2846 }
 0x6c6   : >> { %8139 = vrcp.f32 %v2847_v29 }
 0x6c7   : >> { %v8134_v56 = vpop.eup %8133 }
 0x6c8   : >> { %3045 = vmatpush1.xpose.msra.mxu0 %v2948_v39  ;;  %v2943_v35 = vmul.f32 %v8134_v56, %v10375_v24  ;;  %v2942_v22 = vmul.f32 %v8134_v56, %v10373_v32  ;;  %v10587_v39 = vld [vmem:[#allocation2 + $0x8] sm:$0xff] }
 0x6c9   : >> { %7227 = vmatprep.subr.msk.mxu0 %vm1705_vm2, %v2947_v45  ;;  %v2843_v33 = vpop.xlane.xlu0 %2842 }
 0x6ca   : >> { %8141 = vrcp.f32 %v2843_v33  ;;  %v3391_v33 = vld [vmem:[%s10600_s3 + $0xf8] sm:$0xff] }
 0x6cb   : >> { %v8136_v48 = vpop.eup %8135 }
 0x6cc   : >> { %3047 = vmatpush1.xpose.msra.mxu0 %v2946_v63  ;;  %v2941_v49 = vmul.f32 %v8136_v48, %v10385_v25  ;;  %v2940_v2 = vmul.f32 %v8136_v48, %v10383_v37  ;;  %v3388_v48 = vld [vmem:[%s10600_s3 + $0xe0] sm:$0xff] }
 0x6cd   : >> { %7228 = vmatprep.subr.msk.mxu0 %vm1705_vm2, %v2945_v16  ;;  %v2839_v8 = vpop.xlane.xlu1 %2838 }
 0x6ce   : >> { %8143 = vrcp.f32 %v2839_v8  ;;  %v3387_v8 = vld [vmem:[%s10600_s3 + $0xd8] sm:$0xff] }
 0x6cf   : >> { %v8138_v42 = vpop.eup %8137 }
 0x6d0   : >> { %3049 = vmatpush1.xpose.msra.mxu0 %v2944_v1  ;;  %v2939_v24 = vmul.f32 %v8138_v42, %v10396_v6  ;;  %v2938_v32 = vmul.f32 %v8138_v42, %v10394_v17  ;;  %v3390_v1 = vld [vmem:[%s10600_s3 + $0xf0] sm:$0xff]  ;;  %v3384_v42 = vld [vmem:[%s10600_s3 + $0xc0] sm:$0xff] }
 0x6d1   : >> { %7229 = vmatprep.subr.msk.mxu0 %vm1705_vm2, %v2943_v35  ;;  %v2835_v60 = vpop.xlane.xlu0 %2834  ;;  %v3389_v35 = vld [vmem:[%s10600_s3 + $0xe8] sm:$0xff] }
 0x6d2   : >> { %8145 = vrcp.f32 %v2835_v60  ;;  %v3383_v60 = vld [vmem:[%s10600_s3 + $0xb8] sm:$0xff] }
 0x6d3   : >> { %v8140_v11 = vpop.eup %8139 }
 0x6d4   : >> { %3051 = vmatpush1.xpose.msra.mxu0 %v2942_v22  ;;  %v2937_v25 = vmul.f32 %v8140_v11, %v10406_v7  ;;  %v2936_v37 = vmul.f32 %v8140_v11, %v10404_v10  ;;  %v3386_v22 = vld [vmem:[%s10600_s3 + $0xd0] sm:$0xff]  ;;  %v3380_v11 = vld [vmem:[%s10600_s3 + $0xa0] sm:$0xff] }
 0x6d5   : >> { %7230 = vmatprep.subr.msk.mxu0 %vm1705_vm2, %v2941_v49  ;;  %v2831_v40 = vpop.xlane.xlu1 %2830  ;;  %v2907_v14 = vpop.xlane.xlu0 %2906  ;;  %v3385_v49 = vld [vmem:[%s10600_s3 + $0xc8] sm:$0xff] }
 0x6d6   : >> { %8147 = vrcp.f32 %v2831_v40  ;;  %v3379_v40 = vld [vmem:[%s10600_s3 + $0x98] sm:$0xff] }
 0x6d7   : >> { %v8142_v38 = vpop.eup %8141  ;;  %8149 = vrcp.f32 %v2907_v14  ;;  %v3375_v14 = vld [vmem:[%s10600_s3 + $0x78] sm:$0xff] }
 0x6d8   : >> { %3053 = vmatpush1.xpose.msra.mxu0 %v2940_v2  ;;  %v2935_v6 = vmul.f32 %v8142_v38, %v10415_v44  ;;  %v2934_v17 = vmul.f32 %v8142_v38, %v10413_v57  ;;  %v3382_v2 = vld [vmem:[%s10600_s3 + $0xb0] sm:$0xff]  ;;  %v3376_v38 = vld [vmem:[%s10600_s3 + $0x80] sm:$0xff] }
 0x6d9   : >> { %7231 = vmatprep.subr.msk.mxu0 %vm1705_vm2, %v2939_v24  ;;  %v2903_v34 = vpop.xlane.xlu1 %2902  ;;  %v2899_v13 = vpop.xlane.xlu0 %2898  ;;  %v3381_v24 = vld [vmem:[%s10600_s3 + $0xa8] sm:$0xff] }
 0x6da   : >> { %8151 = vrcp.f32 %v2903_v34  ;;  %v3371_v34 = vld [vmem:[%s10600_s3 + $0x58] sm:$0xff] }
 0x6db   : >> { %v8144_v59 = vpop.eup %8143  ;;  %8153 = vrcp.f32 %v2899_v13  ;;  %v3367_v13 = vld [vmem:[%s10600_s3 + $0x38] sm:$0xff] }
 0x6dc   : >> { %3055 = vmatpush1.xpose.msra.mxu0 %v2938_v32  ;;  %v2933_v7 = vmul.f32 %v8144_v59, %v10424_v4  ;;  %v2932_v10 = vmul.f32 %v8144_v59, %v10422_v26  ;;  %v3378_v32 = vld [vmem:[%s10600_s3 + $0x90] sm:$0xff]  ;;  %v3372_v59 = vld [vmem:[%s10600_s3 + $0x60] sm:$0xff] }
 0x6dd   : >> { %7232 = vmatprep.subr.msk.mxu0 %vm1705_vm2, %v2937_v25  ;;  %v2895_v50 = vpop.xlane.xlu1 %2894  ;;  %v3377_v25 = vld [vmem:[%s10600_s3 + $0x88] sm:$0xff] }
 0x6de   : >> { %8155 = vrcp.f32 %v2895_v50  ;;  %v3363_v50 = vld [vmem:[%s10600_s3 + $0x18] sm:$0xff] }
 0x6df   : >> { %v8146_v20 = vpop.eup %8145 }
 0x6e0   : >> { %3057 = vmatpush1.xpose.msra.mxu0 %v2936_v37  ;;  %v2931_v44 = vmul.f32 %v8146_v20, %v10433_v3  ;;  %v2930_v57 = vmul.f32 %v8146_v20, %v10431_v9  ;;  %v3374_v37 = vld [vmem:[%s10600_s3 + $0x70] sm:$0xff]  ;;  %v3368_v20 = vld [vmem:[%s10600_s3 + $0x40] sm:$0xff] }
 0x6e1   : >> { %7233 = vmatprep.subr.msk.mxu0 %vm1705_vm2, %v2935_v6  ;;  %v3373_v6 = vld [vmem:[%s10600_s3 + $0x68] sm:$0xff] }
 0x6e3   : >> { %v8148_v27 = vpop.eup %8147 }
 0x6e4   : >> { %3059 = vmatpush1.xpose.msra.mxu0 %v2934_v17  ;;  %v2929_v4 = vmul.f32 %v8148_v27, %v10446_v31  ;;  %v8150_v21 = vpop.eup %8149  ;;  %v2928_v23 = vmul.f32 %v8148_v27, %v10442_v0  ;;  %v3370_v17 = vld [vmem:[%s10600_s3 + $0x50] sm:$0xff]  ;;  %v3364_v27 = vld [vmem:[%s10600_s3 + $0x20] sm:$0xff] }
 0x6e5   : >> { %7234 = vmatprep.subr.msk.mxu0 %vm1705_vm2, %v2933_v7  ;;  %v2967_v26 = vmul.f32 %v8150_v21, %v10428_v53  ;;  %v2966_v3 = vmul.f32 %v8150_v21, %v10435_v15  ;;  %v3369_v7 = vld [vmem:[%s10600_s3 + $0x48] sm:$0xff]  ;;  %v3360_v21 = vld [vmem:[%s10600_s3] sm:$0xff] }
 0x6e7   : >> { %v8152_v28 = vpop.eup %8151 }
 0x6e8   : >> { %3061 = vmatpush1.xpose.msra.mxu0 %v2932_v10  ;;  %v2965_v12 = vmul.f32 %v8152_v28, %v10458_v36  ;;  %v8154_v9 = vpop.eup %8153  ;;  %v2964_v31 = vmul.f32 %v8152_v28, %v10454_v62  ;;  %v10581_v62 = vld [vmem:[#allocation2 + $0x10] sm:$0xff]  ;;  %v3397_v28 = vld [vmem:[%s10600_s3 + $0x128] sm:$0xff] }
 0x6e9   : >> { %7235 = vmatprep.subr.msk.mxu0 %vm1705_vm2, %v2931_v44  ;;  %v2963_v46 = vmul.f32 %v8154_v9, %v10439_v58  ;;  %v2962_v53 = vmul.f32 %v8154_v9, %v10450_v55  ;;  %v10577_v58 = vld [vmem:[#allocation2 + $0x18] sm:$0xff]  ;;  %v3147_v55 = vld [vmem:[%s10474_s18 + $0x108] sm:$0xff]  ;;  %v3366_v10 = vld [vmem:[%s10600_s3 + $0x30] sm:$0xff] }
 0x6ea   : >> { %3235 = vmatprep.subr.mxu1 %v3147_v55  ;;  %v3365_v44 = vld [vmem:[%s10600_s3 + $0x28] sm:$0xff]  ;;  %v3394_v9 = vld [vmem:[%s10600_s3 + $0x110] sm:$0xff] }
 0x6eb   : >> { %v8156_v0 = vpop.eup %8155 }
 0x6ec   : >> { %3063 = vmatpush1.xpose.msra.mxu0 %v2930_v57  ;;  %v2961_v15 = vmul.f32 %v8156_v0, %v10466_v19  ;;  %v2960_v36 = vmul.f32 %v8156_v0, %v10464_v61  ;;  %v3146_v19 = vld [vmem:[%s10474_s18 + $0x100] sm:$0xff]  ;;  %v3362_v57 = vld [vmem:[%s10600_s3 + $0x10] sm:$0xff] }
 0x6ed   : >> { %7236 = vmatprep.subr.msk.mxu0 %vm1705_vm2, %v2929_v4  ;;  %3236 = vmatpush2.msra.mxu1 %v3146_v19  ;;  %v3361_v4 = vld [vmem:[%s10600_s3 + $0x8] sm:$0xff]  ;;  %v3155_v0 = vld [vmem:[%s3154_s26] sm:$0x3] }
 0x6ee   : >> { %7497 = vmatprep.subr.mxu1 %v10577_v58 }
 0x6f0   : >> { %3065 = vmatpush1.xpose.msra.mxu0 %v2928_v23  ;;  %v3399_v23 = vld [vmem:[%s10600_s3 + $0x138] sm:$0xff] }
 0x6f1   : >> { %7237 = vmatprep.subr.msk.mxu0 %vm1705_vm2, %v2967_v26  ;;  %v3398_v26 = vld [vmem:[%s10600_s3 + $0x130] sm:$0xff] }
 0x6f4   : >> { %3091 = vmatpush2.xpose.msra.mxu0 %v2966_v3  ;;  %v3396_v3 = vld [vmem:[%s10600_s3 + $0x120] sm:$0xff] }
 0x6f5   : >> { %7238 = vmatprep.subr.msk.mxu0 %vm1705_vm2, %v2965_v12  ;;  %v3395_v12 = vld [vmem:[%s10600_s3 + $0x118] sm:$0xff] }
 0x6f8   : >> { %3093 = vmatpush2.xpose.msra.mxu0 %v2964_v31  ;;  %v3393_v31 = vld [vmem:[%s10600_s3 + $0x108] sm:$0xff] }
 0x6f9   : >> { %7239 = vmatprep.subr.msk.mxu0 %vm1705_vm2, %v2963_v46  ;;  %v3392_v46 = vld [vmem:[%s10600_s3 + $0x100] sm:$0xff] }
 0x6fc   : >> { %3095 = vmatpush2.xpose.msra.mxu0 %v2962_v53  ;;  %v3160_v53 = vrot.slane %v3155_v0, %v10005_v41 }
 0x6fd   : >> { %7240 = vmatprep.subr.msk.mxu0 %vm1705_vm2, %v2961_v15  ;;  %v3164_v15 = vrot.slane %v3155_v0, %v10008_v51 }
 0x700   : >> { %3097 = vmatpush2.xpose.msra.mxu0 %v2960_v36 }
 0x701   : >> { %3419 = vmatprep.subr.mxu0 %v3391_v33 }
 0x703   : >> { %3099 = vmatmul.mubr.f32.vlgmr.msra.gmra.mxu0 %v10574_v18 }
 0x704   : >> { %7242 = vmatprep.mubr.msk.f32.mxu0 %vm1705_vm2, %v10577_v58  ;;  %3420 = vmatpush1.msra.mxu0 %v3390_v1 }
 0x705   : >> { %3421 = vmatprep.subr.mxu0 %v3389_v35 }
 0x706   : >> { %3422 = vmatpush1.msra.mxu0 %v3388_v48 }
 0x707   : >> { %3105 = vmatmul.mubr.f32.gmra.mxu0 %v10581_v62  ;;  %3423 = vmatprep.subr.mxu0 %v3387_v8 }
 0x708   : >> { %3424 = vmatpush1.msra.mxu0 %v3386_v22 }
 0x709   : >> { %3425 = vmatprep.subr.mxu0 %v3385_v49 }
 0x70a   : >> { %3426 = vmatpush1.msra.mxu0 %v3384_v42 }
 0x70b   : >> { %3427 = vmatprep.subr.mxu0 %v3383_v60 }
 0x70c   : >> { %3428 = vmatpush1.msra.mxu0 %v3382_v2 }
 0x70d   : >> { %3429 = vmatprep.subr.mxu0 %v3381_v24 }
 0x70e   : >> { %3430 = vmatpush1.msra.mxu0 %v3380_v11 }
 0x70f   : >> { %3431 = vmatprep.subr.mxu0 %v3379_v40 }
 0x710   : >> { %3432 = vmatpush1.msra.mxu0 %v3378_v32 }
 0x711   : >> { %3433 = vmatprep.subr.mxu0 %v3377_v25 }
 0x712   : >> { %3434 = vmatpush1.msra.mxu0 %v3376_v38 }
 0x713   : >> { %3435 = vmatprep.subr.mxu0 %v3375_v14 }
 0x714   : >> { %3436 = vmatpush1.msra.mxu0 %v3374_v37 }
 0x715   : >> { %3437 = vmatprep.subr.mxu0 %v3373_v6 }
 0x716   : >> { %3438 = vmatpush1.msra.mxu0 %v3372_v59 }
 0x717   : >> { %3439 = vmatprep.subr.mxu0 %v3371_v34 }
 0x718   : >> { %3440 = vmatpush1.msra.mxu0 %v3370_v17 }
 0x719   : >> { %3441 = vmatprep.subr.mxu0 %v3369_v7 }
 0x71a   : >> { %3442 = vmatpush1.msra.mxu0 %v3368_v20 }
 0x71b   : >> { %3443 = vmatprep.subr.mxu0 %v3367_v13 }
 0x71c   : >> { %3444 = vmatpush1.msra.mxu0 %v3366_v10 }
 0x71d   : >> { %3445 = vmatprep.subr.mxu0 %v3365_v44 }
 0x71e   : >> { %3446 = vmatpush1.msra.mxu0 %v3364_v27 }
 0x71f   : >> { %3447 = vmatprep.subr.mxu0 %v3363_v50 }
 0x720   : >> { %3448 = vmatpush1.msra.mxu0 %v3362_v57 }
 0x721   : >> { %3449 = vmatprep.subr.mxu0 %v3361_v4 }
 0x722   : >> { %3450 = vmatpush1.msra.mxu0 %v3360_v21 }
 0x723   : >> { %3475 = vmatprep.subr.mxu0 %v3399_v23 }
 0x724   : >> { %3476 = vmatpush2.msra.mxu0 %v3398_v26 }
 0x725   : >> { %3477 = vmatprep.subr.mxu0 %v3397_v28 }
 0x726   : >> { %3478 = vmatpush2.msra.mxu0 %v3396_v3 }
 0x727   : >> { %3479 = vmatprep.subr.mxu0 %v3395_v12 }
 0x728   : >> { %3480 = vmatpush2.msra.mxu0 %v3394_v9 }
 0x729   : >> { %3481 = vmatprep.subr.mxu0 %v3393_v31 }
 0x72a   : >> { %3482 = vmatpush2.msra.mxu0 %v3392_v46 }
 0x7c3   : >> { %v3100_v61 = vpop.f32.mrf.mxu0 }
 0x7c4   : >> { %v3101_v43 = vadd.f32 %v10574_v18, %v3100_v61 }
 0x7c5   : >> { %v3102_v47 = vpop.f32.mrf.mxu0 }
 0x7c6   : >> { %v3103_v45 = vadd.f32 %v10587_v39, %v3102_v47 }
 0x7c7   : >> { %v3106_v29 = vpop.f32.mrf.mxu0 }
 0x7c8   : >> { %7244 = vmatprep.mubr.msk.f32.mxu1 %vm1705_vm2, %v3103_v45  ;;  %v3107_v56 = vadd.f32 %v10581_v62, %v3106_v29 }
 0x7c9   : >> { %v3108_v63 = vpop.f32.mrf.mxu0  ;;  %3238 = vmatmul.mubr.f32.vlgmr.msra.gmra.mxu1 %v3101_v43 }
 0x7ca   : >> { %v3109_v16 = vadd.f32 %v10577_v58, %v3108_v63  ;;  %7498 = vmatpush3.msra.mxu1 %v10577_v58 }
 0x7cb   : >> { %7499 = vmatprep.subr.mxu1 %v10587_v39 }
 0x7cc   : >> { %7245 = vmatprep.mubr.msk.f32.mxu1 %vm1705_vm2, %v3109_v16  ;;  %7500 = vmatpush3.msra.mxu1 %v10587_v39 }
 0x7cd   : >> { %3244 = vmatmul.mubr.f32.gmra.mxu1 %v3107_v56 }
 0x889   : >> { %v3239_v36 = vpop.f32.mrf.mxu1 }
 0x88a   : >> { %v10645_v55 = vadd.f32 %v3239_v36, %v3160_v53 }
 0x88b   : >> { %v3241_v19 = vpop.f32.mrf.mxu1 }
 0x88c   : >> { %v10648_v61 = vmul.f32 0.70710677, %v10645_v55  ;;  %v10650_v47 = vadd.f32 %v3241_v19, %v3164_v15 }
 0x88d   : >> { %v3245_v45 = vpop.f32.mrf.mxu1 }
 0x88e   : >> { %v3258_v43 = vand.u32 2147483647, %v10648_v61  ;;  %v10654_v29 = vmul.f32 0.70710677, %v10650_v47  ;;  %v10656_v63 = vadd.f32 %v3245_v45, %v3160_v53  ;;  %vm3338_vm4 = vcmp.lt.f32.partialorder %v10648_v61, 0.0 }
 0x88f   : >> { %v3247_v16 = vpop.f32.mrf.mxu1  ;;  %v3250_v61 = vmul.f32 0.5, %v10645_v55  ;;  %v3401_v55 = vld [vmem:[%s3400_s12] sm:$0x3] }
 0x890   : >> { %v3262_v56 = vmul.f32 0.3275911, %v3258_v43  ;;  %v3259_v33 = vand.u32 2147483647, %v10654_v29  ;;  %v10660_v1 = vmul.f32 0.70710677, %v10656_v63  ;;  %v10662_v35 = vadd.f32 %v3247_v16, %v3164_v15 }
 0x891   : >> { %v3314_v32 = vsub.f32 0.0, %v3258_v43  ;;  %vm3339_vm5 = vcmp.lt.f32.partialorder %v10654_v29, 0.0 }
 0x892   : >> { %v3266_v48 = vadd.f32 1.0, %v3262_v56  ;;  %v3263_v8 = vmul.f32 0.3275911, %v3259_v33  ;;  %v3260_v22 = vand.u32 2147483647, %v10660_v1  ;;  %v3315_v25 = vsub.f32 0.0, %v3259_v33 }
 0x893   : >> { %v10666_v49 = vmul.f32 0.70710677, %v10662_v35  ;;  %v3318_v38 = vmul.f32 %v3314_v32, %v3258_v43  ;;  %vm3340_vm6 = vcmp.lt.f32.partialorder %v10660_v1, 0.0  ;;  %v3252_v1 = vmul.f32 0.5, %v10656_v63 }
 0x894   : >> { %8157 = vrcp.f32 %v3266_v48  ;;  %v3267_v42 = vadd.f32 1.0, %v3263_v8  ;;  %v3264_v60 = vmul.f32 0.3275911, %v3260_v22  ;;  %v3316_v14 = vsub.f32 0.0, %v3260_v22 }
 0x895   : >> { %v3261_v2 = vand.u32 2147483647, %v10666_v49  ;;  %v3319_v6 = vmul.f32 %v3315_v25, %v3259_v33  ;;  %v3322_v34 = vmul.f32 1.442695, %v3318_v38  ;;  %vm3341_vm7 = vcmp.lt.f32.partialorder %v10666_v49, 0.0 }
 0x896   : >> { %8159 = vrcp.f32 %v3267_v42  ;;  %v3268_v24 = vadd.f32 1.0, %v3264_v60  ;;  %v3320_v7 = vmul.f32 %v3316_v14, %v3260_v22  ;;  %v3410_v49 = vrot.slane %v3401_v55, %v10008_v51 }
 0x897   : >> { %v3265_v11 = vmul.f32 0.3275911, %v3261_v2  ;;  %v3317_v17 = vsub.f32 0.0, %v3261_v2  ;;  %v3324_v10 = vmul.f32 1.442695, %v3319_v6 }
 0x898   : >> { %8161 = vrcp.f32 %v3268_v24  ;;  %v3326_v4 = vmul.f32 1.442695, %v3320_v7 }
 0x899   : >> { %v3269_v40 = vadd.f32 1.0, %v3265_v11  ;;  %v3321_v57 = vmul.f32 %v3317_v17, %v3261_v2 }
 0x89b   : >> { %8163 = vrcp.f32 %v3269_v40  ;;  %v3328_v31 = vmul.f32 1.442695, %v3321_v57 }
 0x89c   : >> { %8165 = vpow2.f32 %v3322_v34 }
 0x89d   : >> { %8167 = vpow2.f32 %v3324_v10 }
 0x89e   : >> { %8169 = vpow2.f32 %v3326_v4 }
 0x89f   : >> { %8171 = vpow2.f32 %v3328_v31 }
 0x8a1   : >> { %v8158_v37 = vpop.eup %8157 }
 0x8a2   : >> { %v3278_v59 = vmul.f32 1.0614054, %v8158_v37 }
 0x8a3   : >> { %v8160_v20 = vpop.eup %8159 }
 0x8a4   : >> { %v3282_v13 = vadd.f32 -1.4531521, %v3278_v59  ;;  %v3279_v44 = vmul.f32 1.0614054, %v8160_v20 }
 0x8a5   : >> { %v8162_v27 = vpop.eup %8161 }
 0x8a6   : >> { %v3286_v50 = vmul.f32 %v8158_v37, %v3282_v13  ;;  %v3283_v21 = vadd.f32 -1.4531521, %v3279_v44  ;;  %v3280_v23 = vmul.f32 1.0614054, %v8162_v27 }
 0x8a8   : >> { %v3290_v26 = vadd.f32 1.4214138, %v3286_v50  ;;  %v8164_v28 = vpop.eup %8163  ;;  %v3287_v3 = vmul.f32 %v8160_v20, %v3283_v21  ;;  %v3284_v12 = vadd.f32 -1.4531521, %v3280_v23 }
 0x8a9   : >> { %v3281_v46 = vmul.f32 1.0614054, %v8164_v28  ;;  %v8166_v24 = vpop.eup %8165 }
 0x8aa   : >> { %v3294_v9 = vmul.f32 %v8158_v37, %v3290_v26  ;;  %v3291_v0 = vadd.f32 1.4214138, %v3287_v3  ;;  %v3288_v53 = vmul.f32 %v8162_v27, %v3284_v12  ;;  %v8168_v6 = vpop.eup %8167 }
 0x8ab   : >> { %v3285_v36 = vadd.f32 -1.4531521, %v3281_v46  ;;  %v8170_v13 = vpop.eup %8169 }
 0x8ac   : >> { %v3298_v15 = vadd.f32 -0.28449672, %v3294_v9  ;;  %v3295_v19 = vmul.f32 %v8160_v20, %v3291_v0  ;;  %v3292_v45 = vadd.f32 1.4214138, %v3288_v53  ;;  %v8172_v21 = vpop.eup %8171 }
 0x8ad   : >> { %v3289_v16 = vmul.f32 %v8164_v28, %v3285_v36 }
 0x8ae   : >> { %v3302_v43 = vmul.f32 %v8158_v37, %v3298_v15  ;;  %v3299_v56 = vadd.f32 -0.28449672, %v3295_v19  ;;  %v3296_v33 = vmul.f32 %v8162_v27, %v3292_v45  ;;  %v3253_v19 = vmul.f32 0.5, %v10662_v35 }
 0x8af   : >> { %v3293_v8 = vadd.f32 1.4214138, %v3289_v16  ;;  %v3406_v16 = vrot.slane %v3401_v55, %v10005_v41 }
 0x8b0   : >> { %v3306_v48 = vadd.f32 0.2548296, %v3302_v43  ;;  %v3303_v22 = vmul.f32 %v8160_v20, %v3299_v56  ;;  %v3300_v42 = vadd.f32 -0.28449672, %v3296_v33 }
 0x8b1   : >> { %v3297_v2 = vmul.f32 %v8164_v28, %v3293_v8 }
 0x8b2   : >> { %v3310_v60 = vmul.f32 %v8158_v37, %v3306_v48  ;;  %v3307_v11 = vadd.f32 0.2548296, %v3303_v22  ;;  %v3304_v40 = vmul.f32 %v8162_v27, %v3300_v42 }
 0x8b3   : >> { %v3301_v25 = vadd.f32 -0.28449672, %v3297_v2 }
 0x8b4   : >> { %v3330_v32 = vmul.f32 %v8166_v24, %v3310_v60  ;;  %v3311_v38 = vmul.f32 %v8160_v20, %v3307_v11  ;;  %v3308_v14 = vadd.f32 0.2548296, %v3304_v40 }
 0x8b5   : >> { %v3305_v34 = vmul.f32 %v8164_v28, %v3301_v25 }
 0x8b6   : >> { %v3334_v59 = vsub.f32 1.0, %v3330_v32  ;;  %v3331_v17 = vmul.f32 %v8168_v6, %v3311_v38  ;;  %v3312_v7 = vmul.f32 %v8162_v27, %v3308_v14  ;;  %v3251_v27 = vmul.f32 0.5, %v10650_v47 }
 0x8b7   : >> { %v3309_v44 = vadd.f32 0.2548296, %v3305_v34 }
 0x8b8   : >> { %v3342_v10 = vsub.f32 0.0, %v3334_v59  ;;  %v3335_v50 = vsub.f32 1.0, %v3331_v17  ;;  %v3332_v37 = vmul.f32 %v8170_v13, %v3312_v7 }
 0x8b9   : >> { %v3313_v4 = vmul.f32 %v8164_v28, %v3309_v44 }
 0x8ba   : >> { %v3346_v57 = vsel %vm3338_vm4, %v3342_v10, %v3334_v59  ;;  %v3343_v23 = vsub.f32 0.0, %v3335_v50  ;;  %v3336_v26 = vsub.f32 1.0, %v3332_v37 }
 0x8bb   : >> { %v3333_v20 = vmul.f32 %v8172_v21, %v3313_v4  ;;  %v3350_v3 = vadd.f32 1.0, %v3346_v57 }
 0x8bc   : >> { %v3347_v12 = vsel %vm3339_vm5, %v3343_v23, %v3335_v50  ;;  %v3344_v9 = vsub.f32 0.0, %v3336_v26 }
 0x8bd   : >> { %v3351_v31 = vadd.f32 1.0, %v3347_v12  ;;  %v3337_v46 = vsub.f32 1.0, %v3333_v20  ;;  %v3354_v15 = vmul.f32 %v3350_v3, %v3250_v61 }
 0x8be   : >> { %v3348_v0 = vsel %vm3340_vm6, %v3344_v9, %v3336_v26 }
 0x8bf   : >> { %v3355_v28 = vmul.f32 %v3351_v31, %v3251_v27  ;;  %v3345_v53 = vsub.f32 0.0, %v3337_v46  ;;  %v3352_v36 = vadd.f32 1.0, %v3348_v0 }
 0x8c1   : >> { %7247 = vmatprep.mubr.msk.f32.mxu0 %vm1705_vm2, %v3355_v28  ;;  %v3349_v29 = vsel %vm3341_vm7, %v3345_v53, %v3337_v46  ;;  %v3356_v43 = vmul.f32 %v3352_v36, %v3252_v1 }
 0x8c2   : >> { %3484 = vmatmul.mubr.f32.vlgmr.msra.gmra.mxu0 %v3354_v15  ;;  %v3353_v47 = vadd.f32 1.0, %v3349_v29 }
 0x8c4   : >> { %v3357_v45 = vmul.f32 %v3353_v47, %v3253_v19 }
 0x8c6   : >> { %7248 = vmatprep.mubr.msk.f32.mxu0 %vm1705_vm2, %v3357_v45 }
 0x8c7   : >> { %3490 = vmatmul.mubr.f32.gmra.mxu0 %v3356_v43 }
 0x982   : >> { %v3485_v56 = vpop.f32.mrf.mxu0 }
 0x983   : >> { %v3486_v33 = vadd.f32 %v3485_v56, %v3406_v16 }
 0x984   : >> { %v3487_v48 = vpop.f32.mrf.mxu0 }
 0x985   : >> { %v3496_v35 = vadd.f32 %v10574_v18, %v3486_v33  ;;  %v3488_v8 = vadd.f32 %v3487_v48, %v3410_v49 }
 0x987   : >> { %v10684_v22 = vmul.f32 %v3496_v35, %v9950_v52  ;;  %v3497_v63 = vadd.f32 %v10587_v39, %v3488_v8  ;;  %v3491_v42 = vpop.f32.mrf.mxu0 }
 0x988   : >> { %v3492_v60 = vadd.f32 %v3491_v42, %v3406_v16 }
 0x989   : >> { %v3501_v2 = vmul.f32 %v3497_v63, %v9950_v52  ;;  %v3493_v24 = vpop.f32.mrf.mxu0  ;;  %3504 = vxpose.xlu0.b32.start [1/2] (short) %v10684_v22, 128 }
 0x98a   : >> { %v3498_v11 = vadd.f32 %v10581_v62, %v3492_v60  ;;  %v3494_v40 = vadd.f32 %v3493_v24, %v3410_v49 }
 0x98b   : >> { %4495 = vst.msk [vmem:[#allocation2 + $0x8] sm:$0xff] %vm1705_vm2, %v3501_v2 }
 0x98c   : >> { %v10692_v18 = vmul.f32 %v3498_v11, %v9973_v30  ;;  %v3499_v32 = vadd.f32 %v10577_v58, %v3494_v40 }
 0x98e   : >> { %v3503_v25 = vmul.f32 %v3499_v32, %v9973_v30  ;;  %3505 = vxpose.xlu0.b32.end [2/2] (short) %v10692_v18, 128 }
 0x990   : >> { %4496 = vst.msk [vmem:[#allocation2 + $0x18] sm:$0xff] %vm1705_vm2, %v3503_v25 }
 0xa06   : >> { %v3520_v39 = vpop.trf.xlu0 }
 0xa07   : >> { %7501 = vmatprep.mubr.msk.f32.mxu1 %vm2262_vm3, %v3520_v39 }
 0xa0a   : >> { %v3521_v38 = vpop.trf.xlu0 }
 0xa0b   : >> { %7502 = vmatmul.mubr.msk.f32.vlgmr.msra.gmra.mxu1 %vm2262_vm3, %v3521_v38 }
 0xa0e   : >> { %v3522_v62 = vpop.trf.xlu0 }
 0xa0f   : >> { %7504 = vmatprep.mubr.msk.f32.mxu1 %vm2262_vm3, %v3522_v62 }
 0xa12   : >> { %v3523_v14 = vpop.trf.xlu0 }
 0xa13   : >> { %7505 = vmatmul.mubr.msk.f32.gmra.mxu1 %vm2262_vm3, %v3523_v14 }
 0xa16   : >> { %v3524_v6 = vpop.trf.xlu0 }
 0xa17   : >> { %7507 = vmatprep.mubr.msk.f32.mxu1 %vm2262_vm3, %v3524_v6 }
 0xa1a   : >> { %v3525_v58 = vpop.trf.xlu0 }
 0xa1b   : >> { %7508 = vmatmul.mubr.msk.f32.gmra.mxu1 %vm2262_vm3, %v3525_v58 }
 0xa1e   : >> { %v3526_v59 = vpop.trf.xlu0 }
 0xa1f   : >> { %7510 = vmatprep.mubr.msk.f32.mxu1 %vm2262_vm3, %v3526_v59 }
 0xa22   : >> { %v3527_v34 = vpop.trf.xlu0 }
 0xa23   : >> { %7511 = vmatmul.mubr.msk.f32.gmra.mxu1 %vm2262_vm3, %v3527_v34 }
 0xa26   : >> { %v3528_v17 = vpop.trf.xlu0 }
 0xa27   : >> { %7513 = vmatprep.mubr.msk.f32.mxu1 %vm2262_vm3, %v3528_v17 }
 0xa2a   : >> { %v3529_v7 = vpop.trf.xlu0 }
 0xa2b   : >> { %7514 = vmatmul.mubr.msk.f32.gmra.mxu1 %vm2262_vm3, %v3529_v7 }
 0xa2e   : >> { %v3530_v13 = vpop.trf.xlu0 }
 0xa2f   : >> { %7516 = vmatprep.mubr.msk.f32.mxu1 %vm2262_vm3, %v3530_v13 }
 0xa32   : >> { %v3531_v10 = vpop.trf.xlu0 }
 0xa33   : >> { %7517 = vmatmul.mubr.msk.f32.gmra.mxu1 %vm2262_vm3, %v3531_v10 }
 0xa36   : >> { %v3532_v44 = vpop.trf.xlu0 }
 0xa37   : >> { %7519 = vmatprep.mubr.msk.f32.mxu1 %vm2262_vm3, %v3532_v44 }
 0xa3a   : >> { %v3533_v50 = vpop.trf.xlu0 }
 0xa3b   : >> { %7520 = vmatmul.mubr.msk.f32.gmra.mxu1 %vm2262_vm3, %v3533_v50 }
 0xa3e   : >> { %v3534_v37 = vpop.trf.xlu0 }
 0xa3f   : >> { %7522 = vmatprep.mubr.msk.f32.mxu1 %vm2262_vm3, %v3534_v37 }
 0xa42   : >> { %v3535_v57 = vpop.trf.xlu0 }
 0xa43   : >> { %7523 = vmatmul.mubr.msk.f32.gmra.mxu1 %vm2262_vm3, %v3535_v57 }
 0xa44   : >> { %7557 = vmatprep.mubr.f32.mxu1 %v10684_v22 }
 0xacb   : >> { %v7503_v4 = vpop.f32.mrf.mxu1 }
 0xacc   : >> { %v3730_v20 = vmul.f32 0.0625, %v7503_v4 }
 0xacd   : >> { %v3650_v21 = vpop.f32.mrf.mxu1 }
 0xace   : >> { %v3729_v23 = vmul.f32 0.0625, %v3650_v21  ;;  %v3746_v31 = vsel %vm1705_vm2, %v3730_v20, -inf }
 0xad0   : >> { %v3745_v9 = vsel %vm1705_vm2, %v3729_v23, -inf }
 0xad1   : >> { %v3749_v0 = vmax.f32 %v3745_v9, %v3746_v31 }
 0xad3   : >> { %v7506_v26 = vpop.f32.mrf.mxu1 }
 0xad4   : >> { %v3732_v3 = vmul.f32 0.0625, %v7506_v26 }
 0xad5   : >> { %v3660_v12 = vpop.f32.mrf.mxu1 }
 0xad6   : >> { %v3731_v27 = vmul.f32 0.0625, %v3660_v12  ;;  %v3748_v46 = vsel %vm1705_vm2, %v3732_v3, -inf }
 0xad8   : >> { %v3747_v61 = vsel %vm1705_vm2, %v3731_v27, -inf }
 0xad9   : >> { %v3750_v28 = vmax.f32 %v3747_v61, %v3748_v46 }
 0xadb   : >> { %v3751_v53 = vmax.f32 %v3749_v0, %v3750_v28  ;;  %v7509_v15 = vpop.f32.mrf.mxu1 }
 0xadc   : >> { %v3734_v55 = vmul.f32 0.0625, %v7509_v15 }
 0xadd   : >> { %v3752_v29 = vrot.slane %v3751_v53, 4  ;;  %v3670_v19 = vpop.f32.mrf.mxu1 }
 0xade   : >> { %v3733_v45 = vmul.f32 0.0625, %v3670_v19  ;;  %v3789_v8 = vsel %vm1705_vm2, %v3734_v55, -inf }
 0xadf   : >> { %v3753_v36 = vmax.f32 %v3751_v53, %v3752_v29 }
 0xae0   : >> { %v3788_v35 = vsel %vm1705_vm2, %v3733_v45, -inf }
 0xae1   : >> { %v3754_v47 = vrot.slane %v3753_v36, 2  ;;  %v3792_v40 = vmax.f32 %v3788_v35, %v3789_v8 }
 0xae3   : >> { %v3755_v1 = vmax.f32 %v3753_v36, %v3754_v47  ;;  %v7512_v43 = vpop.f32.mrf.mxu1 }
 0xae4   : >> { %v3736_v16 = vmul.f32 0.0625, %v7512_v43 }
 0xae5   : >> { %v3756_v49 = vrot.slane %v3755_v1, 1  ;;  %v3680_v56 = vpop.f32.mrf.mxu1 }
 0xae6   : >> { %v3735_v33 = vmul.f32 0.0625, %v3680_v56  ;;  %v3791_v63 = vsel %vm1705_vm2, %v3736_v16, -inf }
 0xae7   : >> { %v3757_v48 = vmax.f32 %v3755_v1, %v3756_v49 }
 0xae8   : >> { %v3790_v42 = vsel %vm1705_vm2, %v3735_v33, -inf }
 0xae9   : >> { %v3758_v60 = vsub.f32 %v3729_v23, %v3757_v48  ;;  %v3759_v2 = vsub.f32 %v3730_v20, %v3757_v48  ;;  %v3760_v24 = vsub.f32 %v3731_v27, %v3757_v48  ;;  %v3761_v11 = vsub.f32 %v3732_v3, %v3757_v48 }
 0xaea   : >> { %v3793_v32 = vmax.f32 %v3790_v42, %v3791_v63 }
 0xaeb   : >> { %v3762_v25 = vmul.f32 1.442695, %v3758_v60  ;;  %v3764_v39 = vmul.f32 1.442695, %v3759_v2  ;;  %v3766_v38 = vmul.f32 1.442695, %v3760_v24  ;;  %v7515_v62 = vpop.f32.mrf.mxu1 }
 0xaec   : >> { %v3768_v14 = vmul.f32 1.442695, %v3761_v11  ;;  %v3794_v6 = vmax.f32 %v3792_v40, %v3793_v32  ;;  %v10723_v17 = vmul.f32 0.0625, %v7515_v62 }
 0xaed   : >> { %8173 = vpow2.f32 %v3762_v25  ;;  %v3690_v59 = vpop.f32.mrf.mxu1 }
 0xaee   : >> { %8175 = vpow2.f32 %v3764_v39  ;;  %v3795_v58 = vrot.slane %v3794_v6, 4  ;;  %v10725_v7 = vmul.f32 0.0625, %v3690_v59  ;;  %v3832_v50 = vsel %vm1705_vm2, %v10723_v17, -inf }
 0xaef   : >> { %8177 = vpow2.f32 %v3766_v38 }
 0xaf0   : >> { %8179 = vpow2.f32 %v3768_v14  ;;  %v3796_v34 = vmax.f32 %v3794_v6, %v3795_v58  ;;  %v3831_v37 = vsel %vm1705_vm2, %v10725_v7, -inf }
 0xaf1   : >> { %v3835_v20 = vmax.f32 %v3831_v37, %v3832_v50 }
 0xaf2   : >> { %v3797_v13 = vrot.slane %v3796_v34, 2 }
 0xaf3   : >> { %v7518_v10 = vpop.f32.mrf.mxu1 }
 0xaf4   : >> { %v3798_v44 = vmax.f32 %v3796_v34, %v3797_v13  ;;  %v10731_v57 = vmul.f32 0.0625, %v7518_v10 }
 0xaf5   : >> { %v3700_v4 = vpop.f32.mrf.mxu1 }
 0xaf6   : >> { %v3799_v21 = vrot.slane %v3798_v44, 1  ;;  %v3834_v23 = vsel %vm1705_vm2, %v10731_v57, -inf  ;;  %v10735_v26 = vmul.f32 0.0625, %v3700_v4 }
 0xaf8   : >> { %v3800_v3 = vmax.f32 %v3798_v44, %v3799_v21  ;;  %v3833_v12 = vsel %vm1705_vm2, %v10735_v26, -inf }
 0xaf9   : >> { %v3836_v9 = vmax.f32 %v3833_v12, %v3834_v23 }
 0xafa   : >> { %v10739_v27 = vpop.eup %8173  ;;  %v3801_v31 = vsub.f32 %v3733_v45, %v3800_v3  ;;  %v3802_v46 = vsub.f32 %v3734_v55, %v3800_v3  ;;  %v3803_v61 = vsub.f32 %v3735_v33, %v3800_v3  ;;  %v3804_v0 = vsub.f32 %v3736_v16, %v3800_v3 }
 0xafb   : >> { %v10741_v28 = vpop.eup %8175  ;;  %v3770_v53 = vsel %vm1705_vm2, %v10739_v27, 0.0  ;;  %v3837_v15 = vmax.f32 %v3835_v20, %v3836_v9  ;;  %v7521_v29 = vpop.f32.mrf.mxu1 }
 0xafc   : >> { %v10745_v36 = vpop.eup %8177  ;;  %v3771_v19 = vsel %vm1705_vm2, %v10741_v28, 0.0  ;;  %v3805_v47 = vmul.f32 1.442695, %v3801_v31  ;;  %v3807_v1 = vmul.f32 1.442695, %v3802_v46  ;;  %v10753_v48 = vmul.f32 0.0625, %v7521_v29 }
 0xafd   : >> { %v10749_v43 = vpop.eup %8179  ;;  %v3772_v45 = vadd.f32 %v3771_v19, %v3770_v53  ;;  %v3809_v55 = vmul.f32 1.442695, %v3803_v61  ;;  %v3811_v49 = vmul.f32 1.442695, %v3804_v0  ;;  %v3773_v16 = vsel %vm1705_vm2, %v10745_v36, 0.0  ;;  %v3710_v35 = vpop.f32.mrf.mxu1 }
 0xafe   : >> { %8181 = vpow2.f32 %v3805_v47  ;;  %v3838_v56 = vrot.slane %v3837_v15, 4  ;;  %v3775_v8 = vsel %vm1705_vm2, %v10749_v43, 0.0  ;;  %v10757_v42 = vmul.f32 0.0625, %v3710_v35 }
 0xaff   : >> { %v3774_v33 = vadd.f32 %v3773_v16, %v3772_v45  ;;  %8183 = vpow2.f32 %v3807_v1  ;;  %v3875_v32 = vsel %vm1705_vm2, %v10753_v48, -inf }
 0xb00   : >> { %8185 = vpow2.f32 %v3809_v55  ;;  %v3839_v63 = vmax.f32 %v3837_v15, %v3838_v56  ;;  %v3874_v25 = vsel %vm1705_vm2, %v10757_v42, -inf }
 0xb01   : >> { %v3776_v60 = vadd.f32 %v3775_v8, %v3774_v33  ;;  %8187 = vpow2.f32 %v3811_v49  ;;  %v3878_v34 = vmax.f32 %v3874_v25, %v3875_v32 }
 0xb02   : >> { %v3840_v2 = vrot.slane %v3839_v63, 2 }
 0xb03   : >> { %v3777_v24 = vrot.slane %v3776_v60, 4  ;;  %v7524_v11 = vpop.f32.mrf.mxu1 }
 0xb04   : >> { %v3841_v40 = vmax.f32 %v3839_v63, %v3840_v2  ;;  %v3744_v39 = vmul.f32 0.0625, %v7524_v11 }
 0xb05   : >> { %v3778_v38 = vadd.f32 %v3777_v24, %v3776_v60  ;;  %v3720_v62 = vpop.f32.mrf.mxu1 }
 0xb06   : >> { %v3842_v14 = vrot.slane %v3841_v40, 1  ;;  %v3877_v6 = vsel %vm1705_vm2, %v3744_v39, -inf  ;;  %v3743_v58 = vmul.f32 0.0625, %v3720_v62 }
 0xb07   : >> { %v3779_v59 = vrot.slane %v3778_v38, 2 }
 0xb08   : >> { %v3843_v13 = vmax.f32 %v3841_v40, %v3842_v14  ;;  %v3876_v10 = vsel %vm1705_vm2, %v3743_v58, -inf }
 0xb09   : >> { %v3780_v44 = vadd.f32 %v3779_v59, %v3778_v38  ;;  %v3879_v50 = vmax.f32 %v3876_v10, %v3877_v6 }
 0xb0a   : >> { %v3844_v37 = vsub.f32 %v10725_v7, %v3843_v13  ;;  %v3845_v4 = vsub.f32 %v10723_v17, %v3843_v13  ;;  %v3846_v20 = vsub.f32 %v10735_v26, %v3843_v13  ;;  %v3847_v29 = vsub.f32 %v10731_v57, %v3843_v13 }
 0xb0b   : >> { %v10767_v21 = vpop.eup %8181  ;;  %v3781_v23 = vrot.slane %v3780_v44, 1  ;;  %v3880_v3 = vmax.f32 %v3878_v34, %v3879_v50 }
 0xb0c   : >> { %v10770_v12 = vpop.eup %8183  ;;  %v3813_v9 = vsel %vm1705_vm2, %v10767_v21, 0.0  ;;  %v3848_v31 = vmul.f32 1.442695, %v3844_v37  ;;  %v3850_v46 = vmul.f32 1.442695, %v3845_v4 }
 0xb0d   : >> { %v10774_v61 = vpop.eup %8185  ;;  %v3782_v0 = vadd.f32 %v3781_v23, %v3780_v44  ;;  %v3814_v7 = vsel %vm1705_vm2, %v10770_v12, 0.0  ;;  %v3881_v15 = vrot.slane %v3880_v3, 4  ;;  %v3852_v19 = vmul.f32 1.442695, %v3846_v20 }
 0xb0e   : >> { %v8188_v17 = vpop.eup %8187  ;;  %v3815_v53 = vadd.f32 %v3814_v7, %v3813_v9  ;;  %8189 = vpow2.f32 %v3848_v31  ;;  %v3816_v26 = vsel %vm1705_vm2, %v10774_v61, 0.0  ;;  %v3854_v16 = vmul.f32 1.442695, %v3847_v29 }
 0xb0f   : >> { %8191 = vrcp.f32 %v3782_v0  ;;  %v3882_v1 = vmax.f32 %v3880_v3, %v3881_v15  ;;  %v3818_v45 = vsel %vm1705_vm2, %v8188_v17, 0.0 }
 0xb10   : >> { %v3817_v47 = vadd.f32 %v3816_v26, %v3815_v53  ;;  %8193 = vpow2.f32 %v3850_v46 }
 0xb11   : >> { %v3883_v49 = vrot.slane %v3882_v1, 2  ;;  %8195 = vpow2.f32 %v3852_v19 }
 0xb12   : >> { %v3819_v55 = vadd.f32 %v3818_v45, %v3817_v47  ;;  %8197 = vpow2.f32 %v3854_v16 }
 0xb13   : >> { %v3884_v33 = vmax.f32 %v3882_v1, %v3883_v49 }
 0xb14   : >> { %v3820_v56 = vrot.slane %v3819_v55, 4 }
 0xb15   : >> { %v3885_v8 = vrot.slane %v3884_v33, 1 }
 0xb16   : >> { %v3821_v35 = vadd.f32 %v3820_v56, %v3819_v55 }
 0xb17   : >> { %v3886_v60 = vmax.f32 %v3884_v33, %v3885_v8 }
 0xb18   : >> { %v3822_v63 = vrot.slane %v3821_v35, 2 }
 0xb19   : >> { %v3887_v57 = vsub.f32 %v10757_v42, %v3886_v60  ;;  %v3888_v24 = vsub.f32 %v10753_v48, %v3886_v60  ;;  %v3889_v11 = vsub.f32 %v3743_v58, %v3886_v60  ;;  %v3890_v32 = vsub.f32 %v3744_v39, %v3886_v60 }
 0xb1a   : >> { %v3823_v2 = vadd.f32 %v3822_v63, %v3821_v35 }
 0xb1b   : >> { %v10784_v40 = vpop.eup %8189  ;;  %v3891_v62 = vmul.f32 1.442695, %v3887_v57  ;;  %v3893_v14 = vmul.f32 1.442695, %v3888_v24  ;;  %v3895_v59 = vmul.f32 1.442695, %v3889_v11 }
 0xb1c   : >> { %v10786_v25 = vpop.eup %8191  ;;  %v3824_v38 = vrot.slane %v3823_v2, 1  ;;  %v3897_v13 = vmul.f32 1.442695, %v3890_v32  ;;  %v3856_v48 = vsel %vm1705_vm2, %v10784_v40, 0.0 }
 0xb1d   : >> { %v10788_v6 = vpop.eup %8193  ;;  %8199 = vpow2.f32 %v3891_v62  ;;  %v10792_v42 = vmul.f32 %v10786_v25, %v10749_v43  ;;  %v10800_v58 = vmul.f32 %v10786_v25, %v10741_v28  ;;  %v10862_v62 = vmul.f32 %v10786_v25, %v10745_v36 }
 0xb1e   : >> { %v3825_v34 = vadd.f32 %v3824_v38, %v3823_v2  ;;  %v3857_v39 = vsel %vm1705_vm2, %v10788_v6, 0.0  ;;  %8201 = vpow2.f32 %v3893_v14  ;;  %v10802_v10 = vpop.eup %8195  ;;  %v10881_v36 = vmul.f32 %v10786_v25, %v10739_v27 }
 0xb1f   : >> { %v3858_v44 = vadd.f32 %v3857_v39, %v3856_v48  ;;  %v3859_v43 = vsel %vm1705_vm2, %v10802_v10, 0.0  ;;  %v8198_v50 = vpop.eup %8197 }
 0xb20   : >> { %8203 = vrcp.f32 %v3825_v34  ;;  %v3861_v4 = vsel %vm1705_vm2, %v8198_v50, 0.0 }
 0xb21   : >> { %8205 = vpow2.f32 %v3895_v59  ;;  %v3860_v37 = vadd.f32 %v3859_v43, %v3858_v44 }
 0xb22   : >> { %8207 = vpow2.f32 %v3897_v13 }
 0xb23   : >> { %v3862_v23 = vadd.f32 %v3861_v4, %v3860_v37 }
 0xb25   : >> { %v3863_v0 = vrot.slane %v3862_v23, 4 }
 0xb27   : >> { %v3864_v47 = vadd.f32 %v3863_v0, %v3862_v23 }
 0xb29   : >> { %v3865_v55 = vrot.slane %v3864_v47, 2 }
 0xb2a   : >> { %v8200_v20 = vpop.eup %8199 }
 0xb2b   : >> { %v8202_v3 = vpop.eup %8201  ;;  %v3899_v9 = vsel %vm1705_vm2, %v8200_v20, 0.0  ;;  %v3866_v56 = vadd.f32 %v3865_v55, %v3864_v47  ;;  %v4246_v47 = vld [vmem:[%s10961_s15 + $0x50] sm:$0xff] }
 0xb2c   : >> { %v3900_v31 = vsel %vm1705_vm2, %v8202_v3, 0.0 }
 0xb2d   : >> { %v8204_v28 = vpop.eup %8203  ;;  %v3901_v7 = vadd.f32 %v3900_v31, %v3899_v9  ;;  %v3867_v8 = vrot.slane %v3866_v56, 1  ;;  %v4251_v31 = vld [vmem:[%s10961_s15 + $0x78] sm:$0xff] }
 0xb2e   : >> { %v8206_v46 = vpop.eup %8205  ;;  %v10809_v53 = vmul.f32 %v8204_v28, %v8188_v17  ;;  %v10818_v49 = vmul.f32 %v8204_v28, %v10774_v61  ;;  %v10827_v61 = vmul.f32 %v8204_v28, %v10770_v12  ;;  %v10836_v57 = vmul.f32 %v8204_v28, %v10767_v21  ;;  %7560 = vmatprep.subr.mxu0 %v4251_v31 }
 0xb2f   : >> { %v8208_v15 = vpop.eup %8207  ;;  %v3902_v26 = vsel %vm1705_vm2, %v8206_v46, 0.0  ;;  %v3868_v60 = vadd.f32 %v3867_v8, %v3866_v56  ;;  %7561 = vmatpush3.msra.mxu0 %v4251_v31  ;;  %v4242_v56 = vld [vmem:[%s10961_s15 + $0x30] sm:$0xff] }
 0xb30   : >> { %v3903_v29 = vadd.f32 %v3902_v26, %v3901_v7  ;;  %v3904_v19 = vsel %vm1705_vm2, %v8208_v15, 0.0  ;;  %3947 = vrot.lane.b32.xlu1 %v10809_v53, %s9117_s22  ;;  %v4249_v7 = vld [vmem:[%s10961_s15 + $0x68] sm:$0xff]  ;;  %v4247_v26 = vld [vmem:[%s10961_s15 + $0x58] sm:$0xff] }
 0xb32   : >> { %v3905_v1 = vadd.f32 %v3904_v19, %v3903_v29 }
 0xb34   : >> { %v3906_v45 = vrot.slane %v3905_v1, 4  ;;  %3995 = vrot.lane.b32.xlu1 %v10809_v53, %s9118_s7 }
 0xb36   : >> { %v3907_v17 = vadd.f32 %v3906_v45, %v3905_v1  ;;  %v4245_v45 = vld [vmem:[%s10961_s15 + $0x48] sm:$0xff] }
 0xb38   : >> { %v3908_v16 = vrot.slane %v3907_v17, 2  ;;  %3945 = vrot.lane.b32.xlu1 %v10818_v49, %s9117_s22 }
 0xb3a   : >> { %v3909_v33 = vadd.f32 %v3908_v16, %v3907_v17  ;;  %v4244_v17 = vld [vmem:[%s10961_s15 + $0x40] sm:$0xff] }
 0xb3c   : >> { %v3910_v35 = vrot.slane %v3909_v33, 1  ;;  %4043 = vrot.lane.b32.xlu1 %v10809_v53, %s9119_s13 }
 0xb3e   : >> { %v3911_v63 = vadd.f32 %v3910_v35, %v3909_v33  ;;  %v4241_v35 = vld [vmem:[%s10961_s15 + $0x28] sm:$0xff] }
 0xb40   : >> { %8209 = vrcp.f32 %v3911_v63  ;;  %3993 = vrot.lane.b32.xlu1 %v10818_v49, %s9118_s7 }
 0xb41   : >> { %8211 = vrcp.f32 %v3868_v60  ;;  %v4240_v60 = vld [vmem:[%s10961_s15 + $0x20] sm:$0xff] }
 0xb44   : >> { %3943 = vrot.lane.b32.xlu1 %v10827_v61, %s9117_s22 }
 0xb48   : >> { %4041 = vrot.lane.b32.xlu1 %v10818_v49, %s9119_s13 }
 0xb4c   : >> { %3991 = vrot.lane.b32.xlu1 %v10827_v61, %s9118_s7 }
 0xb4d   : >> { %v8210_v2 = vpop.eup %8209 }
 0xb4e   : >> { %v10838_v24 = vmul.f32 %v8210_v2, %v8202_v3  ;;  %v10840_v11 = vmul.f32 %v8210_v2, %v8208_v15  ;;  %v10842_v12 = vmul.f32 %v8210_v2, %v8206_v46  ;;  %v10844_v32 = vmul.f32 %v8210_v2, %v8200_v20  ;;  %v8212_v38 = vpop.eup %8211  ;;  %v4250_v46 = vld [vmem:[%s10961_s15 + $0x70] sm:$0xff]  ;;  %v4248_v15 = vld [vmem:[%s10961_s15 + $0x60] sm:$0xff]  ;;  %v4239_v2 = vld [vmem:[%s10961_s15 + $0x18] sm:$0xff] }
 0xb4f   : >> { %v10854_v21 = vmul.f32 %v8212_v38, %v8198_v50  ;;  %v10869_v14 = vmul.f32 %v8212_v38, %v10802_v10  ;;  %v10888_v59 = vmul.f32 %v8212_v38, %v10788_v6  ;;  %v10899_v27 = vmul.f32 %v8212_v38, %v10784_v40  ;;  %7562 = vmatprep.subr.mxu0 %v4250_v46 }
 0xb50   : >> { %3941 = vrot.lane.b32.xlu1 %v10836_v57, %s9117_s22  ;;  %4055 = vrot.lane.b32.xlu0 %v10838_v24, %s9119_s13 }
 0xb51   : >> { %7563 = vmatpush3.msra.mxu0 %v4250_v46 }
 0xb52   : >> { %7564 = vmatprep.subr.mxu0 %v4249_v7 }
 0xb53   : >> { %7565 = vmatpush3.msra.mxu0 %v4249_v7 }
 0xb54   : >> { %4039 = vrot.lane.b32.xlu1 %v10827_v61, %s9119_s13  ;;  %3989 = vrot.lane.b32.xlu0 %v10836_v57, %s9118_s7 }
 0xb55   : >> { %7566 = vmatprep.subr.mxu0 %v4248_v15 }
 0xb56   : >> { %7567 = vmatpush3.msra.mxu0 %v4248_v15  ;;  %v4141_v15 = vld [vmem:[#allocation17 + $0x70] sm:$0xff] }
 0xb57   : >> { %7568 = vmatprep.subr.mxu0 %v4247_v26 }
 0xb58   : >> { %3955 = vrot.lane.b32.xlu1 %v10854_v21, %s9117_s22  ;;  %4037 = vrot.lane.b32.xlu0 %v10836_v57, %s9119_s13 }
 0xb59   : >> { %7569 = vmatpush3.msra.mxu0 %v4247_v26 }
 0xb5a   : >> { %7570 = vmatprep.subr.mxu0 %v4246_v47 }
 0xb5b   : >> { %7571 = vmatpush3.msra.mxu0 %v4246_v47 }
 0xb5c   : >> { %4003 = vrot.lane.b32.xlu1 %v10854_v21, %s9118_s7  ;;  %3937 = vrot.lane.b32.xlu0 %v10862_v62, %s9117_s22 }
 0xb5d   : >> { %7572 = vmatprep.subr.mxu0 %v4245_v45 }
 0xb5e   : >> { %7573 = vmatpush3.msra.mxu0 %v4245_v45  ;;  %v4140_v45 = vld [vmem:[#allocation17 + $0x68] sm:$0xff] }
 0xb5f   : >> { %7574 = vmatprep.subr.mxu0 %v4244_v17 }
 0xb60   : >> { %3953 = vrot.lane.b32.xlu1 %v10869_v14, %s9117_s22  ;;  %3985 = vrot.lane.b32.xlu0 %v10862_v62, %s9118_s7 }
 0xb61   : >> { %7575 = vmatpush3.msra.mxu0 %v4244_v17 }
 0xb64   : >> { %4051 = vrot.lane.b32.xlu1 %v10854_v21, %s9119_s13  ;;  %4033 = vrot.lane.b32.xlu0 %v10862_v62, %s9119_s13 }
 0xb68   : >> { %4001 = vrot.lane.b32.xlu1 %v10869_v14, %s9118_s7  ;;  %3933 = vrot.lane.b32.xlu0 %v10881_v36, %s9117_s22 }
 0xb6c   : >> { %3951 = vrot.lane.b32.xlu1 %v10888_v59, %s9117_s22  ;;  %3981 = vrot.lane.b32.xlu0 %v10881_v36, %s9118_s7 }
 0xb70   : >> { %4049 = vrot.lane.b32.xlu1 %v10869_v14, %s9119_s13 }
 0xb74   : >> { %3999 = vrot.lane.b32.xlu1 %v10888_v59, %s9118_s7 }
 0xb78   : >> { %3949 = vrot.lane.b32.xlu1 %v10899_v27, %s9117_s22 }
 0xb7c   : >> { %4047 = vrot.lane.b32.xlu1 %v10888_v59, %s9119_s13 }
 0xb80   : >> { %3997 = vrot.lane.b32.xlu1 %v10899_v27, %s9118_s7 }
 0xb84   : >> { %4045 = vrot.lane.b32.xlu1 %v10899_v27, %s9119_s13 }
 0xb88   : >> { %3963 = vrot.lane.b32.xlu1 %v10840_v11, %s9117_s22 }
 0xb8c   : >> { %4011 = vrot.lane.b32.xlu1 %v10840_v11, %s9118_s7 }
 0xb90   : >> { %3961 = vrot.lane.b32.xlu1 %v10842_v12, %s9117_s22 }
 0xb94   : >> { %4059 = vrot.lane.b32.xlu1 %v10840_v11, %s9119_s13 }
 0xb98   : >> { %4009 = vrot.lane.b32.xlu1 %v10842_v12, %s9118_s7 }
 0xb9c   : >> { %3959 = vrot.lane.b32.xlu1 %v10838_v24, %s9117_s22 }
 0xba0   : >> { %4057 = vrot.lane.b32.xlu1 %v10842_v12, %s9119_s13 }
 0xba2   : >> { %v3948_v40 = vpop.permute.xlu1 %3947 }
 0xba3   : >> { %v4084_v25 = vsel %vm1705_vm2, %v10809_v53, %v3948_v40 }
 0xba4   : >> { %4007 = vrot.lane.b32.xlu1 %v10838_v24, %s9118_s7 }
 0xba6   : >> { %v3996_v6 = vpop.permute.xlu1 %3995 }
 0xba7   : >> { %v4101_v34 = vsel %vm4093_vm8, %v4084_v25, %v3996_v6 }
 0xba8   : >> { %3957 = vrot.lane.b32.xlu1 %v10844_v32, %s9117_s22 }
 0xbaa   : >> { %v3946_v13 = vpop.permute.xlu1 %3945 }
 0xbab   : >> { %v4083_v10 = vsel %vm1705_vm2, %v10818_v49, %v3946_v13  ;;  %v4243_v49 = vld [vmem:[%s10961_s15 + $0x38] sm:$0xff] }
 0xbac   : >> { %3939 = vrot.lane.b32.xlu1 %v10792_v42, %s9117_s22  ;;  %7576 = vmatprep.subr.mxu0 %v4243_v49 }
 0xbad   : >> { %7577 = vmatpush3.msra.mxu0 %v4243_v49 }
 0xbae   : >> { %v4044_v48 = vpop.permute.xlu1 %4043  ;;  %7578 = vmatprep.subr.mxu0 %v4242_v56 }
 0xbaf   : >> { %v10933_v39 = vsel %vm4110_vm9, %v4101_v34, %v4044_v48  ;;  %7579 = vmatpush3.msra.mxu0 %v4242_v56 }
 0xbb0   : >> { %4005 = vrot.lane.b32.xlu1 %v10844_v32, %s9118_s7  ;;  %7580 = vmatprep.subr.mxu0 %v4241_v35 }
 0xbb1   : >> { %7581 = vmatpush3.msra.mxu0 %v4241_v35 }
 0xbb2   : >> { %v3994_v44 = vpop.permute.xlu1 %3993  ;;  %7582 = vmatprep.subr.mxu0 %v4240_v60 }
 0xbb3   : >> { %v4100_v43 = vsel %vm4093_vm8, %v4083_v10, %v3994_v44  ;;  %7583 = vmatpush3.msra.mxu0 %v4240_v60  ;;  %v4139_v60 = vld [vmem:[#allocation17 + $0x60] sm:$0xff] }
 0xbb4   : >> { %4053 = vrot.lane.b32.xlu1 %v10844_v32, %s9119_s13  ;;  %7584 = vmatprep.subr.mxu0 %v4239_v2 }
 0xbb5   : >> { %7585 = vmatpush3.msra.mxu0 %v4239_v2 }
 0xbb6   : >> { %v3944_v50 = vpop.permute.xlu1 %3943 }
 0xbb7   : >> { %v4082_v23 = vsel %vm1705_vm2, %v10827_v61, %v3944_v50 }
 0xbb8   : >> { %3987 = vrot.lane.b32.xlu1 %v10792_v42, %s9118_s7 }
 0xbba   : >> { %v4042_v37 = vpop.permute.xlu1 %4041 }
 0xbbb   : >> { %v10945_v4 = vsel %vm4110_vm9, %v4100_v43, %v4042_v37 }
 0xbbc   : >> { %4035 = vrot.lane.b32.xlu1 %v10792_v42, %s9119_s13 }
 0xbbe   : >> { %v3992_v20 = vpop.permute.xlu1 %3991 }
 0xbbf   : >> { %v4099_v3 = vsel %vm4093_vm8, %v4082_v23, %v3992_v20  ;;  %v4142_v23 = vld [vmem:[#allocation17 + $0x78] sm:$0xff] }
 0xbc0   : >> { %3935 = vrot.lane.b32.xlu1 %v10800_v58, %s9117_s22 }
 0xbc2   : >> { %v10954_v9 = vpop.permute.xlu1 %3941  ;;  %v4056_v7 = vpop.permute.xlu0 %4055 }
 0xbc4   : >> { %3983 = vrot.lane.b32.xlu1 %v10800_v58, %s9118_s7 }
 0xbc6   : >> { %v4040_v28 = vpop.permute.xlu1 %4039 }
 0xbc7   : >> { %v10966_v0 = vsel %vm4110_vm9, %v4099_v3, %v4040_v28 }
 0xbc8   : >> { %4031 = vrot.lane.b32.xlu1 %v10800_v58, %s9119_s13 }
 0xbca   : >> { %v3956_v53 = vpop.permute.xlu1 %3955 }
 0xbcb   : >> { %v4088_v29 = vsel %vm1705_vm2, %v10854_v21, %v3956_v53 }
 0xbcc   : >> { %4029 = vrot.lane.b32.xlu1 %v10881_v36, %s9119_s13 }
 0xbce   : >> { %v4004_v19 = vpop.permute.xlu1 %4003 }
 0xbcf   : >> { %v4105_v1 = vsel %vm4093_vm8, %v4088_v29, %v4004_v19 }
 0xbd2   : >> { %v3954_v55 = vpop.permute.xlu1 %3953 }
 0xbd3   : >> { %v4087_v8 = vsel %vm1705_vm2, %v10869_v14, %v3954_v55  ;;  %v3990_v55 = vpop.permute.xlu0 %3989 }
 0xbd6   : >> { %v4052_v16 = vpop.permute.xlu1 %4051 }
 0xbd7   : >> { %v10984_v33 = vsel %vm4110_vm9, %v4105_v1, %v4052_v16  ;;  %v4038_v56 = vpop.permute.xlu0 %4037 }
 0xbda   : >> { %v4002_v63 = vpop.permute.xlu1 %4001 }
 0xbdb   : >> { %v4104_v61 = vsel %vm4093_vm8, %v4087_v8, %v4002_v63  ;;  %v3938_v63 = vpop.permute.xlu0 %3937 }
 0xbde   : >> { %v3952_v38 = vpop.permute.xlu1 %3951 }
 0xbdf   : >> { %v4086_v25 = vsel %vm1705_vm2, %v10888_v59, %v3952_v38  ;;  %v4138_v38 = vld [vmem:[#allocation17 + $0x58] sm:$0xff] }
 0xbe2   : >> { %v4050_v21 = vpop.permute.xlu1 %4049 }
 0xbe3   : >> { %v4121_v40 = vsel %vm4110_vm9, %v4104_v61, %v4050_v21 }
 0xbe6   : >> { %v4000_v14 = vpop.permute.xlu1 %3999 }
 0xbe7   : >> { %v4103_v6 = vsel %vm4093_vm8, %v4086_v25, %v4000_v14  ;;  %v3986_v14 = vpop.permute.xlu0 %3985 }
 0xbea   : >> { %v3950_v34 = vpop.permute.xlu1 %3949 }
 0xbee   : >> { %v4048_v13 = vpop.permute.xlu1 %4047 }
 0xbf2   : >> { %v3998_v48 = vpop.permute.xlu1 %3997 }
 0xbf6   : >> { %v4046_v10 = vpop.permute.xlu1 %4045 }
 0xbfa   : >> { %v3964_v44 = vpop.permute.xlu1 %3963 }
 0xbfb   : >> { %v4092_v37 = vsel %vm1705_vm2, %v10840_v11, %v3964_v44  ;;  %v4137_v44 = vld [vmem:[#allocation17 + $0x50] sm:$0xff] }
 0xbfe   : >> { %v4012_v43 = vpop.permute.xlu1 %4011 }
 0xbff   : >> { %v4109_v20 = vsel %vm4093_vm8, %v4092_v37, %v4012_v43  ;;  %v4154_v43 = vmul.f32 %v4138_v38, %v10984_v33  ;;  %v4085_v37 = vsel %vm1705_vm2, %v10899_v27, %v3950_v34  ;;  %v4133_v27 = vld [vmem:[#allocation17 + $0x30] sm:$0xff]  ;;  %v4081_v34 = vsel %vm1705_vm2, %v10836_v57, %v10954_v9  ;;  %v4130_v9 = vld [vmem:[#allocation17 + $0x18] sm:$0xff]  ;;  %v4237_v38 = vld [vmem:[%s10961_s15 + $0x8] sm:$0xff] }
 0xc02   : >> { %v3962_v50 = vpop.permute.xlu1 %3961 }
 0xc03   : >> { %v4091_v53 = vsel %vm1705_vm2, %v10842_v12, %v3962_v50 }
 0xc06   : >> { %v4060_v3 = vpop.permute.xlu1 %4059 }
 0xc07   : >> { %v4126_v28 = vsel %vm4110_vm9, %v4109_v20, %v4060_v3  ;;  %v4153_v20 = vmul.f32 %v4137_v44, %v4121_v40  ;;  %v4102_v3 = vsel %vm4093_vm8, %v4085_v37, %v3998_v48  ;;  %v4149_v48 = vmul.f32 %v4133_v27, %v10945_v4  ;;  %v4404_v37 = vld [vmem:[%s11050_s29 + $0x70] sm:$0xff] }
 0xc08   : >> { %v4158_v59 = vmul.f32 %v4142_v23, %v4126_v28  ;;  %v4136_v23 = vld [vmem:[#allocation17 + $0x48] sm:$0xff]  ;;  %v4135_v28 = vld [vmem:[#allocation17 + $0x40] sm:$0xff]  ;;  %v4079_v4 = vsel %vm1705_vm2, %v10862_v62, %v3938_v63  ;;  %v4392_v27 = vld [vmem:[%s11050_s29 + $0x10] sm:$0xff] }
 0xc09   : >> { %v4127_v63 = vld [vmem:[#allocation17] sm:$0xff] }
 0xc0a   : >> { %7525 = vmatprep.subr.mxu1 %v4158_v59  ;;  %v4010_v31 = vpop.permute.xlu1 %4009 }
 0xc0b   : >> { %7526 = vmatpush3.msra.mxu1 %v4158_v59  ;;  %v4108_v26 = vsel %vm4093_vm8, %v4091_v53, %v4010_v31  ;;  %v4119_v59 = vsel %vm4110_vm9, %v4102_v3, %v4046_v10  ;;  %v4098_v10 = vsel %vm4093_vm8, %v4081_v34, %v3990_v55  ;;  %v4129_v55 = vld [vmem:[#allocation17 + $0x10] sm:$0xff]  ;;  %v7266_v34 = vld [vmem:[%s4252_s11] ss:$0 sm:$0xff] }
 0xc0c   : >> { %v4151_v53 = vmul.f32 %v4135_v28, %v4119_v59  ;;  %v4400_v3 = vld [vmem:[%s11050_s29 + $0x50] sm:$0xff]  ;;  %v4399_v28 = vld [vmem:[%s11050_s29 + $0x48] sm:$0xff]  ;;  %v4398_v59 = vld [vmem:[%s11050_s29 + $0x40] sm:$0xff] }
 0xc0e   : >> { %v3960_v46 = vpop.permute.xlu1 %3959 }
 0xc0f   : >> { %v4090_v47 = vsel %vm1705_vm2, %v10838_v24, %v3960_v46  ;;  %v4134_v46 = vld [vmem:[#allocation17 + $0x38] sm:$0xff] }
 0xc12   : >> { %v4058_v29 = vpop.permute.xlu1 %4057 }
 0xc13   : >> { %v4125_v11 = vsel %vm4110_vm9, %v4108_v26, %v4058_v29  ;;  %v4115_v26 = vsel %vm4110_vm9, %v4098_v10, %v4038_v56 }
 0xc14   : >> { %v4157_v19 = vmul.f32 %v4141_v15, %v4125_v11  ;;  %v4131_v15 = vld [vmem:[#allocation17 + $0x20] sm:$0xff] }
 0xc16   : >> { %7527 = vmatprep.subr.mxu1 %v4157_v19  ;;  %v4008_v1 = vpop.permute.xlu1 %4007 }
 0xc17   : >> { %v4107_v17 = vsel %vm4093_vm8, %v4090_v47, %v4008_v1  ;;  %7528 = vmatpush3.msra.mxu1 %v4157_v19  ;;  %v4147_v1 = vmul.f32 %v4131_v15, %v4115_v26 }
 0xc18   : >> { %v4124_v49 = vsel %vm4110_vm9, %v4107_v17, %v4056_v7  ;;  %v4034_v7 = vpop.permute.xlu0 %4033 }
 0xc19   : >> { %v4156_v12 = vmul.f32 %v4140_v45, %v4124_v49  ;;  %v4096_v45 = vsel %vm4093_vm8, %v4079_v4, %v3986_v14 }
 0xc1a   : >> { %v3958_v16 = vpop.permute.xlu1 %3957 }
 0xc1b   : >> { %7529 = vmatprep.subr.mxu1 %v4156_v12  ;;  %v4089_v24 = vsel %vm1705_vm2, %v10844_v32, %v3958_v16  ;;  %v4120_v32 = vsel %vm4110_vm9, %v4103_v6, %v4048_v13  ;;  %v4150_v6 = vmul.f32 %v4134_v46, %v10933_v39  ;;  %v4132_v13 = vld [vmem:[#allocation17 + $0x28] sm:$0xff] }
 0xc1c   : >> { %7530 = vmatpush3.msra.mxu1 %v4156_v12  ;;  %v4152_v31 = vmul.f32 %v4136_v23, %v4120_v32  ;;  %v3934_v29 = vpop.permute.xlu0 %3933  ;;  %v4148_v11 = vmul.f32 %v4132_v13, %v10966_v0  ;;  %v4128_v16 = vld [vmem:[#allocation17 + $0x8] sm:$0xff]  ;;  %v4402_v32 = vld [vmem:[%s11050_s29 + $0x60] sm:$0xff] }
 0xc1d   : >> { %v4403_v23 = vld [vmem:[%s11050_s29 + $0x68] sm:$0xff] }
 0xc1e   : >> { %v3940_v35 = vpop.permute.xlu1 %3939  ;;  %v4395_v46 = vld [vmem:[%s11050_s29 + $0x28] sm:$0xff] }
 0xc1f   : >> { %v4080_v39 = vsel %vm1705_vm2, %v10792_v42, %v3940_v35  ;;  %v4113_v42 = vsel %vm4110_vm9, %v4096_v45, %v4034_v7  ;;  %v4394_v7 = vld [vmem:[%s11050_s29 + $0x20] sm:$0xff] }
 0xc20   : >> { %v3982_v12 = vpop.permute.xlu0 %3981  ;;  %v4145_v35 = vmul.f32 %v4129_v55, %v4113_v42 }
 0xc22   : >> { %v4006_v8 = vpop.permute.xlu1 %4005 }
 0xc23   : >> { %v4106_v61 = vsel %vm4093_vm8, %v4089_v24, %v4006_v8  ;;  %v4077_v8 = vsel %vm1705_vm2, %v10881_v36, %v3934_v29  ;;  %v4238_v36 = vld [vmem:[%s10961_s15 + $0x10] sm:$0xff] }
 0xc24   : >> { %7586 = vmatprep.subr.mxu0 %v4238_v36 }
 0xc25   : >> { %7587 = vmatpush3.msra.mxu0 %v4238_v36 }
 0xc26   : >> { %v4054_v2 = vpop.permute.xlu1 %4053  ;;  %7588 = vmatprep.subr.mxu0 %v4237_v38 }
 0xc27   : >> { %v4123_v21 = vsel %vm4110_vm9, %v4106_v61, %v4054_v2  ;;  %7589 = vmatpush3.msra.mxu0 %v4237_v38 }
 0xc28   : >> { %v4155_v25 = vmul.f32 %v4139_v60, %v4123_v21  ;;  %v4236_v21 = vld [vmem:[%s10961_s15] sm:$0xff] }
 0xc29   : >> { %7590 = vmatprep.subr.mxu0 %v4236_v21 }
 0xc2a   : >> { %7531 = vmatprep.subr.mxu1 %v4155_v25  ;;  %v3988_v50 = vpop.permute.xlu1 %3987  ;;  %7591 = vmatpush3.msra.mxu0 %v4236_v21 }
 0xc2b   : >> { %7532 = vmatpush3.msra.mxu1 %v4155_v25  ;;  %v4097_v19 = vsel %vm4093_vm8, %v4080_v39, %v3988_v50  ;;  %v4405_v50 = vld [vmem:[%s11050_s29 + $0x78] sm:$0xff] }
 0xc2c   : >> { %7533 = vmatprep.subr.mxu1 %v4154_v43 }
 0xc2d   : >> { %7534 = vmatpush3.msra.mxu1 %v4154_v43 }
 0xc2e   : >> { %7535 = vmatprep.subr.mxu1 %v4153_v20  ;;  %v4036_v33 = vpop.permute.xlu1 %4035 }
 0xc2f   : >> { %7536 = vmatpush3.msra.mxu1 %v4153_v20  ;;  %v4114_v47 = vsel %vm4110_vm9, %v4097_v19, %v4036_v33  ;;  %v4401_v20 = vld [vmem:[%s11050_s29 + $0x58] sm:$0xff]  ;;  %v4396_v33 = vld [vmem:[%s11050_s29 + $0x30] sm:$0xff] }
 0xc30   : >> { %7537 = vmatprep.subr.mxu1 %v4152_v31  ;;  %v4146_v17 = vmul.f32 %v4130_v9, %v4114_v47 }
 0xc31   : >> { %7538 = vmatpush3.msra.mxu1 %v4152_v31  ;;  %v4397_v31 = vld [vmem:[%s11050_s29 + $0x38] sm:$0xff] }
 0xc32   : >> { %7539 = vmatprep.subr.mxu1 %v4151_v53  ;;  %v3936_v40 = vpop.permute.xlu1 %3935 }
 0xc33   : >> { %7540 = vmatpush3.msra.mxu1 %v4151_v53  ;;  %v4078_v0 = vsel %vm1705_vm2, %v10800_v58, %v3936_v40  ;;  %v4094_v58 = vsel %vm4093_vm8, %v4077_v8, %v3982_v12  ;;  %v4393_v53 = vld [vmem:[%s11050_s29 + $0x18] sm:$0xff]  ;;  %v4390_v40 = vld [vmem:[%s11050_s29] sm:$0xff] }
 0xc34   : >> { %7541 = vmatprep.subr.mxu1 %v4150_v6 }
 0xc35   : >> { %7542 = vmatpush3.msra.mxu1 %v4150_v6  ;;  %v4391_v6 = vld [vmem:[%s11050_s29 + $0x8] sm:$0xff] }
 0xc36   : >> { %7543 = vmatprep.subr.mxu1 %v4149_v48  ;;  %v3984_v57 = vpop.permute.xlu1 %3983 }
 0xc37   : >> { %7544 = vmatpush3.msra.mxu1 %v4149_v48  ;;  %v4095_v49 = vsel %vm4093_vm8, %v4078_v0, %v3984_v57 }
 0xc38   : >> { %7545 = vmatprep.subr.mxu1 %v4148_v11 }
 0xc39   : >> { %7546 = vmatpush3.msra.mxu1 %v4148_v11 }
 0xc3a   : >> { %7547 = vmatprep.subr.mxu1 %v4147_v1  ;;  %v4032_v62 = vpop.permute.xlu1 %4031 }
 0xc3b   : >> { %v4112_v56 = vsel %vm4110_vm9, %v4095_v49, %v4032_v62  ;;  %7548 = vmatpush3.msra.mxu1 %v4147_v1 }
 0xc3c   : >> { %7549 = vmatprep.subr.mxu1 %v4146_v17  ;;  %v4144_v24 = vmul.f32 %v4128_v16, %v4112_v56 }
 0xc3d   : >> { %7550 = vmatpush3.msra.mxu1 %v4146_v17 }
 0xc3e   : >> { %7551 = vmatprep.subr.mxu1 %v4145_v35  ;;  %v4030_v60 = vpop.permute.xlu1 %4029 }
 0xc3f   : >> { %v4111_v61 = vsel %vm4110_vm9, %v4094_v58, %v4030_v60  ;;  %7552 = vmatpush3.msra.mxu1 %v4145_v35 }
 0xc40   : >> { %v4143_v2 = vmul.f32 %v4127_v63, %v4111_v61  ;;  %7553 = vmatprep.subr.mxu1 %v4144_v24 }
 0xc41   : >> { %7554 = vmatpush3.msra.mxu1 %v4144_v24 }
 0xc42   : >> { %7555 = vmatprep.subr.mxu1 %v4143_v2 }
 0xc43   : >> { %7556 = vmatpush3.msra.mxu1 %v4143_v2 }
 0xc44   : >> { %7558 = vmatmul.mubr.f32.vlgmr.msra.gmra.mxu1 %v10692_v18  ;;  %7595 = vmatprep.subr.mxu1 %v4405_v50 }
 0xc45   : >> { %7596 = vmatpush3.msra.mxu1 %v4405_v50 }
 0xc46   : >> { %7597 = vmatprep.subr.mxu1 %v4404_v37 }
 0xc47   : >> { %7598 = vmatpush3.msra.mxu1 %v4404_v37 }
 0xc48   : >> { %7599 = vmatprep.subr.mxu1 %v4403_v23 }
 0xc49   : >> { %7600 = vmatpush3.msra.mxu1 %v4403_v23 }
 0xc4a   : >> { %7601 = vmatprep.subr.mxu1 %v4402_v32 }
 0xc4b   : >> { %7602 = vmatpush3.msra.mxu1 %v4402_v32 }
 0xc4c   : >> { %7603 = vmatprep.subr.mxu1 %v4401_v20 }
 0xc4d   : >> { %7604 = vmatpush3.msra.mxu1 %v4401_v20 }
 0xc4e   : >> { %7605 = vmatprep.subr.mxu1 %v4400_v3 }
 0xc4f   : >> { %7606 = vmatpush3.msra.mxu1 %v4400_v3 }
 0xc50   : >> { %7607 = vmatprep.subr.mxu1 %v4399_v28 }
 0xc51   : >> { %7608 = vmatpush3.msra.mxu1 %v4399_v28 }
 0xc52   : >> { %7609 = vmatprep.subr.mxu1 %v4398_v59 }
 0xc53   : >> { %7610 = vmatpush3.msra.mxu1 %v4398_v59 }
 0xc54   : >> { %7611 = vmatprep.subr.mxu1 %v4397_v31 }
 0xc55   : >> { %7612 = vmatpush3.msra.mxu1 %v4397_v31 }
 0xc56   : >> { %7613 = vmatprep.subr.mxu1 %v4396_v33 }
 0xc57   : >> { %7614 = vmatpush3.msra.mxu1 %v4396_v33 }
 0xc58   : >> { %7615 = vmatprep.subr.mxu1 %v4395_v46 }
 0xc59   : >> { %7616 = vmatpush3.msra.mxu1 %v4395_v46 }
 0xc5a   : >> { %7617 = vmatprep.subr.mxu1 %v4394_v7 }
 0xc5b   : >> { %7618 = vmatpush3.msra.mxu1 %v4394_v7 }
 0xc5c   : >> { %7619 = vmatprep.subr.mxu1 %v4393_v53 }
 0xc5d   : >> { %7620 = vmatpush3.msra.mxu1 %v4393_v53 }
 0xc5e   : >> { %7621 = vmatprep.subr.mxu1 %v4392_v27 }
 0xc5f   : >> { %7622 = vmatpush3.msra.mxu1 %v4392_v27 }
 0xc60   : >> { %7623 = vmatprep.subr.mxu1 %v4391_v6 }
 0xc61   : >> { %7624 = vmatpush3.msra.mxu1 %v4391_v6 }
 0xc62   : >> { %7625 = vmatprep.subr.mxu1 %v4390_v40 }
 0xc63   : >> { %7626 = vmatpush3.msra.mxu1 %v4390_v40  ;;  %v7267_v40 = vld [vmem:[%s4406_s8] ss:$0 sm:$0xff] }
 0xd04   : >> { %v7559_v25 = vpop.f32.mrf.mxu1 }
 0xd05   : >> { %v4231_v43 = vadd.f32 %v7559_v25, %v10692_v18 }
 0xd06   : >> { %v4225_v14 = vpop.f32.mrf.mxu1 }
 0xd07   : >> { %v4226_v44 = vadd.f32 %v4225_v14, %v10684_v22 }
 0xd09   : >> { %7592 = vmatprep.mubr.f32.mxu0 %v4226_v44 }
 0xd0a   : >> { %7593 = vmatmul.mubr.f32.vlgmr.msra.gmra.mxu0 %v4231_v43 }
 0xdca   : >> { %v7594_v13 = vpop.f32.mrf.mxu0 }
 0xdcb   : >> { %v4332_v48 = vadd.f32 %v7594_v13, %v7266_v34 }
 0xdcc   : >> { %v4326_v10 = vpop.f32.mrf.mxu0 }
 0xdcd   : >> { %v4338_v15 = vmul.f32 0.70710677, %v4332_v48  ;;  %v4327_v26 = vadd.f32 %v7266_v34, %v4326_v10  ;;  %v4336_v53 = vmul.f32 0.5, %v4332_v48 }
 0xdcf   : >> { %v4340_v29 = vand.u32 2147483647, %v4338_v15  ;;  %v4337_v39 = vmul.f32 0.70710677, %v4327_v26  ;;  %vm4380_vm10 = vcmp.lt.f32.partialorder %v4338_v15, 0.0  ;;  %v4335_v46 = vmul.f32 0.5, %v4327_v26 }
 0xdd1   : >> { %v4342_v11 = vmul.f32 0.3275911, %v4340_v29  ;;  %v4339_v19 = vand.u32 2147483647, %v4337_v39  ;;  %v4368_v47 = vsub.f32 0.0, %v4340_v29  ;;  %vm4379_vm11 = vcmp.lt.f32.partialorder %v4337_v39, 0.0 }
 0xdd3   : >> { %v4344_v57 = vadd.f32 1.0, %v4342_v11  ;;  %v4341_v4 = vmul.f32 0.3275911, %v4339_v19  ;;  %v4367_v1 = vsub.f32 0.0, %v4339_v19  ;;  %v4370_v45 = vmul.f32 %v4368_v47, %v4340_v29 }
 0xdd5   : >> { %8213 = vrcp.f32 %v4344_v57  ;;  %v4343_v9 = vadd.f32 1.0, %v4341_v4  ;;  %v4369_v42 = vmul.f32 %v4367_v1, %v4339_v19  ;;  %v4373_v17 = vmul.f32 1.442695, %v4370_v45 }
 0xdd7   : >> { %8215 = vrcp.f32 %v4343_v9  ;;  %v4371_v12 = vmul.f32 1.442695, %v4369_v42 }
 0xdd8   : >> { %8217 = vpow2.f32 %v4373_v17 }
 0xdd9   : >> { %8219 = vpow2.f32 %v4371_v12 }
 0xde2   : >> { %v8214_v55 = vpop.eup %8213 }
 0xde3   : >> { %v4350_v0 = vmul.f32 1.0614054, %v8214_v55 }
 0xde4   : >> { %v8216_v49 = vpop.eup %8215 }
 0xde5   : >> { %v4352_v62 = vadd.f32 -1.4531521, %v4350_v0  ;;  %v4349_v16 = vmul.f32 1.0614054, %v8216_v49  ;;  %v8218_v14 = vpop.eup %8217 }
 0xde6   : >> { %v8220_v37 = vpop.eup %8219 }
 0xde7   : >> { %v4354_v56 = vmul.f32 %v8214_v55, %v4352_v62  ;;  %v4351_v35 = vadd.f32 -1.4531521, %v4349_v16 }
 0xde9   : >> { %v4356_v8 = vadd.f32 1.4214138, %v4354_v56  ;;  %v4353_v63 = vmul.f32 %v8216_v49, %v4351_v35 }
 0xdeb   : >> { %v4358_v58 = vmul.f32 %v8214_v55, %v4356_v8  ;;  %v4355_v24 = vadd.f32 1.4214138, %v4353_v63 }
 0xded   : >> { %v4360_v60 = vadd.f32 -0.28449672, %v4358_v58  ;;  %v4357_v61 = vmul.f32 %v8216_v49, %v4355_v24 }
 0xdef   : >> { %v4362_v2 = vmul.f32 %v8214_v55, %v4360_v60  ;;  %v4359_v36 = vadd.f32 -0.28449672, %v4357_v61 }
 0xdf1   : >> { %v4364_v38 = vadd.f32 0.2548296, %v4362_v2  ;;  %v4361_v21 = vmul.f32 %v8216_v49, %v4359_v36 }
 0xdf3   : >> { %v4366_v25 = vmul.f32 %v8214_v55, %v4364_v38  ;;  %v4363_v44 = vadd.f32 0.2548296, %v4361_v21 }
 0xdf5   : >> { %v4376_v43 = vmul.f32 %v8218_v14, %v4366_v25  ;;  %v4365_v50 = vmul.f32 %v8216_v49, %v4363_v44 }
 0xdf7   : >> { %v4378_v23 = vsub.f32 1.0, %v4376_v43  ;;  %v4375_v32 = vmul.f32 %v8220_v37, %v4365_v50 }
 0xdf9   : >> { %v4382_v20 = vsub.f32 0.0, %v4378_v23  ;;  %v4377_v3 = vsub.f32 1.0, %v4375_v32 }
 0xdfb   : >> { %v4384_v28 = vsel %vm4380_vm10, %v4382_v20, %v4378_v23  ;;  %v4381_v59 = vsub.f32 0.0, %v4377_v3 }
 0xdfc   : >> { %v4386_v31 = vadd.f32 1.0, %v4384_v28 }
 0xdfd   : >> { %v4383_v33 = vsel %vm4379_vm11, %v4381_v59, %v4377_v3 }
 0xdfe   : >> { %v4385_v7 = vadd.f32 1.0, %v4383_v33  ;;  %v4388_v6 = vmul.f32 %v4386_v31, %v4336_v53 }
 0xe00   : >> { %v4387_v27 = vmul.f32 %v4385_v7, %v4335_v46 }
 0xe02   : >> { %7627 = vmatprep.mubr.f32.mxu1 %v4387_v27 }
 0xe03   : >> { %7628 = vmatmul.mubr.f32.vlgmr.msra.gmra.mxu1 %v4388_v6 }
 0xec3   : >> { %v7629_v34 = vpop.f32.mrf.mxu1 }
 0xec4   : >> { %v4486_v13 = vadd.f32 %v7629_v34, %v7267_v40 }
 0xec5   : >> { %v4480_v10 = vpop.f32.mrf.mxu1 }
 0xec6   : >> { %v4490_v15 = vadd.f32 %v4486_v13, %v10692_v18  ;;  %v4481_v29 = vadd.f32 %v7267_v40, %v4480_v10 }
 0xec8   : >> { %v4492_v11 = vmul.f32 %v4490_v15, %v9973_v30  ;;  %v4489_v39 = vadd.f32 %v4481_v29, %v10684_v22 }
 0xeca   : >> { %4494 = vst [vmem:[#allocation2 + $0x10] sm:$0xff] %v4492_v11  ;;  %v4491_v26 = vmul.f32 %v4489_v39, %v9950_v52 }
 0xecc   : >> { %4493 = vst [vmem:[#allocation2] sm:$0xff] %v4491_v26 }
 0xecd PF: >> { %v11074_v48 = vld [vmem:[#allocation2 + $0x18] sm:$0xff]  ;;  %s11864_s14 = sld [smem:[#allocation72_spill]]  ;;  %v4498_v57 = vld [vmem:[#allocation2 + $0x8] sm:$0xff]  ;;  %s7268_s28 = sshll.u32 %s9037_s6, 5  ;;  %v9120_v4 = vmov 0.0   ;;  %vm4507_vm12 = vcmask 130048  }
 0xece   : >> { %4548 = vmatprep.subr.mxu0 %v11074_v48  ;;  %4584 = vmatprep.mubr.f32.mxu0 %v9120_v4  ;;  %s7421_s18 = smul.u32 960, %s9037_s6  ;;  %s11316_s22 = sshll.u32 %s9037_s6, 1  ;;  %vm5464_vm13 = vcmask 523264   ;;  %vm5796_vm14 = vcmask 1047808   ;;  %vm5381_vm15 = vcmask 785408   ;;  %vm6020_vm3 = vcmask 162816  }
 0xecf   : >> { %7315 = vmatprep.mubr.msk.f32.mxu1 %vm1705_vm2, %v4498_v57  ;;  %s7422_s26 = smul.u32 640, %s9037_s6  ;;  %s4992_s7 = scalar_lea.vmem [#allocation38], %s11316_s22 }
 0xed0   : >> { %s11091_s3 = scalar_lea.vmem [#allocation37], %s7421_s18  ;;  %s11865_s13 = sld [smem:[#allocation75_spill]] }
 0xed1   : >> { %v11076_v19 = vld [vmem:[#allocation2 + $0x10] sm:$0xff]  ;;  %v7306_v9 = vld [vmem:[%s11091_s3 + $0x238] sm:$0xff]  ;;  %v7304_v1 = vld [vmem:[%s11091_s3 + $0x228] sm:$0xff]  ;;  %s11232_s12 = scalar_lea.vmem [#allocation40], %s7422_s26  ;;  %s7364_s5 = sshll.u32 %s9037_s6, 2 }
 0xed2   : >> { %4549 = vmatpush1.msra.mxu0 %v11076_v19  ;;  %v7305_v47 = vld [vmem:[%s11091_s3 + $0x230] sm:$0xff]  ;;  %4701 = vmatprep.subr.mxu1 %v7306_v9  ;;  %v7303_v45 = vld [vmem:[%s11091_s3 + $0x220] sm:$0xff]  ;;  %v7302_v42 = vld [vmem:[%s11091_s3 + $0x218] sm:$0xff]  ;;  %s5150_s15 = scalar_lea.vmem [#allocation41], %s7364_s5  ;;  %s9121_s29 = smov 96  }
 0xed3   : >> { %v11080_v18 = vld [vmem:[#allocation2] sm:$0xff]  ;;  %s11084_s0 = scalar_lea.vmem %s11864_s14, %s7268_s28  ;;  %4550 = vmatprep.subr.mxu0 %v4498_v57  ;;  %4702 = vmatpush1.msra.mxu1 %v7305_v47  ;;  %v7301_v0 = vld [vmem:[%s11091_s3 + $0x210] sm:$0xff]  ;;  %v7300_v17 = vld [vmem:[%s11091_s3 + $0x208] sm:$0xff]  ;;  %s9122_s11 = smov 64  }
 0xed4   : >> { %v4503_v22 = vld [vmem:[%s11084_s0] sm:$0xff]  ;;  %4551 = vmatpush1.msra.mxu0 %v11080_v18  ;;  %v4504_v55 = vld [vmem:[%s11084_s0 + $0x8] sm:$0xff]  ;;  %4703 = vmatprep.subr.mxu1 %v7304_v1  ;;  %v4505_v62 = vld [vmem:[%s11084_s0 + $0x10] sm:$0xff]  ;;  %s7423_s8 = smul.u32 320, %s9037_s6  ;;  %s6308_s18 = scalar_lea.vmem [#allocation47], %s11316_s22 }
 0xed5   : >> { %7269 = vmatmul.mubr.msk.f32.vlgmr.msra.gmra.mxu0 %vm4507_vm12, %v4503_v22  ;;  %4704 = vmatpush1.msra.mxu1 %v7303_v45  ;;  %v7299_v49 = vld [vmem:[%s11091_s3 + $0x200] sm:$0xff]  ;;  %v7298_v12 = vld [vmem:[%s11091_s3 + $0x1f8] sm:$0xff]  ;;  %v7297_v16 = vld [vmem:[%s11091_s3 + $0x1f0] sm:$0xff]  ;;  %s2073_s6 = sadd.s32 1, %s9037_s6  }
 0xed6   : >> { %4590 = vmatprep.mubr.f32.mxu0 %v9120_v4  ;;  %4705 = vmatprep.subr.mxu1 %v7302_v42  ;;  %v7296_v56 = vld [vmem:[%s11091_s3 + $0x1e8] sm:$0xff]  ;;  %v7295_v35 = vld [vmem:[%s11091_s3 + $0x1e0] sm:$0xff]  ;;  %v4506_v8 = vld [vmem:[%s11084_s0 + $0x18] sm:$0xff]  ;;  %s11492_s14 = scalar_lea.vmem [#allocation43], %s7423_s8  ;;  %s11606_s28 = scalar_lea.vmem [#allocation46], %s7423_s8 }
 0xed7   : >> { %4706 = vmatpush1.msra.mxu1 %v7301_v0  ;;  %v7294_v63 = vld [vmem:[%s11091_s3 + $0x1d8] sm:$0xff]  ;;  %v7293_v58 = vld [vmem:[%s11091_s3 + $0x1d0] sm:$0xff]  ;;  %v7292_v60 = vld [vmem:[%s11091_s3 + $0x1c8] sm:$0xff]  ;;  %s6157_s0 = scalar_lea.vmem [#allocation44], %s11316_s22  ;;  %p2070_p0 = scmp.ge.s32.totalorder %s2073_s6, 10  }
 0xed8   : >> { %4707 = vmatprep.subr.mxu1 %v7300_v17  ;;  %v4643_v24 = vld [vmem:[%s11091_s3 + $0xf8] sm:$0xff]  ;;  %v4642_v61 = vld [vmem:[%s11091_s3 + $0xf0] sm:$0xff]  ;;  %v4641_v2 = vld [vmem:[%s11091_s3 + $0xe8] sm:$0xff] }
 0xed9   : >> { %7270 = vmatmul.mubr.msk.f32.gmra.mxu0 %vm4507_vm12, %v4504_v55  ;;  %4708 = vmatpush1.msra.mxu1 %v7299_v49  ;;  %v7291_v36 = vld [vmem:[%s11091_s3 + $0x1c0] sm:$0xff]  ;;  %v7290_v21 = vld [vmem:[%s11091_s3 + $0x1b8] sm:$0xff]  ;;  %v7289_v14 = vld [vmem:[%s11091_s3 + $0x1b0] sm:$0xff] }
 0xeda   : >> { %4596 = vmatprep.mubr.f32.mxu0 %v9120_v4  ;;  %4709 = vmatprep.subr.mxu1 %v7298_v12  ;;  %v4640_v38 = vld [vmem:[%s11091_s3 + $0xe0] sm:$0xff]  ;;  %v4639_v25 = vld [vmem:[%s11091_s3 + $0xd8] sm:$0xff]  ;;  %v4638_v44 = vld [vmem:[%s11091_s3 + $0xd0] sm:$0xff] }
 0xedb   : >> { %4710 = vmatpush1.msra.mxu1 %v7297_v16  ;;  %4784 = vmatprep.subr.mxu0 %v4643_v24  ;;  %v7288_v43 = vld [vmem:[%s11091_s3 + $0x1a8] sm:$0xff]  ;;  %v7287_v37 = vld [vmem:[%s11091_s3 + $0x1a0] sm:$0xff]  ;;  %v7286_v32 = vld [vmem:[%s11091_s3 + $0x198] sm:$0xff] }
 0xedc   : >> { %4711 = vmatprep.subr.mxu1 %v7296_v56  ;;  %4785 = vmatpush1.msra.mxu0 %v4642_v61  ;;  %v4637_v50 = vld [vmem:[%s11091_s3 + $0xc8] sm:$0xff]  ;;  %v4636_v23 = vld [vmem:[%s11091_s3 + $0xc0] sm:$0xff]  ;;  %v4635_v20 = vld [vmem:[%s11091_s3 + $0xb8] sm:$0xff] }
 0xedd   : >> { %7271 = vmatmul.mubr.msk.f32.gmra.mxu0 %vm4507_vm12, %v4505_v62  ;;  %4712 = vmatpush1.msra.mxu1 %v7295_v35  ;;  %v7285_v3 = vld [vmem:[%s11091_s3 + $0x190] sm:$0xff]  ;;  %v7284_v59 = vld [vmem:[%s11091_s3 + $0x188] sm:$0xff]  ;;  %v7283_v33 = vld [vmem:[%s11091_s3 + $0x180] sm:$0xff] }
 0xede   : >> { %4602 = vmatprep.mubr.f32.mxu0 %v9120_v4  ;;  %4713 = vmatprep.subr.mxu1 %v7294_v63  ;;  %v4634_v28 = vld [vmem:[%s11091_s3 + $0xb0] sm:$0xff]  ;;  %v4633_v31 = vld [vmem:[%s11091_s3 + $0xa8] sm:$0xff]  ;;  %v4632_v46 = vld [vmem:[%s11091_s3 + $0xa0] sm:$0xff] }
 0xedf   : >> { %4714 = vmatpush1.msra.mxu1 %v7293_v58  ;;  %4786 = vmatprep.subr.mxu0 %v4641_v2  ;;  %v7282_v7 = vld [vmem:[%s11091_s3 + $0x178] sm:$0xff]  ;;  %v7281_v27 = vld [vmem:[%s11091_s3 + $0x170] sm:$0xff]  ;;  %v7280_v40 = vld [vmem:[%s11091_s3 + $0x168] sm:$0xff] }
 0xee0   : >> { %4715 = vmatprep.subr.mxu1 %v7292_v60  ;;  %4787 = vmatpush1.msra.mxu0 %v4640_v38  ;;  %v4631_v53 = vld [vmem:[%s11091_s3 + $0x98] sm:$0xff]  ;;  %v4630_v6 = vld [vmem:[%s11091_s3 + $0x90] sm:$0xff]  ;;  %v4629_v34 = vld [vmem:[%s11091_s3 + $0x88] sm:$0xff] }
 0xee1   : >> { %7272 = vmatmul.mubr.msk.f32.gmra.mxu0 %vm4507_vm12, %v4506_v8  ;;  %4716 = vmatpush1.msra.mxu1 %v7291_v36  ;;  %v7279_v13 = vld [vmem:[%s11091_s3 + $0x160] sm:$0xff]  ;;  %v7278_v15 = vld [vmem:[%s11091_s3 + $0x158] sm:$0xff]  ;;  %v7277_v11 = vld [vmem:[%s11091_s3 + $0x150] sm:$0xff] }
 0xee2   : >> { %4717 = vmatprep.subr.mxu1 %v7290_v21  ;;  %4788 = vmatprep.subr.mxu0 %v4639_v25  ;;  %v4628_v10 = vld [vmem:[%s11091_s3 + $0x80] sm:$0xff]  ;;  %v4627_v29 = vld [vmem:[%s11091_s3 + $0x78] sm:$0xff]  ;;  %v4626_v39 = vld [vmem:[%s11091_s3 + $0x70] sm:$0xff] }
 0xee3   : >> { %4718 = vmatpush1.msra.mxu1 %v7289_v14  ;;  %4789 = vmatpush1.msra.mxu0 %v4638_v44  ;;  %v7276_v26 = vld [vmem:[%s11091_s3 + $0x148] sm:$0xff]  ;;  %v7275_v22 = vld [vmem:[%s11091_s3 + $0x140] sm:$0xff]  ;;  %v7314_v47 = vld [vmem:[%s11091_s3 + $0x278] sm:$0xff] }
 0xee4   : >> { %4719 = vmatprep.subr.mxu1 %v7288_v43  ;;  %4790 = vmatprep.subr.mxu0 %v4637_v50  ;;  %v4625_v57 = vld [vmem:[%s11091_s3 + $0x68] sm:$0xff]  ;;  %v4624_v9 = vld [vmem:[%s11091_s3 + $0x60] sm:$0xff]  ;;  %v4623_v1 = vld [vmem:[%s11091_s3 + $0x58] sm:$0xff] }
 0xee5   : >> { %4720 = vmatpush1.msra.mxu1 %v7287_v37  ;;  %4791 = vmatpush1.msra.mxu0 %v4636_v23  ;;  %v7313_v45 = vld [vmem:[%s11091_s3 + $0x270] sm:$0xff]  ;;  %v7312_v42 = vld [vmem:[%s11091_s3 + $0x268] sm:$0xff]  ;;  %v7311_v17 = vld [vmem:[%s11091_s3 + $0x260] sm:$0xff] }
 0xee6   : >> { %4721 = vmatprep.subr.mxu1 %v7286_v32  ;;  %4792 = vmatprep.subr.mxu0 %v4635_v20  ;;  %v4622_v55 = vld [vmem:[%s11091_s3 + $0x50] sm:$0xff]  ;;  %v4621_v0 = vld [vmem:[%s11091_s3 + $0x48] sm:$0xff]  ;;  %v4620_v49 = vld [vmem:[%s11091_s3 + $0x40] sm:$0xff] }
 0xee7   : >> { %4722 = vmatpush1.msra.mxu1 %v7285_v3  ;;  %4793 = vmatpush1.msra.mxu0 %v4634_v28  ;;  %v7310_v62 = vld [vmem:[%s11091_s3 + $0x258] sm:$0xff]  ;;  %v7309_v16 = vld [vmem:[%s11091_s3 + $0x250] sm:$0xff]  ;;  %v7308_v35 = vld [vmem:[%s11091_s3 + $0x248] sm:$0xff] }
 0xee8   : >> { %4723 = vmatprep.subr.mxu1 %v7284_v59  ;;  %4794 = vmatprep.subr.mxu0 %v4633_v31  ;;  %v4619_v12 = vld [vmem:[%s11091_s3 + $0x38] sm:$0xff]  ;;  %v4618_v56 = vld [vmem:[%s11091_s3 + $0x30] sm:$0xff]  ;;  %v4617_v8 = vld [vmem:[%s11091_s3 + $0x28] sm:$0xff] }
 0xee9   : >> { %4724 = vmatpush1.msra.mxu1 %v7283_v33  ;;  %4795 = vmatpush1.msra.mxu0 %v4632_v46  ;;  %v7307_v63 = vld [vmem:[%s11091_s3 + $0x240] sm:$0xff]  ;;  %v7351_v24 = vld [vmem:[%s11091_s3 + $0x378] sm:$0xff]  ;;  %v7350_v60 = vld [vmem:[%s11091_s3 + $0x370] sm:$0xff] }
 0xeea   : >> { %4725 = vmatprep.subr.mxu1 %v7282_v7  ;;  %4796 = vmatprep.subr.mxu0 %v4631_v53  ;;  %v4616_v58 = vld [vmem:[%s11091_s3 + $0x20] sm:$0xff]  ;;  %v4615_v61 = vld [vmem:[%s11091_s3 + $0x18] sm:$0xff]  ;;  %v7349_v2 = vld [vmem:[%s11091_s3 + $0x368] sm:$0xff] }
 0xeeb   : >> { %4726 = vmatpush1.msra.mxu1 %v7281_v27  ;;  %4797 = vmatpush1.msra.mxu0 %v4630_v6  ;;  %v4614_v36 = vld [vmem:[%s11091_s3 + $0x10] sm:$0xff]  ;;  %v7348_v38 = vld [vmem:[%s11091_s3 + $0x360] sm:$0xff]  ;;  %v4613_v21 = vld [vmem:[%s11091_s3 + $0x8] sm:$0xff] }
 0xeec   : >> { %4727 = vmatprep.subr.mxu1 %v7280_v40  ;;  %4798 = vmatprep.subr.mxu0 %v4629_v34  ;;  %v7347_v25 = vld [vmem:[%s11091_s3 + $0x358] sm:$0xff]  ;;  %v4612_v14 = vld [vmem:[%s11091_s3] sm:$0xff]  ;;  %v7346_v44 = vld [vmem:[%s11091_s3 + $0x350] sm:$0xff] }
 0xeed   : >> { %4728 = vmatpush1.msra.mxu1 %v7279_v13  ;;  %4799 = vmatpush1.msra.mxu0 %v4628_v10  ;;  %v4651_v43 = vld [vmem:[%s11091_s3 + $0x138] sm:$0xff]  ;;  %v7345_v50 = vld [vmem:[%s11091_s3 + $0x348] sm:$0xff]  ;;  %v7344_v37 = vld [vmem:[%s11091_s3 + $0x340] sm:$0xff] }
 0xeee   : >> { %4729 = vmatprep.subr.mxu1 %v7278_v15  ;;  %4800 = vmatprep.subr.mxu0 %v4627_v29  ;;  %v4649_v23 = vld [vmem:[%s11091_s3 + $0x128] sm:$0xff]  ;;  %v7343_v32 = vld [vmem:[%s11091_s3 + $0x338] sm:$0xff]  ;;  %v4648_v20 = vld [vmem:[%s11091_s3 + $0x120] sm:$0xff] }
 0xeef   : >> { %4730 = vmatpush1.msra.mxu1 %v7277_v11  ;;  %4801 = vmatpush1.msra.mxu0 %v4626_v39  ;;  %v7342_v3 = vld [vmem:[%s11091_s3 + $0x330] sm:$0xff]  ;;  %v7341_v28 = vld [vmem:[%s11091_s3 + $0x328] sm:$0xff]  ;;  %v7340_v59 = vld [vmem:[%s11091_s3 + $0x320] sm:$0xff] }
 0xef0   : >> { %4731 = vmatprep.subr.mxu1 %v7276_v26  ;;  %4802 = vmatprep.subr.mxu0 %v4625_v57  ;;  %v7339_v31 = vld [vmem:[%s11091_s3 + $0x318] sm:$0xff]  ;;  %v7338_v33 = vld [vmem:[%s11091_s3 + $0x310] sm:$0xff]  ;;  %v7337_v46 = vld [vmem:[%s11091_s3 + $0x308] sm:$0xff] }
 0xef1   : >> { %4732 = vmatpush1.msra.mxu1 %v7275_v22  ;;  %4803 = vmatpush1.msra.mxu0 %v4624_v9  ;;  %v7336_v7 = vld [vmem:[%s11091_s3 + $0x300] sm:$0xff]  ;;  %v7335_v53 = vld [vmem:[%s11091_s3 + $0x2f8] sm:$0xff]  ;;  %v7334_v27 = vld [vmem:[%s11091_s3 + $0x2f0] sm:$0xff] }
 0xef2   : >> { %4757 = vmatprep.subr.mxu1 %v7314_v47  ;;  %4804 = vmatprep.subr.mxu0 %v4623_v1  ;;  %v7332_v6 = vld [vmem:[%s11091_s3 + $0x2e0] sm:$0xff]  ;;  %v7330_v40 = vld [vmem:[%s11091_s3 + $0x2d0] sm:$0xff]  ;;  %v7329_v34 = vld [vmem:[%s11091_s3 + $0x2c8] sm:$0xff] }
 0xef3   : >> { %4758 = vmatpush2.msra.mxu1 %v7313_v45  ;;  %4805 = vmatpush1.msra.mxu0 %v4622_v55  ;;  %v7328_v13 = vld [vmem:[%s11091_s3 + $0x2c0] sm:$0xff]  ;;  %v7327_v10 = vld [vmem:[%s11091_s3 + $0x2b8] sm:$0xff]  ;;  %v7326_v15 = vld [vmem:[%s11091_s3 + $0x2b0] sm:$0xff] }
 0xef4   : >> { %4759 = vmatprep.subr.mxu1 %v7312_v42  ;;  %4806 = vmatprep.subr.mxu0 %v4621_v0  ;;  %v7325_v29 = vld [vmem:[%s11091_s3 + $0x2a8] sm:$0xff]  ;;  %v4647_v11 = vld [vmem:[%s11091_s3 + $0x118] sm:$0xff]  ;;  %v7324_v39 = vld [vmem:[%s11091_s3 + $0x2a0] sm:$0xff] }
 0xef5   : >> { %4760 = vmatpush2.msra.mxu1 %v7311_v17  ;;  %4807 = vmatpush1.msra.mxu0 %v4620_v49  ;;  %v4646_v26 = vld [vmem:[%s11091_s3 + $0x110] sm:$0xff]  ;;  %v7323_v57 = vld [vmem:[%s11091_s3 + $0x298] sm:$0xff]  ;;  %v4645_v22 = vld [vmem:[%s11091_s3 + $0x108] sm:$0xff] }
 0xef6   : >> { %4761 = vmatprep.subr.mxu1 %v7310_v62  ;;  %4808 = vmatprep.subr.mxu0 %v4619_v12  ;;  %v7322_v9 = vld [vmem:[%s11091_s3 + $0x290] sm:$0xff]  ;;  %v4644_v47 = vld [vmem:[%s11091_s3 + $0x100] sm:$0xff]  ;;  %v7321_v1 = vld [vmem:[%s11091_s3 + $0x288] sm:$0xff] }
 0xef7   : >> { %4762 = vmatpush2.msra.mxu1 %v7309_v16  ;;  %4809 = vmatpush1.msra.mxu0 %v4618_v56  ;;  %v7320_v45 = vld [vmem:[%s11091_s3 + $0x280] sm:$0xff]  ;;  %v7359_v55 = vld [vmem:[%s11091_s3 + $0x3b8] sm:$0xff]  ;;  %v7358_v42 = vld [vmem:[%s11091_s3 + $0x3b0] sm:$0xff] }
 0xef8   : >> { %4763 = vmatprep.subr.mxu1 %v7308_v35  ;;  %4810 = vmatprep.subr.mxu0 %v4617_v8  ;;  %v7357_v0 = vld [vmem:[%s11091_s3 + $0x3a8] sm:$0xff]  ;;  %v7356_v17 = vld [vmem:[%s11091_s3 + $0x3a0] sm:$0xff]  ;;  %v7355_v49 = vld [vmem:[%s11091_s3 + $0x398] sm:$0xff] }
 0xef9   : >> { %4764 = vmatpush2.msra.mxu1 %v7307_v63  ;;  %4811 = vmatpush1.msra.mxu0 %v4616_v58  ;;  %v7354_v62 = vld [vmem:[%s11091_s3 + $0x390] sm:$0xff]  ;;  %v7353_v12 = vld [vmem:[%s11091_s3 + $0x388] sm:$0xff]  ;;  %v7352_v16 = vld [vmem:[%s11091_s3 + $0x380] sm:$0xff] }
 0xefa   : >> { %4766 = vmatmul.mubr.f32.vlgmr.msra.gmra.mxu1 %v11080_v18  ;;  %4910 = vmatprep.subr.mxu1 %v7351_v24  ;;  %v4650_v18 = vld [vmem:[%s11091_s3 + $0x130] sm:$0xff] }
 0xefb   : >> { %4911 = vmatpush1.msra.mxu1 %v7350_v60  ;;  %4812 = vmatprep.subr.mxu0 %v4615_v61 }
 0xefc   : >> { %4912 = vmatprep.subr.mxu1 %v7349_v2  ;;  %4813 = vmatpush1.msra.mxu0 %v4614_v36  ;;  %v5130_v2 = vld [vmem:[%s11232_s12 + $0x1e8] sm:$0xff]  ;;  %v5132_v36 = vld [vmem:[%s11232_s12 + $0x1f8] sm:$0xff] }
 0xefd   : >> { %4913 = vmatpush1.msra.mxu1 %v7348_v38  ;;  %4814 = vmatprep.subr.mxu0 %v4613_v21  ;;  %v5129_v38 = vld [vmem:[%s11232_s12 + $0x1e0] sm:$0xff]  ;;  %v5131_v21 = vld [vmem:[%s11232_s12 + $0x1f0] sm:$0xff] }
 0xefe   : >> { %4914 = vmatprep.subr.mxu1 %v7347_v25  ;;  %4815 = vmatpush1.msra.mxu0 %v4612_v14  ;;  %v5126_v25 = vld [vmem:[%s11232_s12 + $0x1c8] sm:$0xff]  ;;  %v5128_v14 = vld [vmem:[%s11232_s12 + $0x1d8] sm:$0xff] }
 0xeff   : >> { %4915 = vmatpush1.msra.mxu1 %v7346_v44  ;;  %4840 = vmatprep.subr.mxu0 %v4651_v43  ;;  %v5125_v44 = vld [vmem:[%s11232_s12 + $0x1c0] sm:$0xff]  ;;  %v5127_v43 = vld [vmem:[%s11232_s12 + $0x1d0] sm:$0xff] }
 0xf00   : >> { %4916 = vmatprep.subr.mxu1 %v7345_v50  ;;  %4841 = vmatpush2.msra.mxu0 %v4650_v18  ;;  %v5122_v50 = vld [vmem:[%s11232_s12 + $0x1a8] sm:$0xff]  ;;  %v5124_v18 = vld [vmem:[%s11232_s12 + $0x1b8] sm:$0xff] }
 0xf01   : >> { %4917 = vmatpush1.msra.mxu1 %v7344_v37  ;;  %4842 = vmatprep.subr.mxu0 %v4649_v23  ;;  %v5121_v37 = vld [vmem:[%s11232_s12 + $0x1a0] sm:$0xff]  ;;  %v5123_v23 = vld [vmem:[%s11232_s12 + $0x1b0] sm:$0xff] }
 0xf02   : >> { %4918 = vmatprep.subr.mxu1 %v7343_v32  ;;  %4843 = vmatpush2.msra.mxu0 %v4648_v20  ;;  %v5118_v32 = vld [vmem:[%s11232_s12 + $0x188] sm:$0xff]  ;;  %v5120_v20 = vld [vmem:[%s11232_s12 + $0x198] sm:$0xff] }
 0xf03   : >> { %4919 = vmatpush1.msra.mxu1 %v7342_v3  ;;  %7316 = vmatprep.mubr.msk.f32.mxu1 %vm1705_vm2, %v11074_v48  ;;  %v7333_v48 = vld [vmem:[%s11091_s3 + $0x2e8] sm:$0xff]  ;;  %v5117_v3 = vld [vmem:[%s11232_s12 + $0x180] sm:$0xff] }
 0xf04   : >> { %4920 = vmatprep.subr.mxu1 %v7341_v28  ;;  %4772 = vmatmul.mubr.f32.gmra.mxu1 %v11076_v19  ;;  %v7331_v19 = vld [vmem:[%s11091_s3 + $0x2d8] sm:$0xff]  ;;  %v5119_v28 = vld [vmem:[%s11232_s12 + $0x190] sm:$0xff] }
 0xf05   : >> { %4921 = vmatpush1.msra.mxu1 %v7340_v59  ;;  %4844 = vmatprep.subr.mxu0 %v4647_v11  ;;  %v5114_v59 = vld [vmem:[%s11232_s12 + $0x168] sm:$0xff] }
 0xf06   : >> { %4922 = vmatprep.subr.mxu1 %v7339_v31  ;;  %4845 = vmatpush2.msra.mxu0 %v4646_v26  ;;  %v5116_v31 = vld [vmem:[%s11232_s12 + $0x178] sm:$0xff]  ;;  %v5098_v11 = vld [vmem:[%s11232_s12 + $0xe8] sm:$0xff]  ;;  %v5097_v26 = vld [vmem:[%s11232_s12 + $0xe0] sm:$0xff] }
 0xf07   : >> { %4923 = vmatpush1.msra.mxu1 %v7338_v33  ;;  %4846 = vmatprep.subr.mxu0 %v4645_v22  ;;  %v5113_v33 = vld [vmem:[%s11232_s12 + $0x160] sm:$0xff]  ;;  %v5094_v22 = vld [vmem:[%s11232_s12 + $0xc8] sm:$0xff] }
 0xf08   : >> { %4924 = vmatprep.subr.mxu1 %v7337_v46  ;;  %4847 = vmatpush2.msra.mxu0 %v4644_v47  ;;  %v5115_v46 = vld [vmem:[%s11232_s12 + $0x170] sm:$0xff]  ;;  %v5093_v47 = vld [vmem:[%s11232_s12 + $0xc0] sm:$0xff] }
 0xf09   : >> { %4925 = vmatpush1.msra.mxu1 %v7336_v7  ;;  %5179 = vmatprep.subr.mxu0 %v5130_v2  ;;  %v5110_v7 = vld [vmem:[%s11232_s12 + $0x148] sm:$0xff]  ;;  %v5076_v2 = vld [vmem:[%s11232_s12 + $0x38] sm:$0xff] }
 0xf0a   : >> { %4926 = vmatprep.subr.mxu1 %v7335_v53  ;;  %v5112_v53 = vld [vmem:[%s11232_s12 + $0x158] sm:$0xff] }
 0xf0b   : >> { %4927 = vmatpush1.msra.mxu1 %v7334_v27  ;;  %v5109_v27 = vld [vmem:[%s11232_s12 + $0x140] sm:$0xff] }
 0xf0c   : >> { %4928 = vmatprep.subr.mxu1 %v7333_v48  ;;  %v5111_v48 = vld [vmem:[%s11232_s12 + $0x150] sm:$0xff] }
 0xf0d   : >> { %4929 = vmatpush1.msra.mxu1 %v7332_v6  ;;  %v5106_v6 = vld [vmem:[%s11232_s12 + $0x128] sm:$0xff] }
 0xf0e   : >> { %4930 = vmatprep.subr.mxu1 %v7331_v19  ;;  %v5108_v19 = vld [vmem:[%s11232_s12 + $0x138] sm:$0xff] }
 0xf0f   : >> { %4931 = vmatpush1.msra.mxu1 %v7330_v40  ;;  %v5105_v40 = vld [vmem:[%s11232_s12 + $0x120] sm:$0xff] }
 0xf10   : >> { %4932 = vmatprep.subr.mxu1 %v7329_v34  ;;  %v5107_v34 = vld [vmem:[%s11232_s12 + $0x130] sm:$0xff] }
 0xf11   : >> { %4933 = vmatpush1.msra.mxu1 %v7328_v13  ;;  %v5102_v13 = vld [vmem:[%s11232_s12 + $0x108] sm:$0xff] }
 0xf12   : >> { %4934 = vmatprep.subr.mxu1 %v7327_v10  ;;  %v5104_v10 = vld [vmem:[%s11232_s12 + $0x118] sm:$0xff] }
 0xf13   : >> { %4935 = vmatpush1.msra.mxu1 %v7326_v15  ;;  %v5101_v15 = vld [vmem:[%s11232_s12 + $0x100] sm:$0xff] }
 0xf14   : >> { %4936 = vmatprep.subr.mxu1 %v7325_v29  ;;  %v5103_v29 = vld [vmem:[%s11232_s12 + $0x110] sm:$0xff] }
 0xf15   : >> { %4937 = vmatpush1.msra.mxu1 %v7324_v39  ;;  %v5100_v39 = vld [vmem:[%s11232_s12 + $0xf8] sm:$0xff] }
 0xf16   : >> { %4938 = vmatprep.subr.mxu1 %v7323_v57  ;;  %v5099_v57 = vld [vmem:[%s11232_s12 + $0xf0] sm:$0xff] }
 0xf17   : >> { %4939 = vmatpush1.msra.mxu1 %v7322_v9  ;;  %v5096_v9 = vld [vmem:[%s11232_s12 + $0xd8] sm:$0xff] }
 0xf18   : >> { %4940 = vmatprep.subr.mxu1 %v7321_v1  ;;  %v5095_v1 = vld [vmem:[%s11232_s12 + $0xd0] sm:$0xff] }
 0xf19   : >> { %4941 = vmatpush1.msra.mxu1 %v7320_v45  ;;  %v5090_v45 = vld [vmem:[%s11232_s12 + $0xa8] sm:$0xff] }
 0xf1a   : >> { %4966 = vmatprep.subr.mxu1 %v7359_v55  ;;  %v5092_v55 = vld [vmem:[%s11232_s12 + $0xb8] sm:$0xff] }
 0xf1b   : >> { %4967 = vmatpush2.msra.mxu1 %v7358_v42  ;;  %v5089_v42 = vld [vmem:[%s11232_s12 + $0xa0] sm:$0xff] }
 0xf1c   : >> { %4968 = vmatprep.subr.mxu1 %v7357_v0  ;;  %v5091_v0 = vld [vmem:[%s11232_s12 + $0xb0] sm:$0xff] }
 0xf1d   : >> { %4969 = vmatpush2.msra.mxu1 %v7356_v17  ;;  %v5086_v17 = vld [vmem:[%s11232_s12 + $0x88] sm:$0xff] }
 0xf1e   : >> { %4970 = vmatprep.subr.mxu1 %v7355_v49  ;;  %v5088_v49 = vld [vmem:[%s11232_s12 + $0x98] sm:$0xff] }
 0xf1f   : >> { %4971 = vmatpush2.msra.mxu1 %v7354_v62  ;;  %v5085_v62 = vld [vmem:[%s11232_s12 + $0x80] sm:$0xff] }
 0xf20   : >> { %4972 = vmatprep.subr.mxu1 %v7353_v12  ;;  %v5087_v12 = vld [vmem:[%s11232_s12 + $0x90] sm:$0xff] }
 0xf21   : >> { %4973 = vmatpush2.msra.mxu1 %v7352_v16  ;;  %v5082_v16 = vld [vmem:[%s11232_s12 + $0x68] sm:$0xff] }
 0xf22   : >> { %5256 = vmatprep.subr.mxu1 %v5132_v36  ;;  %v5073_v36 = vld [vmem:[%s11232_s12 + $0x20] sm:$0xff] }
 0xf95   : >> { %v4586_v56 = vpop.f32.mrf.mxu0 }
 0xf97   : >> { %v4588_v35 = vpop.f32.mrf.mxu0 }
 0xf98   : >> { %7317 = vmatprep.mubr.msk.f32.mxu0 %vm1705_vm2, %v4588_v35  ;;  %v5081_v35 = vld [vmem:[%s11232_s12 + $0x60] sm:$0xff] }
 0xf99   : >> { %v4592_v8 = vpop.f32.mrf.mxu0  ;;  %4849 = vmatmul.mubr.f32.vlgmr.msra.gmra.mxu0 %v4586_v56  ;;  %v5084_v56 = vld [vmem:[%s11232_s12 + $0x78] sm:$0xff] }
 0xf9a   : >> { %5180 = vmatpush1.msra.mxu0 %v5129_v38  ;;  %v5075_v38 = vld [vmem:[%s11232_s12 + $0x30] sm:$0xff] }
 0xf9b   : >> { %v4594_v63 = vpop.f32.mrf.mxu0  ;;  %5181 = vmatprep.subr.mxu0 %v5126_v25  ;;  %v5072_v25 = vld [vmem:[%s11232_s12 + $0x18] sm:$0xff] }
 0xf9c   : >> { %7318 = vmatprep.mubr.msk.f32.mxu0 %vm1705_vm2, %v4594_v63  ;;  %5182 = vmatpush1.msra.mxu0 %v5125_v44  ;;  %v5078_v63 = vld [vmem:[%s11232_s12 + $0x48] sm:$0xff]  ;;  %v5071_v44 = vld [vmem:[%s11232_s12 + $0x10] sm:$0xff] }
 0xf9d   : >> { %v4598_v58 = vpop.f32.mrf.mxu0  ;;  %4855 = vmatmul.mubr.f32.gmra.mxu0 %v4592_v8  ;;  %5183 = vmatprep.subr.mxu0 %v5122_v50  ;;  %v5083_v8 = vld [vmem:[%s11232_s12 + $0x70] sm:$0xff]  ;;  %v5148_v50 = vld [vmem:[%s11232_s12 + $0x278] sm:$0xff] }
 0xf9e   : >> { %5184 = vmatpush1.msra.mxu0 %v5121_v37  ;;  %v5147_v37 = vld [vmem:[%s11232_s12 + $0x270] sm:$0xff] }
 0xf9f   : >> { %v4600_v24 = vpop.f32.mrf.mxu0  ;;  %5185 = vmatprep.subr.mxu0 %v5118_v32  ;;  %v5144_v32 = vld [vmem:[%s11232_s12 + $0x258] sm:$0xff] }
 0xfa0   : >> { %7360 = vmatprep.mubr.msk.f32.mxu1 %vm1705_vm2, %v4600_v24  ;;  %5186 = vmatpush1.msra.mxu0 %v5117_v3  ;;  %v5077_v24 = vld [vmem:[%s11232_s12 + $0x40] sm:$0xff]  ;;  %v5143_v3 = vld [vmem:[%s11232_s12 + $0x250] sm:$0xff] }
 0xfa1   : >> { %v4604_v60 = vpop.f32.mrf.mxu0  ;;  %4975 = vmatmul.mubr.f32.vlgmr.msra.gmra.mxu1 %v4598_v58  ;;  %5187 = vmatprep.subr.mxu0 %v5114_v59  ;;  %v5080_v58 = vld [vmem:[%s11232_s12 + $0x58] sm:$0xff] }
 0xfa2   : >> { %5257 = vmatpush1.msra.mxu1 %v5131_v21  ;;  %5188 = vmatpush1.msra.mxu0 %v5113_v33  ;;  %v5070_v21 = vld [vmem:[%s11232_s12 + $0x8] sm:$0xff]  ;;  %v5140_v59 = vld [vmem:[%s11232_s12 + $0x238] sm:$0xff]  ;;  %v5139_v33 = vld [vmem:[%s11232_s12 + $0x230] sm:$0xff] }
 0xfa3   : >> { %v4606_v61 = vpop.f32.mrf.mxu0  ;;  %5258 = vmatprep.subr.mxu1 %v5128_v14  ;;  %5189 = vmatprep.subr.mxu0 %v5110_v7  ;;  %v5069_v14 = vld [vmem:[%s11232_s12] sm:$0xff]  ;;  %v5136_v7 = vld [vmem:[%s11232_s12 + $0x218] sm:$0xff] }
 0xfa4   : >> { %7361 = vmatprep.mubr.msk.f32.mxu1 %vm1705_vm2, %v4606_v61  ;;  %5259 = vmatpush1.msra.mxu1 %v5127_v43  ;;  %v5074_v61 = vld [vmem:[%s11232_s12 + $0x28] sm:$0xff] }
 0xfa5   : >> { %4981 = vmatmul.mubr.f32.gmra.mxu1 %v4604_v60  ;;  %5260 = vmatprep.subr.mxu1 %v5124_v18  ;;  %v5079_v60 = vld [vmem:[%s11232_s12 + $0x50] sm:$0xff]  ;;  %v5146_v43 = vld [vmem:[%s11232_s12 + $0x268] sm:$0xff]  ;;  %v5145_v18 = vld [vmem:[%s11232_s12 + $0x260] sm:$0xff] }
 0xfa6   : >> { %5261 = vmatpush1.msra.mxu1 %v5123_v23  ;;  %5190 = vmatpush1.msra.mxu0 %v5109_v27  ;;  %v5142_v23 = vld [vmem:[%s11232_s12 + $0x248] sm:$0xff]  ;;  %v5135_v27 = vld [vmem:[%s11232_s12 + $0x210] sm:$0xff] }
 0xfa7   : >> { %5262 = vmatprep.subr.mxu1 %v5120_v20  ;;  %5191 = vmatprep.subr.mxu0 %v5106_v6  ;;  %v5141_v20 = vld [vmem:[%s11232_s12 + $0x240] sm:$0xff] }
 0xfa8   : >> { %5263 = vmatpush1.msra.mxu1 %v5119_v28  ;;  %5192 = vmatpush1.msra.mxu0 %v5105_v40  ;;  %v5138_v28 = vld [vmem:[%s11232_s12 + $0x228] sm:$0xff] }
 0xfa9   : >> { %5264 = vmatprep.subr.mxu1 %v5116_v31  ;;  %5193 = vmatprep.subr.mxu0 %v5102_v13  ;;  %v5137_v31 = vld [vmem:[%s11232_s12 + $0x220] sm:$0xff] }
 0xfaa   : >> { %5265 = vmatpush1.msra.mxu1 %v5115_v46  ;;  %5194 = vmatpush1.msra.mxu0 %v5101_v15  ;;  %v5134_v46 = vld [vmem:[%s11232_s12 + $0x208] sm:$0xff]  ;;  %v4993_v15 = vld [vmem:[%s4992_s7] sm:$0x3] }
 0xfab   : >> { %5266 = vmatprep.subr.mxu1 %v5112_v53  ;;  %5195 = vmatprep.subr.mxu0 %v5098_v11  ;;  %v5133_v53 = vld [vmem:[%s11232_s12 + $0x200] sm:$0xff] }
 0xfac   : >> { %5267 = vmatpush1.msra.mxu1 %v5111_v48  ;;  %5196 = vmatpush1.msra.mxu0 %v5097_v26 }
 0xfad   : >> { %5268 = vmatprep.subr.mxu1 %v5108_v19  ;;  %5197 = vmatprep.subr.mxu0 %v5094_v22  ;;  %v5002_v22 = vrot.slane %v4993_v15, %v10008_v51 }
 0xfae   : >> { %5269 = vmatpush1.msra.mxu1 %v5107_v34  ;;  %5198 = vmatpush1.msra.mxu0 %v5093_v47 }
 0xfaf   : >> { %5270 = vmatprep.subr.mxu1 %v5104_v10  ;;  %5199 = vmatprep.subr.mxu0 %v5090_v45 }
 0xfb0   : >> { %5271 = vmatpush1.msra.mxu1 %v5103_v29  ;;  %5200 = vmatpush1.msra.mxu0 %v5089_v42 }
 0xfb1   : >> { %5272 = vmatprep.subr.mxu1 %v5100_v39  ;;  %5201 = vmatprep.subr.mxu0 %v5086_v17 }
 0xfb2   : >> { %5273 = vmatpush1.msra.mxu1 %v5099_v57  ;;  %5202 = vmatpush1.msra.mxu0 %v5085_v62  ;;  %v4998_v57 = vrot.slane %v4993_v15, %v10005_v41 }
 0xfb3   : >> { %5274 = vmatprep.subr.mxu1 %v5096_v9  ;;  %5203 = vmatprep.subr.mxu0 %v5082_v16 }
 0xfb4   : >> { %5275 = vmatpush1.msra.mxu1 %v5095_v1  ;;  %5204 = vmatpush1.msra.mxu0 %v5081_v35 }
 0xfb5   : >> { %5276 = vmatprep.subr.mxu1 %v5092_v55  ;;  %5205 = vmatprep.subr.mxu0 %v5078_v63 }
 0xfb6   : >> { %5277 = vmatpush1.msra.mxu1 %v5091_v0  ;;  %5206 = vmatpush1.msra.mxu0 %v5077_v24 }
 0xfb7   : >> { %5278 = vmatprep.subr.mxu1 %v5088_v49  ;;  %5207 = vmatprep.subr.mxu0 %v5074_v61 }
 0xfb8   : >> { %5279 = vmatpush1.msra.mxu1 %v5087_v12  ;;  %5208 = vmatpush1.msra.mxu0 %v5073_v36 }
 0xfb9   : >> { %5280 = vmatprep.subr.mxu1 %v5084_v56  ;;  %5209 = vmatprep.subr.mxu0 %v5070_v21 }
 0xfba   : >> { %5281 = vmatpush1.msra.mxu1 %v5083_v8  ;;  %5210 = vmatpush1.msra.mxu0 %v5069_v14  ;;  %v4767_v48 = vpop.f32.mrf.mxu1 }
 0xfbb   : >> { %5282 = vmatprep.subr.mxu1 %v5080_v58  ;;  %5235 = vmatprep.subr.mxu0 %v5146_v43 }
 0xfbc   : >> { %5283 = vmatpush1.msra.mxu1 %v5079_v60  ;;  %5236 = vmatpush2.msra.mxu0 %v5145_v18  ;;  %v4769_v6 = vpop.f32.mrf.mxu1 }
 0xfbd   : >> { %5284 = vmatprep.subr.mxu1 %v5076_v2  ;;  %5237 = vmatprep.subr.mxu0 %v5142_v23 }
 0xfbe   : >> { %5285 = vmatpush1.msra.mxu1 %v5075_v38  ;;  %5238 = vmatpush2.msra.mxu0 %v5141_v20 }
 0xfbf   : >> { %5286 = vmatprep.subr.mxu1 %v5072_v25  ;;  %5239 = vmatprep.subr.mxu0 %v5138_v28 }
 0xfc0   : >> { %5287 = vmatpush1.msra.mxu1 %v5071_v44  ;;  %5240 = vmatpush2.msra.mxu0 %v5137_v31 }
 0xfc1   : >> { %5312 = vmatprep.subr.mxu1 %v5148_v50  ;;  %5241 = vmatprep.subr.mxu0 %v5134_v46 }
 0xfc2   : >> { %5313 = vmatpush2.msra.mxu1 %v5147_v37  ;;  %5242 = vmatpush2.msra.mxu0 %v5133_v53 }
 0xfc3   : >> { %5314 = vmatprep.subr.mxu1 %v5144_v32 }
 0xfc4   : >> { %5315 = vmatpush2.msra.mxu1 %v5143_v3  ;;  %v4773_v40 = vpop.f32.mrf.mxu1 }
 0xfc5   : >> { %5316 = vmatprep.subr.mxu1 %v5140_v59 }
 0xfc6   : >> { %5317 = vmatpush2.msra.mxu1 %v5139_v33  ;;  %v4775_v13 = vpop.f32.mrf.mxu1 }
 0xfc7   : >> { %5318 = vmatprep.subr.mxu1 %v5136_v7 }
 0xfc8   : >> { %5319 = vmatpush2.msra.mxu1 %v5135_v27 }
 0xfc9   : >> { %5856 = vmatprep.subr.mxu1 %v9120_v4 }
0x1059   : >> { %v4850_v19 = vpop.f32.mrf.mxu0 }
0x105a   : >> { %v4851_v29 = vadd.f32 %v4850_v19, %v4767_v48 }
0x105b   : >> { %v4852_v34 = vpop.f32.mrf.mxu0 }
0x105c   : >> { %v4853_v39 = vadd.f32 %v4852_v34, %v4769_v6 }
0x105d   : >> { %v4856_v10 = vpop.f32.mrf.mxu0 }
0x105e   : >> { %v4857_v1 = vadd.f32 %v4856_v10, %v4773_v40 }
0x105f   : >> { %v4858_v9 = vpop.f32.mrf.mxu0 }
0x1060   : >> { %v4859_v42 = vadd.f32 %v4858_v9, %v4775_v13 }
0x1061   : >> { %v4976_v11 = vpop.f32.mrf.mxu1 }
0x1062   : >> { %v4987_v26 = vadd.f32 %v4976_v11, %v4851_v29 }
0x1063   : >> { %v4978_v47 = vpop.f32.mrf.mxu1 }
0x1064   : >> { %v4988_v45 = vadd.f32 %v4978_v47, %v4853_v39  ;;  %v5005_v0 = vadd.f32 %v4998_v57, %v4987_v26 }
0x1065   : >> { %v4982_v55 = vpop.f32.mrf.mxu1 }
0x1066   : >> { %v5006_v17 = vadd.f32 %v5002_v22, %v4988_v45  ;;  %v4989_v49 = vadd.f32 %v4982_v55, %v4857_v1  ;;  %v11321_v56 = vmax.f32 %v5005_v0, 0.0 }
0x1067   : >> { %v4984_v62 = vpop.f32.mrf.mxu1 }
0x1068   : >> { %v5007_v12 = vadd.f32 %v4998_v57, %v4989_v49  ;;  %v4990_v16 = vadd.f32 %v4984_v62, %v4859_v42  ;;  %v11323_v35 = vmax.f32 %v5006_v17, 0.0 }
0x106a   : >> { %v11325_v8 = vmax.f32 %v5007_v12, 0.0  ;;  %v5008_v63 = vadd.f32 %v5002_v22, %v4990_v16  ;;  %v5020_v60 = vsel %vm1705_vm2, %v11323_v35, 0.0 }
0x106c   : >> { %v5013_v58 = vadd.f32 %v11325_v8, %v11321_v56  ;;  %v11329_v24 = vmax.f32 %v5008_v63, 0.0  ;;  %v5845_v63 = vld [vmem:[%s11865_s13 + $0x78] sm:$0xff] }
0x106e   : >> { %v5014_v61 = vrot.slane %v5013_v58, 4  ;;  %v5021_v2 = vsel %vm1705_vm2, %v11329_v24, 0.0 }
0x106f   : >> { %v5022_v36 = vadd.f32 %v5021_v2, %v5020_v60  ;;  %v5843_v60 = vld [vmem:[%s11865_s13 + $0x68] sm:$0xff]  ;;  %v5841_v2 = vld [vmem:[%s11865_s13 + $0x58] sm:$0xff] }
0x1070   : >> { %v5015_v38 = vadd.f32 %v5014_v61, %v5013_v58  ;;  %v5844_v58 = vld [vmem:[%s11865_s13 + $0x70] sm:$0xff]  ;;  %v5842_v61 = vld [vmem:[%s11865_s13 + $0x60] sm:$0xff] }
0x1071   : >> { %v5023_v21 = vrot.slane %v5022_v36, 4 }
0x1072   : >> { %v5016_v25 = vrot.slane %v5015_v38, 2 }
0x1073   : >> { %v5024_v14 = vadd.f32 %v5023_v21, %v5022_v36  ;;  %v5840_v36 = vld [vmem:[%s11865_s13 + $0x50] sm:$0xff]  ;;  %v11360_v21 = vld [vmem:[%s5150_s15] sm:$0xf] }
0x1074   : >> { %v5017_v44 = vadd.f32 %v5016_v25, %v5015_v38  ;;  %v5163_v38 = vsub.s32 2, %v10002_v54 }
0x1075   : >> { %v5025_v43 = vrot.slane %v5024_v14, 2 }
0x1076   : >> { %v5018_v50 = vrot.slane %v5017_v44, 1  ;;  %v5164_v25 = vrot.slane %v11360_v21, %v5163_v38  ;;  %v5849_v38 = vld [vmem:[%s11865_s13 + $0x98] sm:$0xff] }
0x1077   : >> { %v5026_v18 = vadd.f32 %v5025_v43, %v5024_v14  ;;  %v5160_v14 = vrot.slane %v11360_v21, %v10008_v51 }
0x1078   : >> { %v5019_v37 = vadd.f32 %v5018_v50, %v5017_v44 }
0x1079   : >> { %v5027_v23 = vrot.slane %v5026_v18, 1 }
0x107a   : >> { %v5030_v32 = vmul.f32 0.0625, %v5019_v37 }
0x107b   : >> { %v5028_v20 = vadd.f32 %v5027_v23, %v5026_v18 }
0x107c   : >> { %v5032_v3 = vsub.f32 %v11321_v56, %v5030_v32  ;;  %v5034_v28 = vsub.f32 %v11325_v8, %v5030_v32 }
0x107d   : >> { %v5031_v59 = vmul.f32 0.0625, %v5028_v20 }
0x107e   : >> { %v5036_v31 = vmul.f32 %v5032_v3, %v5032_v3  ;;  %v5038_v33 = vmul.f32 %v5034_v28, %v5034_v28 }
0x107f   : >> { %v5035_v46 = vsub.f32 %v11329_v24, %v5031_v59  ;;  %v5033_v7 = vsub.f32 %v11323_v35, %v5031_v59 }
0x1080   : >> { %v5040_v53 = vadd.f32 %v5038_v33, %v5036_v31 }
0x1081   : >> { %v5039_v27 = vmul.f32 %v5035_v46, %v5035_v46  ;;  %v5037_v48 = vmul.f32 %v5033_v7, %v5033_v7 }
0x1082   : >> { %v5041_v6 = vrot.slane %v5040_v53, 4 }
0x1083   : >> { %v5048_v19 = vsel %vm1705_vm2, %v5039_v27, 0.0  ;;  %v5047_v40 = vsel %vm1705_vm2, %v5037_v48, 0.0 }
0x1084   : >> { %v5042_v34 = vadd.f32 %v5041_v6, %v5040_v53  ;;  %v5049_v13 = vadd.f32 %v5048_v19, %v5047_v40  ;;  %v5839_v40 = vld [vmem:[%s11865_s13 + $0x48] sm:$0xff] }
0x1086   : >> { %v5043_v10 = vrot.slane %v5042_v34, 2  ;;  %v5050_v15 = vrot.slane %v5049_v13, 4 }
0x1088   : >> { %v5044_v29 = vadd.f32 %v5043_v10, %v5042_v34  ;;  %v5051_v11 = vadd.f32 %v5050_v15, %v5049_v13  ;;  %v5838_v34 = vld [vmem:[%s11865_s13 + $0x40] sm:$0xff] }
0x108a   : >> { %v5045_v39 = vrot.slane %v5044_v29, 1  ;;  %v5052_v26 = vrot.slane %v5051_v11, 2 }
0x108c   : >> { %v5046_v57 = vadd.f32 %v5045_v39, %v5044_v29  ;;  %v5053_v22 = vadd.f32 %v5052_v26, %v5051_v11  ;;  %v5837_v29 = vld [vmem:[%s11865_s13 + $0x38] sm:$0xff]  ;;  %v5836_v11 = vld [vmem:[%s11865_s13 + $0x30] sm:$0xff]  ;;  %v5835_v39 = vld [vmem:[%s11865_s13 + $0x28] sm:$0xff] }
0x108d   : >> { %v5834_v26 = vld [vmem:[%s11865_s13 + $0x20] sm:$0xff] }
0x108e   : >> { %v5056_v9 = vmul.f32 0.0625, %v5046_v57  ;;  %v5054_v47 = vrot.slane %v5053_v22, 1 }
0x1090   : >> { %v5055_v1 = vadd.f32 %v5054_v47, %v5053_v22  ;;  %v5058_v45 = vadd.f32 1e-05, %v5056_v9  ;;  %v5833_v9 = vld [vmem:[%s11865_s13 + $0x18] sm:$0xff]  ;;  %v5832_v47 = vld [vmem:[%s11865_s13 + $0x10] sm:$0xff] }
0x1092   : >> { %v5057_v55 = vmul.f32 0.0625, %v5055_v1  ;;  %8225 = vrsqrt.f32 %v5058_v45 }
0x1094   : >> { %v5059_v42 = vadd.f32 1e-05, %v5057_v55 }
0x1096   : >> { %8227 = vrsqrt.f32 %v5059_v42 }
0x109f   : >> { %v8226_v0 = vpop.eup %8225 }
0x10a0   : >> { %v5062_v62 = vmul.f32 %v8226_v0, %v5032_v3  ;;  %v5064_v16 = vmul.f32 %v8226_v0, %v5034_v28  ;;  %v5167_v0 = vsub.s32 3, %v10002_v54  ;;  %v6436_v54 = vld [vmem:[%s9296_s17 + $0x60] sm:$0xff] (%p2070_p0) }
0x10a3   : >> { %v8228_v17 = vpop.eup %8227 }
0x10a4   : >> { %v5063_v49 = vmul.f32 %v8228_v17, %v5033_v7  ;;  %v5065_v12 = vmul.f32 %v8228_v17, %v5035_v46 }
0x10a6   : >> { %7365 = vmatprep.mubr.msk.f32.mxu0 %vm1705_vm2, %v5063_v49  ;;  %7367 = vmatprep.mubr.msk.f32.mxu1 %vm1705_vm2, %v5063_v49 }
0x10a7   : >> { %5244 = vmatmul.mubr.f32.vlgmr.msra.gmra.mxu0 %v5062_v62  ;;  %5321 = vmatmul.mubr.f32.vlgmr.msra.gmra.mxu1 %v5062_v62 }
0x10a8   : >> { %7366 = vmatprep.mubr.msk.f32.mxu0 %vm1705_vm2, %v5065_v12  ;;  %7368 = vmatprep.mubr.msk.f32.mxu1 %vm1705_vm2, %v5065_v12  ;;  %v5831_v12 = vld [vmem:[%s11865_s13 + $0x8] sm:$0xff] }
0x10a9   : >> { %5857 = vmatpush1.msra.mxu1 %v5845_v63 }
0x10aa   : >> { %5858 = vmatprep.subr.mxu1 %v9120_v4 }
0x10ab   : >> { %5250 = vmatmul.mubr.f32.gmra.mxu0 %v5064_v16  ;;  %5327 = vmatmul.mubr.f32.gmra.mxu1 %v5064_v16 }
0x10ac   : >> { %5595 = vmatprep.mubr.f32.mxu0 %v9120_v4  ;;  %5859 = vmatpush1.msra.mxu1 %v5844_v58  ;;  %v5830_v58 = vld [vmem:[%s11865_s13] sm:$0xff] }
0x10ad   : >> { %5860 = vmatprep.subr.mxu1 %v9120_v4 }
0x10ae   : >> { %5861 = vmatpush1.msra.mxu1 %v5843_v60 }
0x10af   : >> { %5862 = vmatprep.subr.mxu1 %v9120_v4 }
0x10b0   : >> { %5863 = vmatpush1.msra.mxu1 %v5842_v61 }
0x10b1   : >> { %5864 = vmatprep.subr.mxu1 %v9120_v4 }
0x10b2   : >> { %5865 = vmatpush1.msra.mxu1 %v5841_v2  ;;  %v5168_v2 = vrot.slane %v11360_v21, %v5167_v0 }
0x10b3   : >> { %5866 = vmatprep.subr.mxu1 %v9120_v4 }
0x10b4   : >> { %5867 = vmatpush1.msra.mxu1 %v5840_v36 }
0x10b5   : >> { %5868 = vmatprep.subr.mxu1 %v9120_v4 }
0x10b6   : >> { %5869 = vmatpush1.msra.mxu1 %v5839_v40 }
0x10b7   : >> { %5870 = vmatprep.subr.mxu1 %v9120_v4 }
0x10b8   : >> { %5871 = vmatpush1.msra.mxu1 %v5838_v34 }
0x10b9   : >> { %5872 = vmatprep.subr.mxu1 %v9120_v4 }
0x10ba   : >> { %5873 = vmatpush1.msra.mxu1 %v5837_v29 }
0x10bb   : >> { %5874 = vmatprep.subr.mxu1 %v9120_v4 }
0x10bc   : >> { %5875 = vmatpush1.msra.mxu1 %v5836_v11 }
0x10bd   : >> { %5876 = vmatprep.subr.mxu1 %v9120_v4 }
0x10be   : >> { %5877 = vmatpush1.msra.mxu1 %v5835_v39 }
0x10bf   : >> { %5878 = vmatprep.subr.mxu1 %v9120_v4 }
0x10c0   : >> { %5879 = vmatpush1.msra.mxu1 %v5834_v26 }
0x10c1   : >> { %5880 = vmatprep.subr.mxu1 %v9120_v4 }
0x10c2   : >> { %5881 = vmatpush1.msra.mxu1 %v5833_v9 }
0x10c3   : >> { %5882 = vmatprep.subr.mxu1 %v9120_v4 }
0x10c4   : >> { %5883 = vmatpush1.msra.mxu1 %v5832_v47 }
0x10c5   : >> { %5884 = vmatprep.subr.mxu1 %v9120_v4 }
0x10c6   : >> { %5885 = vmatpush1.msra.mxu1 %v5831_v12 }
0x10c7   : >> { %5886 = vmatprep.subr.mxu1 %v9120_v4 }
0x10c8   : >> { %5887 = vmatpush1.msra.mxu1 %v5830_v58 }
0x10c9   : >> { %5912 = vmatprep.subr.mxu1 %v9120_v4 }
0x10ca   : >> { %5913 = vmatpush2.msra.mxu1 %v5849_v38  ;;  %v6015_v38 = vld [vmem:[#allocation14 + $0x8] sm:$0xff] }
0x10cb   : >> { %5914 = vmatprep.subr.mxu1 %v9120_v4 }
0x1167   : >> { %v11365_v44 = vpop.f32.mrf.mxu0  ;;  %v5322_v43 = vpop.f32.mrf.mxu1 }
0x1168   : >> { %v11367_v50 = vadd.f32 %v5322_v43, %v5164_v25 }
0x1169   : >> { %v5247_v18 = vpop.f32.mrf.mxu0  ;;  %v11369_v37 = vpop.f32.mrf.mxu1 }
0x116a   : >> { %v7371_v23 = vmul.f32 -1.442695, %v11367_v50  ;;  %v5248_v32 = vadd.f32 %v5247_v18, %v5160_v14 }
0x116b   : >> { %v11372_v20 = vpop.f32.mrf.mxu0  ;;  %v5328_v3 = vpop.f32.mrf.mxu1 }
0x116c   : >> { %v7370_v28 = vmul.f32 -1.442695, %v5248_v32  ;;  %v11374_v59 = vadd.f32 %v5328_v3, %v5164_v25  ;;  %8229 = vpow2.f32 %v7371_v23  ;;  %v5848_v23 = vld [vmem:[%s11865_s13 + $0x90] sm:$0xff] }
0x116d   : >> { %v5253_v31 = vpop.f32.mrf.mxu0  ;;  %v5330_v60 = vpop.f32.mrf.mxu1  ;;  %5915 = vmatpush2.msra.mxu1 %v5848_v23 }
0x116e   : >> { %8231 = vpow2.f32 %v7370_v28  ;;  %v7374_v33 = vmul.f32 -1.442695, %v11374_v59  ;;  %v5254_v46 = vadd.f32 %v5253_v31, %v5160_v14  ;;  %v5331_v14 = vadd.f32 %v5330_v60, %v5168_v2  ;;  %v5847_v28 = vld [vmem:[%s11865_s13 + $0x88] sm:$0xff]  ;;  %5916 = vmatprep.subr.mxu1 %v9120_v4  ;;  %v6019_v60 = vld [vmem:[#allocation14 + $0x28] sm:$0xf] }
0x116f   : >> { %5917 = vmatpush2.msra.mxu1 %v5847_v28 }
0x1170   : >> { %v7373_v7 = vmul.f32 -1.442695, %v5254_v46  ;;  %8233 = vpow2.f32 %v7374_v33  ;;  %v5846_v46 = vld [vmem:[%s11865_s13 + $0x80] sm:$0xff]  ;;  %5918 = vmatprep.subr.mxu1 %v9120_v4 }
0x1171   : >> { %5919 = vmatpush2.msra.mxu1 %v5846_v46 }
0x1172   : >> { %8235 = vpow2.f32 %v7373_v7  ;;  %7399 = vmatprep.subr.msk.mxu1 %vm1616_vm0, %v6019_v60 }
0x1179   : >> { %v8230_v53 = vpop.eup %8229 }
0x117a   : >> { %v5353_v48 = vadd.f32 1.0, %v8230_v53 }
0x117b   : >> { %v8232_v27 = vpop.eup %8231 }
0x117c   : >> { %v5352_v6 = vadd.f32 1.0, %v8232_v27 }
0x117d   : >> { %v8234_v19 = vpop.eup %8233 }
0x117e   : >> { %8237 = vrcp.f32 %v5352_v6  ;;  %v5356_v10 = vadd.f32 1.0, %v8234_v19 }
0x117f   : >> { %v8236_v13 = vpop.eup %8235  ;;  %8239 = vrcp.f32 %v5353_v48 }
0x1180   : >> { %v5355_v15 = vadd.f32 1.0, %v8236_v13  ;;  %8241 = vrcp.f32 %v5356_v10 }
0x1182   : >> { %8243 = vrcp.f32 %v5355_v15 }
0x118b   : >> { %v11388_v57 = vpop.eup %8237 }
0x118c   : >> { %v8240_v22 = vpop.eup %8239  ;;  %5373 = vrot.lane.b32.xlu0 %v11388_v57, %s9121_s29  ;;  %v5797_v17 = vsel %vm5796_vm14, %v11388_v57, 0.0 }
0x118d   : >> { %v8242_v1 = vpop.eup %8241  ;;  %v5806_v55 = vsel %vm5464_vm13, %v8240_v22, 0.0 }
0x118e   : >> { %v5807_v42 = vsel %vm5464_vm13, %v8242_v1, 0.0 }
0x118f   : >> { %v11396_v45 = vpop.eup %8243  ;;  %v5808_v62 = vadd.f32 %v5807_v42, %v5806_v55 }
0x1190   : >> { %5377 = vrot.lane.b32.xlu1 %v11396_v45, %s9121_s29  ;;  %5375 = vrot.lane.b32.xlu0 %v8240_v22, %s9121_s29  ;;  %v5798_v49 = vsel %vm5796_vm14, %v11396_v45, 0.0 }
0x1191   : >> { %v5799_v16 = vadd.f32 %v5798_v49, %v5797_v17  ;;  %v5809_v63 = vrot.slane %v5808_v62, 4 }
0x1193   : >> { %v5800_v61 = vrot.slane %v5799_v16, 4  ;;  %v5810_v36 = vadd.f32 %v5809_v63, %v5808_v62 }
0x1194   : >> { %5379 = vrot.lane.b32.xlu1 %v8242_v1, %s9121_s29  ;;  %5460 = vrot.lane.b32.xlu0 %v11374_v59, %s9122_s11  ;;  %v5325_v59 = vadd.f32 %v11369_v37, %v5168_v2  ;;  %v5156_v37 = vrot.slane %v11360_v21, %v10005_v41  ;;  %v6017_v2 = vld [vmem:[#allocation14 + $0x18] sm:$0xff] }
0x1195   : >> { %v5801_v25 = vadd.f32 %v5800_v61, %v5799_v16  ;;  %v5811_v43 = vrot.slane %v5810_v36, 2  ;;  %v6018_v61 = vld [vmem:[#allocation14 + $0x20] sm:$0xf] }
0x1196   : >> { %v5246_v48 = vadd.f32 %v11365_v44, %v5156_v37  ;;  %v5252_v19 = vadd.f32 %v11372_v20, %v5156_v37 }
0x1197   : >> { %v5802_v18 = vrot.slane %v5801_v25, 2  ;;  %v5812_v32 = vadd.f32 %v5811_v43, %v5810_v36  ;;  %v6016_v36 = vld [vmem:[#allocation14 + $0x10] sm:$0xff] }
0x1198   : >> { %5462 = vrot.lane.b32.xlu1 %v5331_v14, %s9122_s11  ;;  %5456 = vrot.lane.b32.xlu0 %v11367_v50, %s9122_s11  ;;  %v7369_v6 = vmul.f32 -1.442695, %v5246_v48  ;;  %v7372_v40 = vmul.f32 -1.442695, %v5252_v19 }
0x1199   : >> { %v5803_v3 = vadd.f32 %v5802_v18, %v5801_v25  ;;  %v5813_v33 = vrot.slane %v5812_v32, 1  ;;  %v6014_v25 = vld [vmem:[#allocation14] sm:$0xff] }
0x119a   : >> { %8245 = vpow2.f32 %v7369_v6 }
0x119b   : >> { %v5804_v31 = vrot.slane %v5803_v3, 1  ;;  %v5814_v53 = vadd.f32 %v5813_v33, %v5812_v32  ;;  %8247 = vpow2.f32 %v7372_v40 }
0x119c   : >> { %5458 = vrot.lane.b32.xlu1 %v5325_v59, %s9122_s11 }
0x119d   : >> { %v5805_v7 = vadd.f32 %v5804_v31, %v5803_v3  ;;  %v5816_v27 = vadd.f32 1e-06, %v5814_v53 }
0x119f   : >> { %v5815_v50 = vadd.f32 1e-06, %v5805_v7 }
0x11a1   : >> { %5819 = vrot.lane.b32.xlu1 %v5815_v50, %s9121_s29 }
0x11a5   : >> { %5821 = vrot.lane.b32.xlu1 %v5816_v27, %s9121_s29 }
0x11a7   : >> { %v8246_v29 = vpop.eup %8245 }
0x11a8   : >> { %v5351_v39 = vadd.f32 1.0, %v8246_v29  ;;  %v8248_v44 = vpop.eup %8247 }
0x11a9   : >> { %v5354_v22 = vadd.f32 1.0, %v8248_v44  ;;  %v6144_v44 = vld [vmem:[%s11492_s14 + $0xd8] sm:$0xff] }
0x11aa   : >> { %8249 = vrcp.f32 %v5351_v39  ;;  %v6147_v39 = vld [vmem:[%s11492_s14 + $0xf0] sm:$0xff] }
0x11ab   : >> { %8251 = vrcp.f32 %v5354_v22  ;;  %v6141_v22 = vld [vmem:[%s11492_s14 + $0xc0] sm:$0xff] }
0x11b7   : >> { %v11433_v17 = vpop.eup %8249 }
0x11b8   : >> { %v11440_v63 = vpop.eup %8251 }
0x11fe   : >> { %v5374_v34 = vpop.permute.xlu0 %5373 }
0x1202   : >> { %v5378_v13 = vpop.permute.xlu1 %5377  ;;  %v5376_v10 = vpop.permute.xlu0 %5375 }
0x1203   : >> { %5420 = vxpose.xlu1.b32.start [1/2] (short) (narrow) %v5376_v10, 32  ;;  %v5382_v15 = vsel %vm5381_vm15, %v5374_v34, %v5376_v10 }
0x1204   : >> { %5388 = vxpose.xlu0.b32.start [1/2] (short) %v5382_v15, 128 }
0x1206   : >> { %v5380_v11 = vpop.permute.xlu1 %5379  ;;  %v5461_v26 = vpop.permute.xlu0 %5460 }
0x1207   : >> { %5421 = vxpose.xlu1.b32.end [2/2] (short) (narrow) %v5380_v11, 32  ;;  %v5383_v21 = vsel %vm5381_vm15, %v5378_v13, %v5380_v11 }
0x1208   : >> { %5389 = vxpose.xlu0.b32.end [2/2] (short) %v5383_v21, 128  ;;  %v6146_v21 = vld [vmem:[%s11492_s14 + $0xe8] sm:$0xff] }
0x120a   : >> { %v5463_v20 = vpop.permute.xlu1 %5462  ;;  %v5457_v47 = vpop.permute.xlu0 %5456 }
0x120b   : >> { %v5466_v9 = vsel %vm5464_vm13, %v5461_v26, %v5463_v20  ;;  %5559 = vmatprep.subr.mxu0 %v5463_v20  ;;  %v6143_v26 = vld [vmem:[%s11492_s14 + $0xd0] sm:$0xff]  ;;  %v6142_v20 = vld [vmem:[%s11492_s14 + $0xc8] sm:$0xff] }
0x120c   : >> { %5560 = vmatpush1.msra.mxu0 %v5466_v9  ;;  %v6140_v9 = vld [vmem:[%s11492_s14 + $0xb8] sm:$0xff] }
0x120e   : >> { %v5459_v1 = vpop.permute.xlu1 %5458 }
0x120f   : >> { %v5465_v55 = vsel %vm5464_vm13, %v5457_v47, %v5459_v1  ;;  %5561 = vmatprep.subr.mxu0 %v5459_v1  ;;  %v6139_v47 = vld [vmem:[%s11492_s14 + $0xb0] sm:$0xff]  ;;  %v6138_v1 = vld [vmem:[%s11492_s14 + $0xa8] sm:$0xff] }
0x1210   : >> { %5562 = vmatpush1.msra.mxu0 %v5465_v55  ;;  %v6137_v55 = vld [vmem:[%s11492_s14 + $0xa0] sm:$0xff] }
0x1213   : >> { %v5820_v42 = vpop.permute.xlu1 %5819 }
0x1217   : >> { %v5822_v0 = vpop.permute.xlu1 %5821 }
0x1218   : >> { %v5823_v49 = vsel %vm5381_vm15, %v5820_v42, %v5822_v0  ;;  %v5827_v62 = vmul.f32 %v11388_v57, %v5822_v0  ;;  %v5829_v16 = vmul.f32 %v11396_v45, %v5822_v0  ;;  %v6136_v42 = vld [vmem:[%s11492_s14 + $0x98] sm:$0xff]  ;;  %v6135_v0 = vld [vmem:[%s11492_s14 + $0x90] sm:$0xff] }
0x1219   : >> { %v5826_v12 = vmul.f32 %v11433_v17, %v5823_v49  ;;  %v5828_v58 = vmul.f32 %v11440_v63, %v5823_v49  ;;  %v6134_v49 = vld [vmem:[%s11492_s14 + $0x88] sm:$0xff] }
0x121a   : >> { %7395 = vmatprep.mubr.msk.f32.mxu1 %vm1705_vm2, %v5827_v62  ;;  %v6133_v62 = vld [vmem:[%s11492_s14 + $0x80] sm:$0xff] }
0x121b   : >> { %5921 = vmatmul.mubr.f32.vlgmr.msra.gmra.mxu1 %v5826_v12 }
0x121c   : >> { %7396 = vmatprep.mubr.msk.f32.mxu1 %vm1705_vm2, %v5829_v16  ;;  %7400 = vmatpush1.msk.msra.mxu1 %vm1616_vm0, %v6018_v61  ;;  %v6132_v16 = vld [vmem:[%s11492_s14 + $0x78] sm:$0xff]  ;;  %v6130_v61 = vld [vmem:[%s11492_s14 + $0x68] sm:$0xff]  ;;  %vm6534_vm0 = vcmask (%p2070_p0), 64512  }
0x121d   : >> { %6061 = vmatprep.subr.mxu1 %v6017_v2  ;;  %v6129_v2 = vld [vmem:[%s11492_s14 + $0x60] sm:$0xff] }
0x121e   : >> { %6062 = vmatpush1.msra.mxu1 %v6016_v36 }
0x121f   : >> { %5926 = vmatmul.mubr.f32.gmra.mxu1 %v5828_v58  ;;  %6063 = vmatprep.subr.mxu1 %v6015_v38  ;;  %v6131_v58 = vld [vmem:[%s11492_s14 + $0x70] sm:$0xff]  ;;  %v6128_v38 = vld [vmem:[%s11492_s14 + $0x58] sm:$0xff] }
0x1220   : >> { %6097 = vmatprep.mubr.f32.mxu1 %v9120_v4  ;;  %6064 = vmatpush1.msra.mxu1 %v6014_v25  ;;  %v6127_v25 = vld [vmem:[%s11492_s14 + $0x50] sm:$0xff] }
0x127f   : >> { %v5436_v37 = vpop.trf.xlu1 }
0x1280   : >> { %v5404_v14 = vpop.trf.xlu0 }
0x1281   : >> { %7375 = vmatmul.mubr.msk.f32.vlgmr.msra.gmra.mxu0 %vm4507_vm12, %v5404_v14 }
0x1282   : >> { %5601 = vmatprep.mubr.f32.mxu0 %v9120_v4 }
0x1283   : >> { %v5437_v6 = vpop.trf.xlu1 }
0x1284   : >> { %v5405_v43 = vpop.trf.xlu0 }
0x1285   : >> { %7376 = vmatmul.mubr.msk.f32.gmra.mxu0 %vm4507_vm12, %v5405_v43  ;;  %v6126_v43 = vld [vmem:[%s11492_s14 + $0x48] sm:$0xff] }
0x1286   : >> { %5607 = vmatprep.mubr.f32.mxu0 %v9120_v4 }
0x1287   : >> { %v5438_v19 = vpop.trf.xlu1 }
0x1288   : >> { %v5406_v18 = vpop.trf.xlu0 }
0x1289   : >> { %7377 = vmatmul.mubr.msk.f32.gmra.mxu0 %vm4507_vm12, %v5406_v18  ;;  %v6125_v18 = vld [vmem:[%s11492_s14 + $0x40] sm:$0xff] }
0x128a   : >> { %5613 = vmatprep.mubr.f32.mxu0 %v9120_v4 }
0x128b   : >> { %v5439_v40 = vpop.trf.xlu1 }
0x128c   : >> { %v5407_v23 = vpop.trf.xlu0 }
0x128d   : >> { %7378 = vmatmul.mubr.msk.f32.gmra.mxu0 %vm4507_vm12, %v5407_v23 }
0x128e   : >> { %5619 = vmatprep.mubr.f32.mxu0 %v9120_v4 }
0x1290   : >> { %v5408_v32 = vpop.trf.xlu0 }
0x1291   : >> { %7379 = vmatmul.mubr.msk.f32.gmra.mxu0 %vm4507_vm12, %v5408_v32  ;;  %v6124_v32 = vld [vmem:[%s11492_s14 + $0x38] sm:$0xff] }
0x1292   : >> { %5625 = vmatprep.mubr.f32.mxu0 %v9120_v4 }
0x1294   : >> { %v5409_v3 = vpop.trf.xlu0 }
0x1295   : >> { %7380 = vmatmul.mubr.msk.f32.gmra.mxu0 %vm4507_vm12, %v5409_v3  ;;  %v6123_v3 = vld [vmem:[%s11492_s14 + $0x30] sm:$0xff] }
0x1296   : >> { %5631 = vmatprep.mubr.f32.mxu0 %v9120_v4 }
0x1298   : >> { %v5410_v28 = vpop.trf.xlu0 }
0x1299   : >> { %7381 = vmatmul.mubr.msk.f32.gmra.mxu0 %vm4507_vm12, %v5410_v28 }
0x129a   : >> { %5637 = vmatprep.mubr.f32.mxu0 %v9120_v4 }
0x129c   : >> { %v5411_v59 = vpop.trf.xlu0 }
0x129d   : >> { %7382 = vmatmul.mubr.msk.f32.gmra.mxu0 %vm4507_vm12, %v5411_v59  ;;  %v6122_v59 = vld [vmem:[%s11492_s14 + $0x28] sm:$0xff] }
0x129e   : >> { %5643 = vmatprep.mubr.f32.mxu0 %v9120_v4 }
0x12a0   : >> { %v5412_v31 = vpop.trf.xlu0 }
0x12a1   : >> { %7383 = vmatmul.mubr.msk.f32.gmra.mxu0 %vm4507_vm12, %v5412_v31  ;;  %v6121_v31 = vld [vmem:[%s11492_s14 + $0x20] sm:$0xff] }
0x12a2   : >> { %5649 = vmatprep.mubr.f32.mxu0 %v9120_v4 }
0x12a4   : >> { %v5413_v33 = vpop.trf.xlu0 }
0x12a5   : >> { %7384 = vmatmul.mubr.msk.f32.gmra.mxu0 %vm4507_vm12, %v5413_v33 }
0x12a6   : >> { %5655 = vmatprep.mubr.f32.mxu0 %v9120_v4 }
0x12a8   : >> { %v5414_v46 = vpop.trf.xlu0 }
0x12a9   : >> { %7385 = vmatmul.mubr.msk.f32.gmra.mxu0 %vm4507_vm12, %v5414_v46  ;;  %v6120_v46 = vld [vmem:[%s11492_s14 + $0x18] sm:$0xff] }
0x12aa   : >> { %5661 = vmatprep.mubr.f32.mxu0 %v9120_v4 }
0x12ac   : >> { %v5415_v7 = vpop.trf.xlu0 }
0x12ad   : >> { %7386 = vmatmul.mubr.msk.f32.gmra.mxu0 %vm4507_vm12, %v5415_v7  ;;  %v6119_v7 = vld [vmem:[%s11492_s14 + $0x10] sm:$0xff] }
0x12ae   : >> { %5667 = vmatprep.mubr.f32.mxu0 %v9120_v4 }
0x12b0   : >> { %v5416_v50 = vpop.trf.xlu0 }
0x12b1   : >> { %7387 = vmatmul.mubr.msk.f32.gmra.mxu0 %vm4507_vm12, %v5416_v50 }
0x12b2   : >> { %5673 = vmatprep.mubr.f32.mxu0 %v9120_v4 }
0x12b4   : >> { %v5417_v53 = vpop.trf.xlu0 }
0x12b5   : >> { %7388 = vmatmul.mubr.msk.f32.gmra.mxu0 %vm4507_vm12, %v5417_v53  ;;  %v6118_v53 = vld [vmem:[%s11492_s14 + $0x8] sm:$0xff] }
0x12b6   : >> { %5679 = vmatprep.mubr.f32.mxu0 %v9120_v4 }
0x12b8   : >> { %v5418_v27 = vpop.trf.xlu0 }
0x12b9   : >> { %7389 = vmatmul.mubr.msk.f32.gmra.mxu0 %vm4507_vm12, %v5418_v27  ;;  %v6117_v27 = vld [vmem:[%s11492_s14] sm:$0xff] }
0x12ba   : >> { %5685 = vmatprep.mubr.f32.mxu0 %v9120_v4 }
0x12bc   : >> { %v5419_v48 = vpop.trf.xlu0 }
0x12bd   : >> { %7390 = vmatmul.mubr.msk.f32.gmra.mxu0 %vm4507_vm12, %v5419_v48  ;;  %v6156_v48 = vld [vmem:[%s11492_s14 + $0x138] sm:$0xff] }
0x12be   : >> { %5691 = vmatprep.mubr.f32.mxu0 %v9120_v4 }
0x12c1   : >> { %7391 = vmatmul.mubr.msk.f32.gmra.mxu0 %vm4507_vm12, %v5436_v37 }
0x12c2   : >> { %5697 = vmatprep.mubr.f32.mxu0 %v9120_v4 }
0x12c5   : >> { %7392 = vmatmul.mubr.msk.f32.gmra.mxu0 %vm4507_vm12, %v5437_v6  ;;  %v6155_v6 = vld [vmem:[%s11492_s14 + $0x130] sm:$0xff] }
0x12c6   : >> { %5703 = vmatprep.mubr.f32.mxu0 %v9120_v4 }
0x12c9   : >> { %7393 = vmatmul.mubr.msk.f32.gmra.mxu0 %vm4507_vm12, %v5438_v19 }
0x12ca   : >> { %5709 = vmatprep.mubr.f32.mxu0 %v9120_v4 }
0x12cd   : >> { %7394 = vmatmul.mubr.msk.f32.gmra.mxu0 %vm4507_vm12, %v5439_v40 }
0x12ce   : >> { %7397 = vmatprep.mubr.msk.f32.mxu0 %vm1705_vm2, %v11388_v57  ;;  %v6148_v57 = vld [vmem:[%s11492_s14 + $0xf8] sm:$0xff] }
0x12cf   : >> { %6176 = vmatprep.subr.mxu1 %v6148_v57 }
0x12db   : >> { %v5922_v34 = vpop.f32.mrf.mxu1 }
0x12dc   : >> { %8253 = vrcp.f32 %v5922_v34 }
0x12dd   : >> { %v5924_v13 = vpop.f32.mrf.mxu1 }
0x12df   : >> { %v5927_v10 = vpop.f32.mrf.mxu1 }
0x12e0   : >> { %8255 = vrcp.f32 %v5927_v10 }
0x12e1   : >> { %v5929_v15 = vpop.f32.mrf.mxu1 }
0x12e9   : >> { %v8254_v29 = vpop.eup %8253 }
0x12ea   : >> { %7401 = vmatmul.mubr.msk.f32.vlgmr.msra.gmra.mxu1 %vm6020_vm3, %v8254_v29 }
0x12eb   : >> { %6103 = vmatprep.mubr.f32.mxu1 %v9120_v4  ;;  %v6145_v4 = vld [vmem:[%s11492_s14 + $0xe0] sm:$0xff]  ;;  %6177 = vmatpush1.msra.mxu1 %v6147_v39 }
0x12ec   : >> { %6178 = vmatprep.subr.mxu1 %v6146_v21 }
0x12ed   : >> { %v8256_v11 = vpop.eup %8255  ;;  %6179 = vmatpush1.msra.mxu1 %v6145_v4 }
0x12ee   : >> { %7402 = vmatmul.mubr.msk.f32.gmra.mxu1 %vm6020_vm3, %v8256_v11  ;;  %6180 = vmatprep.subr.mxu1 %v6144_v44 }
0x12ef   : >> { %6181 = vmatpush1.msra.mxu1 %v6143_v26 }
0x12f0   : >> { %6182 = vmatprep.subr.mxu1 %v6142_v20 }
0x12f1   : >> { %6183 = vmatpush1.msra.mxu1 %v6141_v22 }
0x12f2   : >> { %6184 = vmatprep.subr.mxu1 %v6140_v9 }
0x12f3   : >> { %6185 = vmatpush1.msra.mxu1 %v6139_v47 }
0x12f4   : >> { %6186 = vmatprep.subr.mxu1 %v6138_v1 }
0x12f5   : >> { %6187 = vmatpush1.msra.mxu1 %v6137_v55 }
0x12f6   : >> { %6188 = vmatprep.subr.mxu1 %v6136_v42 }
0x12f7   : >> { %6189 = vmatpush1.msra.mxu1 %v6135_v0 }
0x12f8   : >> { %6190 = vmatprep.subr.mxu1 %v6134_v49  ;;  %v5747_v49 = vld [vmem:[#allocation13 + $0xf8] sm:$0xff] }
0x12f9   : >> { %6191 = vmatpush1.msra.mxu1 %v6133_v62  ;;  %v5746_v62 = vld [vmem:[#allocation13 + $0xf0] sm:$0xff] }
0x12fa   : >> { %6192 = vmatprep.subr.mxu1 %v6132_v16  ;;  %v5745_v16 = vld [vmem:[#allocation13 + $0xe8] sm:$0xff] }
0x12fb   : >> { %6193 = vmatpush1.msra.mxu1 %v6131_v58 }
0x12fc   : >> { %6194 = vmatprep.subr.mxu1 %v6130_v61  ;;  %v5744_v61 = vld [vmem:[#allocation13 + $0xe0] sm:$0xff] }
0x12fd   : >> { %6195 = vmatpush1.msra.mxu1 %v6129_v2 }
0x12fe   : >> { %6196 = vmatprep.subr.mxu1 %v6128_v38  ;;  %v5743_v38 = vld [vmem:[#allocation13 + $0xd8] sm:$0xff] }
0x12ff   : >> { %6197 = vmatpush1.msra.mxu1 %v6127_v25 }
0x1300   : >> { %6198 = vmatprep.subr.mxu1 %v6126_v43 }
0x1301   : >> { %6199 = vmatpush1.msra.mxu1 %v6125_v18  ;;  %v5742_v18 = vld [vmem:[#allocation13 + $0xd0] sm:$0xff] }
0x1302   : >> { %6200 = vmatprep.subr.mxu1 %v6124_v32 }
0x1303   : >> { %6201 = vmatpush1.msra.mxu1 %v6123_v3  ;;  %v5741_v3 = vld [vmem:[#allocation13 + $0xc8] sm:$0xff] }
0x1304   : >> { %6202 = vmatprep.subr.mxu1 %v6122_v59 }
0x1305   : >> { %6203 = vmatpush1.msra.mxu1 %v6121_v31  ;;  %v5740_v31 = vld [vmem:[#allocation13 + $0xc0] sm:$0xff] }
0x1306   : >> { %6204 = vmatprep.subr.mxu1 %v6120_v46 }
0x1307   : >> { %6205 = vmatpush1.msra.mxu1 %v6119_v7  ;;  %v5739_v7 = vld [vmem:[#allocation13 + $0xb8] sm:$0xff] }
0x1308   : >> { %6206 = vmatprep.subr.mxu1 %v6118_v53 }
0x1309   : >> { %6207 = vmatpush1.msra.mxu1 %v6117_v27 }
0x130a   : >> { %6232 = vmatprep.subr.mxu1 %v6156_v48  ;;  %v5738_v48 = vld [vmem:[#allocation13 + $0xb0] sm:$0xff] }
0x130b   : >> { %6233 = vmatpush2.msra.mxu1 %v6155_v6 }
0x1341   : >> { %v11510_v12 = vpop.f32.mrf.mxu0 }
0x1343   : >> { %v11514_v60 = vpop.f32.mrf.mxu0 }
0x1345   : >> { %v11518_v36 = vpop.f32.mrf.mxu0 }
0x1347   : >> { %v11522_v14 = vpop.f32.mrf.mxu0 }
0x1349   : >> { %v11526_v23 = vpop.f32.mrf.mxu0 }
0x134b   : >> { %v11530_v28 = vpop.f32.mrf.mxu0 }
0x134d   : >> { %v11534_v33 = vpop.f32.mrf.mxu0 }
0x134f   : >> { %v11538_v50 = vpop.f32.mrf.mxu0 }
0x1351   : >> { %v11542_v37 = vpop.f32.mrf.mxu0 }
0x1353   : >> { %v11546_v19 = vpop.f32.mrf.mxu0 }
0x1355   : >> { %v11548_v40 = vpop.f32.mrf.mxu0 }
0x1357   : >> { %v11550_v34 = vpop.f32.mrf.mxu0 }
0x1359   : >> { %v11552_v13 = vpop.f32.mrf.mxu0 }
0x135b   : >> { %v11554_v10 = vpop.f32.mrf.mxu0 }
0x135d   : >> { %v11556_v15 = vpop.f32.mrf.mxu0 }
0x135f   : >> { %v11558_v29 = vpop.f32.mrf.mxu0 }
0x1361   : >> { %v11560_v11 = vpop.f32.mrf.mxu0 }
0x1363   : >> { %v11562_v57 = vpop.f32.mrf.mxu0 }
0x1365   : >> { %v5651_v39 = vpop.f32.mrf.mxu0 }
0x1367   : >> { %v5653_v21 = vpop.f32.mrf.mxu0 }
0x1369   : >> { %v5657_v4 = vpop.f32.mrf.mxu0 }
0x136b   : >> { %v5659_v44 = vpop.f32.mrf.mxu0 }
0x136d   : >> { %v5663_v26 = vpop.f32.mrf.mxu0 }
0x136f   : >> { %v5665_v20 = vpop.f32.mrf.mxu0 }
0x1371   : >> { %v5669_v22 = vpop.f32.mrf.mxu0 }
0x1373   : >> { %v5671_v9 = vpop.f32.mrf.mxu0 }
0x1374   : >> { %v5781_v6 = vmul.f32 %v5741_v3, %v5671_v9 }
0x1375   : >> { %v5675_v47 = vpop.f32.mrf.mxu0 }
0x1376   : >> { %v5782_v53 = vmul.f32 %v5742_v18, %v5675_v47  ;;  %v5733_v47 = vld [vmem:[#allocation13 + $0x88] sm:$0xff] }
0x1377   : >> { %v5677_v1 = vpop.f32.mrf.mxu0 }
0x1378   : >> { %v5783_v46 = vmul.f32 %v5743_v38, %v5677_v1  ;;  %v5734_v1 = vld [vmem:[#allocation13 + $0x90] sm:$0xff]  ;;  %v5732_v38 = vld [vmem:[#allocation13 + $0x80] sm:$0xff] }
0x1379   : >> { %v5681_v55 = vpop.f32.mrf.mxu0  ;;  %v5772_v3 = vmul.f32 %v5732_v38, %v11560_v11  ;;  %v5754_v38 = vld [vmem:[#allocation13 + $0x130] sm:$0xff] }
0x137a   : >> { %v5784_v59 = vmul.f32 %v5744_v61, %v5681_v55  ;;  %v5778_v55 = vmul.f32 %v5738_v48, %v5663_v26  ;;  %v5773_v26 = vmul.f32 %v5733_v47, %v11562_v57  ;;  %v5723_v48 = vld [vmem:[#allocation13 + $0x38] sm:$0xff] }
0x137b   : >> { %v5683_v42 = vpop.f32.mrf.mxu0 }
0x137c   : >> { %v5785_v32 = vmul.f32 %v5745_v16, %v5683_v42  ;;  %v5779_v42 = vmul.f32 %v5739_v7, %v5665_v20  ;;  %v5735_v16 = vld [vmem:[#allocation13 + $0x98] sm:$0xff]  ;;  %v5730_v20 = vld [vmem:[#allocation13 + $0x70] sm:$0xff]  ;;  %v5725_v7 = vld [vmem:[#allocation13 + $0x48] sm:$0xff] }
0x137d   : >> { %v5687_v0 = vpop.f32.mrf.mxu0  ;;  %v5775_v9 = vmul.f32 %v5735_v16, %v5653_v21  ;;  %v5770_v21 = vmul.f32 %v5730_v20, %v11556_v15  ;;  %v5722_v15 = vld [vmem:[#allocation13 + $0x30] sm:$0xff] }
0x137e   : >> { %v5786_v25 = vmul.f32 %v5746_v62, %v5687_v0  ;;  %v5737_v0 = vld [vmem:[#allocation13 + $0xa8] sm:$0xff]  ;;  %v5736_v62 = vld [vmem:[#allocation13 + $0xa0] sm:$0xff] }
0x137f   : >> { %v5689_v58 = vpop.f32.mrf.mxu0  ;;  %v5777_v61 = vmul.f32 %v5737_v0, %v5659_v44  ;;  %v5728_v44 = vld [vmem:[#allocation13 + $0x60] sm:$0xff]  ;;  %v5765_v0 = vmul.f32 %v5725_v7, %v11546_v19  ;;  %v6293_v7 = vld [vmem:[%s11606_s28 + $0xc8] sm:$0xff] }
0x1380   : >> { %v5787_v2 = vmul.f32 %v5747_v49, %v5689_v58  ;;  %v5780_v49 = vmul.f32 %v5740_v31, %v5669_v22  ;;  %v5774_v22 = vmul.f32 %v5734_v1, %v5651_v39  ;;  %v5726_v31 = vld [vmem:[#allocation13 + $0x50] sm:$0xff]  ;;  %v5768_v57 = vmul.f32 %v5728_v44, %v11552_v13  ;;  %v5717_v1 = vld [vmem:[#allocation13 + $0x8] sm:$0xff] }
0x1381   : >> { %v11564_v43 = vpop.f32.mrf.mxu0  ;;  %v5763_v13 = vmul.f32 %v5723_v48, %v11538_v50  ;;  %v6289_v48 = vld [vmem:[%s11606_s28 + $0xa8] sm:$0xff] }
0x1382   : >> { %5937 = vmatprep.subr.mxu0 %v5787_v2  ;;  %v5776_v2 = vmul.f32 %v5736_v62, %v5657_v4  ;;  %v5720_v62 = vld [vmem:[#allocation13 + $0x20] sm:$0xff] }
0x1383   : >> { %5938 = vmatpush1.msra.mxu0 %v5786_v25  ;;  %v11566_v27 = vpop.f32.mrf.mxu0  ;;  %v5731_v25 = vld [vmem:[#allocation13 + $0x78] sm:$0xff]  ;;  %v5760_v19 = vmul.f32 %v5720_v62, %v11526_v23  ;;  %v6282_v62 = vld [vmem:[%s11606_s28 + $0x70] sm:$0xff] }
0x1384   : >> { %5939 = vmatprep.subr.mxu0 %v5785_v32  ;;  %v5729_v32 = vld [vmem:[#allocation13 + $0x68] sm:$0xff]  ;;  %v5771_v4 = vmul.f32 %v5731_v25, %v11558_v29  ;;  %v5766_v29 = vmul.f32 %v5726_v31, %v11548_v40  ;;  %v5718_v40 = vld [vmem:[#allocation13 + $0x10] sm:$0xff]  ;;  %v5752_v25 = vld [vmem:[#allocation13 + $0x120] sm:$0xff] }
0x1385   : >> { %5940 = vmatpush1.msra.mxu0 %v5784_v59  ;;  %v11568_v58 = vpop.f32.mrf.mxu0  ;;  %v5727_v59 = vld [vmem:[#allocation13 + $0x58] sm:$0xff]  ;;  %v5758_v50 = vmul.f32 %v5718_v40, %v11518_v36  ;;  %v5749_v36 = vld [vmem:[#allocation13 + $0x108] sm:$0xff] }
0x1386   : >> { %5941 = vmatprep.subr.mxu0 %v5783_v46  ;;  %v5769_v46 = vmul.f32 %v5729_v32, %v11554_v10  ;;  %v5767_v11 = vmul.f32 %v5727_v59, %v11550_v34  ;;  %v5762_v34 = vmul.f32 %v5722_v15, %v11534_v33  ;;  %v5757_v33 = vmul.f32 %v5717_v1, %v11514_v60  ;;  %v5748_v60 = vld [vmem:[#allocation13 + $0x100] sm:$0xff]  ;;  %v6295_v31 = vld [vmem:[%s11606_s28 + $0xd8] sm:$0xff]  ;;  %v6277_v40 = vld [vmem:[%s11606_s28 + $0x48] sm:$0xff] }
0x1387   : >> { %5942 = vmatpush1.msra.mxu0 %v5782_v53  ;;  %v11570_v18 = vpop.f32.mrf.mxu0  ;;  %v5724_v53 = vld [vmem:[#allocation13 + $0x40] sm:$0xff]  ;;  %v5789_v44 = vmul.f32 %v5749_v36, %v11566_v27  ;;  %v6152_v27 = vld [vmem:[%s11492_s14 + $0x118] sm:$0xff] }
0x1388   : >> { %5943 = vmatprep.subr.mxu0 %v5781_v6  ;;  %v5764_v10 = vmul.f32 %v5724_v53, %v11542_v37  ;;  %v6151_v59 = vld [vmem:[%s11492_s14 + $0x110] sm:$0xff]  ;;  %v6291_v53 = vld [vmem:[%s11606_s28 + $0xb8] sm:$0xff] }
0x1389   : >> { %5944 = vmatpush1.msra.mxu0 %v5780_v49  ;;  %v5705_v39 = vpop.f32.mrf.mxu0  ;;  %v5721_v49 = vld [vmem:[#allocation13 + $0x28] sm:$0xff]  ;;  %v6286_v15 = vld [vmem:[%s11606_s28 + $0x90] sm:$0xff] }
0x138a   : >> { %5945 = vmatprep.subr.mxu0 %v5779_v42  ;;  %v5719_v42 = vld [vmem:[#allocation13 + $0x18] sm:$0xff]  ;;  %v5792_v32 = vmul.f32 %v5752_v25, %v5705_v39  ;;  %v6296_v39 = vld [vmem:[%s11606_s28 + $0xe0] sm:$0xff]  ;;  %v6275_v1 = vld [vmem:[%s11606_s28 + $0x38] sm:$0xff] }
0x138b   : >> { %5946 = vmatpush1.msra.mxu0 %v5778_v55  ;;  %v5707_v6 = vpop.f32.mrf.mxu0  ;;  %v5761_v55 = vmul.f32 %v5721_v49, %v11530_v28  ;;  %v5759_v37 = vmul.f32 %v5719_v42, %v11522_v14  ;;  %v5750_v14 = vld [vmem:[#allocation13 + $0x110] sm:$0xff]  ;;  %v6270_v36 = vld [vmem:[%s11606_s28 + $0x10] sm:$0xff] }
0x138c   : >> { %5947 = vmatprep.subr.mxu0 %v5777_v61  ;;  %v5716_v61 = vld [vmem:[#allocation13] sm:$0xff]  ;;  %v6284_v49 = vld [vmem:[%s11606_s28 + $0x80] sm:$0xff] }
0x138d   : >> { %5948 = vmatpush1.msra.mxu0 %v5776_v2  ;;  %v5711_v16 = vpop.f32.mrf.mxu0  ;;  %v5755_v2 = vld [vmem:[#allocation13 + $0x138] sm:$0xff]  ;;  %v5756_v28 = vmul.f32 %v5716_v61, %v11510_v12  ;;  %v5790_v12 = vmul.f32 %v5750_v14, %v11568_v58  ;;  %v6280_v42 = vld [vmem:[%s11606_s28 + $0x60] sm:$0xff] }
0x138e   : >> { %5949 = vmatprep.subr.mxu0 %v5775_v9  ;;  %v5753_v9 = vld [vmem:[#allocation13 + $0x128] sm:$0xff]  ;;  %v5794_v20 = vmul.f32 %v5754_v38, %v5711_v16  ;;  %v6154_v58 = vld [vmem:[%s11492_s14 + $0x128] sm:$0xff]  ;;  %v6278_v16 = vld [vmem:[%s11606_s28 + $0x50] sm:$0xff] }
0x138f   : >> { %5950 = vmatpush1.msra.mxu0 %v5774_v22  ;;  %v5713_v47 = vpop.f32.mrf.mxu0  ;;  %v5751_v22 = vld [vmem:[#allocation13 + $0x118] sm:$0xff]  ;;  %6234 = vmatprep.subr.mxu1 %v6154_v58  ;;  %v6303_v58 = vld [vmem:[%s11606_s28 + $0x118] sm:$0xff] }
0x1390   : >> { %5951 = vmatprep.subr.mxu0 %v5773_v26  ;;  %v5795_v23 = vmul.f32 %v5755_v2, %v5713_v47  ;;  %v5793_v26 = vmul.f32 %v5753_v9, %v5707_v6  ;;  %v6287_v6 = vld [vmem:[%s11606_s28 + $0x98] sm:$0xff]  ;;  %v6273_v61 = vld [vmem:[%s11606_s28 + $0x28] sm:$0xff] }
0x1391   : >> { %5952 = vmatpush1.msra.mxu0 %v5772_v3  ;;  %v5791_v3 = vmul.f32 %v5751_v22, %v11570_v18  ;;  %v6153_v18 = vld [vmem:[%s11492_s14 + $0x120] sm:$0xff] }
0x1392   : >> { %5953 = vmatprep.subr.mxu0 %v5771_v4  ;;  %v5788_v4 = vmul.f32 %v5748_v60, %v11564_v43  ;;  %6235 = vmatpush2.msra.mxu1 %v6153_v18  ;;  %v6150_v43 = vld [vmem:[%s11492_s14 + $0x108] sm:$0xff]  ;;  %v6268_v60 = vld [vmem:[%s11606_s28] sm:$0xff]  ;;  %v6302_v18 = vld [vmem:[%s11606_s28 + $0x110] sm:$0xff] }
0x1393   : >> { %5954 = vmatpush1.msra.mxu0 %v5770_v21  ;;  %6236 = vmatprep.subr.mxu1 %v6152_v27  ;;  %v6149_v21 = vld [vmem:[%s11492_s14 + $0x100] sm:$0xff]  ;;  %v6301_v27 = vld [vmem:[%s11606_s28 + $0x108] sm:$0xff] }
0x1394   : >> { %5955 = vmatprep.subr.mxu0 %v5769_v46  ;;  %6237 = vmatpush2.msra.mxu1 %v6151_v59  ;;  %v6294_v46 = vld [vmem:[%s11606_s28 + $0xd0] sm:$0xff]  ;;  %v6300_v59 = vld [vmem:[%s11606_s28 + $0x100] sm:$0xff] }
0x1395   : >> { %5956 = vmatpush1.msra.mxu0 %v5768_v57  ;;  %6238 = vmatprep.subr.mxu1 %v6150_v43  ;;  %v6292_v57 = vld [vmem:[%s11606_s28 + $0xc0] sm:$0xff] }
0x1396   : >> { %5957 = vmatprep.subr.mxu0 %v5767_v11  ;;  %6239 = vmatpush2.msra.mxu1 %v6149_v21  ;;  %v6290_v11 = vld [vmem:[%s11606_s28 + $0xb0] sm:$0xff]  ;;  %v6158_v43 = vld [vmem:[%s6157_s0] sm:$0x3] }
0x1397   : >> { %5958 = vmatpush1.msra.mxu0 %v5766_v29  ;;  %v6288_v29 = vld [vmem:[%s11606_s28 + $0xa0] sm:$0xff]  ;;  %v6163_v21 = vrot.slane %v6158_v43, %v10005_v41  ;;  %7634 = vmatprep.subr.mxu1 (%p2070_p0), %v9115_v5 }
0x1398   : >> { %5959 = vmatprep.subr.mxu0 %v5765_v0  ;;  %v6285_v0 = vld [vmem:[%s11606_s28 + $0x88] sm:$0xff] }
0x1399   : >> { %5960 = vmatpush1.msra.mxu0 %v5764_v10  ;;  %v6283_v10 = vld [vmem:[%s11606_s28 + $0x78] sm:$0xff] }
0x139a   : >> { %5961 = vmatprep.subr.mxu0 %v5763_v13  ;;  %v6281_v13 = vld [vmem:[%s11606_s28 + $0x68] sm:$0xff] }
0x139b   : >> { %5962 = vmatpush1.msra.mxu0 %v5762_v34  ;;  %v6279_v34 = vld [vmem:[%s11606_s28 + $0x58] sm:$0xff] }
0x139c   : >> { %5963 = vmatprep.subr.mxu0 %v5761_v55  ;;  %v6276_v55 = vld [vmem:[%s11606_s28 + $0x40] sm:$0xff] }
0x139d   : >> { %5964 = vmatpush1.msra.mxu0 %v5760_v19  ;;  %v6274_v19 = vld [vmem:[%s11606_s28 + $0x30] sm:$0xff] }
0x139e   : >> { %5965 = vmatprep.subr.mxu0 %v5759_v37  ;;  %v6272_v37 = vld [vmem:[%s11606_s28 + $0x20] sm:$0xff] }
0x139f   : >> { %5966 = vmatpush1.msra.mxu0 %v5758_v50 }
0x13a0   : >> { %5967 = vmatprep.subr.mxu0 %v5757_v33 }
0x13a1   : >> { %5968 = vmatpush1.msra.mxu0 %v5756_v28 }
0x13a2   : >> { %5993 = vmatprep.subr.mxu0 %v5795_v23 }
0x13a3   : >> { %5994 = vmatpush2.msra.mxu0 %v5794_v20 }
0x13a4   : >> { %5995 = vmatprep.subr.mxu0 %v5793_v26  ;;  %v6271_v26 = vld [vmem:[%s11606_s28 + $0x18] sm:$0xff] }
0x13a5   : >> { %5996 = vmatpush2.msra.mxu0 %v5792_v32  ;;  %v6269_v32 = vld [vmem:[%s11606_s28 + $0x8] sm:$0xff] }
0x13a6   : >> { %5997 = vmatprep.subr.mxu0 %v5791_v3  ;;  %v6307_v3 = vld [vmem:[%s11606_s28 + $0x138] sm:$0xff] }
0x13a7   : >> { %5998 = vmatpush2.msra.mxu0 %v5790_v12  ;;  %v6306_v12 = vld [vmem:[%s11606_s28 + $0x130] sm:$0xff] }
0x13a8   : >> { %5999 = vmatprep.subr.mxu0 %v5789_v44  ;;  %v6305_v44 = vld [vmem:[%s11606_s28 + $0x128] sm:$0xff] }
0x13a9   : >> { %6000 = vmatpush2.msra.mxu0 %v5788_v4  ;;  %v6304_v4 = vld [vmem:[%s11606_s28 + $0x120] sm:$0xff] }
0x13aa   : >> { %6002 = vmatmul.mubr.f32.vlgmr.msra.gmra.mxu0 %v11433_v17  ;;  %v6298_v17 = vld [vmem:[%s11606_s28 + $0xf0] sm:$0xff]  ;;  %v6099_v50 = vpop.f32.mrf.mxu1 }
0x13ab   : >> { %7398 = vmatprep.mubr.msk.f32.mxu0 %vm1705_vm2, %v11396_v45  ;;  %v6299_v45 = vld [vmem:[%s11606_s28 + $0xf8] sm:$0xff] }
0x13ac   : >> { %6327 = vmatprep.subr.mxu0 %v6299_v45  ;;  %v6101_v47 = vpop.f32.mrf.mxu1  ;;  %v6167_v45 = vrot.slane %v6158_v43, %v10008_v51  ;;  %v6427_v43 = vld [vmem:[%s9296_s17 + $0x18] sm:$0xff] (%p2070_p0) }
0x13ad   : >> { %6328 = vmatpush1.msra.mxu0 %v6298_v17 }
0x13ae   : >> { %6008 = vmatmul.mubr.f32.gmra.mxu0 %v11440_v63  ;;  %v6297_v63 = vld [vmem:[%s11606_s28 + $0xe8] sm:$0xff]  ;;  %v6105_v33 = vpop.f32.mrf.mxu1 }
0x13af   : >> { %6329 = vmatprep.subr.mxu0 %v6297_v63 }
0x13b0   : >> { %6330 = vmatpush1.msra.mxu0 %v6296_v39  ;;  %v6107_v23 = vpop.f32.mrf.mxu1 }
0x13b1   : >> { %6331 = vmatprep.subr.mxu0 %v6295_v31 }
0x13b2   : >> { %6332 = vmatpush1.msra.mxu0 %v6294_v46  ;;  %v6257_v46 = vstv %s9624_s21 }
0x13b3   : >> { %6333 = vmatprep.subr.mxu0 %v6293_v7 }
0x13b4   : >> { %6334 = vmatpush1.msra.mxu0 %v6292_v57 }
0x13b5   : >> { %6335 = vmatprep.subr.mxu0 %v6291_v53 }
0x13b6   : >> { %6336 = vmatpush1.msra.mxu0 %v6290_v11 }
0x13b7   : >> { %6337 = vmatprep.subr.mxu0 %v6289_v48 }
0x13b8   : >> { %6338 = vmatpush1.msra.mxu0 %v6288_v29 }
0x13b9   : >> { %6339 = vmatprep.subr.mxu0 %v6287_v6 }
0x13ba   : >> { %6340 = vmatpush1.msra.mxu0 %v6286_v15 }
0x13bb   : >> { %6341 = vmatprep.subr.mxu0 %v6285_v0 }
0x13bc   : >> { %6342 = vmatpush1.msra.mxu0 %v6284_v49 }
0x13bd   : >> { %6343 = vmatprep.subr.mxu0 %v6283_v10 }
0x13be   : >> { %6344 = vmatpush1.msra.mxu0 %v6282_v62 }
0x13bf   : >> { %6345 = vmatprep.subr.mxu0 %v6281_v13 }
0x13c0   : >> { %6346 = vmatpush1.msra.mxu0 %v6280_v42 }
0x13c1   : >> { %6347 = vmatprep.subr.mxu0 %v6279_v34 }
0x13c2   : >> { %6348 = vmatpush1.msra.mxu0 %v6278_v16 }
0x13c3   : >> { %6349 = vmatprep.subr.mxu0 %v6277_v40  ;;  %v6309_v40 = vld [vmem:[%s6308_s18] sm:$0x3] }
0x13c4   : >> { %6350 = vmatpush1.msra.mxu0 %v6276_v55  ;;  %v6314_v55 = vrot.slane %v6309_v40, %v10005_v41  ;;  %v6435_v41 = vld [vmem:[%s9296_s17 + $0x58] sm:$0xff] (%p2070_p0) }
0x13c5   : >> { %6351 = vmatprep.subr.mxu0 %v6275_v1 }
0x13c6   : >> { %6352 = vmatpush1.msra.mxu0 %v6274_v19 }
0x13c7   : >> { %6353 = vmatprep.subr.mxu0 %v6273_v61  ;;  %v8257_v61 = vld [vmem:[#allocation2] sm:$0xff] }
0x13c8   : >> { %6354 = vmatpush1.msra.mxu0 %v6272_v37 }
0x13c9   : >> { %6355 = vmatprep.subr.mxu0 %v6271_v26 }
0x13ca   : >> { %6356 = vmatpush1.msra.mxu0 %v6270_v36  ;;  %v6439_v36 = vld [vmem:[%s9296_s17 + $0x78] sm:$0xff] (%p2070_p0) }
0x13cb   : >> { %6357 = vmatprep.subr.mxu0 %v6269_v32  ;;  %v6438_v32 = vld [vmem:[%s9296_s17 + $0x70] sm:$0xff] (%p2070_p0) }
0x13cc   : >> { %6358 = vmatpush1.msra.mxu0 %v6268_v60  ;;  %v6437_v60 = vld [vmem:[%s9296_s17 + $0x68] sm:$0xff] (%p2070_p0) }
0x13cd   : >> { %6383 = vmatprep.subr.mxu0 %v6307_v3 }
0x13ce   : >> { %6384 = vmatpush2.msra.mxu0 %v6306_v12  ;;  %v6434_v12 = vld [vmem:[%s9296_s17 + $0x50] sm:$0xff] (%p2070_p0) }
0x13cf   : >> { %6385 = vmatprep.subr.mxu0 %v6305_v44  ;;  %v6433_v44 = vld [vmem:[%s9296_s17 + $0x48] sm:$0xff] (%p2070_p0) }
0x13d0   : >> { %6386 = vmatpush2.msra.mxu0 %v6304_v4  ;;  %v6432_v4 = vld [vmem:[%s9296_s17 + $0x40] sm:$0xff] (%p2070_p0) }
0x13d1   : >> { %6387 = vmatprep.subr.mxu0 %v6303_v58  ;;  %v6431_v58 = vld [vmem:[%s9296_s17 + $0x38] sm:$0xff] (%p2070_p0) }
0x13d2   : >> { %6388 = vmatpush2.msra.mxu0 %v6302_v18  ;;  %v6430_v18 = vld [vmem:[%s9296_s17 + $0x30] sm:$0xff] (%p2070_p0) }
0x13d3   : >> { %6389 = vmatprep.subr.mxu0 %v6301_v27  ;;  %v6429_v27 = vld [vmem:[%s9296_s17 + $0x28] sm:$0xff] (%p2070_p0) }
0x13d4   : >> { %6390 = vmatpush2.msra.mxu0 %v6300_v59  ;;  %v6428_v59 = vld [vmem:[%s9296_s17 + $0x20] sm:$0xff] (%p2070_p0) }
0x13d5   : > { %6457 = vmatprep.subr.mxu0 (%p2070_p0), %v9115_v5 }
0x146a   : >> { %v6003_v2 = vpop.f32.mrf.mxu0 }
0x146b   : >> { %v6110_v9 = vmul.f32 %v6099_v50, %v6003_v2  ;;  %v8258_v2 = vld [vmem:[#allocation2 + $0x8] sm:$0xff] }
0x146c   : >> { %v6005_v38 = vpop.f32.mrf.mxu0 }
0x146d   : >> { %v6111_v28 = vmul.f32 %v6101_v47, %v6005_v38 }
0x146e   : >> { %v6009_v25 = vpop.f32.mrf.mxu0 }
0x146f   : >> { %7404 = vmatprep.mubr.msk.f32.mxu1 %vm1705_vm2, %v6111_v28  ;;  %v6112_v14 = vmul.f32 %v6105_v33, %v6009_v25 }
0x1470   : >> { %v6011_v22 = vpop.f32.mrf.mxu0  ;;  %6241 = vmatmul.mubr.f32.vlgmr.msra.gmra.mxu1 %v6110_v9  ;;  %v8259_v9 = vld [vmem:[#allocation2 + $0x10] sm:$0xff] }
0x1471   : >> { %v6113_v20 = vmul.f32 %v6107_v23, %v6011_v22  ;;  %7654 = vmatpush1.msra.mxu1 (%p2070_p0), %v6439_v36 }
0x1472   : > { %7635 = vmatprep.subr.mxu1 (%p2070_p0), %v9115_v5 }
0x1473   : >> { %7405 = vmatprep.mubr.msk.f32.mxu1 %vm1705_vm2, %v6113_v20  ;;  %v8260_v20 = vld [vmem:[#allocation2 + $0x18] sm:$0xff]  ;;  %7655 = vmatpush1.msra.mxu1 (%p2070_p0), %v6438_v32 }
0x1474   : >> { %6247 = vmatmul.mubr.f32.gmra.mxu1 %v6112_v14  ;;  %7636 = vmatprep.subr.mxu1 (%p2070_p0), %v9115_v5 }
0x1475   : > { %7656 = vmatpush1.msra.mxu1 (%p2070_p0), %v6437_v60 }
0x1476   : > { %7637 = vmatprep.subr.mxu1 (%p2070_p0), %v9115_v5 }
0x1477   : > { %7657 = vmatpush1.msra.mxu1 (%p2070_p0), %v6436_v54 }
0x1478   : > { %7638 = vmatprep.subr.mxu1 (%p2070_p0), %v9115_v5 }
0x1479   : > { %7658 = vmatpush1.msra.mxu1 (%p2070_p0), %v6435_v41 }
0x147a   : > { %7639 = vmatprep.subr.mxu1 (%p2070_p0), %v9115_v5 }
0x147b   : > { %7659 = vmatpush1.msra.mxu1 (%p2070_p0), %v6434_v12 }
0x147c   : > { %7640 = vmatprep.subr.mxu1 (%p2070_p0), %v9115_v5 }
0x147d   : > { %7660 = vmatpush1.msra.mxu1 (%p2070_p0), %v6433_v44 }
0x147e   : > { %7641 = vmatprep.subr.mxu1 (%p2070_p0), %v9115_v5 }
0x147f   : > { %7661 = vmatpush1.msra.mxu1 (%p2070_p0), %v6432_v4 }
0x1480   : > { %7642 = vmatprep.subr.mxu1 (%p2070_p0), %v9115_v5 }
0x1481   : > { %7662 = vmatpush1.msra.mxu1 (%p2070_p0), %v6431_v58 }
0x1482   : > { %7643 = vmatprep.subr.mxu1 (%p2070_p0), %v9115_v5 }
0x1483   : > { %7663 = vmatpush1.msra.mxu1 (%p2070_p0), %v6430_v18 }
0x1484   : > { %7644 = vmatprep.subr.mxu1 (%p2070_p0), %v9115_v5 }
0x1485   : > { %7664 = vmatpush1.msra.mxu1 (%p2070_p0), %v6429_v27 }
0x1486   : > { %7645 = vmatprep.subr.mxu1 (%p2070_p0), %v9115_v5 }
0x1487   : > { %7665 = vmatpush1.msra.mxu1 (%p2070_p0), %v6428_v59 }
0x1488   : > { %7646 = vmatprep.subr.mxu1 (%p2070_p0), %v9115_v5 }
0x1489   : > { %7666 = vmatpush1.msra.mxu1 (%p2070_p0), %v6427_v43 }
0x148a   : > { %7647 = vmatprep.subr.mxu1 (%p2070_p0), %v9115_v5 }
0x1530   : >> { %v6242_v17 = vpop.f32.mrf.mxu1 }
0x1531   : >> { %v6243_v63 = vadd.f32 %v6242_v17, %v6163_v21  ;;  %v6424_v17 = vld [vmem:[%s9296_s17] sm:$0xff] (%p2070_p0) }
0x1532   : >> { %v6244_v39 = vpop.f32.mrf.mxu1 }
0x1533   : >> { %v6253_v31 = vmul.f32 %v6243_v63, %v9950_v52  ;;  %v6245_v7 = vadd.f32 %v6244_v39, %v6167_v45  ;;  %v6443_v63 = vld [vmem:[%s9296_s17 + $0x98] sm:$0xff] (%p2070_p0)  ;;  %v6442_v39 = vld [vmem:[%s9296_s17 + $0x90] sm:$0xff] (%p2070_p0) }
0x1534   : >> { %v6248_v57 = vpop.f32.mrf.mxu1 }
0x1535   : >> { %v6254_v53 = vmul.f32 %v6245_v7, %v9950_v52  ;;  %v6249_v11 = vadd.f32 %v6248_v57, %v6163_v21  ;;  %v6258_v48 = vmul.f32 %v6257_v46, %v6253_v31  ;;  %v6426_v21 = vld [vmem:[%s9296_s17 + $0x10] sm:$0xff] (%p2070_p0)  ;;  %v6441_v7 = vld [vmem:[%s9296_s17 + $0x88] sm:$0xff] (%p2070_p0)  ;;  %v6440_v57 = vld [vmem:[%s9296_s17 + $0x80] sm:$0xff] (%p2070_p0) }
0x1536   : >> { %v6250_v29 = vpop.f32.mrf.mxu1  ;;  %7667 = vmatpush1.msra.mxu1 (%p2070_p0), %v6426_v21 }
0x1537   : >> { %v6259_v6 = vmul.f32 %v6257_v46, %v6254_v53  ;;  %v6255_v15 = vmul.f32 %v6249_v11, %v9973_v30  ;;  %v6251_v0 = vadd.f32 %v6250_v29, %v6167_v45  ;;  %v6262_v62 = vadd.f32 %v6258_v48, %v11321_v56  ;;  %v6425_v45 = vld [vmem:[%s9296_s17 + $0x8] sm:$0xff] (%p2070_p0)  ;;  %7648 = vmatprep.subr.mxu1 (%p2070_p0), %v9115_v5 }
0x1538   : > { %7668 = vmatpush1.msra.mxu1 (%p2070_p0), %v6425_v45 }
0x1539   : >> { %v6256_v49 = vmul.f32 %v6251_v0, %v9973_v30  ;;  %v6263_v10 = vadd.f32 %v6259_v6, %v11323_v35  ;;  %v6260_v13 = vmul.f32 %v6257_v46, %v6255_v15  ;;  %v6318_v35 = vrot.slane %v6309_v40, %v10008_v51  ;;  %7649 = vmatprep.subr.mxu1 (%p2070_p0), %v9115_v5  ;;  %v7409_v6 = vld [vmem:[#allocation49] ss:$0 sm:$0xff] (%p2070_p0) }
0x153a   : > { %7669 = vmatpush1.msra.mxu1 (%p2070_p0), %v6424_v17 }
0x153b   : >> { %v6261_v42 = vmul.f32 %v6257_v46, %v6256_v49  ;;  %7407 = vmatprep.mubr.msk.f32.mxu0 %vm1705_vm2, %v6263_v10  ;;  %v6264_v16 = vadd.f32 %v6260_v13, %v11325_v8  ;;  %7650 = vmatprep.subr.mxu1 (%p2070_p0), %v9115_v5 }
0x153c   : >> { %6392 = vmatmul.mubr.f32.vlgmr.msra.gmra.mxu0 %v6262_v62  ;;  %7670 = vmatpush2.msra.mxu1 (%p2070_p0), %v6443_v63 }
0x153d   : >> { %v6265_v34 = vadd.f32 %v6261_v42, %v11329_v24  ;;  %6458 = vmatpush1.msra.mxu0 (%p2070_p0), %v6439_v36  ;;  %7651 = vmatprep.subr.mxu1 (%p2070_p0), %v9115_v5 }
0x153e   : > { %6459 = vmatprep.subr.mxu0 (%p2070_p0), %v9115_v5  ;;  %7671 = vmatpush2.msra.mxu1 (%p2070_p0), %v6442_v39 }
0x153f   : >> { %7408 = vmatprep.mubr.msk.f32.mxu0 %vm1705_vm2, %v6265_v34  ;;  %6460 = vmatpush1.msra.mxu0 (%p2070_p0), %v6438_v32 }
0x1540   : >> { %6398 = vmatmul.mubr.f32.gmra.mxu0 %v6264_v16  ;;  %6461 = vmatprep.subr.mxu0 (%p2070_p0), %v9115_v5 }
0x1541   : > { %6462 = vmatpush1.msra.mxu0 (%p2070_p0), %v6437_v60  ;;  %7652 = vmatprep.subr.mxu1 (%p2070_p0), %v9115_v5 }
0x1542   : > { %6463 = vmatprep.subr.mxu0 (%p2070_p0), %v9115_v5  ;;  %7672 = vmatpush2.msra.mxu1 (%p2070_p0), %v6441_v7 }
0x1543   : > { %6464 = vmatpush1.msra.mxu0 (%p2070_p0), %v6436_v54  ;;  %7653 = vmatprep.subr.mxu1 (%p2070_p0), %v9115_v5 }
0x1544   : > { %6465 = vmatprep.subr.mxu0 (%p2070_p0), %v9115_v5  ;;  %7673 = vmatpush2.msra.mxu1 (%p2070_p0), %v6440_v57 }
0x1545   : > { %6466 = vmatpush1.msra.mxu0 (%p2070_p0), %v6435_v41 }
0x1546   : > { %6467 = vmatprep.subr.mxu0 (%p2070_p0), %v9115_v5 }
0x1547   : > { %6468 = vmatpush1.msra.mxu0 (%p2070_p0), %v6434_v12 }
0x1548   : > { %6469 = vmatprep.subr.mxu0 (%p2070_p0), %v9115_v5 }
0x1549   : > { %6470 = vmatpush1.msra.mxu0 (%p2070_p0), %v6433_v44 }
0x154a   : > { %6471 = vmatprep.subr.mxu0 (%p2070_p0), %v9115_v5 }
0x154b   : > { %6472 = vmatpush1.msra.mxu0 (%p2070_p0), %v6432_v4 }
0x154c   : > { %6473 = vmatprep.subr.mxu0 (%p2070_p0), %v9115_v5 }
0x154d   : > { %6474 = vmatpush1.msra.mxu0 (%p2070_p0), %v6431_v58 }
0x154e   : > { %6475 = vmatprep.subr.mxu0 (%p2070_p0), %v9115_v5 }
0x154f   : > { %6476 = vmatpush1.msra.mxu0 (%p2070_p0), %v6430_v18 }
0x1550   : > { %6477 = vmatprep.subr.mxu0 (%p2070_p0), %v9115_v5 }
0x1551   : > { %6478 = vmatpush1.msra.mxu0 (%p2070_p0), %v6429_v27 }
0x1552   : > { %6479 = vmatprep.subr.mxu0 (%p2070_p0), %v9115_v5 }
0x1553   : > { %6480 = vmatpush1.msra.mxu0 (%p2070_p0), %v6428_v59 }
0x1554   : > { %6481 = vmatprep.subr.mxu0 (%p2070_p0), %v9115_v5 }
0x1555   : > { %6482 = vmatpush1.msra.mxu0 (%p2070_p0), %v6427_v43 }
0x1556   : > { %6483 = vmatprep.subr.mxu0 (%p2070_p0), %v9115_v5 }
0x1557   : > { %6484 = vmatpush1.msra.mxu0 (%p2070_p0), %v6426_v21 }
0x1558   : > { %6485 = vmatprep.subr.mxu0 (%p2070_p0), %v9115_v5 }
0x1559   : > { %6486 = vmatpush1.msra.mxu0 (%p2070_p0), %v6425_v45 }
0x155a   : > { %6487 = vmatprep.subr.mxu0 (%p2070_p0), %v9115_v5 }
0x155b   : > { %6488 = vmatpush1.msra.mxu0 (%p2070_p0), %v6424_v17 }
0x155c   : > { %6513 = vmatprep.subr.mxu0 (%p2070_p0), %v9115_v5 }
0x155d   : > { %6514 = vmatpush2.msra.mxu0 (%p2070_p0), %v6443_v63 }
0x155e   : > { %6515 = vmatprep.subr.mxu0 (%p2070_p0), %v9115_v5 }
0x155f   : > { %6516 = vmatpush2.msra.mxu0 (%p2070_p0), %v6442_v39 }
0x1560   : > { %6517 = vmatprep.subr.mxu0 (%p2070_p0), %v9115_v5 }
0x1561   : > { %6518 = vmatpush2.msra.mxu0 (%p2070_p0), %v6441_v7 }
0x1562   : > { %6519 = vmatprep.subr.mxu0 (%p2070_p0), %v9115_v5 }
0x1563   : > { %6520 = vmatpush2.msra.mxu0 (%p2070_p0), %v6440_v57 }
0x15fc   : >> { %v6393_v1 = vpop.f32.mrf.mxu0 }
0x15fd   : >> { %v6394_v56 = vadd.f32 %v6393_v1, %v6314_v55 }
0x15fe   : >> { %v6395_v19 = vpop.f32.mrf.mxu0 }
0x15ff   : >> { %v6404_v37 = vadd.f32 %v8257_v61, %v6394_v56  ;;  %v6396_v50 = vadd.f32 %v6395_v19, %v6318_v35 }
0x1600   : >> { %v6399_v47 = vpop.f32.mrf.mxu0 }
0x1601   : >> { %v6408_v24 = vmul.f32 %v6404_v37, %v9950_v52  ;;  %v6405_v8 = vadd.f32 %v8258_v2, %v6396_v50  ;;  %v6400_v33 = vadd.f32 %v6399_v47, %v6314_v55 }
0x1602   : >> { %v6401_v38 = vpop.f32.mrf.mxu0 }
0x1603   : >> { %6412 = vst [vmem:[#allocation2] sm:$0xff] %v6408_v24  ;;  %v6409_v28 = vmul.f32 %v6405_v8, %v9950_v52  ;;  %v6406_v25 = vadd.f32 %v8259_v9, %v6400_v33  ;;  %v6402_v23 = vadd.f32 %v6401_v38, %v6318_v35 }
0x1605   : >> { %6413 = vst.msk [vmem:[#allocation2 + $0x8] sm:$0xff] %vm1705_vm2, %v6409_v28  ;;  %v6410_v22 = vmul.f32 %v6406_v25, %v9973_v30  ;;  %v6407_v14 = vadd.f32 %v8260_v20, %v6402_v23  ;;  %2072 = sbr.rel (!%p2070_p0) target bundleno = 798 (0x31e), region = 404 }
0x1607   : >> { %6414 = vst [vmem:[#allocation2 + $0x10] sm:$0xff] %v6410_v22  ;;  %v6411_v26 = vmul.f32 %v6407_v14, %v9973_v30 }
0x1609   : >> { %6415 = vst.msk [vmem:[#allocation2 + $0x18] sm:$0xff] %vm1705_vm2, %v6411_v26 }
0x160a   : > { %v11689_v51 = vld [vmem:[#allocation2] sm:$0xff] }
0x160b   : > { %6537 = vst [vmem:[%s9637_s2] sm:$0xff] %v11689_v51  ;;  %v6420_v48 = vmul.f32 %v11689_v51, %v9950_v52 }
0x160c   : > { %v6417_v31 = vld [vmem:[#allocation2 + $0x8] sm:$0xff] }
0x160d   : > { %v6421_v53 = vmul.f32 %v6417_v31, %v9950_v52 }
0x160e   : > { %v11691_v3 = vld [vmem:[#allocation2 + $0x10] sm:$0xff] }
0x160f   : > { %6538 = vst [vmem:[%s9637_s2 + $0x8] sm:$0xff] %v11691_v3  ;;  %v6422_v29 = vmul.f32 %v11691_v3, %v9973_v30  ;;  %7410 = vmatprep.mubr.msk.f32.mxu0 %vm1705_vm2, %v6421_v53 }
0x1610   : > { %v6419_v46 = vld [vmem:[#allocation2 + $0x18] sm:$0xff]  ;;  %6522 = vmatmul.mubr.f32.vlgmr.msra.gmra.mxu0 %v6420_v48 }
0x1611   : > { %v6423_v11 = vmul.f32 %v6419_v46, %v9973_v30 }
0x1613   : > { %7411 = vmatprep.mubr.msk.f32.mxu1 %vm1705_vm2, %v6423_v11 }
0x1614   : > { %6527 = vmatmul.mubr.f32.vlgmr.msra.gmra.mxu1 %v6422_v29 }
0x16d0   : > { %v6523_v15 = vpop.f32.mrf.mxu0 }
0x16d1   : > { %v6524_v49 = vadd.f32 %v7409_v6, %v6523_v15 }
0x16d2   : > { %v6525_v62 = vpop.f32.mrf.mxu0 }
0x16d3   : > { %v6532_v5 = vmul.f32 %v6524_v49, %v9950_v52 }
0x16d4   : > { %v6528_v0 = vpop.f32.mrf.mxu1 }
0x16d5   : > { %v6529_v10 = vadd.f32 %v7409_v6, %v6528_v0  ;;  %6535 = vst.msk [vmem:[%s9640_s4] sm:$0xff] %vm6534_vm0, %v6532_v5 }
0x16d6   : > { %v6530_v13 = vpop.f32.mrf.mxu1 }
0x16d7   : > { %v6533_v42 = vmul.f32 %v6529_v10, %v9973_v30 }
0x16d9   : > { %6536 = vst.msk [vmem:[%s9640_s4 + $0x8] sm:$0xff] %vm6534_vm0, %v6533_v42 }
0x16da PF: > { %s101_s10 = sadd.s32 1, %s9033_s10  }
0x16db   : > { %p98_p1 = scmp.ge.s32.totalorder %s101_s10, 4  }
0x16dd   :  { %100 = sbr.rel (!%p98_p1) target bundleno = 80 (0x50), region = 415 }
0x16e2   :  { %6576 = vsyncpa [#allocation6], 1 }
0x16e3   :  { %6578 = vsyncpa [#allocation6 + $0x1], 1 }
0x16e4   :  { %6579 = vsyncpa [#allocation15], 1 }
0x16e5   :  { %6580 = vsyncpa [#allocation18], 1 }
0x16e6   :  { %6581 = vsyncpa [#allocation21], 1 }
0x16e7   :  { %6582 = vsyncpa [#allocation24], 1 }
0x16e8   :  { %6583 = vsyncpa [#allocation27], 1 }
0x16e9   :  { %6584 = vsyncpa [#allocation30], 1 }
0x16ea   :  { %6585 = vsyncpa [#allocation33], 1 }
0x16eb   :  { %6586 = vsyncpa [#allocation36], 1 }
0x16ec   :  { %6587 = vsyncpa [#allocation39], 1 }
0x16ed   :  { %6588 = vsyncpa [#allocation42], 1 }
0x16ee   :  { %6589 = vsyncpa [#allocation45], 1 }
0x16ef   :  { %6590 = vsyncpa [#allocation48], 1 }
0x16f0   :  { %6591 = vsyncpa [#allocation7], 1 }
0x16f1   :  { %6593 = vsyncpa [#allocation7 + $0x1], 1 }
0x16f2   :  { %6594 = vsyncpa [#allocation11], 1 }
0x16f3   :  { %6595 = vsyncpa [#allocation8], 1 }
0x16f4   :  { %6597 = vsyncpa [#allocation8 + $0x1], 1 }

</bundles_post_ra>
